<compile_context>
chip_gen: v6e
topology: v6e:2x2x1
jax: 0.10.0
libtpu: 0.0.40
codegen_flags: <defaults>
</compile_context>

<pallas_src>
import functools

import numpy as np
import jax
import jax.numpy as jnp
from jax.experimental import pallas as pl
from jax.experimental.pallas import tpu as pltpu

_VMEM_LIMIT = 48 * 1024 * 1024       # keep well under v7x's 64 MiB physical VMEM
_PALLAS_MIN_M = 128                  # below this, leave the 1x1s to XLA fusion


def _params(parallel=False):
    return pltpu.CompilerParams(
        dimension_semantics=(("parallel",) if parallel else ("arbitrary",)),
        vmem_limit_bytes=_VMEM_LIMIT)


def _cost(flops, bytes_accessed, transcendentals=0):
    return pl.CostEstimate(flops=int(flops), transcendentals=int(transcendentals),
                           bytes_accessed=int(bytes_accessed))


def _nbytes(*arrs):
    return sum(int(a.size) * a.dtype.itemsize for a in arrs)


def _pick_tm(M, multiple_of=1, min_tile=128):
    # Prefer large M-tiles (fewer ~0.35us pipeline steps), but allow >=2 grid
    # steps where requested (min_tile=64) so v7x can megacore-split the axis.
    for t in (256, 128, 64):
        if t < min_tile:
            break
        if M > t and M % t == 0 and t % multiple_of == 0:
            return t
    return M


# ----------------------------------------------------------------------------
# Pallas kernels (bf16 operands, f32 MXU accumulation, f32 epilogue math)
# ----------------------------------------------------------------------------

def _matmul_bias_act_kernel(x_ref, w_ref, b_ref, o_ref, *, act):
    acc = jnp.dot(x_ref[...], w_ref[...], preferred_element_type=jnp.float32)
    acc = acc + b_ref[...]
    if act == "relu":
        acc = jnp.maximum(acc, 0.0)
    o_ref[...] = acc.astype(o_ref.dtype)


def _conv3_res_kernel(y2_ref, b2_ref, w3_ref, b3_ref, r_ref, o_ref):
    # Fused: BN2 bias + relu (f32; y2 streams in as bf16), 1x1 expand matmul,
    # BN3 bias, residual add, final relu.  Residual stays in VMEM as bf16.
    h = jnp.maximum(y2_ref[...] + b2_ref[...], 0.0).astype(w3_ref.dtype)
    acc = jnp.dot(h, w3_ref[...], preferred_element_type=jnp.float32)
    acc = acc + b3_ref[...] + r_ref[...].astype(jnp.float32)
    o_ref[...] = jnp.maximum(acc, 0.0).astype(o_ref.dtype)


def _conv3_ds_kernel(y2_ref, b2_ref, w3_ref, b3_ref, xd_ref, wd_ref, bd_ref, o_ref):
    # Same as above, but the residual branch is a (possibly strided) 1x1
    # projection computed in-kernel from the block input.
    h = jnp.maximum(y2_ref[...] + b2_ref[...], 0.0).astype(w3_ref.dtype)
    acc = jnp.dot(h, w3_ref[...], preferred_element_type=jnp.float32) + b3_ref[...]
    m = y2_ref.shape[0]
    cin = wd_ref.shape[0]
    xd = xd_ref[...].reshape(m, cin)     # (rows, Wo, Cin) -> (m, Cin) sublane-merge
    acc = acc + jnp.dot(xd, wd_ref[...], preferred_element_type=jnp.float32) + bd_ref[...]
    o_ref[...] = jnp.maximum(acc, 0.0).astype(o_ref.dtype)


def _head_kernel(x_ref, wfc_ref, bfc_ref, w1_ref, b1_ref, w21_ref, b21_ref,
                 o_ref, acc_ref):
    # K-tiled fused head: global avg-pool + fc(2048->1024) accumulated over K
    # chunks so the big fc_w DMA overlaps the MXU; at the last step finish with
    # fc1(1024->256)+relu and fc21(256->1)+sigmoid.
    k = pl.program_id(0)

    @pl.when(k == 0)
    def _():
        acc_ref[...] = jnp.zeros_like(acc_ref)

    feat = jnp.mean(x_ref[...].astype(jnp.float32), axis=1)            # (B, Kt)
    acc_ref[...] += jnp.dot(feat.astype(wfc_ref.dtype), wfc_ref[...],
                            preferred_element_type=jnp.float32)

    @pl.when(k == pl.num_programs(0) - 1)
    def _():
        h = acc_ref[...] + bfc_ref[...]
        h = jnp.dot(h.astype(w1_ref.dtype), w1_ref[...],
                    preferred_element_type=jnp.float32) + b1_ref[...]
        h = jnp.maximum(h, 0.0)
        z = jnp.dot(h.astype(w21_ref.dtype), w21_ref[...],
                    preferred_element_type=jnp.float32) + b21_ref[...]
        o_ref[...] = jax.nn.sigmoid(z).astype(o_ref.dtype)


# ----------------------------------------------------------------------------
# pallas_call wrappers
# ----------------------------------------------------------------------------

def pallas_matmul_bias(x, w, b, act=None, out_dtype=jnp.bfloat16):
    M, K = x.shape
    N = w.shape[1]
    tm = _pick_tm(M)
    return pl.pallas_call(
        functools.partial(_matmul_bias_act_kernel, act=act),
        out_shape=jax.ShapeDtypeStruct((M, N), out_dtype),
        grid=(M // tm,),
        in_specs=[
            pl.BlockSpec((tm, K), lambda i: (i, 0)),
            pl.BlockSpec((K, N), lambda i: (0, 0)),
            pl.BlockSpec((1, N), lambda i: (0, 0)),
        ],
        out_specs=pl.BlockSpec((tm, N), lambda i: (i, 0)),
        compiler_params=_params(parallel=True),
        cost_estimate=_cost(2 * M * K * N,
                            _nbytes(x, w, b) + M * N * jnp.dtype(out_dtype).itemsize),
    )(x, w, b.reshape(1, N))


def pallas_conv3_residual(y2, b2, w3, b3, r, out_dtype=jnp.bfloat16):
    M, P = y2.shape
    C4 = w3.shape[1]
    tm = _pick_tm(M)
    return pl.pallas_call(
        _conv3_res_kernel,
        out_shape=jax.ShapeDtypeStruct((M, C4), out_dtype),
        grid=(M // tm,),
        in_specs=[
            pl.BlockSpec((tm, P), lambda i: (i, 0)),
            pl.BlockSpec((1, P), lambda i: (0, 0)),
            pl.BlockSpec((P, C4), lambda i: (0, 0)),
            pl.BlockSpec((1, C4), lambda i: (0, 0)),
            pl.BlockSpec((tm, C4), lambda i: (i, 0)),
        ],
        out_specs=pl.BlockSpec((tm, C4), lambda i: (i, 0)),
        compiler_params=_params(parallel=True),
        cost_estimate=_cost(2 * M * P * C4,
                            _nbytes(y2, b2, w3, b3, r) + M * C4 * 2),
    )(y2, b2.reshape(1, P), w3, b3.reshape(1, C4), r)


def pallas_conv3_downsample(y2, b2, w3, b3, x_nhwc, wd, bd, stride,
                            out_dtype=jnp.bfloat16):
    M, P = y2.shape
    C4 = w3.shape[1]
    Cin = x_nhwc.shape[-1]
    if stride == 1:
        tm = _pick_tm(M, min_tile=64)
        xd = x_nhwc.reshape(M, Cin)
        xd_spec = pl.BlockSpec((tm, Cin), lambda i: (i, 0))
    else:
        N_, H, W, _ = x_nhwc.shape
        assert H % stride == 0 and W % stride == 0, \
            "strided residual trick requires H, W divisible by stride"
        Ho, Wo = H // stride, W // stride
        tm = _pick_tm(M, multiple_of=Wo, min_tile=64)
        rows = tm // Wo
        # Row-major-free reshape; the BlockSpec then DMAs only the stride-s
        # sub-grid straight into VMEM (no XLA strided-slice copy).  The stride
        # axis is declared Squeezed so the kernel sees (rows, Wo, Cin).
        xd = x_nhwc.reshape(N_ * Ho, stride, Wo, stride * Cin)
        xd_spec = pl.BlockSpec((rows, pl.Squeezed(), Wo, Cin),
                               lambda i: (i, 0, 0, 0))
    return pl.pallas_call(
        _conv3_ds_kernel,
        out_shape=jax.ShapeDtypeStruct((M, C4), out_dtype),
        grid=(M // tm,),
        in_specs=[
            pl.BlockSpec((tm, P), lambda i: (i, 0)),
            pl.BlockSpec((1, P), lambda i: (0, 0)),
            pl.BlockSpec((P, C4), lambda i: (0, 0)),
            pl.BlockSpec((1, C4), lambda i: (0, 0)),
            xd_spec,
            pl.BlockSpec((Cin, C4), lambda i: (0, 0)),
            pl.BlockSpec((1, C4), lambda i: (0, 0)),
        ],
        out_specs=pl.BlockSpec((tm, C4), lambda i: (i, 0)),
        compiler_params=_params(parallel=True),
        cost_estimate=_cost(2 * M * P * C4 + 2 * M * Cin * C4,
                            _nbytes(y2, b2, w3, b3, wd, bd)
                            + M * Cin * 2 + M * C4 * 2),
    )(y2, b2.reshape(1, P), w3, b3.reshape(1, C4), xd, wd, bd.reshape(1, C4))


def pallas_head(feats, wfc, bfc, w1, b1, w21, b21):
    B, HW, C = feats.shape
    D1 = wfc.shape[1]
    D2 = w1.shape[1]
    kt = 512 if (C > 512 and C % 512 == 0) else C     # K-tile the 2048 axis
    nk = C // kt
    return pl.pallas_call(
        _head_kernel,
        out_shape=jax.ShapeDtypeStruct((B, 1), jnp.float32),
        grid=(nk,),
        in_specs=[
            pl.BlockSpec((B, HW, kt), lambda k: (0, 0, k)),
            pl.BlockSpec((kt, D1), lambda k: (k, 0)),
            pl.BlockSpec((1, D1), lambda k: (0, 0)),
            pl.BlockSpec((D1, D2), lambda k: (0, 0)),
            pl.BlockSpec((1, D2), lambda k: (0, 0)),
            pl.BlockSpec((D2, 1), lambda k: (0, 0)),
            pl.BlockSpec((1, 1), lambda k: (0, 0)),
        ],
        out_specs=pl.BlockSpec((B, 1), lambda k: (0, 0)),
        scratch_shapes=[pltpu.VMEM((B, D1), jnp.float32)],
        compiler_params=_params(parallel=False),          # K axis is a reduction
        cost_estimate=_cost(2 * B * HW * C + 2 * B * (C * D1 + D1 * D2 + D2),
                            _nbytes(feats, wfc, bfc, w1, b1, w21, b21) + B * 4,
                            transcendentals=2 * B),
    )(feats, wfc, bfc.reshape(1, D1), w1, b1.reshape(1, D2), w21, b21.reshape(1, 1))


# ----------------------------------------------------------------------------
# Plain-JAX glue (spatial convs, max-pool, tiny late-stage blocks)
# ----------------------------------------------------------------------------

def conv2d_nhwc(x, w, stride, padding):
    # TODO(synk): 7x7 stem / 3x3 bottleneck spatial convolutions stay in XLA
    # (no im2col Pallas kernel); their BN-bias/relu epilogues are fused into the
    # neighbouring Pallas kernels (or XLA fusions) instead.
    return jax.lax.conv_general_dilated(
        x, w, window_strides=(stride, stride), padding=padding,
        dimension_numbers=("NHWC", "HWIO", "NHWC"),
        preferred_element_type=jnp.float32)


def maxpool_3x3_s2_p1(x):
    return jax.lax.reduce_window(
        x, -jnp.inf, jax.lax.max,
        window_dimensions=(1, 3, 3, 1), window_strides=(1, 2, 2, 1),
        padding=((0, 0), (1, 1), (1, 1), (0, 0)))


def bottleneck(x, blk):
    N, H, W, Cin = x.shape
    s = blk["stride"]
    P = blk["w1"].shape[1]
    C4 = blk["w3"].shape[1]
    Ho, Wo = H // s, W // s
    m_in, m_out = N * H * W, N * Ho * Wo

    if min(m_in, m_out) < _PALLAS_MIN_M:
        # Tiny late-stage blocks (layers 3/4 at this resolution): Pallas
        # dispatch + exposed weight DMA dominates, so leave the 1x1 matmuls and
        # epilogues to XLA, which fuses them with the neighbouring 3x3 conv.
        h1 = jnp.maximum(
            jnp.dot(x.reshape(m_in, Cin), blk["w1"],
                    preferred_element_type=jnp.float32) + blk["b1"], 0.0
        ).astype(jnp.bfloat16).reshape(N, H, W, P)
        y2 = conv2d_nhwc(h1, blk["w2"], stride=s, padding=((1, 1), (1, 1)))
        y2 = jnp.maximum(y2 + blk["b2"], 0.0).astype(jnp.bfloat16)
        out = jnp.dot(y2.reshape(m_out, P), blk["w3"],
                      preferred_element_type=jnp.float32) + blk["b3"]
        if "wd" in blk:
            xs = x[:, ::s, ::s, :] if s > 1 else x
            res = jnp.dot(xs.reshape(m_out, Cin), blk["wd"],
                          preferred_element_type=jnp.float32) + blk["bd"]
        else:
            res = x.reshape(m_out, C4).astype(jnp.float32)
        out = jnp.maximum(out + res, 0.0).astype(jnp.bfloat16)
        return out.reshape(N, Ho, Wo, C4)

    # Pallas path (layers 1/2): 1x1 reduce + folded-BN bias + relu (M-tiled),
    # XLA 3x3 conv (f32 accumulate, bf16 writeback), then fused
    # bias/relu/1x1-expand/(strided residual)/relu.
    h1 = pallas_matmul_bias(x.reshape(m_in, Cin), blk["w1"], blk["b1"],
                            act="relu").reshape(N, H, W, P)
    y2 = conv2d_nhwc(h1, blk["w2"], stride=s, padding=((1, 1), (1, 1)))
    y2f = y2.astype(jnp.bfloat16).reshape(m_out, P)     # bf16: halve y2 HBM traffic
    if "wd" in blk:
        out = pallas_conv3_downsample(y2f, blk["b2"], blk["w3"], blk["b3"],
                                      x, blk["wd"], blk["bd"], s)
    else:
        out = pallas_conv3_residual(y2f, blk["b2"], blk["w3"], blk["b3"],
                                    x.reshape(m_out, C4))
    return out.reshape(N, Ho, Wo, C4)


def regressor_forward(params, x_nchw):
    # Cast to bf16 before the layout transpose (halves its HBM traffic).
    x = jnp.transpose(x_nchw.astype(jnp.bfloat16), (0, 2, 3, 1))   # NCHW -> NHWC
    x = conv2d_nhwc(x, params["conv1_w"], stride=2, padding=((3, 3), (3, 3)))
    x = jax.nn.relu(x + params["conv1_b"])
    x = maxpool_3x3_s2_p1(x).astype(jnp.bfloat16)
    for layer in params["layers"]:
        for blk in layer:
            x = bottleneck(x, blk)
    B, H, W, C = x.shape
    feats = x.reshape(B, H * W, C)
    # TODO(synk): a cross-call DMA future (P10) could prefetch fc_w during
    # layer4 in addition to the in-kernel K-tiling done in pallas_head.
    return pallas_head(feats, params["fc_w"], params["fc_b"],
                       params["fc1_w"], params["fc1_b"],
                       params["fc21_w"], params["fc21_b"])


# ----------------------------------------------------------------------------
# Deterministic parameter construction (synthetic weights, BN folded into convs)
# Weights in bf16 (MXU operands); biases in f32 (added post-accumulate).
# ----------------------------------------------------------------------------

class KeyGen:
    def __init__(self, seed):
        self.key = jax.random.PRNGKey(seed)
        self.i = 0

    def __call__(self):
        self.i += 1
        return jax.random.fold_in(self.key, self.i)


def _fold_bn(w, cout, eps=1e-5):
    gamma = jnp.ones((cout,), jnp.float32)
    beta = jnp.zeros((cout,), jnp.float32)
    mean = jnp.zeros((cout,), jnp.float32)
    var = jnp.ones((cout,), jnp.float32)
    scale = gamma / jnp.sqrt(var + eps)
    return w * scale, beta - mean * scale


def init_conv_bn(kg, kh, kw, cin, cout):
    fan_in = kh * kw * cin
    w = jax.random.normal(kg(), (kh, kw, cin, cout), jnp.float32) * np.sqrt(2.0 / fan_in)
    w, b = _fold_bn(w, cout)
    if kh == 1 and kw == 1:
        w = w.reshape(cin, cout)
    return w.astype(jnp.bfloat16), b


def init_linear(kg, cin, cout):
    w = jax.random.normal(kg(), (cin, cout), jnp.float32) * np.sqrt(1.0 / cin)
    b = jnp.zeros((cout,), jnp.float32)
    return w.astype(jnp.bfloat16), b


def make_params():
    kg = KeyGen(0)
    params = {}
    params["conv1_w"], params["conv1_b"] = init_conv_bn(kg, 7, 7, 3, 64)
    layers = []
    inplanes = 64
    for planes, nblocks, stride in [(64, 3, 1), (128, 4, 2), (256, 6, 2), (512, 3, 2)]:
        blocks = []
        for bi in range(nblocks):
            s = stride if bi == 0 else 1
            blk = {"stride": s}
            blk["w1"], blk["b1"] = init_conv_bn(kg, 1, 1, inplanes, planes)
            blk["w2"], blk["b2"] = init_conv_bn(kg, 3, 3, planes, planes)
            blk["w3"], blk["b3"] = init_conv_bn(kg, 1, 1, planes, planes * 4)
            if s != 1 or inplanes != planes * 4:
                blk["wd"], blk["bd"] = init_conv_bn(kg, 1, 1, inplanes, planes * 4)
            blocks.append(blk)
            inplanes = planes * 4
        layers.append(blocks)
    params["layers"] = layers
    # resnet50.fc replaced by Linear(2048, 1024), then fc1 / fc21 of the head.
    params["fc_w"], params["fc_b"] = init_linear(kg, 2048, 1024)
    params["fc1_w"], params["fc1_b"] = init_linear(kg, 1024, 256)
    params["fc21_w"], params["fc21_b"] = init_linear(kg, 256, 1)
    # fc22 is declared in __init__ but never used in forward -> not materialized.
    return params


# ----------------------------------------------------------------------------

if __name__ == "__main__":
    params = make_params()
    x = jax.random.normal(jax.random.PRNGKey(0), (2, 3, 64, 64), jnp.float32)  # NCHW

    fwd = jax.jit(lambda inp: regressor_forward(params, inp))
    out = jax.block_until_ready(fwd(x))

    assert out.shape == (2, 1), out.shape
    assert bool(jnp.all(jnp.isfinite(out)))
    assert bool(jnp.all((out >= 0.0) & (out <= 1.0)))   # sigmoid range
    print("KERNEL_OK")
</pallas_src>

<mosaic_0001>
module attributes {stable_mosaic.version = 11 : i64} {
  func.func @_matmul_bias_act_kernel(%arg0: i32, %arg1: memref<256x64xbf16, #tpu.memory_space<vmem>>, %arg2: memref<64x64xbf16, #tpu.memory_space<vmem>>, %arg3: memref<1x64xf32, #tpu.memory_space<vmem>>, %arg4: memref<256x64xbf16, #tpu.memory_space<vmem>>) attributes {dimension_semantics = [#tpu.dimension_semantics<parallel>], iteration_bounds = array<i64: 2>, scalar_prefetch = 0 : i64, scratch_operands = 0 : i64, tpu.core_type = #tpu.core_type<tc>, window_params = [{transform_indices = @transform_0, window_bounds = array<i64: 256, 64>}, {pipeline_mode = #tpu.pipeline_mode<synchronous>, transform_indices = @transform_1, window_bounds = array<i64: 64, 64>}, {pipeline_mode = #tpu.pipeline_mode<synchronous>, transform_indices = @transform_2, window_bounds = array<i64: 1, 64>}, {transform_indices = @transform_3, window_bounds = array<i64: 256, 64>}]} {
    %c0 = arith.constant 0 : index
    %c0_0 = arith.constant 0 : index
    %0 = vector.load %arg1[%c0, %c0_0] : memref<256x64xbf16, #tpu.memory_space<vmem>>, vector<256x64xbf16>
    %c0_1 = arith.constant 0 : index
    %c0_2 = arith.constant 0 : index
    %1 = vector.load %arg2[%c0_1, %c0_2] : memref<64x64xbf16, #tpu.memory_space<vmem>>, vector<64x64xbf16>
    %cst = arith.constant dense<0.000000e+00> : vector<256x64xf32>
    %2 = tpu.matmul %0, %1, %cst {dimension_numbers = #tpu.dot_dimension_numbers<[1], [0], [0], [1], [0, 0, 1, 1], [], []>} : vector<256x64xbf16>, vector<64x64xbf16>, vector<256x64xf32> -> vector<256x64xf32>
    %c0_3 = arith.constant 0 : index
    %c0_4 = arith.constant 0 : index
    %3 = vector.load %arg3[%c0_3, %c0_4] : memref<1x64xf32, #tpu.memory_space<vmem>>, vector<1x64xf32>
    %4 = vector.broadcast %3 : vector<1x64xf32> to vector<256x64xf32>
    %5 = arith.addf %2, %4 : vector<256x64xf32>
    %cst_5 = arith.constant 0.000000e+00 : f32
    %6 = vector.broadcast %cst_5 : f32 to vector<256x64xf32>
    %7 = arith.maximumf %5, %6 : vector<256x64xf32>
    %8 = arith.truncf %7 : vector<256x64xf32> to vector<256x64xbf16>
    %c0_6 = arith.constant 0 : index
    %c0_7 = arith.constant 0 : index
    %9 = vector.load %arg4[%c0_6, %c0_7] : memref<256x64xbf16, #tpu.memory_space<vmem>>, vector<256x64xbf16>
    tpu.vector_store %arg4[%c0_6, %c0_7], %8 {strides = array<i32>} : memref<256x64xbf16, #tpu.memory_space<vmem>>, vector<256x64xbf16>,
    return
  }
  func.func @transform_0(%arg0: i32) -> (i32, i32) {
    %c0_i32 = arith.constant 0 : i32
    %c0_i32_0 = arith.constant 0 : i32
    return %arg0, %c0_i32 : i32, i32
  }
  func.func @transform_1(%arg0: i32) -> (i32, i32) {
    %c0_i32 = arith.constant 0 : i32
    %c0_i32_0 = arith.constant 0 : i32
    %c0_i32_1 = arith.constant 0 : i32
    return %c0_i32, %c0_i32_0 : i32, i32
  }
  func.func @transform_2(%arg0: i32) -> (i32, i32) {
    %c0_i32 = arith.constant 0 : i32
    %c0_i32_0 = arith.constant 0 : i32
    %c0_i32_1 = arith.constant 0 : i32
    return %c0_i32, %c0_i32_0 : i32, i32
  }
  func.func @transform_3(%arg0: i32) -> (i32, i32) {
    %c0_i32 = arith.constant 0 : i32
    %c0_i32_0 = arith.constant 0 : i32
    return %arg0, %c0_i32 : i32, i32
  }
}

module attributes {stable_mosaic.version = 11 : i64} {
  func.func @_conv3_ds_kernel(%arg0: i32, %arg1: memref<256x64xbf16, #tpu.memory_space<vmem>>, %arg2: memref<1x64xf32, #tpu.memory_space<vmem>>, %arg3: memref<64x256xbf16, #tpu.memory_space<vmem>>, %arg4: memref<1x256xf32, #tpu.memory_space<vmem>>, %arg5: memref<256x64xbf16, #tpu.memory_space<vmem>>, %arg6: memref<64x256xbf16, #tpu.memory_space<vmem>>, %arg7: memref<1x256xf32, #tpu.memory_space<vmem>>, %arg8: memref<256x256xbf16, #tpu.memory_space<vmem>>) attributes {dimension_semantics = [#tpu.dimension_semantics<parallel>], iteration_bounds = array<i64: 2>, scalar_prefetch = 0 : i64, scratch_operands = 0 : i64, tpu.core_type = #tpu.core_type<tc>, window_params = [{transform_indices = @transform_0, window_bounds = array<i64: 256, 64>}, {pipeline_mode = #tpu.pipeline_mode<synchronous>, transform_indices = @transform_1, window_bounds = array<i64: 1, 64>}, {pipeline_mode = #tpu.pipeline_mode<synchronous>, transform_indices = @transform_2, window_bounds = array<i64: 64, 256>}, {pipeline_mode = #tpu.pipeline_mode<synchronous>, transform_indices = @transform_3, window_bounds = array<i64: 1, 256>}, {transform_indices = @transform_4, window_bounds = array<i64: 256, 64>}, {pipeline_mode = #tpu.pipeline_mode<synchronous>, transform_indices = @transform_5, window_bounds = array<i64: 64, 256>}, {pipeline_mode = #tpu.pipeline_mode<synchronous>, transform_indices = @transform_6, window_bounds = array<i64: 1, 256>}, {transform_indices = @transform_7, window_bounds = array<i64: 256, 256>}]} {
    %c0 = arith.constant 0 : index
    %c0_0 = arith.constant 0 : index
    %0 = vector.load %arg1[%c0, %c0_0] : memref<256x64xbf16, #tpu.memory_space<vmem>>, vector<256x64xbf16>
    %c0_1 = arith.constant 0 : index
    %c0_2 = arith.constant 0 : index
    %1 = vector.load %arg2[%c0_1, %c0_2] : memref<1x64xf32, #tpu.memory_space<vmem>>, vector<1x64xf32>
    %2 = arith.extf %0 : vector<256x64xbf16> to vector<256x64xf32>
    %3 = vector.broadcast %1 : vector<1x64xf32> to vector<256x64xf32>
    %4 = arith.addf %2, %3 : vector<256x64xf32>
    %cst = arith.constant 0.000000e+00 : f32
    %5 = vector.broadcast %cst : f32 to vector<256x64xf32>
    %6 = arith.maximumf %4, %5 : vector<256x64xf32>
    %7 = arith.truncf %6 : vector<256x64xf32> to vector<256x64xbf16>
    %c0_3 = arith.constant 0 : index
    %c0_4 = arith.constant 0 : index
    %8 = vector.load %arg3[%c0_3, %c0_4] : memref<64x256xbf16, #tpu.memory_space<vmem>>, vector<64x256xbf16>
    %cst_5 = arith.constant dense<0.000000e+00> : vector<256x256xf32>
    %9 = tpu.matmul %7, %8, %cst_5 {dimension_numbers = #tpu.dot_dimension_numbers<[1], [0], [0], [1], [0, 0, 1, 1], [], []>} : vector<256x64xbf16>, vector<64x256xbf16>, vector<256x256xf32> -> vector<256x256xf32>
    %c0_6 = arith.constant 0 : index
    %c0_7 = arith.constant 0 : index
    %10 = vector.load %arg4[%c0_6, %c0_7] : memref<1x256xf32, #tpu.memory_space<vmem>>, vector<1x256xf32>
    %11 = vector.broadcast %10 : vector<1x256xf32> to vector<256x256xf32>
    %12 = arith.addf %9, %11 : vector<256x256xf32>
    %c0_8 = arith.constant 0 : index
    %c0_9 = arith.constant 0 : index
    %13 = vector.load %arg5[%c0_8, %c0_9] : memref<256x64xbf16, #tpu.memory_space<vmem>>, vector<256x64xbf16>
    %c0_10 = arith.constant 0 : index
    %c0_11 = arith.constant 0 : index
    %14 = vector.load %arg6[%c0_10, %c0_11] : memref<64x256xbf16, #tpu.memory_space<vmem>>, vector<64x256xbf16>
    %cst_12 = arith.constant dense<0.000000e+00> : vector<256x256xf32>
    %15 = tpu.matmul %13, %14, %cst_12 {dimension_numbers = #tpu.dot_dimension_numbers<[1], [0], [0], [1], [0, 0, 1, 1], [], []>} : vector<256x64xbf16>, vector<64x256xbf16>, vector<256x256xf32> -> vector<256x256xf32>
    %16 = arith.addf %12, %15 : vector<256x256xf32>
    %c0_13 = arith.constant 0 : index
    %c0_14 = arith.constant 0 : index
    %17 = vector.load %arg7[%c0_13, %c0_14] : memref<1x256xf32, #tpu.memory_space<vmem>>, vector<1x256xf32>
    %18 = vector.broadcast %17 : vector<1x256xf32> to vector<256x256xf32>
    %19 = arith.addf %16, %18 : vector<256x256xf32>
    %cst_15 = arith.constant 0.000000e+00 : f32
    %20 = vector.broadcast %cst_15 : f32 to vector<256x256xf32>
    %21 = arith.maximumf %19, %20 : vector<256x256xf32>
    %22 = arith.truncf %21 : vector<256x256xf32> to vector<256x256xbf16>
    %c0_16 = arith.constant 0 : index
    %c0_17 = arith.constant 0 : index
    %23 = vector.load %arg8[%c0_16, %c0_17] : memref<256x256xbf16, #tpu.memory_space<vmem>>, vector<256x256xbf16>
    tpu.vector_store %arg8[%c0_16, %c0_17], %22 {strides = array<i32>} : memref<256x256xbf16, #tpu.memory_space<vmem>>, vector<256x256xbf16>,
    return
  }
  func.func @transform_0(%arg0: i32) -> (i32, i32) {
    %c0_i32 = arith.constant 0 : i32
    %c0_i32_0 = arith.constant 0 : i32
    return %arg0, %c0_i32 : i32, i32
  }
  func.func @transform_1(%arg0: i32) -> (i32, i32) {
    %c0_i32 = arith.constant 0 : i32
    %c0_i32_0 = arith.constant 0 : i32
    %c0_i32_1 = arith.constant 0 : i32
    return %c0_i32, %c0_i32_0 : i32, i32
  }
  func.func @transform_2(%arg0: i32) -> (i32, i32) {
    %c0_i32 = arith.constant 0 : i32
    %c0_i32_0 = arith.constant 0 : i32
    %c0_i32_1 = arith.constant 0 : i32
    return %c0_i32, %c0_i32_0 : i32, i32
  }
  func.func @transform_3(%arg0: i32) -> (i32, i32) {
    %c0_i32 = arith.constant 0 : i32
    %c0_i32_0 = arith.constant 0 : i32
    %c0_i32_1 = arith.constant 0 : i32
    return %c0_i32, %c0_i32_0 : i32, i32
  }
  func.func @transform_4(%arg0: i32) -> (i32, i32) {
    %c0_i32 = arith.constant 0 : i32
    %c0_i32_0 = arith.constant 0 : i32
    return %arg0, %c0_i32 : i32, i32
  }
  func.func @transform_5(%arg0: i32) -> (i32, i32) {
    %c0_i32 = arith.constant 0 : i32
    %c0_i32_0 = arith.constant 0 : i32
    %c0_i32_1 = arith.constant 0 : i32
    return %c0_i32, %c0_i32_0 : i32, i32
  }
  func.func @transform_6(%arg0: i32) -> (i32, i32) {
    %c0_i32 = arith.constant 0 : i32
    %c0_i32_0 = arith.constant 0 : i32
    %c0_i32_1 = arith.constant 0 : i32
    return %c0_i32, %c0_i32_0 : i32, i32
  }
  func.func @transform_7(%arg0: i32) -> (i32, i32) {
    %c0_i32 = arith.constant 0 : i32
    %c0_i32_0 = arith.constant 0 : i32
    return %arg0, %c0_i32 : i32, i32
  }
}

module attributes {stable_mosaic.version = 11 : i64} {
  func.func @_matmul_bias_act_kernel(%arg0: i32, %arg1: memref<256x256xbf16, #tpu.memory_space<vmem>>, %arg2: memref<256x64xbf16, #tpu.memory_space<vmem>>, %arg3: memref<1x64xf32, #tpu.memory_space<vmem>>, %arg4: memref<256x64xbf16, #tpu.memory_space<vmem>>) attributes {dimension_semantics = [#tpu.dimension_semantics<parallel>], iteration_bounds = array<i64: 2>, scalar_prefetch = 0 : i64, scratch_operands = 0 : i64, tpu.core_type = #tpu.core_type<tc>, window_params = [{transform_indices = @transform_0, window_bounds = array<i64: 256, 256>}, {pipeline_mode = #tpu.pipeline_mode<synchronous>, transform_indices = @transform_1, window_bounds = array<i64: 256, 64>}, {pipeline_mode = #tpu.pipeline_mode<synchronous>, transform_indices = @transform_2, window_bounds = array<i64: 1, 64>}, {transform_indices = @transform_3, window_bounds = array<i64: 256, 64>}]} {
    %c0 = arith.constant 0 : index
    %c0_0 = arith.constant 0 : index
    %0 = vector.load %arg1[%c0, %c0_0] : memref<256x256xbf16, #tpu.memory_space<vmem>>, vector<256x256xbf16>
    %c0_1 = arith.constant 0 : index
    %c0_2 = arith.constant 0 : index
    %1 = vector.load %arg2[%c0_1, %c0_2] : memref<256x64xbf16, #tpu.memory_space<vmem>>, vector<256x64xbf16>
    %cst = arith.constant dense<0.000000e+00> : vector<256x64xf32>
    %2 = tpu.matmul %0, %1, %cst {dimension_numbers = #tpu.dot_dimension_numbers<[1], [0], [0], [1], [0, 0, 1, 1], [], []>} : vector<256x256xbf16>, vector<256x64xbf16>, vector<256x64xf32> -> vector<256x64xf32>
    %c0_3 = arith.constant 0 : index
    %c0_4 = arith.constant 0 : index
    %3 = vector.load %arg3[%c0_3, %c0_4] : memref<1x64xf32, #tpu.memory_space<vmem>>, vector<1x64xf32>
    %4 = vector.broadcast %3 : vector<1x64xf32> to vector<256x64xf32>
    %5 = arith.addf %2, %4 : vector<256x64xf32>
    %cst_5 = arith.constant 0.000000e+00 : f32
    %6 = vector.broadcast %cst_5 : f32 to vector<256x64xf32>
    %7 = arith.maximumf %5, %6 : vector<256x64xf32>
    %8 = arith.truncf %7 : vector<256x64xf32> to vector<256x64xbf16>
    %c0_6 = arith.constant 0 : index
    %c0_7 = arith.constant 0 : index
    %9 = vector.load %arg4[%c0_6, %c0_7] : memref<256x64xbf16, #tpu.memory_space<vmem>>, vector<256x64xbf16>
    tpu.vector_store %arg4[%c0_6, %c0_7], %8 {strides = array<i32>} : memref<256x64xbf16, #tpu.memory_space<vmem>>, vector<256x64xbf16>,
    return
  }
  func.func @transform_0(%arg0: i32) -> (i32, i32) {
    %c0_i32 = arith.constant 0 : i32
    %c0_i32_0 = arith.constant 0 : i32
    return %arg0, %c0_i32 : i32, i32
  }
  func.func @transform_1(%arg0: i32) -> (i32, i32) {
    %c0_i32 = arith.constant 0 : i32
    %c0_i32_0 = arith.constant 0 : i32
    %c0_i32_1 = arith.constant 0 : i32
    return %c0_i32, %c0_i32_0 : i32, i32
  }
  func.func @transform_2(%arg0: i32) -> (i32, i32) {
    %c0_i32 = arith.constant 0 : i32
    %c0_i32_0 = arith.constant 0 : i32
    %c0_i32_1 = arith.constant 0 : i32
    return %c0_i32, %c0_i32_0 : i32, i32
  }
  func.func @transform_3(%arg0: i32) -> (i32, i32) {
    %c0_i32 = arith.constant 0 : i32
    %c0_i32_0 = arith.constant 0 : i32
    return %arg0, %c0_i32 : i32, i32
  }
}

module attributes {stable_mosaic.version = 11 : i64} {
  func.func @_conv3_res_kernel(%arg0: i32, %arg1: memref<256x64xbf16, #tpu.memory_space<vmem>>, %arg2: memref<1x64xf32, #tpu.memory_space<vmem>>, %arg3: memref<64x256xbf16, #tpu.memory_space<vmem>>, %arg4: memref<1x256xf32, #tpu.memory_space<vmem>>, %arg5: memref<256x256xbf16, #tpu.memory_space<vmem>>, %arg6: memref<256x256xbf16, #tpu.memory_space<vmem>>) attributes {dimension_semantics = [#tpu.dimension_semantics<parallel>], iteration_bounds = array<i64: 2>, scalar_prefetch = 0 : i64, scratch_operands = 0 : i64, tpu.core_type = #tpu.core_type<tc>, window_params = [{transform_indices = @transform_0, window_bounds = array<i64: 256, 64>}, {pipeline_mode = #tpu.pipeline_mode<synchronous>, transform_indices = @transform_1, window_bounds = array<i64: 1, 64>}, {pipeline_mode = #tpu.pipeline_mode<synchronous>, transform_indices = @transform_2, window_bounds = array<i64: 64, 256>}, {pipeline_mode = #tpu.pipeline_mode<synchronous>, transform_indices = @transform_3, window_bounds = array<i64: 1, 256>}, {transform_indices = @transform_4, window_bounds = array<i64: 256, 256>}, {transform_indices = @transform_5, window_bounds = array<i64: 256, 256>}]} {
    %c0 = arith.constant 0 : index
    %c0_0 = arith.constant 0 : index
    %0 = vector.load %arg1[%c0, %c0_0] : memref<256x64xbf16, #tpu.memory_space<vmem>>, vector<256x64xbf16>
    %c0_1 = arith.constant 0 : index
    %c0_2 = arith.constant 0 : index
    %1 = vector.load %arg2[%c0_1, %c0_2] : memref<1x64xf32, #tpu.memory_space<vmem>>, vector<1x64xf32>
    %2 = arith.extf %0 : vector<256x64xbf16> to vector<256x64xf32>
    %3 = vector.broadcast %1 : vector<1x64xf32> to vector<256x64xf32>
    %4 = arith.addf %2, %3 : vector<256x64xf32>
    %cst = arith.constant 0.000000e+00 : f32
    %5 = vector.broadcast %cst : f32 to vector<256x64xf32>
    %6 = arith.maximumf %4, %5 : vector<256x64xf32>
    %7 = arith.truncf %6 : vector<256x64xf32> to vector<256x64xbf16>
    %c0_3 = arith.constant 0 : index
    %c0_4 = arith.constant 0 : index
    %8 = vector.load %arg3[%c0_3, %c0_4] : memref<64x256xbf16, #tpu.memory_space<vmem>>, vector<64x256xbf16>
    %cst_5 = arith.constant dense<0.000000e+00> : vector<256x256xf32>
    %9 = tpu.matmul %7, %8, %cst_5 {dimension_numbers = #tpu.dot_dimension_numbers<[1], [0], [0], [1], [0, 0, 1, 1], [], []>} : vector<256x64xbf16>, vector<64x256xbf16>, vector<256x256xf32> -> vector<256x256xf32>
    %c0_6 = arith.constant 0 : index
    %c0_7 = arith.constant 0 : index
    %10 = vector.load %arg4[%c0_6, %c0_7] : memref<1x256xf32, #tpu.memory_space<vmem>>, vector<1x256xf32>
    %11 = vector.broadcast %10 : vector<1x256xf32> to vector<256x256xf32>
    %12 = arith.addf %9, %11 : vector<256x256xf32>
    %c0_8 = arith.constant 0 : index
    %c0_9 = arith.constant 0 : index
    %13 = vector.load %arg5[%c0_8, %c0_9] : memref<256x256xbf16, #tpu.memory_space<vmem>>, vector<256x256xbf16>
    %14 = arith.extf %13 : vector<256x256xbf16> to vector<256x256xf32>
    %15 = arith.addf %12, %14 : vector<256x256xf32>
    %cst_10 = arith.constant 0.000000e+00 : f32
    %16 = vector.broadcast %cst_10 : f32 to vector<256x256xf32>
    %17 = arith.maximumf %15, %16 : vector<256x256xf32>
    %18 = arith.truncf %17 : vector<256x256xf32> to vector<256x256xbf16>
    %c0_11 = arith.constant 0 : index
    %c0_12 = arith.constant 0 : index
    %19 = vector.load %arg6[%c0_11, %c0_12] : memref<256x256xbf16, #tpu.memory_space<vmem>>, vector<256x256xbf16>
    tpu.vector_store %arg6[%c0_11, %c0_12], %18 {strides = array<i32>} : memref<256x256xbf16, #tpu.memory_space<vmem>>, vector<256x256xbf16>,
    return
  }
  func.func @transform_0(%arg0: i32) -> (i32, i32) {
    %c0_i32 = arith.constant 0 : i32
    %c0_i32_0 = arith.constant 0 : i32
    return %arg0, %c0_i32 : i32, i32
  }
  func.func @transform_1(%arg0: i32) -> (i32, i32) {
    %c0_i32 = arith.constant 0 : i32
    %c0_i32_0 = arith.constant 0 : i32
    %c0_i32_1 = arith.constant 0 : i32
    return %c0_i32, %c0_i32_0 : i32, i32
  }
  func.func @transform_2(%arg0: i32) -> (i32, i32) {
    %c0_i32 = arith.constant 0 : i32
    %c0_i32_0 = arith.constant 0 : i32
    %c0_i32_1 = arith.constant 0 : i32
    return %c0_i32, %c0_i32_0 : i32, i32
  }
  func.func @transform_3(%arg0: i32) -> (i32, i32) {
    %c0_i32 = arith.constant 0 : i32
    %c0_i32_0 = arith.constant 0 : i32
    %c0_i32_1 = arith.constant 0 : i32
    return %c0_i32, %c0_i32_0 : i32, i32
  }
  func.func @transform_4(%arg0: i32) -> (i32, i32) {
    %c0_i32 = arith.constant 0 : i32
    %c0_i32_0 = arith.constant 0 : i32
    return %arg0, %c0_i32 : i32, i32
  }
  func.func @transform_5(%arg0: i32) -> (i32, i32) {
    %c0_i32 = arith.constant 0 : i32
    %c0_i32_0 = arith.constant 0 : i32
    return %arg0, %c0_i32 : i32, i32
  }
}

module attributes {stable_mosaic.version = 11 : i64} {
  func.func @_matmul_bias_act_kernel(%arg0: i32, %arg1: memref<256x256xbf16, #tpu.memory_space<vmem>>, %arg2: memref<256x128xbf16, #tpu.memory_space<vmem>>, %arg3: memref<1x128xf32, #tpu.memory_space<vmem>>, %arg4: memref<256x128xbf16, #tpu.memory_space<vmem>>) attributes {dimension_semantics = [#tpu.dimension_semantics<parallel>], iteration_bounds = array<i64: 2>, scalar_prefetch = 0 : i64, scratch_operands = 0 : i64, tpu.core_type = #tpu.core_type<tc>, window_params = [{transform_indices = @transform_0, window_bounds = array<i64: 256, 256>}, {pipeline_mode = #tpu.pipeline_mode<synchronous>, transform_indices = @transform_1, window_bounds = array<i64: 256, 128>}, {pipeline_mode = #tpu.pipeline_mode<synchronous>, transform_indices = @transform_2, window_bounds = array<i64: 1, 128>}, {transform_indices = @transform_3, window_bounds = array<i64: 256, 128>}]} {
    %c0 = arith.constant 0 : index
    %c0_0 = arith.constant 0 : index
    %0 = vector.load %arg1[%c0, %c0_0] : memref<256x256xbf16, #tpu.memory_space<vmem>>, vector<256x256xbf16>
    %c0_1 = arith.constant 0 : index
    %c0_2 = arith.constant 0 : index
    %1 = vector.load %arg2[%c0_1, %c0_2] : memref<256x128xbf16, #tpu.memory_space<vmem>>, vector<256x128xbf16>
    %cst = arith.constant dense<0.000000e+00> : vector<256x128xf32>
    %2 = tpu.matmul %0, %1, %cst {dimension_numbers = #tpu.dot_dimension_numbers<[1], [0], [0], [1], [0, 0, 1, 1], [], []>} : vector<256x256xbf16>, vector<256x128xbf16>, vector<256x128xf32> -> vector<256x128xf32>
    %c0_3 = arith.constant 0 : index
    %c0_4 = arith.constant 0 : index
    %3 = vector.load %arg3[%c0_3, %c0_4] : memref<1x128xf32, #tpu.memory_space<vmem>>, vector<1x128xf32>
    %4 = vector.broadcast %3 : vector<1x128xf32> to vector<256x128xf32>
    %5 = arith.addf %2, %4 : vector<256x128xf32>
    %cst_5 = arith.constant 0.000000e+00 : f32
    %6 = vector.broadcast %cst_5 : f32 to vector<256x128xf32>
    %7 = arith.maximumf %5, %6 : vector<256x128xf32>
    %8 = arith.truncf %7 : vector<256x128xf32> to vector<256x128xbf16>
    %c0_6 = arith.constant 0 : index
    %c0_7 = arith.constant 0 : index
    %9 = vector.load %arg4[%c0_6, %c0_7] : memref<256x128xbf16, #tpu.memory_space<vmem>>, vector<256x128xbf16>
    tpu.vector_store %arg4[%c0_6, %c0_7], %8 {strides = array<i32>} : memref<256x128xbf16, #tpu.memory_space<vmem>>, vector<256x128xbf16>,
    return
  }
  func.func @transform_0(%arg0: i32) -> (i32, i32) {
    %c0_i32 = arith.constant 0 : i32
    %c0_i32_0 = arith.constant 0 : i32
    return %arg0, %c0_i32 : i32, i32
  }
  func.func @transform_1(%arg0: i32) -> (i32, i32) {
    %c0_i32 = arith.constant 0 : i32
    %c0_i32_0 = arith.constant 0 : i32
    %c0_i32_1 = arith.constant 0 : i32
    return %c0_i32, %c0_i32_0 : i32, i32
  }
  func.func @transform_2(%arg0: i32) -> (i32, i32) {
    %c0_i32 = arith.constant 0 : i32
    %c0_i32_0 = arith.constant 0 : i32
    %c0_i32_1 = arith.constant 0 : i32
    return %c0_i32, %c0_i32_0 : i32, i32
  }
  func.func @transform_3(%arg0: i32) -> (i32, i32) {
    %c0_i32 = arith.constant 0 : i32
    %c0_i32_0 = arith.constant 0 : i32
    return %arg0, %c0_i32 : i32, i32
  }
}

module attributes {stable_mosaic.version = 11 : i64} {
  func.func @_conv3_ds_kernel(%arg0: i32, %arg1: memref<64x128xbf16, #tpu.memory_space<vmem>>, %arg2: memref<1x128xf32, #tpu.memory_space<vmem>>, %arg3: memref<128x512xbf16, #tpu.memory_space<vmem>>, %arg4: memref<1x512xf32, #tpu.memory_space<vmem>>, %arg5: memref<8x1x8x256xbf16, #tpu.memory_space<vmem>>, %arg6: memref<256x512xbf16, #tpu.memory_space<vmem>>, %arg7: memref<1x512xf32, #tpu.memory_space<vmem>>, %arg8: memref<64x512xbf16, #tpu.memory_space<vmem>>) attributes {dimension_semantics = [#tpu.dimension_semantics<parallel>], iteration_bounds = array<i64: 2>, scalar_prefetch = 0 : i64, scratch_operands = 0 : i64, tpu.core_type = #tpu.core_type<tc>, window_params = [{transform_indices = @transform_0, window_bounds = array<i64: 64, 128>}, {pipeline_mode = #tpu.pipeline_mode<synchronous>, transform_indices = @transform_1, window_bounds = array<i64: 1, 128>}, {pipeline_mode = #tpu.pipeline_mode<synchronous>, transform_indices = @transform_2, window_bounds = array<i64: 128, 512>}, {pipeline_mode = #tpu.pipeline_mode<synchronous>, transform_indices = @transform_3, window_bounds = array<i64: 1, 512>}, {transform_indices = @transform_4, window_bounds = array<i64: 8, 1, 8, 256>}, {pipeline_mode = #tpu.pipeline_mode<synchronous>, transform_indices = @transform_5, window_bounds = array<i64: 256, 512>}, {pipeline_mode = #tpu.pipeline_mode<synchronous>, transform_indices = @transform_6, window_bounds = array<i64: 1, 512>}, {transform_indices = @transform_7, window_bounds = array<i64: 64, 512>}]} {
    %c0 = arith.constant 0 : index
    %c0_0 = arith.constant 0 : index
    %0 = vector.load %arg1[%c0, %c0_0] : memref<64x128xbf16, #tpu.memory_space<vmem>>, vector<64x128xbf16>
    %c0_1 = arith.constant 0 : index
    %c0_2 = arith.constant 0 : index
    %1 = vector.load %arg2[%c0_1, %c0_2] : memref<1x128xf32, #tpu.memory_space<vmem>>, vector<1x128xf32>
    %2 = arith.extf %0 : vector<64x128xbf16> to vector<64x128xf32>
    %3 = vector.broadcast %1 : vector<1x128xf32> to vector<64x128xf32>
    %4 = arith.addf %2, %3 : vector<64x128xf32>
    %cst = arith.constant 0.000000e+00 : f32
    %5 = vector.broadcast %cst : f32 to vector<64x128xf32>
    %6 = arith.maximumf %4, %5 : vector<64x128xf32>
    %7 = arith.truncf %6 : vector<64x128xf32> to vector<64x128xbf16>
    %c0_3 = arith.constant 0 : index
    %c0_4 = arith.constant 0 : index
    %8 = vector.load %arg3[%c0_3, %c0_4] : memref<128x512xbf16, #tpu.memory_space<vmem>>, vector<128x512xbf16>
    %cst_5 = arith.constant dense<0.000000e+00> : vector<64x512xf32>
    %9 = tpu.matmul %7, %8, %cst_5 {dimension_numbers = #tpu.dot_dimension_numbers<[1], [0], [0], [1], [0, 0, 1, 1], [], []>} : vector<64x128xbf16>, vector<128x512xbf16>, vector<64x512xf32> -> vector<64x512xf32>
    %c0_6 = arith.constant 0 : index
    %c0_7 = arith.constant 0 : index
    %10 = vector.load %arg4[%c0_6, %c0_7] : memref<1x512xf32, #tpu.memory_space<vmem>>, vector<1x512xf32>
    %11 = vector.broadcast %10 : vector<1x512xf32> to vector<64x512xf32>
    %12 = arith.addf %9, %11 : vector<64x512xf32>
    %c0_8 = arith.constant 0 : index
    %c0_9 = arith.constant 0 : index
    %c0_10 = arith.constant 0 : index
    %c0_11 = arith.constant 0 : index
    %13 = vector.load %arg5[%c0_8, %c0_9, %c0_10, %c0_11] : memref<8x1x8x256xbf16, #tpu.memory_space<vmem>>, vector<8x1x8x256xbf16>
    %14 = vector.shape_cast %13 : vector<8x1x8x256xbf16> to vector<8x8x256xbf16>
    %15 = vector.shape_cast %14 : vector<8x8x256xbf16> to vector<64x256xbf16>
    %c0_12 = arith.constant 0 : index
    %c0_13 = arith.constant 0 : index
    %16 = vector.load %arg6[%c0_12, %c0_13] : memref<256x512xbf16, #tpu.memory_space<vmem>>, vector<256x512xbf16>
    %cst_14 = arith.constant dense<0.000000e+00> : vector<64x512xf32>
    %17 = tpu.matmul %15, %16, %cst_14 {dimension_numbers = #tpu.dot_dimension_numbers<[1], [0], [0], [1], [0, 0, 1, 1], [], []>} : vector<64x256xbf16>, vector<256x512xbf16>, vector<64x512xf32> -> vector<64x512xf32>
    %18 = arith.addf %12, %17 : vector<64x512xf32>
    %c0_15 = arith.constant 0 : index
    %c0_16 = arith.constant 0 : index
    %19 = vector.load %arg7[%c0_15, %c0_16] : memref<1x512xf32, #tpu.memory_space<vmem>>, vector<1x512xf32>
    %20 = vector.broadcast %19 : vector<1x512xf32> to vector<64x512xf32>
    %21 = arith.addf %18, %20 : vector<64x512xf32>
    %cst_17 = arith.constant 0.000000e+00 : f32
    %22 = vector.broadcast %cst_17 : f32 to vector<64x512xf32>
    %23 = arith.maximumf %21, %22 : vector<64x512xf32>
    %24 = arith.truncf %23 : vector<64x512xf32> to vector<64x512xbf16>
    %c0_18 = arith.constant 0 : index
    %c0_19 = arith.constant 0 : index
    %25 = vector.load %arg8[%c0_18, %c0_19] : memref<64x512xbf16, #tpu.memory_space<vmem>>, vector<64x512xbf16>
    tpu.vector_store %arg8[%c0_18, %c0_19], %24 {strides = array<i32>} : memref<64x512xbf16, #tpu.memory_space<vmem>>, vector<64x512xbf16>,
    return
  }
  func.func @transform_0(%arg0: i32) -> (i32, i32) {
    %c0_i32 = arith.constant 0 : i32
    %c0_i32_0 = arith.constant 0 : i32
    return %arg0, %c0_i32 : i32, i32
  }
  func.func @transform_1(%arg0: i32) -> (i32, i32) {
    %c0_i32 = arith.constant 0 : i32
    %c0_i32_0 = arith.constant 0 : i32
    %c0_i32_1 = arith.constant 0 : i32
    return %c0_i32, %c0_i32_0 : i32, i32
  }
  func.func @transform_2(%arg0: i32) -> (i32, i32) {
    %c0_i32 = arith.constant 0 : i32
    %c0_i32_0 = arith.constant 0 : i32
    %c0_i32_1 = arith.constant 0 : i32
    return %c0_i32, %c0_i32_0 : i32, i32
  }
  func.func @transform_3(%arg0: i32) -> (i32, i32) {
    %c0_i32 = arith.constant 0 : i32
    %c0_i32_0 = arith.constant 0 : i32
    %c0_i32_1 = arith.constant 0 : i32
    return %c0_i32, %c0_i32_0 : i32, i32
  }
  func.func @transform_4(%arg0: i32) -> (i32, i32, i32, i32) {
    %c0_i32 = arith.constant 0 : i32
    %c0_i32_0 = arith.constant 0 : i32
    %c0_i32_1 = arith.constant 0 : i32
    %c0_i32_2 = arith.constant 0 : i32
    return %arg0, %c0_i32, %c0_i32_0, %c0_i32_1 : i32, i32, i32, i32
  }
  func.func @transform_5(%arg0: i32) -> (i32, i32) {
    %c0_i32 = arith.constant 0 : i32
    %c0_i32_0 = arith.constant 0 : i32
    %c0_i32_1 = arith.constant 0 : i32
    return %c0_i32, %c0_i32_0 : i32, i32
  }
  func.func @transform_6(%arg0: i32) -> (i32, i32) {
    %c0_i32 = arith.constant 0 : i32
    %c0_i32_0 = arith.constant 0 : i32
    %c0_i32_1 = arith.constant 0 : i32
    return %c0_i32, %c0_i32_0 : i32, i32
  }
  func.func @transform_7(%arg0: i32) -> (i32, i32) {
    %c0_i32 = arith.constant 0 : i32
    %c0_i32_0 = arith.constant 0 : i32
    return %arg0, %c0_i32 : i32, i32
  }
}

module attributes {stable_mosaic.version = 11 : i64} {
  func.func @_matmul_bias_act_kernel(%arg0: i32, %arg1: memref<128x512xbf16, #tpu.memory_space<vmem>>, %arg2: memref<512x128xbf16, #tpu.memory_space<vmem>>, %arg3: memref<1x128xf32, #tpu.memory_space<vmem>>, %arg4: memref<128x128xbf16, #tpu.memory_space<vmem>>) attributes {dimension_semantics = [#tpu.dimension_semantics<parallel>], iteration_bounds = array<i64: 1>, scalar_prefetch = 0 : i64, scratch_operands = 0 : i64, tpu.core_type = #tpu.core_type<tc>, window_params = [{transform_indices = @transform_0, window_bounds = array<i64: 128, 512>}, {pipeline_mode = #tpu.pipeline_mode<synchronous>, transform_indices = @transform_1, window_bounds = array<i64: 512, 128>}, {pipeline_mode = #tpu.pipeline_mode<synchronous>, transform_indices = @transform_2, window_bounds = array<i64: 1, 128>}, {transform_indices = @transform_3, window_bounds = array<i64: 128, 128>}]} {
    %c0 = arith.constant 0 : index
    %c0_0 = arith.constant 0 : index
    %0 = vector.load %arg1[%c0, %c0_0] : memref<128x512xbf16, #tpu.memory_space<vmem>>, vector<128x512xbf16>
    %c0_1 = arith.constant 0 : index
    %c0_2 = arith.constant 0 : index
    %1 = vector.load %arg2[%c0_1, %c0_2] : memref<512x128xbf16, #tpu.memory_space<vmem>>, vector<512x128xbf16>
    %cst = arith.constant dense<0.000000e+00> : vector<128x128xf32>
    %2 = tpu.matmul %0, %1, %cst {dimension_numbers = #tpu.dot_dimension_numbers<[1], [0], [0], [1], [0, 0, 1, 1], [], []>} : vector<128x512xbf16>, vector<512x128xbf16>, vector<128x128xf32> -> vector<128x128xf32>
    %c0_3 = arith.constant 0 : index
    %c0_4 = arith.constant 0 : index
    %3 = vector.load %arg3[%c0_3, %c0_4] : memref<1x128xf32, #tpu.memory_space<vmem>>, vector<1x128xf32>
    %4 = vector.broadcast %3 : vector<1x128xf32> to vector<128x128xf32>
    %5 = arith.addf %2, %4 : vector<128x128xf32>
    %cst_5 = arith.constant 0.000000e+00 : f32
    %6 = vector.broadcast %cst_5 : f32 to vector<128x128xf32>
    %7 = arith.maximumf %5, %6 : vector<128x128xf32>
    %8 = arith.truncf %7 : vector<128x128xf32> to vector<128x128xbf16>
    %c0_6 = arith.constant 0 : index
    %c0_7 = arith.constant 0 : index
    %9 = vector.load %arg4[%c0_6, %c0_7] : memref<128x128xbf16, #tpu.memory_space<vmem>>, vector<128x128xbf16>
    tpu.vector_store %arg4[%c0_6, %c0_7], %8 {strides = array<i32>} : memref<128x128xbf16, #tpu.memory_space<vmem>>, vector<128x128xbf16>,
    return
  }
  func.func @transform_0(%arg0: i32) -> (i32, i32) {
    %c0_i32 = arith.constant 0 : i32
    %c0_i32_0 = arith.constant 0 : i32
    return %arg0, %c0_i32 : i32, i32
  }
  func.func @transform_1(%arg0: i32) -> (i32, i32) {
    %c0_i32 = arith.constant 0 : i32
    %c0_i32_0 = arith.constant 0 : i32
    %c0_i32_1 = arith.constant 0 : i32
    return %c0_i32, %c0_i32_0 : i32, i32
  }
  func.func @transform_2(%arg0: i32) -> (i32, i32) {
    %c0_i32 = arith.constant 0 : i32
    %c0_i32_0 = arith.constant 0 : i32
    %c0_i32_1 = arith.constant 0 : i32
    return %c0_i32, %c0_i32_0 : i32, i32
  }
  func.func @transform_3(%arg0: i32) -> (i32, i32) {
    %c0_i32 = arith.constant 0 : i32
    %c0_i32_0 = arith.constant 0 : i32
    return %arg0, %c0_i32 : i32, i32
  }
}

module attributes {stable_mosaic.version = 11 : i64} {
  func.func @_conv3_res_kernel(%arg0: i32, %arg1: memref<128x128xbf16, #tpu.memory_space<vmem>>, %arg2: memref<1x128xf32, #tpu.memory_space<vmem>>, %arg3: memref<128x512xbf16, #tpu.memory_space<vmem>>, %arg4: memref<1x512xf32, #tpu.memory_space<vmem>>, %arg5: memref<128x512xbf16, #tpu.memory_space<vmem>>, %arg6: memref<128x512xbf16, #tpu.memory_space<vmem>>) attributes {dimension_semantics = [#tpu.dimension_semantics<parallel>], iteration_bounds = array<i64: 1>, scalar_prefetch = 0 : i64, scratch_operands = 0 : i64, tpu.core_type = #tpu.core_type<tc>, window_params = [{transform_indices = @transform_0, window_bounds = array<i64: 128, 128>}, {pipeline_mode = #tpu.pipeline_mode<synchronous>, transform_indices = @transform_1, window_bounds = array<i64: 1, 128>}, {pipeline_mode = #tpu.pipeline_mode<synchronous>, transform_indices = @transform_2, window_bounds = array<i64: 128, 512>}, {pipeline_mode = #tpu.pipeline_mode<synchronous>, transform_indices = @transform_3, window_bounds = array<i64: 1, 512>}, {transform_indices = @transform_4, window_bounds = array<i64: 128, 512>}, {transform_indices = @transform_5, window_bounds = array<i64: 128, 512>}]} {
    %c0 = arith.constant 0 : index
    %c0_0 = arith.constant 0 : index
    %0 = vector.load %arg1[%c0, %c0_0] : memref<128x128xbf16, #tpu.memory_space<vmem>>, vector<128x128xbf16>
    %c0_1 = arith.constant 0 : index
    %c0_2 = arith.constant 0 : index
    %1 = vector.load %arg2[%c0_1, %c0_2] : memref<1x128xf32, #tpu.memory_space<vmem>>, vector<1x128xf32>
    %2 = arith.extf %0 : vector<128x128xbf16> to vector<128x128xf32>
    %3 = vector.broadcast %1 : vector<1x128xf32> to vector<128x128xf32>
    %4 = arith.addf %2, %3 : vector<128x128xf32>
    %cst = arith.constant 0.000000e+00 : f32
    %5 = vector.broadcast %cst : f32 to vector<128x128xf32>
    %6 = arith.maximumf %4, %5 : vector<128x128xf32>
    %7 = arith.truncf %6 : vector<128x128xf32> to vector<128x128xbf16>
    %c0_3 = arith.constant 0 : index
    %c0_4 = arith.constant 0 : index
    %8 = vector.load %arg3[%c0_3, %c0_4] : memref<128x512xbf16, #tpu.memory_space<vmem>>, vector<128x512xbf16>
    %cst_5 = arith.constant dense<0.000000e+00> : vector<128x512xf32>
    %9 = tpu.matmul %7, %8, %cst_5 {dimension_numbers = #tpu.dot_dimension_numbers<[1], [0], [0], [1], [0, 0, 1, 1], [], []>} : vector<128x128xbf16>, vector<128x512xbf16>, vector<128x512xf32> -> vector<128x512xf32>
    %c0_6 = arith.constant 0 : index
    %c0_7 = arith.constant 0 : index
    %10 = vector.load %arg4[%c0_6, %c0_7] : memref<1x512xf32, #tpu.memory_space<vmem>>, vector<1x512xf32>
    %11 = vector.broadcast %10 : vector<1x512xf32> to vector<128x512xf32>
    %12 = arith.addf %9, %11 : vector<128x512xf32>
    %c0_8 = arith.constant 0 : index
    %c0_9 = arith.constant 0 : index
    %13 = vector.load %arg5[%c0_8, %c0_9] : memref<128x512xbf16, #tpu.memory_space<vmem>>, vector<128x512xbf16>
    %14 = arith.extf %13 : vector<128x512xbf16> to vector<128x512xf32>
    %15 = arith.addf %12, %14 : vector<128x512xf32>
    %cst_10 = arith.constant 0.000000e+00 : f32
    %16 = vector.broadcast %cst_10 : f32 to vector<128x512xf32>
    %17 = arith.maximumf %15, %16 : vector<128x512xf32>
    %18 = arith.truncf %17 : vector<128x512xf32> to vector<128x512xbf16>
    %c0_11 = arith.constant 0 : index
    %c0_12 = arith.constant 0 : index
    %19 = vector.load %arg6[%c0_11, %c0_12] : memref<128x512xbf16, #tpu.memory_space<vmem>>, vector<128x512xbf16>
    tpu.vector_store %arg6[%c0_11, %c0_12], %18 {strides = array<i32>} : memref<128x512xbf16, #tpu.memory_space<vmem>>, vector<128x512xbf16>,
    return
  }
  func.func @transform_0(%arg0: i32) -> (i32, i32) {
    %c0_i32 = arith.constant 0 : i32
    %c0_i32_0 = arith.constant 0 : i32
    return %arg0, %c0_i32 : i32, i32
  }
  func.func @transform_1(%arg0: i32) -> (i32, i32) {
    %c0_i32 = arith.constant 0 : i32
    %c0_i32_0 = arith.constant 0 : i32
    %c0_i32_1 = arith.constant 0 : i32
    return %c0_i32, %c0_i32_0 : i32, i32
  }
  func.func @transform_2(%arg0: i32) -> (i32, i32) {
    %c0_i32 = arith.constant 0 : i32
    %c0_i32_0 = arith.constant 0 : i32
    %c0_i32_1 = arith.constant 0 : i32
    return %c0_i32, %c0_i32_0 : i32, i32
  }
  func.func @transform_3(%arg0: i32) -> (i32, i32) {
    %c0_i32 = arith.constant 0 : i32
    %c0_i32_0 = arith.constant 0 : i32
    %c0_i32_1 = arith.constant 0 : i32
    return %c0_i32, %c0_i32_0 : i32, i32
  }
  func.func @transform_4(%arg0: i32) -> (i32, i32) {
    %c0_i32 = arith.constant 0 : i32
    %c0_i32_0 = arith.constant 0 : i32
    return %arg0, %c0_i32 : i32, i32
  }
  func.func @transform_5(%arg0: i32) -> (i32, i32) {
    %c0_i32 = arith.constant 0 : i32
    %c0_i32_0 = arith.constant 0 : i32
    return %arg0, %c0_i32 : i32, i32
  }
}

module attributes {stable_mosaic.version = 11 : i64} {
  func.func @_head_kernel(%arg0: i32, %arg1: memref<2x4x512xbf16, #tpu.memory_space<vmem>>, %arg2: memref<512x1024xbf16, #tpu.memory_space<vmem>>, %arg3: memref<1x1024xf32, #tpu.memory_space<vmem>>, %arg4: memref<1024x256xbf16, #tpu.memory_space<vmem>>, %arg5: memref<1x256xf32, #tpu.memory_space<vmem>>, %arg6: memref<256x1xbf16, #tpu.memory_space<vmem>>, %arg7: memref<1x1xf32, #tpu.memory_space<vmem>>, %arg8: memref<2x1xf32, #tpu.memory_space<vmem>>, %arg9: memref<2x1024xf32, #tpu.memory_space<vmem>>) attributes {dimension_semantics = [#tpu.dimension_semantics<arbitrary>], iteration_bounds = array<i64: 4>, scalar_prefetch = 0 : i64, scratch_operands = 1 : i64, tpu.core_type = #tpu.core_type<tc>, window_params = [{transform_indices = @transform_0, window_bounds = array<i64: 2, 4, 512>}, {transform_indices = @transform_1, window_bounds = array<i64: 512, 1024>}, {pipeline_mode = #tpu.pipeline_mode<synchronous>, transform_indices = @transform_2, window_bounds = array<i64: 1, 1024>}, {pipeline_mode = #tpu.pipeline_mode<synchronous>, transform_indices = @transform_3, window_bounds = array<i64: 1024, 256>}, {pipeline_mode = #tpu.pipeline_mode<synchronous>, transform_indices = @transform_4, window_bounds = array<i64: 1, 256>}, {pipeline_mode = #tpu.pipeline_mode<synchronous>, transform_indices = @transform_5, window_bounds = array<i64: 256, 1>}, {pipeline_mode = #tpu.pipeline_mode<synchronous>, transform_indices = @transform_6, window_bounds = array<i64: 1, 1>}, {pipeline_mode = #tpu.pipeline_mode<synchronous>, transform_indices = @transform_7, window_bounds = array<i64: 2, 1>}]} {
    %c0_i32 = arith.constant 0 : i32
    %0 = arith.cmpi eq, %arg0, %c0_i32 : i32
    %1 = arith.extui %0 : i1 to i32
    %c0_i32_0 = arith.constant 0 : i32
    %2 = arith.cmpi ne, %1, %c0_i32_0 : i32
    scf.if %2 {
      %cst_12 = arith.constant 0.000000e+00 : f32
      %17 = vector.broadcast %cst_12 : f32 to vector<2x1024xf32>
      %c0_13 = arith.constant 0 : index
      %c0_14 = arith.constant 0 : index
      %18 = vector.load %arg9[%c0_13, %c0_14] : memref<2x1024xf32, #tpu.memory_space<vmem>>, vector<2x1024xf32>
      tpu.vector_store %arg9[%c0_13, %c0_14], %17 {strides = array<i32>} : memref<2x1024xf32, #tpu.memory_space<vmem>>, vector<2x1024xf32>,
    } else {
    }
    %c0 = arith.constant 0 : index
    %c0_1 = arith.constant 0 : index
    %c0_2 = arith.constant 0 : index
    %3 = vector.load %arg1[%c0, %c0_1, %c0_2] : memref<2x4x512xbf16, #tpu.memory_space<vmem>>, vector<2x4x512xbf16>
    %4 = arith.extf %3 : vector<2x4x512xbf16> to vector<2x4x512xf32>
    %cst = arith.constant dense<0.000000e+00> : vector<2x512xf32>
    %5 = vector.multi_reduction <add>, %4, %cst [1] : vector<2x4x512xf32> to vector<2x512xf32>
    %cst_3 = arith.constant 4.000000e+00 : f32
    %6 = vector.broadcast %cst_3 : f32 to vector<2x512xf32>
    %7 = arith.divf %5, %6 : vector<2x512xf32>
    %c0_4 = arith.constant 0 : index
    %c0_5 = arith.constant 0 : index
    %8 = vector.load %arg9[%c0_4, %c0_5] : memref<2x1024xf32, #tpu.memory_space<vmem>>, vector<2x1024xf32>
    %9 = arith.truncf %7 : vector<2x512xf32> to vector<2x512xbf16>
    %c0_6 = arith.constant 0 : index
    %c0_7 = arith.constant 0 : index
    %10 = vector.load %arg2[%c0_6, %c0_7] : memref<512x1024xbf16, #tpu.memory_space<vmem>>, vector<512x1024xbf16>
    %cst_8 = arith.constant dense<0.000000e+00> : vector<2x1024xf32>
    %11 = tpu.matmul %9, %10, %cst_8 {dimension_numbers = #tpu.dot_dimension_numbers<[1], [0], [0], [1], [0, 0, 1, 1], [], []>} : vector<2x512xbf16>, vector<512x1024xbf16>, vector<2x1024xf32> -> vector<2x1024xf32>
    %12 = arith.addf %8, %11 : vector<2x1024xf32>
    %c0_9 = arith.constant 0 : index
    %c0_10 = arith.constant 0 : index
    %13 = vector.load %arg9[%c0_9, %c0_10] : memref<2x1024xf32, #tpu.memory_space<vmem>>, vector<2x1024xf32>
    tpu.vector_store %arg9[%c0_9, %c0_10], %12 {strides = array<i32>} : memref<2x1024xf32, #tpu.memory_space<vmem>>, vector<2x1024xf32>,
    %c3_i32 = arith.constant 3 : i32
    %14 = arith.cmpi eq, %arg0, %c3_i32 : i32
    %15 = arith.extui %14 : i1 to i32
    %c0_i32_11 = arith.constant 0 : i32
    %16 = arith.cmpi ne, %15, %c0_i32_11 : i32
    scf.if %16 {
      %c0_12 = arith.constant 0 : index
      %c0_13 = arith.constant 0 : index
      %17 = vector.load %arg9[%c0_12, %c0_13] : memref<2x1024xf32, #tpu.memory_space<vmem>>, vector<2x1024xf32>
      %c0_14 = arith.constant 0 : index
      %c0_15 = arith.constant 0 : index
      %18 = vector.load %arg3[%c0_14, %c0_15] : memref<1x1024xf32, #tpu.memory_space<vmem>>, vector<1x1024xf32>
      %19 = vector.broadcast %18 : vector<1x1024xf32> to vector<2x1024xf32>
      %20 = arith.addf %17, %19 : vector<2x1024xf32>
      %21 = arith.truncf %20 : vector<2x1024xf32> to vector<2x1024xbf16>
      %c0_16 = arith.constant 0 : index
      %c0_17 = arith.constant 0 : index
      %22 = vector.load %arg4[%c0_16, %c0_17] : memref<1024x256xbf16, #tpu.memory_space<vmem>>, vector<1024x256xbf16>
      %cst_18 = arith.constant dense<0.000000e+00> : vector<2x256xf32>
      %23 = tpu.matmul %21, %22, %cst_18 {dimension_numbers = #tpu.dot_dimension_numbers<[1], [0], [0], [1], [0, 0, 1, 1], [], []>} : vector<2x1024xbf16>, vector<1024x256xbf16>, vector<2x256xf32> -> vector<2x256xf32>
      %c0_19 = arith.constant 0 : index
      %c0_20 = arith.constant 0 : index
      %24 = vector.load %arg5[%c0_19, %c0_20] : memref<1x256xf32, #tpu.memory_space<vmem>>, vector<1x256xf32>
      %25 = vector.broadcast %24 : vector<1x256xf32> to vector<2x256xf32>
      %26 = arith.addf %23, %25 : vector<2x256xf32>
      %cst_21 = arith.constant 0.000000e+00 : f32
      %27 = vector.broadcast %cst_21 : f32 to vector<2x256xf32>
      %28 = arith.maximumf %26, %27 : vector<2x256xf32>
      %29 = arith.truncf %28 : vector<2x256xf32> to vector<2x256xbf16>
      %c0_22 = arith.constant 0 : index
      %c0_23 = arith.constant 0 : index
      %30 = vector.load %arg6[%c0_22, %c0_23] : memref<256x1xbf16, #tpu.memory_space<vmem>>, vector<256x1xbf16>
      %cst_24 = arith.constant dense<0.000000e+00> : vector<2x1xf32>
      %31 = tpu.matmul %29, %30, %cst_24 {dimension_numbers = #tpu.dot_dimension_numbers<[1], [0], [0], [1], [0, 0, 1, 1], [], []>} : vector<2x256xbf16>, vector<256x1xbf16>, vector<2x1xf32> -> vector<2x1xf32>
      %c0_25 = arith.constant 0 : index
      %c0_26 = arith.constant 0 : index
      %32 = vector.load %arg7[%c0_25, %c0_26] : memref<1x1xf32, #tpu.memory_space<vmem>>, vector<1x1xf32>
      %33 = vector.broadcast %32 : vector<1x1xf32> to vector<2x1xf32>
      %34 = arith.addf %31, %33 : vector<2x1xf32>
      %35 = arith.negf %34 : vector<2x1xf32>
      %36 = math.exp %35 : vector<2x1xf32>
      %cst_27 = arith.constant 1.000000e+00 : f32
      %37 = vector.broadcast %cst_27 : f32 to vector<2x1xf32>
      %38 = arith.addf %37, %36 : vector<2x1xf32>
      %39 = arith.divf %37, %38 : vector<2x1xf32>
      %c0_28 = arith.constant 0 : index
      %c0_29 = arith.constant 0 : index
      %40 = vector.load %arg8[%c0_28, %c0_29] : memref<2x1xf32, #tpu.memory_space<vmem>>, vector<2x1xf32>
      tpu.vector_store %arg8[%c0_28, %c0_29], %39 {strides = array<i32>} : memref<2x1xf32, #tpu.memory_space<vmem>>, vector<2x1xf32>,
    } else {
    }
    return
  }
  func.func @transform_0(%arg0: i32) -> (i32, i32, i32) {
    %c0_i32 = arith.constant 0 : i32
    %c0_i32_0 = arith.constant 0 : i32
    %c0_i32_1 = arith.constant 0 : i32
    return %c0_i32, %c0_i32_0, %arg0 : i32, i32, i32
  }
  func.func @transform_1(%arg0: i32) -> (i32, i32) {
    %c0_i32 = arith.constant 0 : i32
    %c0_i32_0 = arith.constant 0 : i32
    return %arg0, %c0_i32 : i32, i32
  }
  func.func @transform_2(%arg0: i32) -> (i32, i32) {
    %c0_i32 = arith.constant 0 : i32
    %c0_i32_0 = arith.constant 0 : i32
    %c0_i32_1 = arith.constant 0 : i32
    return %c0_i32, %c0_i32_0 : i32, i32
  }
  func.func @transform_3(%arg0: i32) -> (i32, i32) {
    %c0_i32 = arith.constant 0 : i32
    %c0_i32_0 = arith.constant 0 : i32
    %c0_i32_1 = arith.constant 0 : i32
    return %c0_i32, %c0_i32_0 : i32, i32
  }
  func.func @transform_4(%arg0: i32) -> (i32, i32) {
    %c0_i32 = arith.constant 0 : i32
    %c0_i32_0 = arith.constant 0 : i32
    %c0_i32_1 = arith.constant 0 : i32
    return %c0_i32, %c0_i32_0 : i32, i32
  }
  func.func @transform_5(%arg0: i32) -> (i32, i32) {
    %c0_i32 = arith.constant 0 : i32
    %c0_i32_0 = arith.constant 0 : i32
    %c0_i32_1 = arith.constant 0 : i32
    return %c0_i32, %c0_i32_0 : i32, i32
  }
  func.func @transform_6(%arg0: i32) -> (i32, i32) {
    %c0_i32 = arith.constant 0 : i32
    %c0_i32_0 = arith.constant 0 : i32
    %c0_i32_1 = arith.constant 0 : i32
    return %c0_i32, %c0_i32_0 : i32, i32
  }
  func.func @transform_7(%arg0: i32) -> (i32, i32) {
    %c0_i32 = arith.constant 0 : i32
    %c0_i32_0 = arith.constant 0 : i32
    %c0_i32_1 = arith.constant 0 : i32
    return %c0_i32, %c0_i32_0 : i32, i32
  }
}

</mosaic_0001>

<bundles_post_ra>
// kernel: _lambda_.15
= control target key start
LH: loop header
LB: loop body
LE: loop exit
PB: predicated region body
PF: predicated region fallthrough
CT: control target
= control target key end

     0   :  { %s1021_s12 = smov 0   ;;  %s1194_s0 = inlined_call_operand.vmem [shape: bf16[512,64], index: 0, kind: input, shape index: {}]   ;;  %s1195_s1 = inlined_call_operand.vmem [shape: bf16[64,64], index: 1, kind: input, shape index: {}]   ;;  %s1196_s2 = inlined_call_operand.vmem [shape: f32[1,64], index: 2, kind: input, shape index: {}]   ;;  %s1197_s3 = inlined_call_operand.vmem [shape: bf16[512,64], index: 3, kind: output, shape index: {}]  }
   0x1 LB: > { %s785_s13 = sadd.s32 4294967295, %s999_s12   ;;  %p789_p0 = scmp.ge.s32.totalorder %s999_s12, 1  ;;  %s999_s12 = sphi %s1021_s12, %s13_s12  }
   0x2   : > { %p138_p1 = scmp.lt.s32.totalorder %s999_s12, 3 }
   0x4   : > { %p139_p2 = pnand %p789_p0, %p138_p1 }
   0x5   : > { %s790_s16 = sshll.u32 (!%p139_p2), %s785_s13, 5 }
   0x6   : > { %142 = sbr.rel (%p139_p2) target bundleno = 259 (0x103), region = 32  ;;  %p163_p3 = scmp.lt.s32.totalorder (!%p139_p2), %s790_s16, 63 }
   0xb   : > { %v973_v0 = vld [vmem:[%s1195_s1 + $0x18] sm:$0xff]   ;;  %v974_v1 = vld [vmem:[%s1195_s1 + $0x10] sm:$0xff]   ;;  %s1199_s16 = smov (!%p163_p3, %s790_s16), 63  ;;  %v975_v2 = vld [vmem:[%s1195_s1 + $0x8] sm:$0xff]   ;;  %vm326_vm0 = vcmask 523264   ;;  %vm696_vm1 = vcmask 519168  }
   0xc   : > { %917 = vmatprep.subr.bf16.mxu0 %v973_v0  ;;  %957 = vmatprep.subr.bf16.mxu1 %v973_v0  ;;  %s791_s21 = sshll.u32 %s1199_s16, 2  ;;  %v976_v3 = vld [vmem:[%s1195_s1] sm:$0xff]  }
   0xd   : > { %918 = vmatpush3.bf16.msra.mxu0 %v973_v0  ;;  %961 = vmatpush3.bf16.msra.mxu1 %v973_v0  ;;  %s1049_s26 = scalar_lea.vmem %s1194_s0, %s791_s21  ;;  %v1086_v20 = vld [vmem:[%s1196_s2] ss:$0 sm:$0xff]  ;;  %s1097_s4 = scalar_lea.vmem %s1197_s3, %s791_s21 }
   0xe   : > { %919 = vmatprep.subr.bf16.mxu0 %v974_v1  ;;  %958 = vmatprep.subr.bf16.mxu1 %v974_v1  ;;  %v977_v4 = vld [vmem:[%s1049_s26] sm:$0xff]   ;;  %v979_v6 = vld [vmem:[%s1049_s26 + $0x8] sm:$0xff]   ;;  %v981_v8 = vld [vmem:[%s1049_s26 + $0x10] sm:$0xff]  }
   0xf   : > { %v978_v5 = vld [vmem:[%s1049_s26 + $0x40] sm:$0xff]   ;;  %925 = vmatprep.mubr.msk.bf16.mxu0 %vm326_vm0, %v977_v4  ;;  %v980_v7 = vld [vmem:[%s1049_s26 + $0x48] sm:$0xff]   ;;  %v982_v9 = vld [vmem:[%s1049_s26 + $0x50] sm:$0xff]  }
  0x10   : > { %941 = vmatprep.mubr.msk.bf16.mxu1 %vm326_vm0, %v978_v5  ;;  %v983_v10 = vld [vmem:[%s1049_s26 + $0x18] sm:$0xff]   ;;  %v985_v12 = vld [vmem:[%s1049_s26 + $0x20] sm:$0xff]   ;;  %v987_v14 = vld [vmem:[%s1049_s26 + $0x28] sm:$0xff]  }
  0x11   : > { %920 = vmatpush3.bf16.msra.mxu0 %v974_v1  ;;  %962 = vmatpush3.bf16.msra.mxu1 %v974_v1  ;;  %v984_v11 = vld [vmem:[%s1049_s26 + $0x58] sm:$0xff]   ;;  %v986_v13 = vld [vmem:[%s1049_s26 + $0x60] sm:$0xff]   ;;  %v988_v15 = vld [vmem:[%s1049_s26 + $0x68] sm:$0xff]  }
  0x12   : > { %921 = vmatprep.subr.bf16.mxu0 %v975_v2  ;;  %959 = vmatprep.subr.bf16.mxu1 %v975_v2  ;;  %v989_v16 = vld [vmem:[%s1049_s26 + $0x30] sm:$0xff]   ;;  %v991_v18 = vld [vmem:[%s1049_s26 + $0x38] sm:$0xff]  }
  0x13   : > { %v990_v17 = vld [vmem:[%s1049_s26 + $0x70] sm:$0xff]   ;;  %v992_v19 = vld [vmem:[%s1049_s26 + $0x78] sm:$0xff]  }
  0x15   : > { %922 = vmatpush3.bf16.msra.mxu0 %v975_v2  ;;  %963 = vmatpush3.bf16.msra.mxu1 %v975_v2 }
  0x16   : > { %923 = vmatprep.subr.bf16.mxu0 %v976_v3  ;;  %960 = vmatprep.subr.bf16.mxu1 %v976_v3 }
  0x19   : > { %924 = vmatpush3.bf16.msra.mxu0 %v976_v3  ;;  %964 = vmatpush3.bf16.msra.mxu1 %v976_v3 }
  0x1c   : > { %926 = vmatmul.mubr.msk.bf16.vlgmr.msra.gmra.mxu0 %vm326_vm0, %v979_v6  ;;  %942 = vmatmul.mubr.msk.bf16.vlgmr.msra.gmra.mxu1 %vm326_vm0, %v980_v7 }
  0x1d   : > { %929 = vmatprep.mubr.msk.bf16.mxu0 %vm326_vm0, %v981_v8  ;;  %945 = vmatprep.mubr.msk.bf16.mxu1 %vm326_vm0, %v982_v9 }
  0x24   : > { %930 = vmatmul.mubr.msk.bf16.gmra.mxu0 %vm326_vm0, %v983_v10  ;;  %946 = vmatmul.mubr.msk.bf16.gmra.mxu1 %vm326_vm0, %v984_v11 }
  0x25   : > { %933 = vmatprep.mubr.msk.bf16.mxu0 %vm326_vm0, %v985_v12  ;;  %949 = vmatprep.mubr.msk.bf16.mxu1 %vm326_vm0, %v986_v13 }
  0x2c   : > { %934 = vmatmul.mubr.msk.bf16.gmra.mxu0 %vm326_vm0, %v987_v14  ;;  %950 = vmatmul.mubr.msk.bf16.gmra.mxu1 %vm326_vm0, %v988_v15 }
  0x2d   : > { %937 = vmatprep.mubr.msk.bf16.mxu0 %vm326_vm0, %v989_v16  ;;  %953 = vmatprep.mubr.msk.bf16.mxu1 %vm326_vm0, %v990_v17 }
  0x34   : > { %938 = vmatmul.mubr.msk.bf16.gmra.mxu0 %vm326_vm0, %v991_v18  ;;  %954 = vmatmul.mubr.msk.bf16.gmra.mxu1 %vm326_vm0, %v992_v19 }
  0xdc   : > { %v927_v21 = vpop.f32.mrf.mxu0  ;;  %v943_v22 = vpop.f32.mrf.mxu1 }
  0xdd   : > { %v418_v23 = vadd.f32 %v927_v21, %v1086_v20  ;;  %v482_v24 = vadd.f32 %v943_v22, %v1086_v20 }
  0xde   : > { %v409_v25 = vpop.f32.mrf.mxu0  ;;  %v473_v26 = vpop.f32.mrf.mxu1 }
  0xdf   : > { %v538_v27 = vmax.f32 %v418_v23, 0.0  ;;  %v554_v28 = vmax.f32 %v482_v24, 0.0  ;;  %v410_v29 = vadd.f32 %v1086_v20, %v409_v25  ;;  %v474_v30 = vadd.f32 %v1086_v20, %v473_v26 }
  0xe0   : > { %v928_v31 = vpop.f32.mrf.mxu0  ;;  %v944_v32 = vpop.f32.mrf.mxu1 }
  0xe1   : > { %v867_v33 = vpack.c.bf16 %v538_v27, %v538_v27  ;;  %v883_v34 = vpack.c.bf16 %v554_v28, %v554_v28  ;;  %v536_v35 = vmax.f32 %v410_v29, 0.0  ;;  %v552_v36 = vmax.f32 %v474_v30, 0.0 }
  0xe2   : > { %v421_v37 = vadd.f32 %v928_v31, %v1086_v20  ;;  %v485_v38 = vadd.f32 %v944_v32, %v1086_v20  ;;  %v412_v39 = vpop.f32.mrf.mxu0  ;;  %v476_v40 = vpop.f32.mrf.mxu1 }
  0xe3   : > { %699 = vst.msk [vmem:[%s1097_s4 + $0x8] sm:$0xf] %vm696_vm1, %v867_v33  ;;  %715 = vst.msk [vmem:[%s1097_s4 + $0x48] sm:$0xf] %vm696_vm1, %v883_v34  ;;  %v865_v41 = vpack.c.bf16 %v536_v35, %v536_v35  ;;  %v881_v42 = vpack.c.bf16 %v552_v36, %v552_v36  ;;  %v413_v43 = vadd.f32 %v1086_v20, %v412_v39 }
  0xe4   : > { %v477_v44 = vadd.f32 %v1086_v20, %v476_v40  ;;  %v539_v45 = vmax.f32 %v421_v37, 0.0  ;;  %v555_v46 = vmax.f32 %v485_v38, 0.0  ;;  %v931_v47 = vpop.f32.mrf.mxu0  ;;  %v947_v48 = vpop.f32.mrf.mxu1 }
  0xe5   : > { %697 = vst.msk [vmem:[%s1097_s4] sm:$0xf] %vm696_vm1, %v865_v41  ;;  %713 = vst.msk [vmem:[%s1097_s4 + $0x40] sm:$0xf] %vm696_vm1, %v881_v42  ;;  %v537_v49 = vmax.f32 %v413_v43, 0.0  ;;  %v434_v51 = vadd.f32 %v931_v47, %v1086_v20  ;;  %v498_v52 = vadd.f32 %v947_v48, %v1086_v20 }
  0xe6   : > { %v553_v50 = vmax.f32 %v477_v44, 0.0  ;;  %v868_v53 = vpack.c.bf16 %v539_v45, %v539_v45  ;;  %v884_v54 = vpack.c.bf16 %v555_v46, %v555_v46  ;;  %v425_v55 = vpop.f32.mrf.mxu0  ;;  %v489_v56 = vpop.f32.mrf.mxu1 }
  0xe7   : > { %v866_v57 = vpack.c.bf16 %v537_v49, %v537_v49  ;;  %v542_v59 = vmax.f32 %v434_v51, 0.0  ;;  %v558_v60 = vmax.f32 %v498_v52, 0.0  ;;  %v426_v61 = vadd.f32 %v1086_v20, %v425_v55 }
  0xe8   : > { %v882_v58 = vpack.c.bf16 %v553_v50, %v553_v50  ;;  %700 = vst.msk [vmem:[%s1097_s4 + $0xc] sm:$0xf] %vm696_vm1, %v868_v53  ;;  %716 = vst.msk [vmem:[%s1097_s4 + $0x4c] sm:$0xf] %vm696_vm1, %v884_v54  ;;  %v490_v62 = vadd.f32 %v1086_v20, %v489_v56  ;;  %v932_v63 = vpop.f32.mrf.mxu0  ;;  %v948_v0 = vpop.f32.mrf.mxu1 }
  0xe9   : > { %698 = vst.msk [vmem:[%s1097_s4 + $0x4] sm:$0xf] %vm696_vm1, %v866_v57  ;;  %v871_v1 = vpack.c.bf16 %v542_v59, %v542_v59  ;;  %v887_v2 = vpack.c.bf16 %v558_v60, %v558_v60  ;;  %v437_v3 = vadd.f32 %v932_v63, %v1086_v20  ;;  %v501_v4 = vadd.f32 %v948_v0, %v1086_v20 }
  0xea   : > { %714 = vst.msk [vmem:[%s1097_s4 + $0x44] sm:$0xf] %vm696_vm1, %v882_v58  ;;  %v540_v5 = vmax.f32 %v426_v61, 0.0  ;;  %v556_v6 = vmax.f32 %v490_v62, 0.0  ;;  %v428_v7 = vpop.f32.mrf.mxu0  ;;  %v492_v8 = vpop.f32.mrf.mxu1 }
  0xeb   : > { %703 = vst.msk [vmem:[%s1097_s4 + $0x18] sm:$0xf] %vm696_vm1, %v871_v1  ;;  %719 = vst.msk [vmem:[%s1097_s4 + $0x58] sm:$0xf] %vm696_vm1, %v887_v2  ;;  %v543_v9 = vmax.f32 %v437_v3, 0.0  ;;  %v559_v10 = vmax.f32 %v501_v4, 0.0  ;;  %v429_v11 = vadd.f32 %v1086_v20, %v428_v7  ;;  %v493_v12 = vadd.f32 %v1086_v20, %v492_v8 }
  0xec   : > { %v869_v13 = vpack.c.bf16 %v540_v5, %v540_v5  ;;  %v885_v14 = vpack.c.bf16 %v556_v6, %v556_v6  ;;  %v935_v15 = vpop.f32.mrf.mxu0  ;;  %v951_v16 = vpop.f32.mrf.mxu1 }
  0xed   : > { %v872_v17 = vpack.c.bf16 %v543_v9, %v543_v9  ;;  %v888_v18 = vpack.c.bf16 %v559_v10, %v559_v10  ;;  %v541_v19 = vmax.f32 %v429_v11, 0.0  ;;  %v557_v21 = vmax.f32 %v493_v12, 0.0 }
  0xee   : > { %701 = vst.msk [vmem:[%s1097_s4 + $0x10] sm:$0xf] %vm696_vm1, %v869_v13  ;;  %717 = vst.msk [vmem:[%s1097_s4 + $0x50] sm:$0xf] %vm696_vm1, %v885_v14  ;;  %v450_v22 = vadd.f32 %v935_v15, %v1086_v20  ;;  %v514_v23 = vadd.f32 %v951_v16, %v1086_v20  ;;  %v441_v24 = vpop.f32.mrf.mxu0  ;;  %v505_v25 = vpop.f32.mrf.mxu1 }
  0xef   : > { %704 = vst.msk [vmem:[%s1097_s4 + $0x1c] sm:$0xf] %vm696_vm1, %v872_v17  ;;  %720 = vst.msk [vmem:[%s1097_s4 + $0x5c] sm:$0xf] %vm696_vm1, %v888_v18  ;;  %v870_v26 = vpack.c.bf16 %v541_v19, %v541_v19  ;;  %v886_v27 = vpack.c.bf16 %v557_v21, %v557_v21  ;;  %v442_v28 = vadd.f32 %v1086_v20, %v441_v24 }
  0xf0   : > { %v506_v29 = vadd.f32 %v1086_v20, %v505_v25  ;;  %v546_v30 = vmax.f32 %v450_v22, 0.0  ;;  %v562_v31 = vmax.f32 %v514_v23, 0.0  ;;  %v936_v32 = vpop.f32.mrf.mxu0  ;;  %v952_v33 = vpop.f32.mrf.mxu1 }
  0xf1   : > { %702 = vst.msk [vmem:[%s1097_s4 + $0x14] sm:$0xf] %vm696_vm1, %v870_v26  ;;  %718 = vst.msk [vmem:[%s1097_s4 + $0x54] sm:$0xf] %vm696_vm1, %v886_v27  ;;  %v544_v34 = vmax.f32 %v442_v28, 0.0  ;;  %v453_v36 = vadd.f32 %v936_v32, %v1086_v20  ;;  %v517_v37 = vadd.f32 %v952_v33, %v1086_v20 }
  0xf2   : > { %v560_v35 = vmax.f32 %v506_v29, 0.0  ;;  %v875_v38 = vpack.c.bf16 %v546_v30, %v546_v30  ;;  %v891_v39 = vpack.c.bf16 %v562_v31, %v562_v31  ;;  %v444_v40 = vpop.f32.mrf.mxu0  ;;  %v508_v41 = vpop.f32.mrf.mxu1 }
  0xf3   : > { %v873_v42 = vpack.c.bf16 %v544_v34, %v544_v34  ;;  %v547_v44 = vmax.f32 %v453_v36, 0.0  ;;  %v563_v45 = vmax.f32 %v517_v37, 0.0  ;;  %v445_v46 = vadd.f32 %v1086_v20, %v444_v40 }
  0xf4   : > { %v889_v43 = vpack.c.bf16 %v560_v35, %v560_v35  ;;  %707 = vst.msk [vmem:[%s1097_s4 + $0x28] sm:$0xf] %vm696_vm1, %v875_v38  ;;  %723 = vst.msk [vmem:[%s1097_s4 + $0x68] sm:$0xf] %vm696_vm1, %v891_v39  ;;  %v509_v47 = vadd.f32 %v1086_v20, %v508_v41  ;;  %v939_v48 = vpop.f32.mrf.mxu0  ;;  %v955_v49 = vpop.f32.mrf.mxu1 }
  0xf5   : > { %705 = vst.msk [vmem:[%s1097_s4 + $0x20] sm:$0xf] %vm696_vm1, %v873_v42  ;;  %v876_v50 = vpack.c.bf16 %v547_v44, %v547_v44  ;;  %v892_v51 = vpack.c.bf16 %v563_v45, %v563_v45  ;;  %v466_v52 = vadd.f32 %v939_v48, %v1086_v20  ;;  %v530_v53 = vadd.f32 %v955_v49, %v1086_v20 }
  0xf6   : > { %721 = vst.msk [vmem:[%s1097_s4 + $0x60] sm:$0xf] %vm696_vm1, %v889_v43  ;;  %v545_v54 = vmax.f32 %v445_v46, 0.0  ;;  %v561_v55 = vmax.f32 %v509_v47, 0.0  ;;  %v457_v56 = vpop.f32.mrf.mxu0  ;;  %v521_v57 = vpop.f32.mrf.mxu1 }
  0xf7   : > { %708 = vst.msk [vmem:[%s1097_s4 + $0x2c] sm:$0xf] %vm696_vm1, %v876_v50  ;;  %724 = vst.msk [vmem:[%s1097_s4 + $0x6c] sm:$0xf] %vm696_vm1, %v892_v51  ;;  %v550_v58 = vmax.f32 %v466_v52, 0.0  ;;  %v566_v59 = vmax.f32 %v530_v53, 0.0  ;;  %v458_v60 = vadd.f32 %v1086_v20, %v457_v56  ;;  %v522_v61 = vadd.f32 %v1086_v20, %v521_v57 }
  0xf8   : > { %v874_v62 = vpack.c.bf16 %v545_v54, %v545_v54  ;;  %v890_v63 = vpack.c.bf16 %v561_v55, %v561_v55  ;;  %v940_v0 = vpop.f32.mrf.mxu0  ;;  %v956_v1 = vpop.f32.mrf.mxu1 }
  0xf9   : > { %v879_v2 = vpack.c.bf16 %v550_v58, %v550_v58  ;;  %v895_v3 = vpack.c.bf16 %v566_v59, %v566_v59  ;;  %v548_v4 = vmax.f32 %v458_v60, 0.0  ;;  %v564_v5 = vmax.f32 %v522_v61, 0.0 }
  0xfa   : > { %706 = vst.msk [vmem:[%s1097_s4 + $0x24] sm:$0xf] %vm696_vm1, %v874_v62  ;;  %722 = vst.msk [vmem:[%s1097_s4 + $0x64] sm:$0xf] %vm696_vm1, %v890_v63  ;;  %v469_v6 = vadd.f32 %v940_v0, %v1086_v20  ;;  %v533_v7 = vadd.f32 %v956_v1, %v1086_v20  ;;  %v460_v8 = vpop.f32.mrf.mxu0  ;;  %v524_v9 = vpop.f32.mrf.mxu1 }
  0xfb   : > { %711 = vst.msk [vmem:[%s1097_s4 + $0x38] sm:$0xf] %vm696_vm1, %v879_v2  ;;  %727 = vst.msk [vmem:[%s1097_s4 + $0x78] sm:$0xf] %vm696_vm1, %v895_v3  ;;  %v877_v10 = vpack.c.bf16 %v548_v4, %v548_v4  ;;  %v893_v11 = vpack.c.bf16 %v564_v5, %v564_v5  ;;  %v461_v12 = vadd.f32 %v1086_v20, %v460_v8 }
  0xfc   : > { %v525_v13 = vadd.f32 %v1086_v20, %v524_v9  ;;  %v551_v14 = vmax.f32 %v469_v6, 0.0  ;;  %v567_v15 = vmax.f32 %v533_v7, 0.0 }
  0xfd   : > { %709 = vst.msk [vmem:[%s1097_s4 + $0x30] sm:$0xf] %vm696_vm1, %v877_v10  ;;  %725 = vst.msk [vmem:[%s1097_s4 + $0x70] sm:$0xf] %vm696_vm1, %v893_v11  ;;  %v549_v16 = vmax.f32 %v461_v12, 0.0 }
  0xfe   : > { %v565_v17 = vmax.f32 %v525_v13, 0.0  ;;  %v880_v18 = vpack.c.bf16 %v551_v14, %v551_v14  ;;  %v896_v19 = vpack.c.bf16 %v567_v15, %v567_v15 }
  0xff   : > { %v878_v21 = vpack.c.bf16 %v549_v16, %v549_v16 }
 0x100   : > { %v894_v22 = vpack.c.bf16 %v565_v17, %v565_v17  ;;  %712 = vst.msk [vmem:[%s1097_s4 + $0x3c] sm:$0xf] %vm696_vm1, %v880_v18  ;;  %728 = vst.msk [vmem:[%s1097_s4 + $0x7c] sm:$0xf] %vm696_vm1, %v896_v19 }
 0x101   : > { %710 = vst.msk [vmem:[%s1097_s4 + $0x34] sm:$0xf] %vm696_vm1, %v878_v21 }
 0x102   : > { %726 = vst.msk [vmem:[%s1097_s4 + $0x74] sm:$0xf] %vm696_vm1, %v894_v22 }
 0x103 PF: > { %s13_s12 = sadd.s32 1, %s999_s12  }
 0x104   : > { %p10_p4 = scmp.ge.s32.totalorder %s13_s12, 4  }
 0x106   :  { %12 = sbr.rel (!%p10_p4) target bundleno = 1 (0x1), region = 62 }

// kernel: _lambda_.16
= control target key start
LH: loop header
LB: loop body
LE: loop exit
PB: predicated region body
PF: predicated region fallthrough
CT: control target
= control target key end

     0   :  { %s1980_s24 = smov 0   ;;  %s2402_s0 = inlined_call_operand.vmem [shape: bf16[512,64], index: 0, kind: input, shape index: {}]   ;;  %s2403_s1 = inlined_call_operand.vmem [shape: f32[1,64], index: 1, kind: input, shape index: {}]   ;;  %s2404_s2 = inlined_call_operand.vmem [shape: bf16[64,256], index: 2, kind: input, shape index: {}]   ;;  %s2405_s3 = inlined_call_operand.vmem [shape: f32[1,256], index: 3, kind: input, shape index: {}, may-alias: {3,6}]   ;;  %s2406_s4 = inlined_call_operand.vmem [shape: bf16[512,64], index: 4, kind: input, shape index: {}]   ;;  %s2407_s5 = inlined_call_operand.vmem [shape: bf16[64,256], index: 5, kind: input, shape index: {}]   ;;  %s2408_s6 = inlined_call_operand.vmem [shape: f32[1,256], index: 6, kind: input, shape index: {}, may-alias: {3,6}]   ;;  %s2409_s7 = inlined_call_operand.vmem [shape: bf16[512,256], index: 7, kind: output, shape index: {}]  }
   0x1 LB: > { %s1659_s25 = sadd.s32 4294967295, %s1937_s24   ;;  %p1663_p0 = scmp.ge.s32.totalorder %s1937_s24, 1  ;;  %s1937_s24 = sphi %s1980_s24, %s17_s24  }
   0x2   : > { %p249_p1 = scmp.lt.s32.totalorder %s1937_s24, 3 }
   0x4   : > { %p250_p2 = pnand %p1663_p0, %p249_p1 }
   0x5   : > { %s1664_s28 = sshll.u32 (!%p250_p2), %s1659_s25, 5 }
   0x6   : > { %253 = sbr.rel (%p250_p2) target bundleno = 359 (0x167), region = 48  ;;  %p288_p3 = scmp.lt.s32.totalorder (!%p250_p2), %s1664_s28, 63 }
   0xb   : > { %v1891_v0 = vld [vmem:[%s2404_s2 + $0x34] ss:$8 sps:$4 sm:$0xff]   ;;  %v1939_v2 = vmov 0   ;;  %v1895_v3 = vld [vmem:[%s2404_s2 + $0x30] ss:$8 sps:$4 sm:$0xff]   ;;  %s2411_s28 = smov (!%p288_p3, %s1664_s28), 63 }
   0xc   : > { %v1893_v1 = vld [vmem:[%s2407_s5 + $0x34] ss:$8 sps:$4 sm:$0xff]   ;;  %599 = vmatprep.mubr.bf16.mxu0 %v1939_v2  ;;  %1000 = vmatprep.mubr.bf16.mxu1 %v1939_v2  ;;  %v1896_v4 = vld [vmem:[%s2407_s5 + $0x30] ss:$8 sps:$4 sm:$0xff]   ;;  %v1897_v5 = vld [vmem:[%s2404_s2 + $0x24] ss:$8 sps:$4 sm:$0xff]  }
   0xd   : > { %575 = vmatprep.subr.bf16.mxu0 %v1891_v0  ;;  %976 = vmatprep.subr.bf16.mxu1 %v1893_v1  ;;  %v1899_v6 = vld [vmem:[%s2407_s5 + $0x24] ss:$8 sps:$4 sm:$0xff]   ;;  %v1901_v7 = vld [vmem:[%s2404_s2 + $0x20] ss:$8 sps:$4 sm:$0xff]   ;;  %s1665_s20 = sshll.u32 %s2411_s28, 2  ;;  %vm518_vm0 = vcmask 523264  }
   0xe   : > { %576 = vmatpush1.bf16.msra.mxu0 %v1895_v3  ;;  %977 = vmatpush1.bf16.msra.mxu1 %v1896_v4  ;;  %v1902_v8 = vld [vmem:[%s2407_s5 + $0x20] ss:$8 sps:$4 sm:$0xff]   ;;  %v1903_v9 = vld [vmem:[%s2404_s2 + $0x14] ss:$8 sps:$4 sm:$0xff]   ;;  %v1907_v11 = vld [vmem:[%s2404_s2 + $0x10] ss:$8 sps:$4 sm:$0xff]   ;;  %s2032_s10 = scalar_lea.vmem %s2402_s0, %s1665_s20  ;;  %s2046_s19 = scalar_lea.vmem %s2406_s4, %s1665_s20 }
   0xf   : > { %577 = vmatprep.subr.bf16.mxu0 %v1897_v5  ;;  %978 = vmatprep.subr.bf16.mxu1 %v1899_v6  ;;  %v1905_v10 = vld [vmem:[%s2407_s5 + $0x14] ss:$8 sps:$4 sm:$0xff]   ;;  %v1908_v12 = vld [vmem:[%s2407_s5 + $0x10] ss:$8 sps:$4 sm:$0xff]   ;;  %v1909_v13 = vld [vmem:[%s2404_s2 + $0x4] ss:$8 sps:$4 sm:$0xff]  }
  0x10   : > { %v1911_v14 = vld [vmem:[%s2407_s5 + $0x4] ss:$8 sps:$4 sm:$0xff]   ;;  %v1913_v15 = vld [vmem:[%s2404_s2] ss:$8 sps:$4 sm:$0xff]   ;;  %v1868_v26 = vld [vmem:[%s2032_s10 + $0x10] sm:$0xff]   ;;  %s1770_s30 = sshll.u32 %s2411_s28, 3 }
  0x11   : > { %v1804_v16 = vld [vmem:[%s2032_s10] sm:$0xff]   ;;  %v1867_v21 = vld [vmem:[%s2032_s10 + $0x8] sm:$0xff]   ;;  %v1813_v27 = vunpack.c.l.bf16 %v1868_v26  ;;  %v1814_v28 = vunpack.c.h.bf16 %v1868_v26  ;;  %v1869_v35 = vld [vmem:[%s2032_s10 + $0x18] sm:$0xff]  }
  0x12   : > { %578 = vmatpush1.bf16.msra.mxu0 %v1901_v7  ;;  %979 = vmatpush1.bf16.msra.mxu1 %v1902_v8  ;;  %v1805_v17 = vunpack.c.l.bf16 %v1804_v16  ;;  %v1806_v18 = vunpack.c.h.bf16 %v1804_v16  ;;  %v2052_v19 = vld [vmem:[%s2403_s1] ss:$0 sm:$0xff]  ;;  %v1809_v24 = vunpack.c.l.bf16 %v1867_v21  ;;  %v1810_v25 = vunpack.c.h.bf16 %v1867_v21  ;;  %v1916_v46 = vld [vmem:[%s2046_s19 + $0x8] sm:$0xff]   ;;  %v1876_v54 = vld [vmem:[%s2032_s10 + $0x50] sm:$0xff]  }
  0x13   : > { %579 = vmatprep.subr.bf16.mxu0 %v1903_v9  ;;  %980 = vmatprep.subr.bf16.mxu1 %v1905_v10  ;;  %v1914_v20 = vld [vmem:[%s2407_s5] ss:$8 sps:$4 sm:$0xff]   ;;  %v382_v38 = vadd.f32 %v1813_v27, %v2052_v19  ;;  %v383_v39 = vadd.f32 %v1814_v28, %v2052_v19  ;;  %v1817_v41 = vunpack.c.l.bf16 %v1869_v35  ;;  %v1818_v42 = vunpack.c.h.bf16 %v1869_v35  ;;  %v1877_v62 = vld [vmem:[%s2032_s10 + $0x58] sm:$0xff]  }
  0x14   : > { %v378_v22 = vadd.f32 %v1805_v17, %v2052_v19  ;;  %v379_v23 = vadd.f32 %v1806_v18, %v2052_v19  ;;  %v1915_v31 = vld [vmem:[%s2046_s19] sm:$0xff]   ;;  %v380_v32 = vadd.f32 %v1809_v24, %v2052_v19  ;;  %v381_v33 = vadd.f32 %v1810_v25, %v2052_v19  ;;  %v1875_v51 = vld [vmem:[%s2032_s10 + $0x48] sm:$0xff]   ;;  %v1880_v24 = vld [vmem:[%s2032_s10 + $0x70] sm:$0xff]  }
  0x15   : > { %v2070_v40 = vld [vmem:[%s2032_s10 + $0x20] sm:$0xff]   ;;  %v414_v47 = vmax.f32 %v382_v38, 0.0  ;;  %v415_v48 = vmax.f32 %v383_v39, 0.0  ;;  %v2078_v49 = vadd.f32 %v1817_v41, %v2052_v19  ;;  %v2082_v52 = vadd.f32 %v1818_v42, %v2052_v19 }
  0x16   : > { %580 = vmatpush1.bf16.msra.mxu0 %v1907_v11  ;;  %981 = vmatpush1.bf16.msra.mxu1 %v1908_v12  ;;  %v410_v29 = vmax.f32 %v378_v22, 0.0  ;;  %v411_v30 = vmax.f32 %v379_v23, 0.0  ;;  %v412_v36 = vmax.f32 %v380_v32, 0.0  ;;  %v413_v37 = vmax.f32 %v381_v33, 0.0  ;;  %v1874_v44 = vld [vmem:[%s2032_s10 + $0x40] sm:$0xff]  }
  0x17   : > { %581 = vmatprep.subr.bf16.mxu0 %v1909_v13  ;;  %982 = vmatprep.subr.bf16.mxu1 %v1911_v14  ;;  %v1821_v43 = vunpack.c.l.bf16 %v2070_v40  ;;  %v1837_v50 = vunpack.c.l.bf16 %v1874_v44  ;;  %v1838_v53 = vunpack.c.h.bf16 %v1874_v44  ;;  %v1822_v55 = vunpack.c.h.bf16 %v2070_v40  ;;  %v1878_v4 = vld [vmem:[%s2032_s10 + $0x60] sm:$0xff]   ;;  %v1879_v13 = vld [vmem:[%s2032_s10 + $0x68] sm:$0xff]   ;;  %v1917_v14 = vld [vmem:[%s2046_s19 + $0x10] sm:$0xff]  }
  0x18   : > { %v442_v34 = vpack.c.bf16 %v411_v30, %v410_v29  ;;  %v443_v45 = vpack.c.bf16 %v413_v37, %v412_v36  ;;  %v444_v58 = vpack.c.bf16 %v415_v48, %v414_v47  ;;  %v1841_v60 = vunpack.c.l.bf16 %v1875_v51  ;;  %v1881_v29 = vld [vmem:[%s2032_s10 + $0x78] sm:$0xff]  }
  0x19   : > { %v2087_v56 = vadd.f32 %v1821_v43, %v2052_v19  ;;  %v394_v57 = vadd.f32 %v1837_v50, %v2052_v19  ;;  %v395_v59 = vadd.f32 %v1838_v53, %v2052_v19  ;;  %v1842_v61 = vunpack.c.h.bf16 %v1875_v51  ;;  %v1918_v51 = vld [vmem:[%s2046_s19 + $0x18] sm:$0xff]  }
  0x1a   : > { %582 = vmatpush1.bf16.msra.mxu0 %v1913_v15  ;;  %983 = vmatpush1.bf16.msra.mxu1 %v1914_v20  ;;  %v416_v63 = vmax.f32 %v2078_v49, 0.0  ;;  %v1845_v1 = vunpack.c.l.bf16 %v1876_v54  ;;  %v1846_v3 = vunpack.c.h.bf16 %v1876_v54  ;;  %v417_v5 = vmax.f32 %v2082_v52, 0.0  ;;  %v1871_v52 = vld [vmem:[%s2032_s10 + $0x28] sm:$0xff]  }
  0x1b   : > { %v426_v0 = vmax.f32 %v394_v57, 0.0  ;;  %v427_v6 = vmax.f32 %v395_v59, 0.0  ;;  %v396_v7 = vadd.f32 %v1841_v60, %v2052_v19  ;;  %v397_v8 = vadd.f32 %v1842_v61, %v2052_v19 }
  0x1c   : > { %v398_v9 = vadd.f32 %v1845_v1, %v2052_v19  ;;  %v399_v10 = vadd.f32 %v1846_v3, %v2052_v19  ;;  %v1849_v11 = vunpack.c.l.bf16 %v1877_v62  ;;  %v1850_v12 = vunpack.c.h.bf16 %v1877_v62 }
  0x1d   : > { %1680 = vmatmul.mubr.msk.bf16.vlgmr.msra.gmra.mxu0 %vm518_vm0, %v442_v34  ;;  %1720 = vmatmul.mubr.msk.bf16.vlgmr.msra.gmra.mxu1 %vm518_vm0, %v1915_v31  ;;  %v2105_v15 = vpack.c.bf16 %v427_v6, %v426_v0  ;;  %v428_v16 = vmax.f32 %v396_v7, 0.0  ;;  %v429_v17 = vmax.f32 %v397_v8, 0.0  ;;  %v1853_v18 = vunpack.c.l.bf16 %v1878_v4  ;;  %v1872_v8 = vld [vmem:[%s2032_s10 + $0x30] sm:$0xff]  }
  0x1e   : > { %609 = vmatprep.mubr.bf16.mxu0 %v1939_v2  ;;  %1010 = vmatprep.mubr.bf16.mxu1 %v1939_v2  ;;  %v430_v20 = vmax.f32 %v398_v9, 0.0  ;;  %v431_v21 = vmax.f32 %v399_v10, 0.0  ;;  %v400_v22 = vadd.f32 %v1849_v11, %v2052_v19  ;;  %v401_v23 = vadd.f32 %v1850_v12, %v2052_v19 }
  0x1f   : > { %v2110_v25 = vpack.c.bf16 %v429_v17, %v428_v16  ;;  %v1854_v26 = vunpack.c.h.bf16 %v1878_v4  ;;  %v402_v27 = vadd.f32 %v1853_v18, %v2052_v19  ;;  %v1857_v28 = vunpack.c.l.bf16 %v1879_v13  ;;  %v1873_v17 = vld [vmem:[%s2032_s10 + $0x38] sm:$0xff]   ;;  %s2245_s10 = scalar_lea.vmem %s2409_s7, %s1770_s30 }
  0x20   : > { %v2114_v30 = vpack.c.bf16 %v431_v21, %v430_v20  ;;  %v432_v31 = vmax.f32 %v400_v22, 0.0  ;;  %v433_v32 = vmax.f32 %v401_v23, 0.0  ;;  %v1858_v33 = vunpack.c.h.bf16 %v1879_v13  ;;  %v1920_v13 = vld [vmem:[%s2046_s19 + $0x28] sm:$0xff]  }
  0x21   : > { %v403_v34 = vadd.f32 %v1854_v26, %v2052_v19  ;;  %v434_v35 = vmax.f32 %v402_v27, 0.0  ;;  %v404_v36 = vadd.f32 %v1857_v28, %v2052_v19  ;;  %v1861_v37 = vunpack.c.l.bf16 %v1880_v24 }
  0x22   : > { %v2122_v38 = vpack.c.bf16 %v433_v32, %v432_v31  ;;  %v405_v39 = vadd.f32 %v1858_v33, %v2052_v19  ;;  %v1862_v40 = vunpack.c.h.bf16 %v1880_v24  ;;  %v1865_v41 = vunpack.c.l.bf16 %v1881_v29  ;;  %v1921_v24 = vld [vmem:[%s2046_s19 + $0x30] sm:$0xff]   ;;  %v1922_v32 = vld [vmem:[%s2046_s19 + $0x38] sm:$0xff]   ;;  %v1924_v33 = vld [vmem:[%s2046_s19 + $0x48] sm:$0xff]  }
  0x23   : > { %v435_v42 = vmax.f32 %v403_v34, 0.0  ;;  %v436_v43 = vmax.f32 %v404_v36, 0.0  ;;  %v406_v44 = vadd.f32 %v1861_v37, %v2052_v19  ;;  %v445_v50 = vpack.c.bf16 %v417_v5, %v416_v63  ;;  %v1919_v5 = vld [vmem:[%s2046_s19 + $0x20] sm:$0xff]   ;;  %v1925_v34 = vld [vmem:[%s2046_s19 + $0x50] sm:$0xff]   ;;  %v1930_v36 = vld [vmem:[%s2046_s19 + $0x78] sm:$0xff]  }
  0x24   : > { %v437_v47 = vmax.f32 %v405_v39, 0.0  ;;  %v407_v48 = vadd.f32 %v1862_v40, %v2052_v19  ;;  %v408_v49 = vadd.f32 %v1865_v41, %v2052_v19  ;;  %v1825_v61 = vunpack.c.l.bf16 %v1871_v52  ;;  %v466_v40 = vld [vmem:[%s2405_s3] sm:$0x3] }
  0x25   : > { %1681 = vmatmul.mubr.msk.bf16.gmra.mxu0 %vm518_vm0, %v443_v45  ;;  %1721 = vmatmul.mubr.msk.bf16.gmra.mxu1 %vm518_vm0, %v1916_v46  ;;  %v1866_v45 = vunpack.c.h.bf16 %v1881_v29  ;;  %v387_v46 = vadd.f32 %v1822_v55, %v2052_v19  ;;  %v2131_v53 = vpack.c.bf16 %v435_v42, %v434_v35  ;;  %v438_v54 = vmax.f32 %v406_v44, 0.0  ;;  %v1929_v35 = vld [vmem:[%s2046_s19 + $0x70] sm:$0xff]  }
  0x26   : > { %619 = vmatprep.mubr.bf16.mxu0 %v1939_v2  ;;  %1020 = vmatprep.mubr.bf16.mxu1 %v1939_v2  ;;  %v439_v59 = vmax.f32 %v407_v48, 0.0  ;;  %v440_v60 = vmax.f32 %v408_v49, 0.0  ;;  %v418_v63 = vmax.f32 %v2087_v56, 0.0  ;;  %v1826_v1 = vunpack.c.h.bf16 %v1871_v52 }
  0x27   : > { %v409_v57 = vadd.f32 %v1866_v45, %v2052_v19  ;;  %v419_v0 = vmax.f32 %v387_v46, 0.0  ;;  %v388_v6 = vadd.f32 %v1825_v61, %v2052_v19  ;;  %v1829_v10 = vunpack.c.l.bf16 %v1872_v8 }
  0x28   : > { %v2136_v62 = vpack.c.bf16 %v439_v59, %v438_v54  ;;  %v389_v7 = vadd.f32 %v1826_v1, %v2052_v19  ;;  %v1830_v11 = vunpack.c.h.bf16 %v1872_v8  ;;  %v1833_v21 = vunpack.c.l.bf16 %v1873_v17 }
  0x29   : > { %v441_v55 = vmax.f32 %v409_v57, 0.0  ;;  %v446_v4 = vpack.c.bf16 %v419_v0, %v418_v63  ;;  %v420_v56 = vmax.f32 %v388_v6, 0.0  ;;  %v1834_v22 = vunpack.c.h.bf16 %v1873_v17 }
  0x2a   : > { %v421_v9 = vmax.f32 %v389_v7, 0.0  ;;  %v391_v16 = vadd.f32 %v1830_v11, %v2052_v19  ;;  %v392_v26 = vadd.f32 %v1833_v21, %v2052_v19  ;;  %v468_v37 = vlaneseq }
  0x2b   : > { %v2141_v3 = vpack.c.bf16 %v441_v55, %v440_v60  ;;  %v393_v27 = vadd.f32 %v1834_v22, %v2052_v19 }
  0x2c   : > { %v447_v12 = vpack.c.bf16 %v421_v9, %v420_v56  ;;  %v423_v20 = vmax.f32 %v391_v16, 0.0  ;;  %v424_v28 = vmax.f32 %v392_v26, 0.0 }
  0x2d   : > { %1682 = vmatmul.mubr.msk.bf16.gmra.mxu0 %vm518_vm0, %v444_v58  ;;  %1722 = vmatmul.mubr.msk.bf16.gmra.mxu1 %vm518_vm0, %v1917_v14  ;;  %v2134_v58 = vpack.c.bf16 %v437_v47, %v436_v43  ;;  %v390_v14 = vadd.f32 %v1829_v10, %v2052_v19  ;;  %v425_v29 = vmax.f32 %v393_v27, 0.0  ;;  %v1923_v19 = vld [vmem:[%s2046_s19 + $0x40] sm:$0xff]  }
  0x2e   : > { %629 = vmatprep.mubr.bf16.mxu0 %v1939_v2  ;;  %1030 = vmatprep.mubr.bf16.mxu1 %v1939_v2 }
  0x2f   : > { %v422_v18 = vmax.f32 %v390_v14, 0.0  ;;  %v449_v31 = vpack.c.bf16 %v425_v29, %v424_v28 }
  0x31   : > { %v448_v23 = vpack.c.bf16 %v423_v20, %v422_v18 }
  0x35   : > { %1683 = vmatmul.mubr.msk.bf16.gmra.mxu0 %vm518_vm0, %v445_v50  ;;  %1723 = vmatmul.mubr.msk.bf16.gmra.mxu1 %vm518_vm0, %v1918_v51 }
  0x36   : > { %639 = vmatprep.mubr.bf16.mxu0 %v1939_v2  ;;  %1040 = vmatprep.mubr.bf16.mxu1 %v1939_v2 }
  0x3d   : > { %1684 = vmatmul.mubr.msk.bf16.gmra.mxu0 %vm518_vm0, %v446_v4  ;;  %1724 = vmatmul.mubr.msk.bf16.gmra.mxu1 %vm518_vm0, %v1919_v5 }
  0x3e   : > { %649 = vmatprep.mubr.bf16.mxu0 %v1939_v2  ;;  %1050 = vmatprep.mubr.bf16.mxu1 %v1939_v2 }
  0x45   : > { %1685 = vmatmul.mubr.msk.bf16.gmra.mxu0 %vm518_vm0, %v447_v12  ;;  %1725 = vmatmul.mubr.msk.bf16.gmra.mxu1 %vm518_vm0, %v1920_v13 }
  0x46   : > { %659 = vmatprep.mubr.bf16.mxu0 %v1939_v2  ;;  %1060 = vmatprep.mubr.bf16.mxu1 %v1939_v2 }
  0x4d   : > { %1686 = vmatmul.mubr.msk.bf16.gmra.mxu0 %vm518_vm0, %v448_v23  ;;  %1726 = vmatmul.mubr.msk.bf16.gmra.mxu1 %vm518_vm0, %v1921_v24 }
  0x4e   : > { %669 = vmatprep.mubr.bf16.mxu0 %v1939_v2  ;;  %1070 = vmatprep.mubr.bf16.mxu1 %v1939_v2 }
  0x55   : > { %1687 = vmatmul.mubr.msk.bf16.gmra.mxu0 %vm518_vm0, %v449_v31  ;;  %1727 = vmatmul.mubr.msk.bf16.gmra.mxu1 %vm518_vm0, %v1922_v32 }
  0x56   : > { %679 = vmatprep.mubr.bf16.mxu0 %v1939_v2  ;;  %1080 = vmatprep.mubr.bf16.mxu1 %v1939_v2 }
  0x5d   : > { %1688 = vmatmul.mubr.msk.bf16.gmra.mxu0 %vm518_vm0, %v2105_v15  ;;  %1728 = vmatmul.mubr.msk.bf16.gmra.mxu1 %vm518_vm0, %v1923_v19  ;;  %v1926_v15 = vld [vmem:[%s2046_s19 + $0x58] sm:$0xff]  }
  0x5e   : > { %689 = vmatprep.mubr.bf16.mxu0 %v1939_v2  ;;  %1090 = vmatprep.mubr.bf16.mxu1 %v1939_v2 }
  0x65   : > { %1689 = vmatmul.mubr.msk.bf16.gmra.mxu0 %vm518_vm0, %v2110_v25  ;;  %1729 = vmatmul.mubr.msk.bf16.gmra.mxu1 %vm518_vm0, %v1924_v33  ;;  %v1927_v25 = vld [vmem:[%s2046_s19 + $0x60] sm:$0xff]  }
  0x66   : > { %699 = vmatprep.mubr.bf16.mxu0 %v1939_v2  ;;  %1100 = vmatprep.mubr.bf16.mxu1 %v1939_v2 }
  0x6d   : > { %1690 = vmatmul.mubr.msk.bf16.gmra.mxu0 %vm518_vm0, %v2114_v30  ;;  %1730 = vmatmul.mubr.msk.bf16.gmra.mxu1 %vm518_vm0, %v1925_v34  ;;  %v1928_v30 = vld [vmem:[%s2046_s19 + $0x68] sm:$0xff]  }
  0x6e   : > { %709 = vmatprep.mubr.bf16.mxu0 %v1939_v2  ;;  %1110 = vmatprep.mubr.bf16.mxu1 %v1939_v2 }
  0x75   : > { %1691 = vmatmul.mubr.msk.bf16.gmra.mxu0 %vm518_vm0, %v2122_v38  ;;  %1731 = vmatmul.mubr.msk.bf16.gmra.mxu1 %vm518_vm0, %v1926_v15  ;;  %v469_v38 = vshrl.u32 %v468_v37, 7 }
  0x76   : > { %719 = vmatprep.mubr.bf16.mxu0 %v1939_v2  ;;  %1120 = vmatprep.mubr.bf16.mxu1 %v1939_v2 }
  0x77   : > { %v470_v39 = vsub.s32 0, %v469_v38  ;;  %v474_v41 = vsub.s32 1, %v469_v38 }
  0x79   : > { %v2222_v42 = vrot.slane %v466_v40, %v470_v39  ;;  %v2227_v43 = vrot.slane %v466_v40, %v474_v41 }
  0x7d   : > { %1692 = vmatmul.mubr.msk.bf16.gmra.mxu0 %vm518_vm0, %v2131_v53  ;;  %1732 = vmatmul.mubr.msk.bf16.gmra.mxu1 %vm518_vm0, %v1927_v25 }
  0x7e   : > { %729 = vmatprep.mubr.bf16.mxu0 %v1939_v2  ;;  %1130 = vmatprep.mubr.bf16.mxu1 %v1939_v2 }
  0x85   : > { %1693 = vmatmul.mubr.msk.bf16.gmra.mxu0 %vm518_vm0, %v2134_v58  ;;  %1733 = vmatmul.mubr.msk.bf16.gmra.mxu1 %vm518_vm0, %v1928_v30 }
  0x86   : > { %739 = vmatprep.mubr.bf16.mxu0 %v1939_v2  ;;  %1140 = vmatprep.mubr.bf16.mxu1 %v1939_v2 }
  0x8d   : > { %1694 = vmatmul.mubr.msk.bf16.gmra.mxu0 %vm518_vm0, %v2136_v62  ;;  %1734 = vmatmul.mubr.msk.bf16.gmra.mxu1 %vm518_vm0, %v1929_v35 }
  0x8e   : > { %749 = vmatprep.mubr.bf16.mxu0 %v1939_v2  ;;  %1150 = vmatprep.mubr.bf16.mxu1 %v1939_v2  ;;  %v1225_v2 = vld [vmem:[%s2408_s6] sm:$0x3] }
  0x8f   : > { %v2230_v47 = vrot.slane %v1225_v2, %v470_v39  ;;  %v2233_v52 = vrot.slane %v1225_v2, %v474_v41 }
  0x95   : > { %1695 = vmatmul.mubr.msk.bf16.gmra.mxu0 %vm518_vm0, %v2141_v3  ;;  %1735 = vmatmul.mubr.msk.bf16.gmra.mxu1 %vm518_vm0, %v1930_v36 }
  0xdd   : > { %v601_v44 = vpop.f32.mrf.mxu0  ;;  %v1002_v45 = vpop.f32.mrf.mxu1 }
  0xde   : > { %v602_v46 = vadd.f32 %v601_v44, %v2222_v42 }
  0xdf   : > { %v603_v48 = vpop.f32.mrf.mxu0  ;;  %v1004_v49 = vpop.f32.mrf.mxu1 }
  0xe0   : > { %v1161_v50 = vadd.f32 %v1002_v45, %v602_v46  ;;  %v604_v51 = vadd.f32 %v603_v48, %v2227_v43 }
  0xe1   : > { %v605_v53 = vpop.f32.mrf.mxu0  ;;  %v1006_v54 = vpop.f32.mrf.mxu1 }
  0xe2   : > { %v1237_v57 = vadd.f32 %v2230_v47, %v1161_v50  ;;  %v1162_v58 = vadd.f32 %v1004_v49, %v604_v51  ;;  %v606_v59 = vadd.f32 %v605_v53, %v2222_v42 }
  0xe3   : > { %v607_v60 = vpop.f32.mrf.mxu0  ;;  %v1008_v55 = vpop.f32.mrf.mxu1 }
  0xe4   : > { %v1238_v61 = vadd.f32 %v2233_v52, %v1162_v58  ;;  %v1163_v62 = vadd.f32 %v1006_v54, %v606_v59  ;;  %v608_v63 = vadd.f32 %v607_v60, %v2227_v43  ;;  %v1301_v0 = vmax.f32 %v1237_v57, 0.0 }
  0xe5   : > { %v611_v1 = vpop.f32.mrf.mxu0  ;;  %v1012_v3 = vpop.f32.mrf.mxu1 }
  0xe6   : > { %v1302_v4 = vmax.f32 %v1238_v61, 0.0  ;;  %v1239_v5 = vadd.f32 %v2230_v47, %v1163_v62  ;;  %v1164_v6 = vadd.f32 %v1008_v55, %v608_v63  ;;  %v612_v7 = vadd.f32 %v611_v1, %v2222_v42 }
  0xe7   : > { %v613_v8 = vpop.f32.mrf.mxu0  ;;  %v1014_v56 = vpop.f32.mrf.mxu1 }
  0xe8   : > { %v1771_v9 = vpack.c.bf16 %v1302_v4, %v1301_v0  ;;  %v1240_v10 = vadd.f32 %v2233_v52, %v1164_v6  ;;  %v1165_v11 = vadd.f32 %v1012_v3, %v612_v7  ;;  %v614_v12 = vadd.f32 %v613_v8, %v2227_v43 }
  0xe9   : > { %v615_v13 = vpop.f32.mrf.mxu0  ;;  %v1016_v14 = vpop.f32.mrf.mxu1  ;;  %v1303_v16 = vmax.f32 %v1239_v5, 0.0 }
  0xea   : > { %1557 = vst [vmem:[%s2245_s10] sm:$0xff] %v1771_v9  ;;  %v1304_v17 = vmax.f32 %v1240_v10, 0.0  ;;  %v616_v18 = vadd.f32 %v615_v13, %v2222_v42  ;;  %v1241_v20 = vadd.f32 %v2230_v47, %v1165_v11  ;;  %v1166_v21 = vadd.f32 %v1014_v56, %v614_v12 }
  0xeb   : > { %v617_v22 = vpop.f32.mrf.mxu0  ;;  %v1018_v23 = vpop.f32.mrf.mxu1 }
  0xec   : > { %v1772_v24 = vpack.c.bf16 %v1304_v17, %v1303_v16  ;;  %v1167_v26 = vadd.f32 %v1016_v14, %v616_v18  ;;  %v618_v27 = vadd.f32 %v617_v22, %v2227_v43  ;;  %v1242_v28 = vadd.f32 %v2233_v52, %v1166_v21 }
  0xed   : > { %v621_v29 = vpop.f32.mrf.mxu0  ;;  %v1022_v31 = vpop.f32.mrf.mxu1  ;;  %v1305_v34 = vmax.f32 %v1241_v20, 0.0 }
  0xee   : > { %1558 = vst [vmem:[%s2245_s10 + $0x8] sm:$0xff] %v1772_v24  ;;  %v1243_v32 = vadd.f32 %v2230_v47, %v1167_v26  ;;  %v1168_v19 = vadd.f32 %v1018_v23, %v618_v27  ;;  %v622_v33 = vadd.f32 %v621_v29, %v2222_v42  ;;  %v1306_v15 = vmax.f32 %v1242_v28, 0.0 }
  0xef   : > { %v623_v25 = vpop.f32.mrf.mxu0  ;;  %v1024_v30 = vpop.f32.mrf.mxu1 }
  0xf0   : > { %v1244_v35 = vadd.f32 %v2233_v52, %v1168_v19  ;;  %v1169_v36 = vadd.f32 %v1022_v31, %v622_v33  ;;  %v624_v37 = vadd.f32 %v623_v25, %v2227_v43  ;;  %v1773_v38 = vpack.c.bf16 %v1306_v15, %v1305_v34 }
  0xf1   : > { %v1307_v39 = vmax.f32 %v1243_v32, 0.0  ;;  %v625_v40 = vpop.f32.mrf.mxu0  ;;  %v1026_v41 = vpop.f32.mrf.mxu1 }
  0xf2   : > { %v1308_v2 = vmax.f32 %v1244_v35, 0.0  ;;  %v1245_v44 = vadd.f32 %v2230_v47, %v1169_v36  ;;  %v1170_v45 = vadd.f32 %v1024_v30, %v624_v37  ;;  %v626_v46 = vadd.f32 %v625_v40, %v2222_v42  ;;  %1559 = vst [vmem:[%s2245_s10 + $0x10] sm:$0xff] %v1773_v38 }
  0xf3   : > { %v627_v48 = vpop.f32.mrf.mxu0  ;;  %v1028_v49 = vpop.f32.mrf.mxu1 }
  0xf4   : > { %v1774_v50 = vpack.c.bf16 %v1308_v2, %v1307_v39  ;;  %v1246_v51 = vadd.f32 %v2233_v52, %v1170_v45  ;;  %v1171_v53 = vadd.f32 %v1026_v41, %v626_v46  ;;  %v628_v54 = vadd.f32 %v627_v48, %v2227_v43 }
  0xf5   : > { %v631_v57 = vpop.f32.mrf.mxu0  ;;  %v1032_v58 = vpop.f32.mrf.mxu1  ;;  %v1309_v59 = vmax.f32 %v1245_v44, 0.0 }
  0xf6   : > { %1560 = vst [vmem:[%s2245_s10 + $0x18] sm:$0xff] %v1774_v50  ;;  %v1310_v60 = vmax.f32 %v1246_v51, 0.0  ;;  %v632_v55 = vadd.f32 %v631_v57, %v2222_v42  ;;  %v1247_v61 = vadd.f32 %v2230_v47, %v1171_v53  ;;  %v1172_v62 = vadd.f32 %v1028_v49, %v628_v54 }
  0xf7   : > { %v633_v63 = vpop.f32.mrf.mxu0  ;;  %v1034_v0 = vpop.f32.mrf.mxu1 }
  0xf8   : > { %v1775_v1 = vpack.c.bf16 %v1310_v60, %v1309_v59  ;;  %v1173_v3 = vadd.f32 %v1032_v58, %v632_v55  ;;  %v634_v4 = vadd.f32 %v633_v63, %v2227_v43  ;;  %v1248_v5 = vadd.f32 %v2233_v52, %v1172_v62 }
  0xf9   : > { %v635_v6 = vpop.f32.mrf.mxu0  ;;  %v1036_v7 = vpop.f32.mrf.mxu1  ;;  %v1311_v10 = vmax.f32 %v1247_v61, 0.0 }
  0xfa   : > { %1561 = vst [vmem:[%s2245_s10 + $0x20] sm:$0xff] %v1775_v1  ;;  %v1249_v8 = vadd.f32 %v2230_v47, %v1173_v3  ;;  %v1174_v56 = vadd.f32 %v1034_v0, %v634_v4  ;;  %v636_v9 = vadd.f32 %v635_v6, %v2222_v42  ;;  %v1312_v11 = vmax.f32 %v1248_v5, 0.0 }
  0xfb   : > { %v637_v12 = vpop.f32.mrf.mxu0  ;;  %v1038_v13 = vpop.f32.mrf.mxu1 }
  0xfc   : > { %v1250_v14 = vadd.f32 %v2233_v52, %v1174_v56  ;;  %v1175_v16 = vadd.f32 %v1036_v7, %v636_v9  ;;  %v638_v17 = vadd.f32 %v637_v12, %v2227_v43  ;;  %v1776_v18 = vpack.c.bf16 %v1312_v11, %v1311_v10 }
  0xfd   : > { %v1313_v20 = vmax.f32 %v1249_v8, 0.0  ;;  %v641_v21 = vpop.f32.mrf.mxu0  ;;  %v1042_v22 = vpop.f32.mrf.mxu1 }
  0xfe   : > { %v1314_v23 = vmax.f32 %v1250_v14, 0.0  ;;  %v1251_v24 = vadd.f32 %v2230_v47, %v1175_v16  ;;  %v1176_v26 = vadd.f32 %v1038_v13, %v638_v17  ;;  %v642_v27 = vadd.f32 %v641_v21, %v2222_v42  ;;  %1562 = vst [vmem:[%s2245_s10 + $0x28] sm:$0xff] %v1776_v18 }
  0xff   : > { %v643_v28 = vpop.f32.mrf.mxu0  ;;  %v1044_v29 = vpop.f32.mrf.mxu1 }
 0x100   : > { %v1777_v31 = vpack.c.bf16 %v1314_v23, %v1313_v20  ;;  %v1252_v32 = vadd.f32 %v2233_v52, %v1176_v26  ;;  %v1177_v19 = vadd.f32 %v1042_v22, %v642_v27  ;;  %v644_v33 = vadd.f32 %v643_v28, %v2227_v43 }
 0x101   : > { %v645_v34 = vpop.f32.mrf.mxu0  ;;  %v1046_v15 = vpop.f32.mrf.mxu1  ;;  %v1315_v25 = vmax.f32 %v1251_v24, 0.0 }
 0x102   : > { %1563 = vst [vmem:[%s2245_s10 + $0x30] sm:$0xff] %v1777_v31  ;;  %v1316_v30 = vmax.f32 %v1252_v32, 0.0  ;;  %v646_v35 = vadd.f32 %v645_v34, %v2222_v42  ;;  %v1253_v36 = vadd.f32 %v2230_v47, %v1177_v19  ;;  %v1178_v37 = vadd.f32 %v1044_v29, %v644_v33 }
 0x103   : > { %v647_v38 = vpop.f32.mrf.mxu0  ;;  %v1048_v39 = vpop.f32.mrf.mxu1 }
 0x104   : > { %v1778_v40 = vpack.c.bf16 %v1316_v30, %v1315_v25  ;;  %v1179_v41 = vadd.f32 %v1046_v15, %v646_v35  ;;  %v648_v2 = vadd.f32 %v647_v38, %v2227_v43  ;;  %v1254_v44 = vadd.f32 %v2233_v52, %v1178_v37 }
 0x105   : > { %v651_v45 = vpop.f32.mrf.mxu0  ;;  %v1052_v46 = vpop.f32.mrf.mxu1  ;;  %v1317_v51 = vmax.f32 %v1253_v36, 0.0 }
 0x106   : > { %1564 = vst [vmem:[%s2245_s10 + $0x38] sm:$0xff] %v1778_v40  ;;  %v1255_v48 = vadd.f32 %v2230_v47, %v1179_v41  ;;  %v1180_v49 = vadd.f32 %v1048_v39, %v648_v2  ;;  %v652_v50 = vadd.f32 %v651_v45, %v2222_v42  ;;  %v1318_v53 = vmax.f32 %v1254_v44, 0.0 }
 0x107   : > { %v653_v54 = vpop.f32.mrf.mxu0  ;;  %v1054_v57 = vpop.f32.mrf.mxu1 }
 0x108   : > { %v1256_v58 = vadd.f32 %v2233_v52, %v1180_v49  ;;  %v1181_v59 = vadd.f32 %v1052_v46, %v652_v50  ;;  %v654_v60 = vadd.f32 %v653_v54, %v2227_v43  ;;  %v1779_v55 = vpack.c.bf16 %v1318_v53, %v1317_v51 }
 0x109   : > { %v1319_v61 = vmax.f32 %v1255_v48, 0.0  ;;  %v655_v62 = vpop.f32.mrf.mxu0  ;;  %v1056_v63 = vpop.f32.mrf.mxu1 }
 0x10a   : > { %v1320_v0 = vmax.f32 %v1256_v58, 0.0  ;;  %v1257_v1 = vadd.f32 %v2230_v47, %v1181_v59  ;;  %v1182_v3 = vadd.f32 %v1054_v57, %v654_v60  ;;  %v656_v4 = vadd.f32 %v655_v62, %v2222_v42  ;;  %1565 = vst [vmem:[%s2245_s10 + $0x40] sm:$0xff] %v1779_v55 }
 0x10b   : > { %v657_v5 = vpop.f32.mrf.mxu0  ;;  %v1058_v6 = vpop.f32.mrf.mxu1 }
 0x10c   : > { %v1780_v7 = vpack.c.bf16 %v1320_v0, %v1319_v61  ;;  %v1258_v8 = vadd.f32 %v2233_v52, %v1182_v3  ;;  %v1183_v56 = vadd.f32 %v1056_v63, %v656_v4  ;;  %v658_v9 = vadd.f32 %v657_v5, %v2227_v43 }
 0x10d   : > { %v661_v10 = vpop.f32.mrf.mxu0  ;;  %v1062_v11 = vpop.f32.mrf.mxu1  ;;  %v1321_v12 = vmax.f32 %v1257_v1, 0.0 }
 0x10e   : > { %1566 = vst [vmem:[%s2245_s10 + $0x48] sm:$0xff] %v1780_v7  ;;  %v1322_v13 = vmax.f32 %v1258_v8, 0.0  ;;  %v662_v14 = vadd.f32 %v661_v10, %v2222_v42  ;;  %v1259_v16 = vadd.f32 %v2230_v47, %v1183_v56  ;;  %v1184_v17 = vadd.f32 %v1058_v6, %v658_v9 }
 0x10f   : > { %v663_v18 = vpop.f32.mrf.mxu0  ;;  %v1064_v20 = vpop.f32.mrf.mxu1 }
 0x110   : > { %v1781_v21 = vpack.c.bf16 %v1322_v13, %v1321_v12  ;;  %v1185_v22 = vadd.f32 %v1062_v11, %v662_v14  ;;  %v664_v23 = vadd.f32 %v663_v18, %v2227_v43  ;;  %v1260_v24 = vadd.f32 %v2233_v52, %v1184_v17 }
 0x111   : > { %v665_v26 = vpop.f32.mrf.mxu0  ;;  %v1066_v27 = vpop.f32.mrf.mxu1  ;;  %v1323_v32 = vmax.f32 %v1259_v16, 0.0 }
 0x112   : > { %1567 = vst [vmem:[%s2245_s10 + $0x50] sm:$0xff] %v1781_v21  ;;  %v1261_v28 = vadd.f32 %v2230_v47, %v1185_v22  ;;  %v1186_v29 = vadd.f32 %v1064_v20, %v664_v23  ;;  %v666_v31 = vadd.f32 %v665_v26, %v2222_v42  ;;  %v1324_v19 = vmax.f32 %v1260_v24, 0.0 }
 0x113   : > { %v667_v33 = vpop.f32.mrf.mxu0  ;;  %v1068_v34 = vpop.f32.mrf.mxu1 }
 0x114   : > { %v1262_v15 = vadd.f32 %v2233_v52, %v1186_v29  ;;  %v1187_v25 = vadd.f32 %v1066_v27, %v666_v31  ;;  %v668_v30 = vadd.f32 %v667_v33, %v2227_v43  ;;  %v1782_v35 = vpack.c.bf16 %v1324_v19, %v1323_v32 }
 0x115   : > { %v1325_v36 = vmax.f32 %v1261_v28, 0.0  ;;  %v671_v37 = vpop.f32.mrf.mxu0  ;;  %v1072_v38 = vpop.f32.mrf.mxu1 }
 0x116   : > { %v1326_v39 = vmax.f32 %v1262_v15, 0.0  ;;  %v1263_v40 = vadd.f32 %v2230_v47, %v1187_v25  ;;  %v1188_v41 = vadd.f32 %v1068_v34, %v668_v30  ;;  %v672_v2 = vadd.f32 %v671_v37, %v2222_v42  ;;  %1568 = vst [vmem:[%s2245_s10 + $0x58] sm:$0xff] %v1782_v35 }
 0x117   : > { %v673_v44 = vpop.f32.mrf.mxu0  ;;  %v1074_v45 = vpop.f32.mrf.mxu1 }
 0x118   : > { %v1783_v46 = vpack.c.bf16 %v1326_v39, %v1325_v36  ;;  %v1264_v48 = vadd.f32 %v2233_v52, %v1188_v41  ;;  %v1189_v49 = vadd.f32 %v1072_v38, %v672_v2  ;;  %v674_v50 = vadd.f32 %v673_v44, %v2227_v43 }
 0x119   : > { %v675_v51 = vpop.f32.mrf.mxu0  ;;  %v1076_v53 = vpop.f32.mrf.mxu1  ;;  %v1327_v54 = vmax.f32 %v1263_v40, 0.0 }
 0x11a   : > { %1569 = vst [vmem:[%s2245_s10 + $0x60] sm:$0xff] %v1783_v46  ;;  %v1328_v57 = vmax.f32 %v1264_v48, 0.0  ;;  %v676_v58 = vadd.f32 %v675_v51, %v2222_v42  ;;  %v1265_v59 = vadd.f32 %v2230_v47, %v1189_v49  ;;  %v1190_v60 = vadd.f32 %v1074_v45, %v674_v50 }
 0x11b   : > { %v677_v55 = vpop.f32.mrf.mxu0  ;;  %v1078_v61 = vpop.f32.mrf.mxu1 }
 0x11c   : > { %v1784_v62 = vpack.c.bf16 %v1328_v57, %v1327_v54  ;;  %v1191_v63 = vadd.f32 %v1076_v53, %v676_v58  ;;  %v678_v0 = vadd.f32 %v677_v55, %v2227_v43  ;;  %v1266_v1 = vadd.f32 %v2233_v52, %v1190_v60 }
 0x11d   : > { %v681_v3 = vpop.f32.mrf.mxu0  ;;  %v1082_v4 = vpop.f32.mrf.mxu1  ;;  %v1329_v8 = vmax.f32 %v1265_v59, 0.0 }
 0x11e   : > { %1570 = vst [vmem:[%s2245_s10 + $0x68] sm:$0xff] %v1784_v62  ;;  %v1267_v5 = vadd.f32 %v2230_v47, %v1191_v63  ;;  %v1192_v6 = vadd.f32 %v1078_v61, %v678_v0  ;;  %v682_v7 = vadd.f32 %v681_v3, %v2222_v42  ;;  %v1330_v56 = vmax.f32 %v1266_v1, 0.0 }
 0x11f   : > { %v683_v9 = vpop.f32.mrf.mxu0  ;;  %v1084_v10 = vpop.f32.mrf.mxu1 }
 0x120   : > { %v1268_v11 = vadd.f32 %v2233_v52, %v1192_v6  ;;  %v1193_v12 = vadd.f32 %v1082_v4, %v682_v7  ;;  %v684_v13 = vadd.f32 %v683_v9, %v2227_v43  ;;  %v1785_v14 = vpack.c.bf16 %v1330_v56, %v1329_v8 }
 0x121   : > { %v1331_v16 = vmax.f32 %v1267_v5, 0.0  ;;  %v685_v17 = vpop.f32.mrf.mxu0  ;;  %v1086_v18 = vpop.f32.mrf.mxu1 }
 0x122   : > { %v1332_v20 = vmax.f32 %v1268_v11, 0.0  ;;  %v1269_v21 = vadd.f32 %v2230_v47, %v1193_v12  ;;  %v1194_v22 = vadd.f32 %v1084_v10, %v684_v13  ;;  %v686_v23 = vadd.f32 %v685_v17, %v2222_v42  ;;  %1571 = vst [vmem:[%s2245_s10 + $0x70] sm:$0xff] %v1785_v14 }
 0x123   : > { %v687_v24 = vpop.f32.mrf.mxu0  ;;  %v1088_v26 = vpop.f32.mrf.mxu1 }
 0x124   : > { %v1786_v27 = vpack.c.bf16 %v1332_v20, %v1331_v16  ;;  %v1270_v28 = vadd.f32 %v2233_v52, %v1194_v22  ;;  %v1195_v29 = vadd.f32 %v1086_v18, %v686_v23  ;;  %v688_v31 = vadd.f32 %v687_v24, %v2227_v43 }
 0x125   : > { %v691_v32 = vpop.f32.mrf.mxu0  ;;  %v1092_v19 = vpop.f32.mrf.mxu1  ;;  %v1333_v33 = vmax.f32 %v1269_v21, 0.0 }
 0x126   : > { %1572 = vst [vmem:[%s2245_s10 + $0x78] sm:$0xff] %v1786_v27  ;;  %v1334_v34 = vmax.f32 %v1270_v28, 0.0  ;;  %v692_v15 = vadd.f32 %v691_v32, %v2222_v42  ;;  %v1271_v25 = vadd.f32 %v2230_v47, %v1195_v29  ;;  %v1196_v30 = vadd.f32 %v1088_v26, %v688_v31 }
 0x127   : > { %v693_v35 = vpop.f32.mrf.mxu0  ;;  %v1094_v36 = vpop.f32.mrf.mxu1 }
 0x128   : > { %v1787_v37 = vpack.c.bf16 %v1334_v34, %v1333_v33  ;;  %v1197_v38 = vadd.f32 %v1092_v19, %v692_v15  ;;  %v694_v39 = vadd.f32 %v693_v35, %v2227_v43  ;;  %v1272_v40 = vadd.f32 %v2233_v52, %v1196_v30 }
 0x129   : > { %v695_v41 = vpop.f32.mrf.mxu0  ;;  %v1096_v2 = vpop.f32.mrf.mxu1  ;;  %v1335_v48 = vmax.f32 %v1271_v25, 0.0 }
 0x12a   : > { %1573 = vst [vmem:[%s2245_s10 + $0x80] sm:$0xff] %v1787_v37  ;;  %v1273_v44 = vadd.f32 %v2230_v47, %v1197_v38  ;;  %v1198_v45 = vadd.f32 %v1094_v36, %v694_v39  ;;  %v696_v46 = vadd.f32 %v695_v41, %v2222_v42  ;;  %v1336_v49 = vmax.f32 %v1272_v40, 0.0 }
 0x12b   : > { %v697_v50 = vpop.f32.mrf.mxu0  ;;  %v1098_v51 = vpop.f32.mrf.mxu1 }
 0x12c   : > { %v1274_v53 = vadd.f32 %v2233_v52, %v1198_v45  ;;  %v1199_v54 = vadd.f32 %v1096_v2, %v696_v46  ;;  %v698_v57 = vadd.f32 %v697_v50, %v2227_v43  ;;  %v1788_v58 = vpack.c.bf16 %v1336_v49, %v1335_v48 }
 0x12d   : > { %v1337_v59 = vmax.f32 %v1273_v44, 0.0  ;;  %v701_v60 = vpop.f32.mrf.mxu0  ;;  %v1102_v55 = vpop.f32.mrf.mxu1 }
 0x12e   : > { %v1338_v61 = vmax.f32 %v1274_v53, 0.0  ;;  %v1275_v62 = vadd.f32 %v2230_v47, %v1199_v54  ;;  %v1200_v63 = vadd.f32 %v1098_v51, %v698_v57  ;;  %v702_v0 = vadd.f32 %v701_v60, %v2222_v42  ;;  %1574 = vst [vmem:[%s2245_s10 + $0x88] sm:$0xff] %v1788_v58 }
 0x12f   : > { %v703_v1 = vpop.f32.mrf.mxu0  ;;  %v1104_v3 = vpop.f32.mrf.mxu1 }
 0x130   : > { %v1789_v4 = vpack.c.bf16 %v1338_v61, %v1337_v59  ;;  %v1276_v5 = vadd.f32 %v2233_v52, %v1200_v63  ;;  %v1201_v6 = vadd.f32 %v1102_v55, %v702_v0  ;;  %v704_v7 = vadd.f32 %v703_v1, %v2227_v43 }
 0x131   : > { %v705_v8 = vpop.f32.mrf.mxu0  ;;  %v1106_v56 = vpop.f32.mrf.mxu1  ;;  %v1339_v9 = vmax.f32 %v1275_v62, 0.0 }
 0x132   : > { %1575 = vst [vmem:[%s2245_s10 + $0x90] sm:$0xff] %v1789_v4  ;;  %v1340_v10 = vmax.f32 %v1276_v5, 0.0  ;;  %v706_v11 = vadd.f32 %v705_v8, %v2222_v42  ;;  %v1277_v12 = vadd.f32 %v2230_v47, %v1201_v6  ;;  %v1202_v13 = vadd.f32 %v1104_v3, %v704_v7 }
 0x133   : > { %v707_v14 = vpop.f32.mrf.mxu0  ;;  %v1108_v16 = vpop.f32.mrf.mxu1 }
 0x134   : > { %v1790_v17 = vpack.c.bf16 %v1340_v10, %v1339_v9  ;;  %v1203_v18 = vadd.f32 %v1106_v56, %v706_v11  ;;  %v708_v20 = vadd.f32 %v707_v14, %v2227_v43  ;;  %v1278_v21 = vadd.f32 %v2233_v52, %v1202_v13 }
 0x135   : > { %v711_v22 = vpop.f32.mrf.mxu0  ;;  %v1112_v23 = vpop.f32.mrf.mxu1  ;;  %v1341_v28 = vmax.f32 %v1277_v12, 0.0 }
 0x136   : > { %1576 = vst [vmem:[%s2245_s10 + $0x98] sm:$0xff] %v1790_v17  ;;  %v1279_v24 = vadd.f32 %v2230_v47, %v1203_v18  ;;  %v1204_v26 = vadd.f32 %v1108_v16, %v708_v20  ;;  %v712_v27 = vadd.f32 %v711_v22, %v2222_v42  ;;  %v1342_v29 = vmax.f32 %v1278_v21, 0.0 }
 0x137   : > { %v713_v31 = vpop.f32.mrf.mxu0  ;;  %v1114_v32 = vpop.f32.mrf.mxu1 }
 0x138   : > { %v1280_v19 = vadd.f32 %v2233_v52, %v1204_v26  ;;  %v1205_v33 = vadd.f32 %v1112_v23, %v712_v27  ;;  %v714_v34 = vadd.f32 %v713_v31, %v2227_v43  ;;  %v1791_v15 = vpack.c.bf16 %v1342_v29, %v1341_v28 }
 0x139   : > { %v1343_v25 = vmax.f32 %v1279_v24, 0.0  ;;  %v715_v30 = vpop.f32.mrf.mxu0  ;;  %v1116_v35 = vpop.f32.mrf.mxu1 }
 0x13a   : > { %v1344_v36 = vmax.f32 %v1280_v19, 0.0  ;;  %v1281_v37 = vadd.f32 %v2230_v47, %v1205_v33  ;;  %v1206_v38 = vadd.f32 %v1114_v32, %v714_v34  ;;  %v716_v39 = vadd.f32 %v715_v30, %v2222_v42  ;;  %1577 = vst [vmem:[%s2245_s10 + $0xa0] sm:$0xff] %v1791_v15 }
 0x13b   : > { %v717_v40 = vpop.f32.mrf.mxu0  ;;  %v1118_v41 = vpop.f32.mrf.mxu1 }
 0x13c   : > { %v1792_v2 = vpack.c.bf16 %v1344_v36, %v1343_v25  ;;  %v1282_v44 = vadd.f32 %v2233_v52, %v1206_v38  ;;  %v1207_v45 = vadd.f32 %v1116_v35, %v716_v39  ;;  %v718_v46 = vadd.f32 %v717_v40, %v2227_v43 }
 0x13d   : > { %v721_v48 = vpop.f32.mrf.mxu0  ;;  %v1122_v49 = vpop.f32.mrf.mxu1  ;;  %v1345_v50 = vmax.f32 %v1281_v37, 0.0 }
 0x13e   : > { %1578 = vst [vmem:[%s2245_s10 + $0xa8] sm:$0xff] %v1792_v2  ;;  %v1346_v51 = vmax.f32 %v1282_v44, 0.0  ;;  %v722_v53 = vadd.f32 %v721_v48, %v2222_v42  ;;  %v1283_v54 = vadd.f32 %v2230_v47, %v1207_v45  ;;  %v1208_v57 = vadd.f32 %v1118_v41, %v718_v46 }
 0x13f   : > { %v723_v58 = vpop.f32.mrf.mxu0  ;;  %v1124_v59 = vpop.f32.mrf.mxu1 }
 0x140   : > { %v1793_v60 = vpack.c.bf16 %v1346_v51, %v1345_v50  ;;  %v1209_v55 = vadd.f32 %v1122_v49, %v722_v53  ;;  %v724_v61 = vadd.f32 %v723_v58, %v2227_v43  ;;  %v1284_v62 = vadd.f32 %v2233_v52, %v1208_v57 }
 0x141   : > { %v725_v63 = vpop.f32.mrf.mxu0  ;;  %v1126_v0 = vpop.f32.mrf.mxu1  ;;  %v1347_v5 = vmax.f32 %v1283_v54, 0.0 }
 0x142   : > { %1579 = vst [vmem:[%s2245_s10 + $0xb0] sm:$0xff] %v1793_v60  ;;  %v1285_v1 = vadd.f32 %v2230_v47, %v1209_v55  ;;  %v1210_v3 = vadd.f32 %v1124_v59, %v724_v61  ;;  %v726_v4 = vadd.f32 %v725_v63, %v2222_v42  ;;  %v1348_v6 = vmax.f32 %v1284_v62, 0.0 }
 0x143   : > { %v727_v7 = vpop.f32.mrf.mxu0  ;;  %v1128_v8 = vpop.f32.mrf.mxu1 }
 0x144   : > { %v1286_v56 = vadd.f32 %v2233_v52, %v1210_v3  ;;  %v1211_v9 = vadd.f32 %v1126_v0, %v726_v4  ;;  %v728_v10 = vadd.f32 %v727_v7, %v2227_v43  ;;  %v1794_v11 = vpack.c.bf16 %v1348_v6, %v1347_v5 }
 0x145   : > { %v1349_v12 = vmax.f32 %v1285_v1, 0.0  ;;  %v731_v13 = vpop.f32.mrf.mxu0  ;;  %v1132_v14 = vpop.f32.mrf.mxu1 }
 0x146   : > { %v1350_v16 = vmax.f32 %v1286_v56, 0.0  ;;  %v1287_v17 = vadd.f32 %v2230_v47, %v1211_v9  ;;  %v1212_v18 = vadd.f32 %v1128_v8, %v728_v10  ;;  %v732_v20 = vadd.f32 %v731_v13, %v2222_v42  ;;  %1580 = vst [vmem:[%s2245_s10 + $0xb8] sm:$0xff] %v1794_v11 }
 0x147   : > { %v733_v21 = vpop.f32.mrf.mxu0  ;;  %v1134_v22 = vpop.f32.mrf.mxu1 }
 0x148   : > { %v1795_v23 = vpack.c.bf16 %v1350_v16, %v1349_v12  ;;  %v1288_v24 = vadd.f32 %v2233_v52, %v1212_v18  ;;  %v1213_v26 = vadd.f32 %v1132_v14, %v732_v20  ;;  %v734_v27 = vadd.f32 %v733_v21, %v2227_v43 }
 0x149   : > { %v735_v28 = vpop.f32.mrf.mxu0  ;;  %v1136_v29 = vpop.f32.mrf.mxu1  ;;  %v1351_v31 = vmax.f32 %v1287_v17, 0.0 }
 0x14a   : > { %1581 = vst [vmem:[%s2245_s10 + $0xc0] sm:$0xff] %v1795_v23  ;;  %v1352_v32 = vmax.f32 %v1288_v24, 0.0  ;;  %v736_v19 = vadd.f32 %v735_v28, %v2222_v42  ;;  %v1289_v33 = vadd.f32 %v2230_v47, %v1213_v26  ;;  %v1214_v34 = vadd.f32 %v1134_v22, %v734_v27 }
 0x14b   : > { %v737_v15 = vpop.f32.mrf.mxu0  ;;  %v1138_v25 = vpop.f32.mrf.mxu1 }
 0x14c   : > { %v1796_v30 = vpack.c.bf16 %v1352_v32, %v1351_v31  ;;  %v1215_v35 = vadd.f32 %v1136_v29, %v736_v19  ;;  %v738_v36 = vadd.f32 %v737_v15, %v2227_v43  ;;  %v1290_v37 = vadd.f32 %v2233_v52, %v1214_v34 }
 0x14d   : > { %v741_v38 = vpop.f32.mrf.mxu0  ;;  %v1142_v39 = vpop.f32.mrf.mxu1  ;;  %v1353_v44 = vmax.f32 %v1289_v33, 0.0 }
 0x14e   : > { %1582 = vst [vmem:[%s2245_s10 + $0xc8] sm:$0xff] %v1796_v30  ;;  %v1291_v40 = vadd.f32 %v2230_v47, %v1215_v35  ;;  %v1216_v41 = vadd.f32 %v1138_v25, %v738_v36  ;;  %v742_v2 = vadd.f32 %v741_v38, %v2222_v42  ;;  %v1354_v45 = vmax.f32 %v1290_v37, 0.0 }
 0x14f   : > { %v743_v46 = vpop.f32.mrf.mxu0  ;;  %v1144_v48 = vpop.f32.mrf.mxu1 }
 0x150   : > { %v1292_v49 = vadd.f32 %v2233_v52, %v1216_v41  ;;  %v1217_v50 = vadd.f32 %v1142_v39, %v742_v2  ;;  %v744_v51 = vadd.f32 %v743_v46, %v2227_v43  ;;  %v1797_v53 = vpack.c.bf16 %v1354_v45, %v1353_v44 }
 0x151   : > { %v1355_v54 = vmax.f32 %v1291_v40, 0.0  ;;  %v745_v57 = vpop.f32.mrf.mxu0  ;;  %v1146_v58 = vpop.f32.mrf.mxu1 }
 0x152   : > { %v1356_v59 = vmax.f32 %v1292_v49, 0.0  ;;  %v1293_v60 = vadd.f32 %v2230_v47, %v1217_v50  ;;  %v1218_v55 = vadd.f32 %v1144_v48, %v744_v51  ;;  %v746_v61 = vadd.f32 %v745_v57, %v2222_v42  ;;  %1583 = vst [vmem:[%s2245_s10 + $0xd0] sm:$0xff] %v1797_v53 }
 0x153   : > { %v747_v62 = vpop.f32.mrf.mxu0  ;;  %v1148_v63 = vpop.f32.mrf.mxu1 }
 0x154   : > { %v1798_v0 = vpack.c.bf16 %v1356_v59, %v1355_v54  ;;  %v1294_v1 = vadd.f32 %v2233_v52, %v1218_v55  ;;  %v1219_v3 = vadd.f32 %v1146_v58, %v746_v61  ;;  %v748_v4 = vadd.f32 %v747_v62, %v2227_v43 }
 0x155   : > { %v751_v5 = vpop.f32.mrf.mxu0  ;;  %v1152_v6 = vpop.f32.mrf.mxu1  ;;  %v1357_v7 = vmax.f32 %v1293_v60, 0.0 }
 0x156   : > { %1584 = vst [vmem:[%s2245_s10 + $0xd8] sm:$0xff] %v1798_v0  ;;  %v1358_v8 = vmax.f32 %v1294_v1, 0.0  ;;  %v752_v56 = vadd.f32 %v751_v5, %v2222_v42  ;;  %v1295_v9 = vadd.f32 %v2230_v47, %v1219_v3  ;;  %v1220_v10 = vadd.f32 %v1148_v63, %v748_v4 }
 0x157   : > { %v753_v11 = vpop.f32.mrf.mxu0  ;;  %v1154_v12 = vpop.f32.mrf.mxu1 }
 0x158   : > { %v1799_v13 = vpack.c.bf16 %v1358_v8, %v1357_v7  ;;  %v1221_v14 = vadd.f32 %v1152_v6, %v752_v56  ;;  %v754_v16 = vadd.f32 %v753_v11, %v2227_v43  ;;  %v1296_v17 = vadd.f32 %v2233_v52, %v1220_v10 }
 0x159   : > { %v755_v18 = vpop.f32.mrf.mxu0  ;;  %v1156_v20 = vpop.f32.mrf.mxu1  ;;  %v1359_v24 = vmax.f32 %v1295_v9, 0.0 }
 0x15a   : > { %1585 = vst [vmem:[%s2245_s10 + $0xe0] sm:$0xff] %v1799_v13  ;;  %v1297_v21 = vadd.f32 %v2230_v47, %v1221_v14  ;;  %v1222_v22 = vadd.f32 %v1154_v12, %v754_v16  ;;  %v756_v23 = vadd.f32 %v755_v18, %v2222_v42  ;;  %v1360_v26 = vmax.f32 %v1296_v17, 0.0 }
 0x15b   : > { %v757_v27 = vpop.f32.mrf.mxu0  ;;  %v1158_v19 = vpop.f32.mrf.mxu1 }
 0x15c   : > { %v1298_v28 = vadd.f32 %v2233_v52, %v1222_v22  ;;  %v1223_v29 = vadd.f32 %v1156_v20, %v756_v23  ;;  %v758_v31 = vadd.f32 %v757_v27, %v2227_v43  ;;  %v1800_v32 = vpack.c.bf16 %v1360_v26, %v1359_v24 }
 0x15d   : > { %v1361_v33 = vmax.f32 %v1297_v21, 0.0 }
 0x15e   : > { %v1362_v34 = vmax.f32 %v1298_v28, 0.0  ;;  %v1299_v15 = vadd.f32 %v2230_v47, %v1223_v29  ;;  %v1224_v25 = vadd.f32 %v1158_v19, %v758_v31  ;;  %1586 = vst [vmem:[%s2245_s10 + $0xe8] sm:$0xff] %v1800_v32 }
 0x160   : > { %v1801_v30 = vpack.c.bf16 %v1362_v34, %v1361_v33  ;;  %v1300_v42 = vadd.f32 %v2233_v52, %v1224_v25  ;;  %v1363_v35 = vmax.f32 %v1299_v15, 0.0 }
 0x162   : > { %1587 = vst [vmem:[%s2245_s10 + $0xf0] sm:$0xff] %v1801_v30  ;;  %v1364_v36 = vmax.f32 %v1300_v42, 0.0 }
 0x164   : > { %v1802_v37 = vpack.c.bf16 %v1364_v36, %v1363_v35 }
 0x166   : > { %1588 = vst [vmem:[%s2245_s10 + $0xf8] sm:$0xff] %v1802_v37 }
 0x167 PF: > { %s17_s24 = sadd.s32 1, %s1937_s24  }
 0x168   : > { %p14_p4 = scmp.ge.s32.totalorder %s17_s24, 4  }
 0x16a   :  { %16 = sbr.rel (!%p14_p4) target bundleno = 1 (0x1), region = 81 }

// kernel: _lambda_.17
= control target key start
LH: loop header
LB: loop body
LE: loop exit
PB: predicated region body
PF: predicated region fallthrough
CT: control target
= control target key end

     0   :  { %s1269_s12 = smov 0   ;;  %s1475_s0 = inlined_call_operand.vmem [shape: bf16[512,256], index: 0, kind: input, shape index: {}]   ;;  %s1476_s1 = inlined_call_operand.vmem [shape: bf16[256,64], index: 1, kind: input, shape index: {}]   ;;  %s1477_s2 = inlined_call_operand.vmem [shape: f32[1,64], index: 2, kind: input, shape index: {}]   ;;  %s1478_s3 = inlined_call_operand.vmem [shape: bf16[512,64], index: 3, kind: output, shape index: {}]  }
   0x1 LB: > { %s915_s13 = sadd.s32 4294967295, %s1247_s12   ;;  %p919_p0 = scmp.ge.s32.totalorder %s1247_s12, 1  ;;  %s1247_s12 = sphi %s1269_s12, %s13_s12  }
   0x2   : > { %p139_p1 = scmp.lt.s32.totalorder %s1247_s12, 3 }
   0x4   : > { %p140_p2 = pnand %p919_p0, %p139_p1 }
   0x5   : > { %s920_s16 = sshll.u32 (!%p140_p2), %s915_s13, 5 }
   0x6   : > { %143 = sbr.rel (%p140_p2) target bundleno = 308 (0x134), region = 32  ;;  %p165_p3 = scmp.lt.s32.totalorder (!%p140_p2), %s920_s16, 63 }
   0xb   : > { %v1177_v0 = vld [vmem:[%s1476_s1 + $0x78] sm:$0xff]   ;;  %v1179_v2 = vld [vmem:[%s1476_s1 + $0x70] sm:$0xff]   ;;  %v1181_v4 = vld [vmem:[%s1476_s1 + $0x68] sm:$0xff]   ;;  %s1480_s16 = smov (!%p165_p3, %s920_s16), 63  ;;  %vm826_vm0 = vcmask 519168  }
   0xc   : > { %v1178_v1 = vld [vmem:[%s1476_s1 + $0x38] sm:$0xff]   ;;  %1041 = vmatprep.subr.bf16.mxu0 %v1177_v0  ;;  %1153 = vmatprep.subr.bf16.mxu1 %v1177_v0  ;;  %v1180_v3 = vld [vmem:[%s1476_s1 + $0x30] sm:$0xff]   ;;  %v1182_v5 = vld [vmem:[%s1476_s1 + $0x28] sm:$0xff]   ;;  %s1008_s4 = sshll.u32 %s1480_s16, 3  ;;  %s924_s28 = sshll.u32 %s1480_s16, 2 }
   0xd   : > { %1042 = vmatpush3.bf16.msra.mxu0 %v1178_v1  ;;  %1161 = vmatpush3.bf16.msra.mxu1 %v1178_v1  ;;  %v1183_v6 = vld [vmem:[%s1476_s1 + $0x60] sm:$0xff]   ;;  %v1185_v8 = vld [vmem:[%s1476_s1 + $0x58] sm:$0xff]   ;;  %s1310_s9 = scalar_lea.vmem %s1475_s0, %s1008_s4  ;;  %v1187_v10 = vld [vmem:[%s1476_s1 + $0x50] sm:$0xff]   ;;  %s1376_s4 = scalar_lea.vmem %s1478_s3, %s924_s28 }
   0xe   : > { %1043 = vmatprep.subr.bf16.mxu0 %v1179_v2  ;;  %1154 = vmatprep.subr.bf16.mxu1 %v1179_v2  ;;  %v1184_v7 = vld [vmem:[%s1476_s1 + $0x20] sm:$0xff]   ;;  %v1186_v9 = vld [vmem:[%s1476_s1 + $0x18] sm:$0xff]   ;;  %v1188_v13 = vld [vmem:[%s1476_s1 + $0x10] sm:$0xff]  }
   0xf   : > { %v1195_v11 = vld [vmem:[%s1310_s9 + $0x4] ss:$8 sps:$4 sm:$0xff]   ;;  %v1193_v18 = vld [vmem:[%s1310_s9] ss:$8 sps:$4 sm:$0xff]   ;;  %v1199_v20 = vld [vmem:[%s1310_s9 + $0x14] ss:$8 sps:$4 sm:$0xff]  }
  0x10   : > { %v1198_v12 = vld [vmem:[%s1310_s9 + $0x84] ss:$8 sps:$4 sm:$0xff]   ;;  %537 = vmatprep.mubr.bf16.mxu0 %v1195_v11  ;;  %v1196_v19 = vld [vmem:[%s1310_s9 + $0x80] ss:$8 sps:$4 sm:$0xff]   ;;  %v1201_v21 = vld [vmem:[%s1310_s9 + $0x94] ss:$8 sps:$4 sm:$0xff]  }
  0x11   : > { %1044 = vmatpush3.bf16.msra.mxu0 %v1180_v3  ;;  %1162 = vmatpush3.bf16.msra.mxu1 %v1180_v3  ;;  %v1189_v14 = vld [vmem:[%s1476_s1 + $0x48] sm:$0xff]   ;;  %v1191_v16 = vld [vmem:[%s1476_s1 + $0x40] sm:$0xff]   ;;  %v1203_v22 = vld [vmem:[%s1310_s9 + $0x10] ss:$8 sps:$4 sm:$0xff]  }
  0x12   : > { %1045 = vmatprep.subr.bf16.mxu0 %v1181_v4  ;;  %1155 = vmatprep.subr.bf16.mxu1 %v1181_v4  ;;  %v1190_v15 = vld [vmem:[%s1476_s1 + $0x8] sm:$0xff]   ;;  %v1192_v17 = vld [vmem:[%s1476_s1] sm:$0xff]   ;;  %v1204_v23 = vld [vmem:[%s1310_s9 + $0x90] ss:$8 sps:$4 sm:$0xff]  }
  0x13   : > { %601 = vmatprep.mubr.bf16.mxu1 %v1198_v12  ;;  %v1205_v24 = vld [vmem:[%s1310_s9 + $0x24] ss:$8 sps:$4 sm:$0xff]   ;;  %v1209_v26 = vld [vmem:[%s1310_s9 + $0x20] ss:$8 sps:$4 sm:$0xff]   ;;  %v1211_v28 = vld [vmem:[%s1310_s9 + $0x34] ss:$8 sps:$4 sm:$0xff]  }
  0x14   : > { %v1207_v25 = vld [vmem:[%s1310_s9 + $0xa4] ss:$8 sps:$4 sm:$0xff]   ;;  %v1210_v27 = vld [vmem:[%s1310_s9 + $0xa0] ss:$8 sps:$4 sm:$0xff]   ;;  %v1213_v29 = vld [vmem:[%s1310_s9 + $0xb4] ss:$8 sps:$4 sm:$0xff]  }
  0x15   : > { %1046 = vmatpush3.bf16.msra.mxu0 %v1182_v5  ;;  %1163 = vmatpush3.bf16.msra.mxu1 %v1182_v5  ;;  %v1215_v30 = vld [vmem:[%s1310_s9 + $0x30] ss:$8 sps:$4 sm:$0xff]   ;;  %v1217_v32 = vld [vmem:[%s1310_s9 + $0x44] ss:$8 sps:$4 sm:$0xff]   ;;  %v1221_v34 = vld [vmem:[%s1310_s9 + $0x40] ss:$8 sps:$4 sm:$0xff]  }
  0x16   : > { %1047 = vmatprep.subr.bf16.mxu0 %v1183_v6  ;;  %1156 = vmatprep.subr.bf16.mxu1 %v1183_v6  ;;  %v1216_v31 = vld [vmem:[%s1310_s9 + $0xb0] ss:$8 sps:$4 sm:$0xff]   ;;  %v1219_v33 = vld [vmem:[%s1310_s9 + $0xc4] ss:$8 sps:$4 sm:$0xff]   ;;  %v1222_v35 = vld [vmem:[%s1310_s9 + $0xc0] ss:$8 sps:$4 sm:$0xff]  }
  0x17   : > { %v1223_v36 = vld [vmem:[%s1310_s9 + $0x54] ss:$8 sps:$4 sm:$0xff]   ;;  %v1227_v38 = vld [vmem:[%s1310_s9 + $0x50] ss:$8 sps:$4 sm:$0xff]   ;;  %v1229_v40 = vld [vmem:[%s1310_s9 + $0x64] ss:$8 sps:$4 sm:$0xff]  }
  0x18   : > { %v1225_v37 = vld [vmem:[%s1310_s9 + $0xd4] ss:$8 sps:$4 sm:$0xff]   ;;  %v1228_v39 = vld [vmem:[%s1310_s9 + $0xd0] ss:$8 sps:$4 sm:$0xff]   ;;  %v1231_v41 = vld [vmem:[%s1310_s9 + $0xe4] ss:$8 sps:$4 sm:$0xff]  }
  0x19   : > { %1048 = vmatpush3.bf16.msra.mxu0 %v1184_v7  ;;  %1164 = vmatpush3.bf16.msra.mxu1 %v1184_v7  ;;  %v1233_v42 = vld [vmem:[%s1310_s9 + $0x60] ss:$8 sps:$4 sm:$0xff]   ;;  %v1235_v44 = vld [vmem:[%s1310_s9 + $0x74] ss:$8 sps:$4 sm:$0xff]   ;;  %v1239_v46 = vld [vmem:[%s1310_s9 + $0x70] ss:$8 sps:$4 sm:$0xff]  }
  0x1a   : > { %1049 = vmatprep.subr.bf16.mxu0 %v1185_v8  ;;  %1157 = vmatprep.subr.bf16.mxu1 %v1185_v8  ;;  %v1234_v43 = vld [vmem:[%s1310_s9 + $0xe0] ss:$8 sps:$4 sm:$0xff]   ;;  %v1237_v45 = vld [vmem:[%s1310_s9 + $0xf4] ss:$8 sps:$4 sm:$0xff]   ;;  %v1240_v47 = vld [vmem:[%s1310_s9 + $0xf0] ss:$8 sps:$4 sm:$0xff]  }
  0x1b   : > { %v1368_v50 = vld [vmem:[%s1477_s2] ss:$0 sm:$0xff] }
  0x1d   : > { %1050 = vmatpush3.bf16.msra.mxu0 %v1186_v9  ;;  %1165 = vmatpush3.bf16.msra.mxu1 %v1186_v9 }
  0x1e   : > { %1051 = vmatprep.subr.bf16.mxu0 %v1187_v10  ;;  %1158 = vmatprep.subr.bf16.mxu1 %v1187_v10 }
  0x21   : > { %1052 = vmatpush3.bf16.msra.mxu0 %v1188_v13  ;;  %1166 = vmatpush3.bf16.msra.mxu1 %v1188_v13 }
  0x22   : > { %1053 = vmatprep.subr.bf16.mxu0 %v1189_v14  ;;  %1159 = vmatprep.subr.bf16.mxu1 %v1189_v14 }
  0x25   : > { %1054 = vmatpush3.bf16.msra.mxu0 %v1190_v15  ;;  %1167 = vmatpush3.bf16.msra.mxu1 %v1190_v15 }
  0x26   : > { %1055 = vmatprep.subr.bf16.mxu0 %v1191_v16  ;;  %1160 = vmatprep.subr.bf16.mxu1 %v1191_v16 }
  0x29   : > { %1056 = vmatpush3.bf16.msra.mxu0 %v1192_v17  ;;  %1168 = vmatpush3.bf16.msra.mxu1 %v1192_v17 }
  0x2c   : > { %538 = vmatmul.mubr.bf16.vlgmr.msra.gmra.mxu0 %v1193_v18  ;;  %602 = vmatmul.mubr.bf16.vlgmr.msra.gmra.mxu1 %v1196_v19 }
  0x2d   : > { %545 = vmatprep.mubr.bf16.mxu0 %v1199_v20  ;;  %609 = vmatprep.mubr.bf16.mxu1 %v1201_v21 }
  0x34   : > { %546 = vmatmul.mubr.bf16.gmra.mxu0 %v1203_v22  ;;  %610 = vmatmul.mubr.bf16.gmra.mxu1 %v1204_v23 }
  0x35   : > { %553 = vmatprep.mubr.bf16.mxu0 %v1205_v24  ;;  %617 = vmatprep.mubr.bf16.mxu1 %v1207_v25 }
  0x3c   : > { %554 = vmatmul.mubr.bf16.gmra.mxu0 %v1209_v26  ;;  %618 = vmatmul.mubr.bf16.gmra.mxu1 %v1210_v27 }
  0x3d   : > { %561 = vmatprep.mubr.bf16.mxu0 %v1211_v28  ;;  %625 = vmatprep.mubr.bf16.mxu1 %v1213_v29 }
  0x44   : > { %562 = vmatmul.mubr.bf16.gmra.mxu0 %v1215_v30  ;;  %626 = vmatmul.mubr.bf16.gmra.mxu1 %v1216_v31 }
  0x45   : > { %569 = vmatprep.mubr.bf16.mxu0 %v1217_v32  ;;  %633 = vmatprep.mubr.bf16.mxu1 %v1219_v33 }
  0x4c   : > { %570 = vmatmul.mubr.bf16.gmra.mxu0 %v1221_v34  ;;  %634 = vmatmul.mubr.bf16.gmra.mxu1 %v1222_v35 }
  0x4d   : > { %577 = vmatprep.mubr.bf16.mxu0 %v1223_v36  ;;  %641 = vmatprep.mubr.bf16.mxu1 %v1225_v37 }
  0x54   : > { %578 = vmatmul.mubr.bf16.gmra.mxu0 %v1227_v38  ;;  %642 = vmatmul.mubr.bf16.gmra.mxu1 %v1228_v39 }
  0x55   : > { %585 = vmatprep.mubr.bf16.mxu0 %v1229_v40  ;;  %649 = vmatprep.mubr.bf16.mxu1 %v1231_v41 }
  0x5c   : > { %586 = vmatmul.mubr.bf16.gmra.mxu0 %v1233_v42  ;;  %650 = vmatmul.mubr.bf16.gmra.mxu1 %v1234_v43 }
  0x5d   : > { %593 = vmatprep.mubr.bf16.mxu0 %v1235_v44  ;;  %657 = vmatprep.mubr.bf16.mxu1 %v1237_v45 }
  0x64   : > { %594 = vmatmul.mubr.bf16.gmra.mxu0 %v1239_v46  ;;  %658 = vmatmul.mubr.bf16.gmra.mxu1 %v1240_v47 }
  0xec   : > { %v1057_v48 = vpop.f32.mrf.mxu0  ;;  %v1105_v49 = vpop.f32.mrf.mxu1 }
  0xee   : > { %v1058_v51 = vpop.f32.mrf.mxu0  ;;  %v1106_v52 = vpop.f32.mrf.mxu1 }
  0xef   : > { %v1059_v53 = vadd.f32 %v1058_v51, %v1057_v48  ;;  %v1107_v54 = vadd.f32 %v1106_v52, %v1105_v49 }
  0xf0   : > { %v1060_v55 = vpop.f32.mrf.mxu0  ;;  %v1108_v56 = vpop.f32.mrf.mxu1 }
  0xf1   : > { %v540_v57 = vadd.f32 %v1059_v53, %v1368_v50  ;;  %v604_v58 = vadd.f32 %v1107_v54, %v1368_v50 }
  0xf2   : > { %v1061_v59 = vpop.f32.mrf.mxu0  ;;  %v1109_v60 = vpop.f32.mrf.mxu1 }
  0xf3   : > { %v666_v61 = vmax.f32 %v540_v57, 0.0  ;;  %v682_v62 = vmax.f32 %v604_v58, 0.0  ;;  %v1062_v63 = vadd.f32 %v1061_v59, %v1060_v55  ;;  %v1110_v0 = vadd.f32 %v1109_v60, %v1108_v56 }
  0xf4   : > { %v1063_v1 = vpop.f32.mrf.mxu0  ;;  %v1111_v2 = vpop.f32.mrf.mxu1 }
  0xf5   : > { %v1009_v3 = vpack.c.bf16 %v666_v61, %v666_v61  ;;  %v1025_v4 = vpack.c.bf16 %v682_v62, %v682_v62  ;;  %v543_v5 = vadd.f32 %v1062_v63, %v1368_v50  ;;  %v607_v6 = vadd.f32 %v1110_v0, %v1368_v50 }
  0xf6   : > { %v1064_v7 = vpop.f32.mrf.mxu0  ;;  %v1112_v8 = vpop.f32.mrf.mxu1 }
  0xf7   : > { %827 = vst.msk [vmem:[%s1376_s4] sm:$0xf] %vm826_vm0, %v1009_v3  ;;  %843 = vst.msk [vmem:[%s1376_s4 + $0x40] sm:$0xf] %vm826_vm0, %v1025_v4  ;;  %v667_v9 = vmax.f32 %v543_v5, 0.0  ;;  %v683_v10 = vmax.f32 %v607_v6, 0.0  ;;  %v1065_v11 = vadd.f32 %v1064_v7, %v1063_v1  ;;  %v1113_v12 = vadd.f32 %v1112_v8, %v1111_v2 }
  0xf8   : > { %v1066_v13 = vpop.f32.mrf.mxu0  ;;  %v1114_v14 = vpop.f32.mrf.mxu1 }
  0xf9   : > { %v1010_v15 = vpack.c.bf16 %v667_v9, %v667_v9  ;;  %v1026_v16 = vpack.c.bf16 %v683_v10, %v683_v10  ;;  %v548_v17 = vadd.f32 %v1065_v11, %v1368_v50  ;;  %v612_v18 = vadd.f32 %v1113_v12, %v1368_v50 }
  0xfa   : > { %v1067_v19 = vpop.f32.mrf.mxu0  ;;  %v1115_v20 = vpop.f32.mrf.mxu1 }
  0xfb   : > { %828 = vst.msk [vmem:[%s1376_s4 + $0x4] sm:$0xf] %vm826_vm0, %v1010_v15  ;;  %844 = vst.msk [vmem:[%s1376_s4 + $0x44] sm:$0xf] %vm826_vm0, %v1026_v16  ;;  %v668_v21 = vmax.f32 %v548_v17, 0.0  ;;  %v684_v22 = vmax.f32 %v612_v18, 0.0  ;;  %v1068_v23 = vadd.f32 %v1067_v19, %v1066_v13  ;;  %v1116_v24 = vadd.f32 %v1115_v20, %v1114_v14 }
  0xfc   : > { %v1069_v25 = vpop.f32.mrf.mxu0  ;;  %v1117_v26 = vpop.f32.mrf.mxu1 }
  0xfd   : > { %v1011_v27 = vpack.c.bf16 %v668_v21, %v668_v21  ;;  %v1027_v28 = vpack.c.bf16 %v684_v22, %v684_v22  ;;  %v551_v29 = vadd.f32 %v1068_v23, %v1368_v50  ;;  %v615_v30 = vadd.f32 %v1116_v24, %v1368_v50 }
  0xfe   : > { %v1070_v31 = vpop.f32.mrf.mxu0  ;;  %v1118_v32 = vpop.f32.mrf.mxu1 }
  0xff   : > { %829 = vst.msk [vmem:[%s1376_s4 + $0x8] sm:$0xf] %vm826_vm0, %v1011_v27  ;;  %845 = vst.msk [vmem:[%s1376_s4 + $0x48] sm:$0xf] %vm826_vm0, %v1027_v28  ;;  %v669_v33 = vmax.f32 %v551_v29, 0.0  ;;  %v685_v34 = vmax.f32 %v615_v30, 0.0  ;;  %v1071_v35 = vadd.f32 %v1070_v31, %v1069_v25  ;;  %v1119_v36 = vadd.f32 %v1118_v32, %v1117_v26 }
 0x100   : > { %v1072_v37 = vpop.f32.mrf.mxu0  ;;  %v1120_v38 = vpop.f32.mrf.mxu1 }
 0x101   : > { %v1012_v39 = vpack.c.bf16 %v669_v33, %v669_v33  ;;  %v1028_v40 = vpack.c.bf16 %v685_v34, %v685_v34  ;;  %v556_v41 = vadd.f32 %v1071_v35, %v1368_v50  ;;  %v620_v42 = vadd.f32 %v1119_v36, %v1368_v50 }
 0x102   : > { %v1073_v43 = vpop.f32.mrf.mxu0  ;;  %v1121_v44 = vpop.f32.mrf.mxu1 }
 0x103   : > { %830 = vst.msk [vmem:[%s1376_s4 + $0xc] sm:$0xf] %vm826_vm0, %v1012_v39  ;;  %846 = vst.msk [vmem:[%s1376_s4 + $0x4c] sm:$0xf] %vm826_vm0, %v1028_v40  ;;  %v670_v45 = vmax.f32 %v556_v41, 0.0  ;;  %v686_v46 = vmax.f32 %v620_v42, 0.0  ;;  %v1074_v47 = vadd.f32 %v1073_v43, %v1072_v37  ;;  %v1122_v48 = vadd.f32 %v1121_v44, %v1120_v38 }
 0x104   : > { %v1075_v49 = vpop.f32.mrf.mxu0  ;;  %v1123_v51 = vpop.f32.mrf.mxu1 }
 0x105   : > { %v1013_v52 = vpack.c.bf16 %v670_v45, %v670_v45  ;;  %v1029_v53 = vpack.c.bf16 %v686_v46, %v686_v46  ;;  %v559_v54 = vadd.f32 %v1074_v47, %v1368_v50  ;;  %v623_v55 = vadd.f32 %v1122_v48, %v1368_v50 }
 0x106   : > { %v1076_v56 = vpop.f32.mrf.mxu0  ;;  %v1124_v57 = vpop.f32.mrf.mxu1 }
 0x107   : > { %831 = vst.msk [vmem:[%s1376_s4 + $0x10] sm:$0xf] %vm826_vm0, %v1013_v52  ;;  %847 = vst.msk [vmem:[%s1376_s4 + $0x50] sm:$0xf] %vm826_vm0, %v1029_v53  ;;  %v671_v58 = vmax.f32 %v559_v54, 0.0  ;;  %v687_v59 = vmax.f32 %v623_v55, 0.0  ;;  %v1077_v60 = vadd.f32 %v1076_v56, %v1075_v49  ;;  %v1125_v61 = vadd.f32 %v1124_v57, %v1123_v51 }
 0x108   : > { %v1078_v62 = vpop.f32.mrf.mxu0  ;;  %v1126_v63 = vpop.f32.mrf.mxu1 }
 0x109   : > { %v1014_v0 = vpack.c.bf16 %v671_v58, %v671_v58  ;;  %v1030_v1 = vpack.c.bf16 %v687_v59, %v687_v59  ;;  %v564_v2 = vadd.f32 %v1077_v60, %v1368_v50  ;;  %v628_v3 = vadd.f32 %v1125_v61, %v1368_v50 }
 0x10a   : > { %v1079_v4 = vpop.f32.mrf.mxu0  ;;  %v1127_v5 = vpop.f32.mrf.mxu1 }
 0x10b   : > { %832 = vst.msk [vmem:[%s1376_s4 + $0x14] sm:$0xf] %vm826_vm0, %v1014_v0  ;;  %848 = vst.msk [vmem:[%s1376_s4 + $0x54] sm:$0xf] %vm826_vm0, %v1030_v1  ;;  %v672_v6 = vmax.f32 %v564_v2, 0.0  ;;  %v688_v7 = vmax.f32 %v628_v3, 0.0  ;;  %v1080_v8 = vadd.f32 %v1079_v4, %v1078_v62  ;;  %v1128_v9 = vadd.f32 %v1127_v5, %v1126_v63 }
 0x10c   : > { %v1081_v10 = vpop.f32.mrf.mxu0  ;;  %v1129_v11 = vpop.f32.mrf.mxu1 }
 0x10d   : > { %v1015_v12 = vpack.c.bf16 %v672_v6, %v672_v6  ;;  %v1031_v13 = vpack.c.bf16 %v688_v7, %v688_v7  ;;  %v567_v14 = vadd.f32 %v1080_v8, %v1368_v50  ;;  %v631_v15 = vadd.f32 %v1128_v9, %v1368_v50 }
 0x10e   : > { %v1082_v16 = vpop.f32.mrf.mxu0  ;;  %v1130_v17 = vpop.f32.mrf.mxu1 }
 0x10f   : > { %833 = vst.msk [vmem:[%s1376_s4 + $0x18] sm:$0xf] %vm826_vm0, %v1015_v12  ;;  %849 = vst.msk [vmem:[%s1376_s4 + $0x58] sm:$0xf] %vm826_vm0, %v1031_v13  ;;  %v673_v18 = vmax.f32 %v567_v14, 0.0  ;;  %v689_v19 = vmax.f32 %v631_v15, 0.0  ;;  %v1083_v20 = vadd.f32 %v1082_v16, %v1081_v10  ;;  %v1131_v21 = vadd.f32 %v1130_v17, %v1129_v11 }
 0x110   : > { %v1084_v22 = vpop.f32.mrf.mxu0  ;;  %v1132_v23 = vpop.f32.mrf.mxu1 }
 0x111   : > { %v1016_v24 = vpack.c.bf16 %v673_v18, %v673_v18  ;;  %v1032_v25 = vpack.c.bf16 %v689_v19, %v689_v19  ;;  %v572_v26 = vadd.f32 %v1083_v20, %v1368_v50  ;;  %v636_v27 = vadd.f32 %v1131_v21, %v1368_v50 }
 0x112   : > { %v1085_v28 = vpop.f32.mrf.mxu0  ;;  %v1133_v29 = vpop.f32.mrf.mxu1 }
 0x113   : > { %834 = vst.msk [vmem:[%s1376_s4 + $0x1c] sm:$0xf] %vm826_vm0, %v1016_v24  ;;  %850 = vst.msk [vmem:[%s1376_s4 + $0x5c] sm:$0xf] %vm826_vm0, %v1032_v25  ;;  %v674_v30 = vmax.f32 %v572_v26, 0.0  ;;  %v690_v31 = vmax.f32 %v636_v27, 0.0  ;;  %v1086_v32 = vadd.f32 %v1085_v28, %v1084_v22  ;;  %v1134_v33 = vadd.f32 %v1133_v29, %v1132_v23 }
 0x114   : > { %v1087_v34 = vpop.f32.mrf.mxu0  ;;  %v1135_v35 = vpop.f32.mrf.mxu1 }
 0x115   : > { %v1017_v36 = vpack.c.bf16 %v674_v30, %v674_v30  ;;  %v1033_v37 = vpack.c.bf16 %v690_v31, %v690_v31  ;;  %v575_v38 = vadd.f32 %v1086_v32, %v1368_v50  ;;  %v639_v39 = vadd.f32 %v1134_v33, %v1368_v50 }
 0x116   : > { %v1088_v40 = vpop.f32.mrf.mxu0  ;;  %v1136_v41 = vpop.f32.mrf.mxu1 }
 0x117   : > { %835 = vst.msk [vmem:[%s1376_s4 + $0x20] sm:$0xf] %vm826_vm0, %v1017_v36  ;;  %851 = vst.msk [vmem:[%s1376_s4 + $0x60] sm:$0xf] %vm826_vm0, %v1033_v37  ;;  %v675_v42 = vmax.f32 %v575_v38, 0.0  ;;  %v691_v43 = vmax.f32 %v639_v39, 0.0  ;;  %v1089_v44 = vadd.f32 %v1088_v40, %v1087_v34  ;;  %v1137_v45 = vadd.f32 %v1136_v41, %v1135_v35 }
 0x118   : > { %v1090_v46 = vpop.f32.mrf.mxu0  ;;  %v1138_v47 = vpop.f32.mrf.mxu1 }
 0x119   : > { %v1018_v48 = vpack.c.bf16 %v675_v42, %v675_v42  ;;  %v1034_v49 = vpack.c.bf16 %v691_v43, %v691_v43  ;;  %v580_v51 = vadd.f32 %v1089_v44, %v1368_v50  ;;  %v644_v52 = vadd.f32 %v1137_v45, %v1368_v50 }
 0x11a   : > { %v1091_v53 = vpop.f32.mrf.mxu0  ;;  %v1139_v54 = vpop.f32.mrf.mxu1 }
 0x11b   : > { %836 = vst.msk [vmem:[%s1376_s4 + $0x24] sm:$0xf] %vm826_vm0, %v1018_v48  ;;  %852 = vst.msk [vmem:[%s1376_s4 + $0x64] sm:$0xf] %vm826_vm0, %v1034_v49  ;;  %v676_v55 = vmax.f32 %v580_v51, 0.0  ;;  %v692_v56 = vmax.f32 %v644_v52, 0.0  ;;  %v1092_v57 = vadd.f32 %v1091_v53, %v1090_v46  ;;  %v1140_v58 = vadd.f32 %v1139_v54, %v1138_v47 }
 0x11c   : > { %v1093_v59 = vpop.f32.mrf.mxu0  ;;  %v1141_v60 = vpop.f32.mrf.mxu1 }
 0x11d   : > { %v1019_v61 = vpack.c.bf16 %v676_v55, %v676_v55  ;;  %v1035_v62 = vpack.c.bf16 %v692_v56, %v692_v56  ;;  %v583_v63 = vadd.f32 %v1092_v57, %v1368_v50  ;;  %v647_v0 = vadd.f32 %v1140_v58, %v1368_v50 }
 0x11e   : > { %v1094_v1 = vpop.f32.mrf.mxu0  ;;  %v1142_v2 = vpop.f32.mrf.mxu1 }
 0x11f   : > { %837 = vst.msk [vmem:[%s1376_s4 + $0x28] sm:$0xf] %vm826_vm0, %v1019_v61  ;;  %853 = vst.msk [vmem:[%s1376_s4 + $0x68] sm:$0xf] %vm826_vm0, %v1035_v62  ;;  %v677_v3 = vmax.f32 %v583_v63, 0.0  ;;  %v693_v4 = vmax.f32 %v647_v0, 0.0  ;;  %v1095_v5 = vadd.f32 %v1094_v1, %v1093_v59  ;;  %v1143_v6 = vadd.f32 %v1142_v2, %v1141_v60 }
 0x120   : > { %v1096_v7 = vpop.f32.mrf.mxu0  ;;  %v1144_v8 = vpop.f32.mrf.mxu1 }
 0x121   : > { %v1020_v9 = vpack.c.bf16 %v677_v3, %v677_v3  ;;  %v1036_v10 = vpack.c.bf16 %v693_v4, %v693_v4  ;;  %v588_v11 = vadd.f32 %v1095_v5, %v1368_v50  ;;  %v652_v12 = vadd.f32 %v1143_v6, %v1368_v50 }
 0x122   : > { %v1097_v13 = vpop.f32.mrf.mxu0  ;;  %v1145_v14 = vpop.f32.mrf.mxu1 }
 0x123   : > { %838 = vst.msk [vmem:[%s1376_s4 + $0x2c] sm:$0xf] %vm826_vm0, %v1020_v9  ;;  %854 = vst.msk [vmem:[%s1376_s4 + $0x6c] sm:$0xf] %vm826_vm0, %v1036_v10  ;;  %v678_v15 = vmax.f32 %v588_v11, 0.0  ;;  %v694_v16 = vmax.f32 %v652_v12, 0.0  ;;  %v1098_v17 = vadd.f32 %v1097_v13, %v1096_v7  ;;  %v1146_v18 = vadd.f32 %v1145_v14, %v1144_v8 }
 0x124   : > { %v1099_v19 = vpop.f32.mrf.mxu0  ;;  %v1147_v20 = vpop.f32.mrf.mxu1 }
 0x125   : > { %v1021_v21 = vpack.c.bf16 %v678_v15, %v678_v15  ;;  %v1037_v22 = vpack.c.bf16 %v694_v16, %v694_v16  ;;  %v591_v23 = vadd.f32 %v1098_v17, %v1368_v50  ;;  %v655_v24 = vadd.f32 %v1146_v18, %v1368_v50 }
 0x126   : > { %v1100_v25 = vpop.f32.mrf.mxu0  ;;  %v1148_v26 = vpop.f32.mrf.mxu1 }
 0x127   : > { %839 = vst.msk [vmem:[%s1376_s4 + $0x30] sm:$0xf] %vm826_vm0, %v1021_v21  ;;  %855 = vst.msk [vmem:[%s1376_s4 + $0x70] sm:$0xf] %vm826_vm0, %v1037_v22  ;;  %v679_v27 = vmax.f32 %v591_v23, 0.0  ;;  %v695_v28 = vmax.f32 %v655_v24, 0.0  ;;  %v1101_v29 = vadd.f32 %v1100_v25, %v1099_v19  ;;  %v1149_v30 = vadd.f32 %v1148_v26, %v1147_v20 }
 0x128   : > { %v1102_v31 = vpop.f32.mrf.mxu0  ;;  %v1150_v32 = vpop.f32.mrf.mxu1 }
 0x129   : > { %v1022_v33 = vpack.c.bf16 %v679_v27, %v679_v27  ;;  %v1038_v34 = vpack.c.bf16 %v695_v28, %v695_v28  ;;  %v596_v35 = vadd.f32 %v1101_v29, %v1368_v50  ;;  %v660_v36 = vadd.f32 %v1149_v30, %v1368_v50 }
 0x12a   : > { %v1103_v37 = vpop.f32.mrf.mxu0  ;;  %v1151_v38 = vpop.f32.mrf.mxu1 }
 0x12b   : > { %840 = vst.msk [vmem:[%s1376_s4 + $0x34] sm:$0xf] %vm826_vm0, %v1022_v33  ;;  %856 = vst.msk [vmem:[%s1376_s4 + $0x74] sm:$0xf] %vm826_vm0, %v1038_v34  ;;  %v680_v39 = vmax.f32 %v596_v35, 0.0  ;;  %v696_v40 = vmax.f32 %v660_v36, 0.0  ;;  %v1104_v41 = vadd.f32 %v1103_v37, %v1102_v31  ;;  %v1152_v42 = vadd.f32 %v1151_v38, %v1150_v32 }
 0x12d   : > { %v1023_v43 = vpack.c.bf16 %v680_v39, %v680_v39  ;;  %v1039_v44 = vpack.c.bf16 %v696_v40, %v696_v40  ;;  %v599_v45 = vadd.f32 %v1104_v41, %v1368_v50  ;;  %v663_v46 = vadd.f32 %v1152_v42, %v1368_v50 }
 0x12f   : > { %841 = vst.msk [vmem:[%s1376_s4 + $0x38] sm:$0xf] %vm826_vm0, %v1023_v43  ;;  %857 = vst.msk [vmem:[%s1376_s4 + $0x78] sm:$0xf] %vm826_vm0, %v1039_v44  ;;  %v681_v47 = vmax.f32 %v599_v45, 0.0  ;;  %v697_v48 = vmax.f32 %v663_v46, 0.0 }
 0x131   : > { %v1024_v49 = vpack.c.bf16 %v681_v47, %v681_v47  ;;  %v1040_v51 = vpack.c.bf16 %v697_v48, %v697_v48 }
 0x133   : > { %842 = vst.msk [vmem:[%s1376_s4 + $0x3c] sm:$0xf] %vm826_vm0, %v1024_v49  ;;  %858 = vst.msk [vmem:[%s1376_s4 + $0x7c] sm:$0xf] %vm826_vm0, %v1040_v51 }
 0x134 PF: > { %s13_s12 = sadd.s32 1, %s1247_s12  }
 0x135   : > { %p10_p4 = scmp.ge.s32.totalorder %s13_s12, 4  }
 0x137   :  { %12 = sbr.rel (!%p10_p4) target bundleno = 1 (0x1), region = 62 }

// kernel: _lambda_.18
= control target key start
LH: loop header
LB: loop body
LE: loop exit
PB: predicated region body
PF: predicated region fallthrough
CT: control target
= control target key end

     0   :  { %s1480_s18 = smov 0   ;;  %s1994_s0 = inlined_call_operand.vmem [shape: bf16[512,64], index: 0, kind: input, shape index: {}]   ;;  %s1995_s1 = inlined_call_operand.vmem [shape: f32[1,64], index: 1, kind: input, shape index: {}]   ;;  %s1996_s2 = inlined_call_operand.vmem [shape: bf16[64,256], index: 2, kind: input, shape index: {}]   ;;  %s1997_s3 = inlined_call_operand.vmem [shape: f32[1,256], index: 3, kind: input, shape index: {}]   ;;  %s1998_s4 = inlined_call_operand.vmem [shape: bf16[512,256], index: 4, kind: input, shape index: {}]   ;;  %s1999_s5 = inlined_call_operand.vmem [shape: bf16[512,256], index: 5, kind: output, shape index: {}]  }
   0x1 LB: > { %s1227_s19 = sadd.s32 4294967295, %s1447_s18   ;;  %p1231_p0 = scmp.ge.s32.totalorder %s1447_s18, 1  ;;  %s1447_s18 = sphi %s1480_s18, %s15_s18  }
   0x2   : > { %p200_p1 = scmp.lt.s32.totalorder %s1447_s18, 3 }
   0x4   : > { %p201_p2 = pnand %p1231_p0, %p200_p1 }
   0x5   : > { %s1232_s22 = sshll.u32 (!%p201_p2), %s1227_s19, 5 }
   0x6   : > { %204 = sbr.rel (%p201_p2) target bundleno = 295 (0x127), region = 40  ;;  %p236_p3 = scmp.lt.s32.totalorder (!%p201_p2), %s1232_s22, 63 }
   0xb   : > { %v1429_v0 = vld [vmem:[%s1996_s2 + $0x34] ss:$8 sps:$4 sm:$0xff]   ;;  %v1431_v1 = vld [vmem:[%s1996_s2 + $0x30] ss:$8 sps:$4 sm:$0xff]   ;;  %v1449_v2 = vmov 0   ;;  %s2009_s22 = smov (!%p236_p3, %s1232_s22), 63 }
   0xc   : > { %548 = vmatprep.mubr.bf16.mxu0 %v1449_v2  ;;  %628 = vmatprep.mubr.bf16.mxu1 %v1449_v2  ;;  %v1432_v3 = vld [vmem:[%s1996_s2 + $0x24] ss:$8 sps:$4 sm:$0xff]   ;;  %v1434_v4 = vld [vmem:[%s1996_s2 + $0x20] ss:$8 sps:$4 sm:$0xff]   ;;  %v1435_v5 = vld [vmem:[%s1996_s2 + $0x14] ss:$8 sps:$4 sm:$0xff]  }
   0xd   : > { %524 = vmatprep.subr.bf16.mxu0 %v1429_v0  ;;  %1412 = vmatprep.subr.bf16.mxu1 %v1429_v0  ;;  %s1233_s6 = sshll.u32 %s2009_s22, 2  ;;  %v1437_v6 = vld [vmem:[%s1996_s2 + $0x10] ss:$8 sps:$4 sm:$0xff]   ;;  %v1519_v7 = vld [vmem:[%s1995_s1] ss:$0 sm:$0xff]  ;;  %vm467_vm0 = vcmask 523264  }
   0xe   : > { %525 = vmatpush1.bf16.msra.mxu0 %v1431_v1  ;;  %1416 = vmatpush1.bf16.msra.mxu1 %v1431_v1  ;;  %s1514_s11 = scalar_lea.vmem %s1994_s0, %s1233_s6  ;;  %v1438_v11 = vld [vmem:[%s1996_s2 + $0x4] ss:$8 sps:$4 sm:$0xff]   ;;  %v1440_v25 = vld [vmem:[%s1996_s2] ss:$8 sps:$4 sm:$0xff]   ;;  %s1299_s19 = sshll.u32 %s2009_s22, 3 }
   0xf   : > { %526 = vmatprep.subr.bf16.mxu0 %v1432_v3  ;;  %1413 = vmatprep.subr.bf16.mxu1 %v1432_v3  ;;  %v1334_v8 = vld [vmem:[%s1514_s11] sm:$0xff]   ;;  %v1397_v10 = vld [vmem:[%s1514_s11 + $0x8] sm:$0xff]   ;;  %v1398_v36 = vld [vmem:[%s1514_s11 + $0x10] sm:$0xff]   ;;  %s1611_s23 = scalar_lea.vmem %s1998_s4, %s1299_s19  ;;  %s1729_s28 = scalar_lea.vmem %s1999_s5, %s1299_s19 }
  0x10   : > { %v1404_v9 = vld [vmem:[%s1514_s11 + $0x40] sm:$0xff]   ;;  %v1335_v12 = vunpack.c.l.bf16 %v1334_v8  ;;  %v1336_v13 = vunpack.c.h.bf16 %v1334_v8  ;;  %v1405_v16 = vld [vmem:[%s1514_s11 + $0x48] sm:$0xff]   ;;  %v1339_v17 = vunpack.c.l.bf16 %v1397_v10  ;;  %v1340_v18 = vunpack.c.h.bf16 %v1397_v10  ;;  %v1406_v37 = vld [vmem:[%s1514_s11 + $0x50] sm:$0xff]  }
  0x11   : > { %v1367_v14 = vunpack.c.l.bf16 %v1404_v9  ;;  %v1368_v15 = vunpack.c.h.bf16 %v1404_v9  ;;  %v1371_v19 = vunpack.c.l.bf16 %v1405_v16  ;;  %v1372_v20 = vunpack.c.h.bf16 %v1405_v16  ;;  %v1399_v52 = vld [vmem:[%s1514_s11 + $0x18] sm:$0xff]  }
  0x12   : > { %527 = vmatpush1.bf16.msra.mxu0 %v1434_v4  ;;  %1417 = vmatpush1.bf16.msra.mxu1 %v1434_v4  ;;  %v327_v21 = vadd.f32 %v1335_v12, %v1519_v7  ;;  %v328_v22 = vadd.f32 %v1336_v13, %v1519_v7  ;;  %v329_v30 = vadd.f32 %v1339_v17, %v1519_v7  ;;  %v1343_v41 = vunpack.c.l.bf16 %v1398_v36  ;;  %v1407_v53 = vld [vmem:[%s1514_s11 + $0x58] sm:$0xff]  }
  0x13   : > { %528 = vmatprep.subr.bf16.mxu0 %v1435_v5  ;;  %1414 = vmatprep.subr.bf16.mxu1 %v1435_v5  ;;  %v343_v23 = vadd.f32 %v1367_v14, %v1519_v7  ;;  %v344_v24 = vadd.f32 %v1368_v15, %v1519_v7  ;;  %v330_v31 = vadd.f32 %v1340_v18, %v1519_v7  ;;  %v1344_v43 = vunpack.c.h.bf16 %v1398_v36  ;;  %v1400_v5 = vld [vmem:[%s1514_s11 + $0x20] sm:$0xff]  }
  0x14   : > { %v359_v26 = vmax.f32 %v327_v21, 0.0  ;;  %v360_v27 = vmax.f32 %v328_v22, 0.0  ;;  %v345_v32 = vadd.f32 %v1371_v19, %v1519_v7  ;;  %v346_v35 = vadd.f32 %v1372_v20, %v1519_v7  ;;  %v1401_v22 = vld [vmem:[%s1514_s11 + $0x28] sm:$0xff]  }
  0x15   : > { %v375_v28 = vmax.f32 %v343_v23, 0.0  ;;  %v376_v29 = vmax.f32 %v344_v24, 0.0  ;;  %v361_v38 = vmax.f32 %v329_v30, 0.0  ;;  %v362_v39 = vmax.f32 %v330_v31, 0.0  ;;  %v1409_v23 = vld [vmem:[%s1514_s11 + $0x68] sm:$0xff]  }
  0x16   : > { %529 = vmatpush1.bf16.msra.mxu0 %v1437_v6  ;;  %1418 = vmatpush1.bf16.msra.mxu1 %v1437_v6  ;;  %v391_v33 = vpack.c.bf16 %v360_v27, %v359_v26  ;;  %v377_v40 = vmax.f32 %v345_v32, 0.0  ;;  %v378_v42 = vmax.f32 %v346_v35, 0.0  ;;  %v1375_v44 = vunpack.c.l.bf16 %v1406_v37  ;;  %v1408_v6 = vld [vmem:[%s1514_s11 + $0x60] sm:$0xff]  }
  0x17   : > { %530 = vmatprep.subr.bf16.mxu0 %v1438_v11  ;;  %1415 = vmatprep.subr.bf16.mxu1 %v1438_v11  ;;  %v399_v34 = vpack.c.bf16 %v376_v29, %v375_v28  ;;  %v1376_v45 = vunpack.c.h.bf16 %v1406_v37  ;;  %v392_v46 = vpack.c.bf16 %v362_v39, %v361_v38  ;;  %v331_v47 = vadd.f32 %v1343_v41, %v1519_v7  ;;  %v1402_v38 = vld [vmem:[%s1514_s11 + $0x30] sm:$0xff]  }
  0x18   : > { %v400_v48 = vpack.c.bf16 %v378_v42, %v377_v40  ;;  %v332_v49 = vadd.f32 %v1344_v43, %v1519_v7  ;;  %v347_v50 = vadd.f32 %v1375_v44, %v1519_v7  ;;  %v1347_v55 = vunpack.c.l.bf16 %v1399_v52  ;;  %v1410_v39 = vld [vmem:[%s1514_s11 + $0x70] sm:$0xff]  }
  0x19   : > { %v348_v51 = vadd.f32 %v1376_v45, %v1519_v7  ;;  %v363_v54 = vmax.f32 %v331_v47, 0.0  ;;  %v1348_v56 = vunpack.c.h.bf16 %v1399_v52  ;;  %v1379_v57 = vunpack.c.l.bf16 %v1407_v53 }
  0x1a   : > { %531 = vmatpush1.bf16.msra.mxu0 %v1440_v25  ;;  %1419 = vmatpush1.bf16.msra.mxu1 %v1440_v25  ;;  %v364_v58 = vmax.f32 %v332_v49, 0.0  ;;  %v379_v59 = vmax.f32 %v347_v50, 0.0  ;;  %v1380_v61 = vunpack.c.h.bf16 %v1407_v53  ;;  %v333_v62 = vadd.f32 %v1347_v55, %v1519_v7  ;;  %v1411_v55 = vld [vmem:[%s1514_s11 + $0x78] sm:$0xff]  }
  0x1b   : > { %v380_v60 = vmax.f32 %v348_v51, 0.0  ;;  %v334_v63 = vadd.f32 %v1348_v56, %v1519_v7  ;;  %v349_v0 = vadd.f32 %v1379_v57, %v1519_v7  ;;  %v1351_v11 = vunpack.c.l.bf16 %v1400_v5 }
  0x1c   : > { %v393_v1 = vpack.c.bf16 %v364_v58, %v363_v54  ;;  %v350_v4 = vadd.f32 %v1380_v61, %v1519_v7  ;;  %v365_v8 = vmax.f32 %v333_v62, 0.0  ;;  %v1352_v13 = vunpack.c.h.bf16 %v1400_v5  ;;  %v1403_v54 = vld [vmem:[%s1514_s11 + $0x38] sm:$0xff]  }
  0x1d   : > { %1249 = vmatmul.mubr.msk.bf16.vlgmr.msra.gmra.mxu0 %vm467_vm0, %v391_v33  ;;  %1257 = vmatmul.mubr.msk.bf16.vlgmr.msra.gmra.mxu1 %vm467_vm0, %v399_v34  ;;  %v401_v3 = vpack.c.bf16 %v380_v60, %v379_v59  ;;  %v366_v9 = vmax.f32 %v334_v63, 0.0  ;;  %v381_v10 = vmax.f32 %v349_v0, 0.0  ;;  %v1383_v14 = vunpack.c.l.bf16 %v1408_v6 }
  0x1e   : > { %558 = vmatprep.mubr.bf16.mxu0 %v1449_v2  ;;  %638 = vmatprep.mubr.bf16.mxu1 %v1449_v2  ;;  %v382_v12 = vmax.f32 %v350_v4, 0.0  ;;  %v1384_v15 = vunpack.c.h.bf16 %v1408_v6  ;;  %v335_v17 = vadd.f32 %v1351_v11, %v1519_v7  ;;  %v336_v19 = vadd.f32 %v1352_v13, %v1519_v7 }
  0x1f   : > { %v394_v16 = vpack.c.bf16 %v366_v9, %v365_v8  ;;  %v351_v20 = vadd.f32 %v1383_v14, %v1519_v7  ;;  %v1355_v25 = vunpack.c.l.bf16 %v1401_v22  ;;  %v1356_v26 = vunpack.c.h.bf16 %v1401_v22 }
  0x20   : > { %v402_v18 = vpack.c.bf16 %v382_v12, %v381_v10  ;;  %v352_v21 = vadd.f32 %v1384_v15, %v1519_v7  ;;  %v367_v24 = vmax.f32 %v335_v17, 0.0  ;;  %v1387_v27 = vunpack.c.l.bf16 %v1409_v23  ;;  %v415_v15 = vld [vmem:[%s1997_s3] sm:$0x3] }
  0x21   : > { %v368_v28 = vmax.f32 %v336_v19, 0.0  ;;  %v383_v29 = vmax.f32 %v351_v20, 0.0  ;;  %v1388_v31 = vunpack.c.h.bf16 %v1409_v23  ;;  %v337_v32 = vadd.f32 %v1355_v25, %v1519_v7  ;;  %v1623_v19 = vld [vmem:[%s1611_s23 + $0x8] sm:$0xff]  ;;  %v1632_v23 = vld [vmem:[%s1611_s23 + $0x10] sm:$0xff] }
  0x22   : > { %v384_v30 = vmax.f32 %v352_v21, 0.0  ;;  %v338_v33 = vadd.f32 %v1356_v26, %v1519_v7  ;;  %v353_v34 = vadd.f32 %v1387_v27, %v1519_v7  ;;  %v1359_v43 = vunpack.c.l.bf16 %v1402_v38  ;;  %v1626_v20 = vld [vmem:[%s1611_s23 + $0x88] sm:$0xff] }
  0x23   : > { %v395_v35 = vpack.c.bf16 %v368_v28, %v367_v24  ;;  %v354_v37 = vadd.f32 %v1388_v31, %v1519_v7  ;;  %v369_v40 = vmax.f32 %v337_v32, 0.0  ;;  %v1360_v45 = vunpack.c.h.bf16 %v1402_v38  ;;  %v1635_v24 = vld [vmem:[%s1611_s23 + $0x90] sm:$0xff] }
  0x24   : > { %v403_v36 = vpack.c.bf16 %v384_v30, %v383_v29  ;;  %v370_v41 = vmax.f32 %v338_v33, 0.0  ;;  %v385_v42 = vmax.f32 %v353_v34, 0.0  ;;  %v1392_v47 = vunpack.c.h.bf16 %v1410_v39  ;;  %v1643_v29 = vld [vmem:[%s1611_s23 + $0x18] sm:$0xff] }
  0x25   : > { %1250 = vmatmul.mubr.msk.bf16.gmra.mxu0 %vm467_vm0, %v392_v46  ;;  %1258 = vmatmul.mubr.msk.bf16.gmra.mxu1 %vm467_vm0, %v400_v48  ;;  %v386_v44 = vmax.f32 %v354_v37, 0.0  ;;  %v1391_v46 = vunpack.c.l.bf16 %v1410_v39  ;;  %v339_v49 = vadd.f32 %v1359_v43, %v1519_v7  ;;  %v340_v51 = vadd.f32 %v1360_v45, %v1519_v7  ;;  %v1646_v30 = vld [vmem:[%s1611_s23 + $0x98] sm:$0xff] }
  0x26   : > { %568 = vmatprep.mubr.bf16.mxu0 %v1449_v2  ;;  %648 = vmatprep.mubr.bf16.mxu1 %v1449_v2  ;;  %v396_v48 = vpack.c.bf16 %v370_v41, %v369_v40  ;;  %v356_v53 = vadd.f32 %v1392_v47, %v1519_v7  ;;  %v1363_v57 = vunpack.c.l.bf16 %v1403_v54  ;;  %v1364_v58 = vunpack.c.h.bf16 %v1403_v54  ;;  %v1663_v41 = vld [vmem:[%s1611_s23 + $0x28] sm:$0xff]  ;;  %v1673_v47 = vld [vmem:[%s1611_s23 + $0x30] sm:$0xff]  ;;  %v1686_v54 = vld [vmem:[%s1611_s23 + $0xb8] sm:$0xff] }
  0x27   : > { %v404_v50 = vpack.c.bf16 %v386_v44, %v385_v42  ;;  %v355_v52 = vadd.f32 %v1391_v46, %v1519_v7  ;;  %v371_v56 = vmax.f32 %v339_v49, 0.0  ;;  %v1395_v59 = vunpack.c.l.bf16 %v1411_v55  ;;  %v1666_v42 = vld [vmem:[%s1611_s23 + $0xa8] sm:$0xff] }
  0x28   : > { %v372_v60 = vmax.f32 %v340_v51, 0.0  ;;  %v388_v62 = vmax.f32 %v356_v53, 0.0  ;;  %v1396_v63 = vunpack.c.h.bf16 %v1411_v55  ;;  %v341_v0 = vadd.f32 %v1363_v57, %v1519_v7  ;;  %v1683_v53 = vld [vmem:[%s1611_s23 + $0x38] sm:$0xff] }
  0x29   : > { %v387_v61 = vmax.f32 %v355_v52, 0.0  ;;  %v357_v5 = vadd.f32 %v1395_v59, %v1519_v7  ;;  %v743_v31 = vunpack.c.l.bf16 %v1623_v19  ;;  %v775_v32 = vunpack.c.l.bf16 %v1626_v20 }
  0x2a   : > { %v358_v6 = vadd.f32 %v1396_v63, %v1519_v7  ;;  %v373_v8 = vmax.f32 %v341_v0, 0.0  ;;  %v744_v33 = vunpack.c.h.bf16 %v1623_v19  ;;  %v776_v34 = vunpack.c.h.bf16 %v1626_v20 }
  0x2b   : > { %v405_v4 = vpack.c.bf16 %v388_v62, %v387_v61  ;;  %v389_v10 = vmax.f32 %v357_v5, 0.0  ;;  %v745_v37 = vunpack.c.l.bf16 %v1632_v23  ;;  %v777_v38 = vunpack.c.l.bf16 %v1635_v24 }
  0x2c   : > { %v390_v11 = vmax.f32 %v358_v6, 0.0  ;;  %v746_v39 = vunpack.c.h.bf16 %v1632_v23  ;;  %v778_v40 = vunpack.c.h.bf16 %v1635_v24  ;;  %v747_v43 = vunpack.c.l.bf16 %v1643_v29 }
  0x2d   : > { %1251 = vmatmul.mubr.msk.bf16.gmra.mxu0 %vm467_vm0, %v393_v1  ;;  %1259 = vmatmul.mubr.msk.bf16.gmra.mxu1 %vm467_vm0, %v401_v3  ;;  %v342_v1 = vadd.f32 %v1364_v58, %v1519_v7  ;;  %v397_v3 = vpack.c.bf16 %v372_v60, %v371_v56  ;;  %v417_v7 = vlaneseq  ;;  %v779_v44 = vunpack.c.l.bf16 %v1646_v30 }
  0x2e   : > { %578 = vmatprep.mubr.bf16.mxu0 %v1449_v2  ;;  %658 = vmatprep.mubr.bf16.mxu1 %v1449_v2  ;;  %v406_v13 = vpack.c.bf16 %v390_v11, %v389_v10  ;;  %v748_v45 = vunpack.c.h.bf16 %v1643_v29  ;;  %v780_v46 = vunpack.c.h.bf16 %v1646_v30  ;;  %v751_v57 = vunpack.c.l.bf16 %v1663_v41 }
  0x2f   : > { %v374_v9 = vmax.f32 %v342_v1, 0.0  ;;  %v418_v14 = vshrl.u32 %v417_v7, 7  ;;  %v783_v58 = vunpack.c.l.bf16 %v1666_v42  ;;  %v752_v59 = vunpack.c.h.bf16 %v1663_v41  ;;  %v1697_v1 = vld [vmem:[%s1611_s23 + $0x40] sm:$0xff] }
  0x30   : > { %v784_v60 = vunpack.c.h.bf16 %v1666_v42  ;;  %v753_v63 = vunpack.c.l.bf16 %v1673_v47  ;;  %v754_v6 = vunpack.c.h.bf16 %v1673_v47 }
  0x31   : > { %v398_v12 = vpack.c.bf16 %v374_v9, %v373_v8  ;;  %v423_v17 = vsub.s32 1, %v418_v14 }
  0x33   : > { %v1638_v26 = vrot.slane %v415_v15, %v423_v17 }
  0x35   : > { %1252 = vmatmul.mubr.msk.bf16.gmra.mxu0 %vm467_vm0, %v394_v16  ;;  %1260 = vmatmul.mubr.msk.bf16.gmra.mxu1 %vm467_vm0, %v402_v18  ;;  %v1617_v16 = vld [vmem:[%s1611_s23] sm:$0xff] }
  0x36   : > { %588 = vmatprep.mubr.bf16.mxu0 %v1449_v2  ;;  %668 = vmatprep.mubr.bf16.mxu1 %v1449_v2  ;;  %v1620_v18 = vld [vmem:[%s1611_s23 + $0x80] sm:$0xff]  ;;  %v741_v22 = vunpack.c.l.bf16 %v1617_v16  ;;  %v742_v27 = vunpack.c.h.bf16 %v1617_v16 }
  0x37   : > { %v773_v25 = vunpack.c.l.bf16 %v1620_v18  ;;  %v774_v28 = vunpack.c.h.bf16 %v1620_v18 }
  0x3d   : > { %1253 = vmatmul.mubr.msk.bf16.gmra.mxu0 %vm467_vm0, %v395_v35  ;;  %1261 = vmatmul.mubr.msk.bf16.gmra.mxu1 %vm467_vm0, %v403_v36  ;;  %v1653_v35 = vld [vmem:[%s1611_s23 + $0x20] sm:$0xff] }
  0x3e   : > { %598 = vmatprep.mubr.bf16.mxu0 %v1449_v2  ;;  %678 = vmatprep.mubr.bf16.mxu1 %v1449_v2  ;;  %v1656_v36 = vld [vmem:[%s1611_s23 + $0xa0] sm:$0xff]  ;;  %v749_v49 = vunpack.c.l.bf16 %v1653_v35  ;;  %v750_v51 = vunpack.c.h.bf16 %v1653_v35 }
  0x3f   : > { %v782_v52 = vunpack.c.h.bf16 %v1656_v36 }
  0x45   : > { %1254 = vmatmul.mubr.msk.bf16.gmra.mxu0 %vm467_vm0, %v396_v48  ;;  %1262 = vmatmul.mubr.msk.bf16.gmra.mxu1 %vm467_vm0, %v404_v50  ;;  %v1676_v48 = vld [vmem:[%s1611_s23 + $0xb0] sm:$0xff]  ;;  %v781_v50 = vunpack.c.l.bf16 %v1656_v36 }
  0x46   : > { %608 = vmatprep.mubr.bf16.mxu0 %v1449_v2  ;;  %688 = vmatprep.mubr.bf16.mxu1 %v1449_v2  ;;  %v785_v0 = vunpack.c.l.bf16 %v1676_v48  ;;  %v786_v8 = vunpack.c.h.bf16 %v1676_v48 }
  0x4d   : > { %1255 = vmatmul.mubr.msk.bf16.gmra.mxu0 %vm467_vm0, %v397_v3  ;;  %1263 = vmatmul.mubr.msk.bf16.gmra.mxu1 %vm467_vm0, %v405_v4  ;;  %v1700_v3 = vld [vmem:[%s1611_s23 + $0xc0] sm:$0xff] }
  0x4e   : > { %618 = vmatprep.mubr.bf16.mxu0 %v1449_v2  ;;  %698 = vmatprep.mubr.bf16.mxu1 %v1449_v2  ;;  %v419_v2 = vsub.s32 0, %v418_v14 }
  0x50   : > { %v1628_v21 = vrot.slane %v415_v15, %v419_v2 }
  0x55   : > { %1256 = vmatmul.mubr.msk.bf16.gmra.mxu0 %vm467_vm0, %v398_v12  ;;  %1264 = vmatmul.mubr.msk.bf16.gmra.mxu1 %vm467_vm0, %v406_v13 }
  0xdd   : > { %v550_v55 = vpop.f32.mrf.mxu0  ;;  %v630_v56 = vpop.f32.mrf.mxu1 }
  0xde   : > { %v551_v61 = vadd.f32 %v550_v55, %v1628_v21  ;;  %v631_v62 = vadd.f32 %v630_v56, %v1628_v21 }
  0xdf   : > { %v552_v4 = vpop.f32.mrf.mxu0  ;;  %v632_v5 = vpop.f32.mrf.mxu1 }
  0xe0   : > { %v805_v11 = vadd.f32 %v741_v22, %v551_v61  ;;  %v837_v12 = vadd.f32 %v773_v25, %v631_v62  ;;  %v553_v13 = vadd.f32 %v552_v4, %v1638_v26  ;;  %v633_v7 = vadd.f32 %v632_v5, %v1638_v26  ;;  %v1715_v61 = vld [vmem:[%s1611_s23 + $0x48] sm:$0xff] }
  0xe1   : > { %v554_v14 = vpop.f32.mrf.mxu0  ;;  %v634_v2 = vpop.f32.mrf.mxu1  ;;  %v1718_v62 = vld [vmem:[%s1611_s23 + $0xc8] sm:$0xff] }
  0xe2   : > { %v806_v55 = vadd.f32 %v742_v27, %v553_v13  ;;  %v838_v56 = vadd.f32 %v774_v28, %v633_v7  ;;  %v869_v4 = vmax.f32 %v805_v11, 0.0  ;;  %v901_v5 = vmax.f32 %v837_v12, 0.0 }
  0xe3   : > { %v555_v15 = vadd.f32 %v554_v14, %v1628_v21  ;;  %v635_v16 = vadd.f32 %v634_v2, %v1628_v21  ;;  %v556_v17 = vpop.f32.mrf.mxu0  ;;  %v636_v10 = vpop.f32.mrf.mxu1  ;;  %v759_v2 = vunpack.c.l.bf16 %v1715_v61 }
  0xe4   : > { %v870_v18 = vmax.f32 %v806_v55, 0.0  ;;  %v902_v27 = vmax.f32 %v838_v56, 0.0  ;;  %v557_v28 = vadd.f32 %v556_v17, %v1638_v26  ;;  %v637_v13 = vadd.f32 %v636_v10, %v1638_v26 }
  0xe5   : > { %v807_v11 = vadd.f32 %v743_v31, %v555_v15  ;;  %v839_v12 = vadd.f32 %v775_v32, %v635_v16  ;;  %v560_v7 = vpop.f32.mrf.mxu0  ;;  %v640_v14 = vpop.f32.mrf.mxu1  ;;  %v791_v10 = vunpack.c.l.bf16 %v1718_v62 }
  0xe6   : > { %v1301_v17 = vpack.c.bf16 %v870_v18, %v869_v4  ;;  %v1317_v55 = vpack.c.bf16 %v902_v27, %v901_v5  ;;  %v808_v56 = vadd.f32 %v744_v33, %v557_v28  ;;  %v840_v25 = vadd.f32 %v776_v34, %v637_v13 }
  0xe7   : > { %v871_v31 = vmax.f32 %v807_v11, 0.0  ;;  %v903_v15 = vmax.f32 %v839_v12, 0.0  ;;  %v561_v22 = vadd.f32 %v560_v7, %v1628_v21  ;;  %v641_v32 = vadd.f32 %v640_v14, %v1628_v21  ;;  %v562_v16 = vpop.f32.mrf.mxu0  ;;  %v642_v9 = vpop.f32.mrf.mxu1 }
  0xe8   : > { %1125 = vst [vmem:[%s1729_s28] sm:$0xff] %v1301_v17  ;;  %1141 = vst [vmem:[%s1729_s28 + $0x80] sm:$0xff] %v1317_v55  ;;  %v872_v18 = vmax.f32 %v808_v56, 0.0  ;;  %v904_v4 = vmax.f32 %v840_v25, 0.0  ;;  %v563_v19 = vadd.f32 %v562_v16, %v1638_v26  ;;  %v643_v33 = vadd.f32 %v642_v9, %v1638_v26 }
  0xe9   : > { %v809_v20 = vadd.f32 %v745_v37, %v561_v22  ;;  %v841_v34 = vadd.f32 %v777_v38, %v641_v32  ;;  %v564_v5 = vpop.f32.mrf.mxu0  ;;  %v644_v27 = vpop.f32.mrf.mxu1  ;;  %v760_v28 = vunpack.c.h.bf16 %v1715_v61  ;;  %v792_v13 = vunpack.c.h.bf16 %v1718_v62  ;;  %v1758_v37 = vld [vmem:[%s1611_s23 + $0x50] sm:$0xff] }
  0xea   : > { %v1302_v11 = vpack.c.bf16 %v872_v18, %v871_v31  ;;  %v1318_v25 = vpack.c.bf16 %v904_v4, %v903_v15  ;;  %v810_v12 = vadd.f32 %v746_v39, %v563_v19  ;;  %v842_v9 = vadd.f32 %v778_v40, %v643_v33  ;;  %v1761_v22 = vld [vmem:[%s1611_s23 + $0xd0] sm:$0xff] }
  0xeb   : > { %v873_v38 = vmax.f32 %v809_v20, 0.0  ;;  %v905_v7 = vmax.f32 %v841_v34, 0.0  ;;  %v565_v14 = vadd.f32 %v564_v5, %v1628_v21  ;;  %v645_v17 = vadd.f32 %v644_v27, %v1628_v21  ;;  %v566_v55 = vpop.f32.mrf.mxu0  ;;  %v646_v56 = vpop.f32.mrf.mxu1 }
  0xec   : > { %1126 = vst [vmem:[%s1729_s28 + $0x8] sm:$0xff] %v1302_v11  ;;  %1142 = vst [vmem:[%s1729_s28 + $0x88] sm:$0xff] %v1318_v25  ;;  %v874_v31 = vmax.f32 %v810_v12, 0.0  ;;  %v906_v23 = vmax.f32 %v842_v9, 0.0  ;;  %v567_v39 = vadd.f32 %v566_v55, %v1638_v26  ;;  %v647_v24 = vadd.f32 %v646_v56, %v1638_v26 }
  0xed   : > { %v811_v40 = vadd.f32 %v747_v43, %v565_v14  ;;  %v843_v15 = vadd.f32 %v779_v44, %v645_v17  ;;  %v570_v32 = vpop.f32.mrf.mxu0  ;;  %v650_v16 = vpop.f32.mrf.mxu1  ;;  %v761_v18 = vunpack.c.l.bf16 %v1758_v37  ;;  %v793_v4 = vunpack.c.l.bf16 %v1761_v22 }
  0xee   : > { %v1303_v19 = vpack.c.bf16 %v874_v31, %v873_v38  ;;  %v1319_v33 = vpack.c.bf16 %v906_v23, %v905_v7  ;;  %v812_v20 = vadd.f32 %v748_v45, %v567_v39  ;;  %v844_v34 = vadd.f32 %v780_v46, %v647_v24  ;;  %v1799_v39 = vld [vmem:[%s1611_s23 + $0xd8] sm:$0xff] }
  0xef   : > { %v875_v43 = vmax.f32 %v811_v40, 0.0  ;;  %v907_v5 = vmax.f32 %v843_v15, 0.0  ;;  %v571_v27 = vadd.f32 %v570_v32, %v1628_v21  ;;  %v651_v44 = vadd.f32 %v650_v16, %v1628_v21  ;;  %v572_v11 = vpop.f32.mrf.mxu0  ;;  %v652_v25 = vpop.f32.mrf.mxu1 }
  0xf0   : > { %1127 = vst [vmem:[%s1729_s28 + $0x10] sm:$0xff] %v1303_v19  ;;  %1143 = vst [vmem:[%s1729_s28 + $0x90] sm:$0xff] %v1319_v33  ;;  %v876_v12 = vmax.f32 %v812_v20, 0.0  ;;  %v908_v9 = vmax.f32 %v844_v34, 0.0  ;;  %v573_v29 = vadd.f32 %v572_v11, %v1638_v26  ;;  %v653_v45 = vadd.f32 %v652_v25, %v1638_v26 }
  0xf1   : > { %v813_v30 = vadd.f32 %v749_v49, %v571_v27  ;;  %v845_v46 = vadd.f32 %v781_v50, %v651_v44  ;;  %v574_v38 = vpop.f32.mrf.mxu0  ;;  %v654_v7 = vpop.f32.mrf.mxu1  ;;  %v762_v14 = vunpack.c.h.bf16 %v1758_v37  ;;  %v794_v17 = vunpack.c.h.bf16 %v1761_v22  ;;  %v1796_v49 = vld [vmem:[%s1611_s23 + $0x58] sm:$0xff] }
  0xf2   : > { %v1304_v55 = vpack.c.bf16 %v876_v12, %v875_v43  ;;  %v1320_v56 = vpack.c.bf16 %v908_v9, %v907_v5  ;;  %v814_v31 = vadd.f32 %v750_v51, %v573_v29  ;;  %v846_v23 = vadd.f32 %v782_v52, %v653_v45 }
  0xf3   : > { %v877_v50 = vmax.f32 %v813_v30, 0.0  ;;  %v909_v24 = vmax.f32 %v845_v46, 0.0  ;;  %v575_v40 = vadd.f32 %v574_v38, %v1628_v21  ;;  %v655_v15 = vadd.f32 %v654_v7, %v1628_v21  ;;  %v576_v32 = vpop.f32.mrf.mxu0  ;;  %v656_v16 = vpop.f32.mrf.mxu1 }
  0xf4   : > { %1128 = vst [vmem:[%s1729_s28 + $0x18] sm:$0xff] %v1304_v55  ;;  %1144 = vst [vmem:[%s1729_s28 + $0x98] sm:$0xff] %v1320_v56  ;;  %v878_v19 = vmax.f32 %v814_v31, 0.0  ;;  %v910_v35 = vmax.f32 %v846_v23, 0.0  ;;  %v577_v51 = vadd.f32 %v576_v32, %v1638_v26  ;;  %v657_v36 = vadd.f32 %v656_v16, %v1638_v26 }
  0xf5   : > { %v815_v52 = vadd.f32 %v751_v57, %v575_v40  ;;  %v847_v33 = vadd.f32 %v783_v58, %v655_v15  ;;  %v580_v20 = vpop.f32.mrf.mxu0  ;;  %v660_v34 = vpop.f32.mrf.mxu1  ;;  %v763_v43 = vunpack.c.l.bf16 %v1796_v49  ;;  %v795_v5 = vunpack.c.l.bf16 %v1799_v39  ;;  %v1837_v40 = vld [vmem:[%s1611_s23 + $0xe0] sm:$0xff] }
  0xf6   : > { %v1305_v27 = vpack.c.bf16 %v878_v19, %v877_v50  ;;  %v1321_v44 = vpack.c.bf16 %v910_v35, %v909_v24  ;;  %v816_v11 = vadd.f32 %v752_v59, %v577_v51  ;;  %v848_v25 = vadd.f32 %v784_v60, %v657_v36 }
  0xf7   : > { %v879_v57 = vmax.f32 %v815_v52, 0.0  ;;  %v911_v12 = vmax.f32 %v847_v33, 0.0  ;;  %v581_v9 = vadd.f32 %v580_v20, %v1628_v21  ;;  %v661_v58 = vadd.f32 %v660_v34, %v1628_v21  ;;  %v582_v29 = vpop.f32.mrf.mxu0  ;;  %v662_v45 = vpop.f32.mrf.mxu1 }
  0xf8   : > { %1129 = vst [vmem:[%s1729_s28 + $0x20] sm:$0xff] %v1305_v27  ;;  %1145 = vst [vmem:[%s1729_s28 + $0xa0] sm:$0xff] %v1321_v44  ;;  %v880_v30 = vmax.f32 %v816_v11, 0.0  ;;  %v912_v46 = vmax.f32 %v848_v25, 0.0  ;;  %v583_v41 = vadd.f32 %v582_v29, %v1638_v26  ;;  %v663_v59 = vadd.f32 %v662_v45, %v1638_v26 }
  0xf9   : > { %v817_v42 = vadd.f32 %v753_v63, %v581_v9  ;;  %v849_v60 = vadd.f32 %v785_v0, %v661_v58  ;;  %v584_v38 = vpop.f32.mrf.mxu0  ;;  %v664_v7 = vpop.f32.mrf.mxu1  ;;  %v764_v55 = vunpack.c.h.bf16 %v1796_v49  ;;  %v796_v56 = vunpack.c.h.bf16 %v1799_v39  ;;  %v1834_v63 = vld [vmem:[%s1611_s23 + $0x60] sm:$0xff] }
  0xfa   : > { %v1306_v31 = vpack.c.bf16 %v880_v30, %v879_v57  ;;  %v1322_v23 = vpack.c.bf16 %v912_v46, %v911_v12  ;;  %v818_v50 = vadd.f32 %v754_v6, %v583_v41  ;;  %v850_v24 = vadd.f32 %v786_v8, %v663_v59 }
  0xfb   : > { %v881_v0 = vmax.f32 %v817_v42, 0.0  ;;  %v913_v15 = vmax.f32 %v849_v60, 0.0  ;;  %v585_v32 = vadd.f32 %v584_v38, %v1628_v21  ;;  %v665_v16 = vadd.f32 %v664_v7, %v1628_v21  ;;  %v586_v19 = vpop.f32.mrf.mxu0  ;;  %v666_v35 = vpop.f32.mrf.mxu1 }
  0xfc   : > { %1130 = vst [vmem:[%s1729_s28 + $0x28] sm:$0xff] %v1306_v31  ;;  %1146 = vst [vmem:[%s1729_s28 + $0xa8] sm:$0xff] %v1322_v23  ;;  %v882_v51 = vmax.f32 %v818_v50, 0.0  ;;  %v914_v47 = vmax.f32 %v850_v24, 0.0  ;;  %v587_v6 = vadd.f32 %v586_v19, %v1638_v26  ;;  %v667_v48 = vadd.f32 %v666_v35, %v1638_v26 }
  0xfd   : > { %v2000_v8 = vunpack.c.l.bf16 %v1683_v53  ;;  %v2001_v52 = vunpack.c.l.bf16 %v1686_v54  ;;  %v590_v20 = vpop.f32.mrf.mxu0  ;;  %v670_v34 = vpop.f32.mrf.mxu1  ;;  %v765_v27 = vunpack.c.l.bf16 %v1834_v63  ;;  %v797_v44 = vunpack.c.l.bf16 %v1837_v40 }
  0xfe   : > { %v1307_v11 = vpack.c.bf16 %v882_v51, %v881_v0  ;;  %v1323_v25 = vpack.c.bf16 %v914_v47, %v913_v15  ;;  %v2002_v57 = vunpack.c.h.bf16 %v1683_v53  ;;  %v2003_v9 = vunpack.c.h.bf16 %v1686_v54 }
  0xff   : > { %v819_v36 = vadd.f32 %v2000_v8, %v585_v32  ;;  %v851_v33 = vadd.f32 %v2001_v52, %v665_v16  ;;  %v591_v30 = vadd.f32 %v590_v20, %v1628_v21  ;;  %v671_v46 = vadd.f32 %v670_v34, %v1628_v21  ;;  %v592_v41 = vpop.f32.mrf.mxu0  ;;  %v672_v59 = vpop.f32.mrf.mxu1 }
 0x100   : > { %v820_v12 = vadd.f32 %v2002_v57, %v587_v6  ;;  %v852_v58 = vadd.f32 %v2003_v9, %v667_v48  ;;  %1131 = vst [vmem:[%s1729_s28 + $0x30] sm:$0xff] %v1307_v11  ;;  %1147 = vst [vmem:[%s1729_s28 + $0xb0] sm:$0xff] %v1323_v25  ;;  %v593_v53 = vadd.f32 %v592_v41, %v1638_v26  ;;  %v2004_v54 = vunpack.c.l.bf16 %v1697_v1  ;;  %v1872_v6 = vld [vmem:[%s1611_s23 + $0x68] sm:$0xff] }
 0x101   : > { %v883_v29 = vmax.f32 %v819_v36, 0.0  ;;  %v915_v45 = vmax.f32 %v851_v33, 0.0  ;;  %v673_v38 = vadd.f32 %v672_v59, %v1638_v26  ;;  %v2005_v31 = vunpack.c.l.bf16 %v1700_v3  ;;  %v594_v50 = vpop.f32.mrf.mxu0  ;;  %v674_v24 = vpop.f32.mrf.mxu1  ;;  %v1875_v48 = vld [vmem:[%s1611_s23 + $0xe8] sm:$0xff] }
 0x102   : > { %v884_v42 = vmax.f32 %v820_v12, 0.0  ;;  %v916_v60 = vmax.f32 %v852_v58, 0.0  ;;  %v821_v7 = vadd.f32 %v2004_v54, %v591_v30  ;;  %v766_v0 = vunpack.c.h.bf16 %v1834_v63 }
 0x103   : > { %v853_v23 = vadd.f32 %v2005_v31, %v671_v46  ;;  %v798_v15 = vunpack.c.h.bf16 %v1837_v40  ;;  %v2006_v19 = vunpack.c.h.bf16 %v1697_v1  ;;  %v2007_v51 = vunpack.c.h.bf16 %v1700_v3  ;;  %v596_v20 = vpop.f32.mrf.mxu0  ;;  %v676_v34 = vpop.f32.mrf.mxu1 }
 0x104   : > { %v1308_v32 = vpack.c.bf16 %v884_v42, %v883_v29  ;;  %v1324_v16 = vpack.c.bf16 %v916_v60, %v915_v45  ;;  %v885_v8 = vmax.f32 %v821_v7, 0.0  ;;  %v595_v52 = vadd.f32 %v594_v50, %v1628_v21 }
 0x105   : > { %v822_v35 = vadd.f32 %v2006_v19, %v593_v53  ;;  %v854_v47 = vadd.f32 %v2007_v51, %v673_v38  ;;  %v917_v36 = vmax.f32 %v853_v23, 0.0  ;;  %v675_v33 = vadd.f32 %v674_v24, %v1628_v21  ;;  %v600_v9 = vpop.f32.mrf.mxu0  ;;  %v680_v58 = vpop.f32.mrf.mxu1  ;;  %v1913_v51 = vld [vmem:[%s1611_s23 + $0xf0] sm:$0xff] }
 0x106   : > { %1132 = vst [vmem:[%s1729_s28 + $0x38] sm:$0xff] %v1308_v32  ;;  %1148 = vst [vmem:[%s1729_s28 + $0xb8] sm:$0xff] %v1324_v16  ;;  %v597_v25 = vadd.f32 %v596_v20, %v1638_v26  ;;  %v677_v3 = vadd.f32 %v676_v34, %v1638_v26  ;;  %v823_v57 = vadd.f32 %v759_v2, %v595_v52  ;;  %v767_v29 = vunpack.c.l.bf16 %v1872_v6 }
 0x107   : > { %v886_v11 = vmax.f32 %v822_v35, 0.0  ;;  %v918_v1 = vmax.f32 %v854_v47, 0.0  ;;  %v855_v12 = vadd.f32 %v791_v10, %v675_v33  ;;  %v799_v45 = vunpack.c.l.bf16 %v1875_v48  ;;  %v602_v53 = vpop.f32.mrf.mxu0  ;;  %v682_v38 = vpop.f32.mrf.mxu1 }
 0x108   : > { %v824_v41 = vadd.f32 %v760_v28, %v597_v25  ;;  %v856_v59 = vadd.f32 %v792_v13, %v677_v3  ;;  %v887_v2 = vmax.f32 %v823_v57, 0.0  ;;  %v601_v60 = vadd.f32 %v600_v9, %v1628_v21 }
 0x109   : > { %v1309_v30 = vpack.c.bf16 %v886_v11, %v885_v8  ;;  %v1325_v46 = vpack.c.bf16 %v918_v1, %v917_v36  ;;  %v919_v42 = vmax.f32 %v855_v12, 0.0  ;;  %v681_v10 = vadd.f32 %v680_v58, %v1628_v21  ;;  %v604_v31 = vpop.f32.mrf.mxu0  ;;  %v684_v23 = vpop.f32.mrf.mxu1 }
 0x10a   : > { %v888_v54 = vmax.f32 %v824_v41, 0.0  ;;  %v920_v7 = vmax.f32 %v856_v59, 0.0  ;;  %v603_v61 = vadd.f32 %v602_v53, %v1638_v26  ;;  %v683_v28 = vadd.f32 %v682_v38, %v1638_v26 }
 0x10b   : > { %1133 = vst [vmem:[%s1729_s28 + $0x40] sm:$0xff] %v1309_v30  ;;  %1149 = vst [vmem:[%s1729_s28 + $0xc0] sm:$0xff] %v1325_v46  ;;  %v825_v62 = vadd.f32 %v761_v18, %v601_v60  ;;  %v857_v13 = vadd.f32 %v793_v4, %v681_v10  ;;  %v768_v50 = vunpack.c.h.bf16 %v1872_v6  ;;  %v800_v24 = vunpack.c.h.bf16 %v1875_v48  ;;  %v1910_v18 = vld [vmem:[%s1611_s23 + $0x70] sm:$0xff]  ;;  %v606_v52 = vpop.f32.mrf.mxu0  ;;  %v686_v33 = vpop.f32.mrf.mxu1 }
 0x10c   : > { %v1310_v32 = vpack.c.bf16 %v888_v54, %v887_v2  ;;  %v1326_v16 = vpack.c.bf16 %v920_v7, %v919_v42  ;;  %v826_v19 = vadd.f32 %v762_v14, %v603_v61  ;;  %v858_v35 = vadd.f32 %v794_v17, %v683_v28 }
 0x10d   : > { %v889_v4 = vmax.f32 %v825_v62, 0.0  ;;  %v921_v47 = vmax.f32 %v857_v13, 0.0  ;;  %v605_v8 = vadd.f32 %v604_v31, %v1628_v21  ;;  %v685_v36 = vadd.f32 %v684_v23, %v1628_v21  ;;  %v610_v11 = vpop.f32.mrf.mxu0  ;;  %v690_v1 = vpop.f32.mrf.mxu1  ;;  %v1951_v62 = vld [vmem:[%s1611_s23 + $0xf8] sm:$0xff] }
 0x10e   : > { %1134 = vst [vmem:[%s1729_s28 + $0x48] sm:$0xff] %v1310_v32  ;;  %1150 = vst [vmem:[%s1729_s28 + $0xc8] sm:$0xff] %v1326_v16  ;;  %v890_v20 = vmax.f32 %v826_v19, 0.0  ;;  %v922_v37 = vmax.f32 %v858_v35, 0.0  ;;  %v607_v14 = vadd.f32 %v606_v52, %v1638_v26  ;;  %v687_v22 = vadd.f32 %v686_v33, %v1638_v26 }
 0x10f   : > { %v827_v17 = vadd.f32 %v763_v43, %v605_v8  ;;  %v859_v34 = vadd.f32 %v795_v5, %v685_v36  ;;  %v769_v25 = vunpack.c.l.bf16 %v1910_v18  ;;  %v801_v3 = vunpack.c.l.bf16 %v1913_v51  ;;  %v612_v41 = vpop.f32.mrf.mxu0  ;;  %v692_v59 = vpop.f32.mrf.mxu1 }
 0x110   : > { %v1311_v57 = vpack.c.bf16 %v890_v20, %v889_v4  ;;  %v1327_v12 = vpack.c.bf16 %v922_v37, %v921_v47  ;;  %v828_v9 = vadd.f32 %v764_v55, %v607_v14  ;;  %v860_v58 = vadd.f32 %v796_v56, %v687_v22 }
 0x111   : > { %v891_v43 = vmax.f32 %v827_v17, 0.0  ;;  %v923_v30 = vmax.f32 %v859_v34, 0.0  ;;  %v611_v46 = vadd.f32 %v610_v11, %v1628_v21  ;;  %v691_v5 = vadd.f32 %v690_v1, %v1628_v21  ;;  %v614_v60 = vpop.f32.mrf.mxu0  ;;  %v694_v10 = vpop.f32.mrf.mxu1 }
 0x112   : > { %1135 = vst [vmem:[%s1729_s28 + $0x50] sm:$0xff] %v1311_v57  ;;  %1151 = vst [vmem:[%s1729_s28 + $0xd0] sm:$0xff] %v1327_v12  ;;  %v892_v2 = vmax.f32 %v828_v9, 0.0  ;;  %v924_v42 = vmax.f32 %v860_v58, 0.0  ;;  %v613_v49 = vadd.f32 %v612_v41, %v1638_v26  ;;  %v693_v55 = vadd.f32 %v692_v59, %v1638_v26 }
 0x113   : > { %v829_v39 = vadd.f32 %v765_v27, %v611_v46  ;;  %v861_v56 = vadd.f32 %v797_v44, %v691_v5  ;;  %v770_v53 = vunpack.c.h.bf16 %v1910_v18  ;;  %v802_v38 = vunpack.c.h.bf16 %v1913_v51  ;;  %v1948_v27 = vld [vmem:[%s1611_s23 + $0x78] sm:$0xff]  ;;  %v616_v32 = vpop.f32.mrf.mxu0  ;;  %v696_v16 = vpop.f32.mrf.mxu1 }
 0x114   : > { %v1312_v54 = vpack.c.bf16 %v892_v2, %v891_v43  ;;  %v1328_v7 = vpack.c.bf16 %v924_v42, %v923_v30  ;;  %v830_v61 = vadd.f32 %v766_v0, %v613_v49  ;;  %v862_v28 = vadd.f32 %v798_v15, %v693_v55 }
 0x115   : > { %v893_v44 = vmax.f32 %v829_v39, 0.0  ;;  %v925_v13 = vmax.f32 %v861_v56, 0.0  ;;  %v615_v31 = vadd.f32 %v614_v60, %v1628_v21  ;;  %v695_v23 = vadd.f32 %v694_v10, %v1628_v21  ;;  %v620_v4 = vpop.f32.mrf.mxu0  ;;  %v700_v47 = vpop.f32.mrf.mxu1 }
 0x116   : > { %1136 = vst [vmem:[%s1729_s28 + $0x58] sm:$0xff] %v1312_v54  ;;  %1152 = vst [vmem:[%s1729_s28 + $0xd8] sm:$0xff] %v1328_v7  ;;  %v894_v19 = vmax.f32 %v830_v61, 0.0  ;;  %v926_v63 = vmax.f32 %v862_v28, 0.0  ;;  %v617_v0 = vadd.f32 %v616_v32, %v1638_v26  ;;  %v697_v40 = vadd.f32 %v696_v16, %v1638_v26 }
 0x117   : > { %v831_v15 = vadd.f32 %v767_v29, %v615_v31  ;;  %v863_v35 = vadd.f32 %v799_v45, %v695_v23  ;;  %v771_v8 = vunpack.c.l.bf16 %v1948_v27  ;;  %v803_v36 = vunpack.c.l.bf16 %v1951_v62  ;;  %v622_v17 = vpop.f32.mrf.mxu0  ;;  %v702_v34 = vpop.f32.mrf.mxu1 }
 0x118   : > { %v1313_v52 = vpack.c.bf16 %v894_v19, %v893_v44  ;;  %v1329_v33 = vpack.c.bf16 %v926_v63, %v925_v13  ;;  %v832_v20 = vadd.f32 %v768_v50, %v617_v0  ;;  %v864_v37 = vadd.f32 %v800_v24, %v697_v40 }
 0x119   : > { %v895_v29 = vmax.f32 %v831_v15, 0.0  ;;  %v927_v14 = vmax.f32 %v863_v35, 0.0  ;;  %v621_v22 = vadd.f32 %v620_v4, %v1628_v21  ;;  %v701_v45 = vadd.f32 %v700_v47, %v1628_v21  ;;  %v624_v24 = vpop.f32.mrf.mxu0  ;;  %v704_v12 = vpop.f32.mrf.mxu1 }
 0x11a   : > { %1137 = vst [vmem:[%s1729_s28 + $0x60] sm:$0xff] %v1313_v52  ;;  %1153 = vst [vmem:[%s1729_s28 + $0xe0] sm:$0xff] %v1329_v33  ;;  %v896_v11 = vmax.f32 %v832_v20, 0.0  ;;  %v928_v1 = vmax.f32 %v864_v37, 0.0  ;;  %v623_v57 = vadd.f32 %v622_v17, %v1638_v26  ;;  %v703_v6 = vadd.f32 %v702_v34, %v1638_v26 }
 0x11b   : > { %v833_v48 = vadd.f32 %v769_v25, %v621_v22  ;;  %v865_v50 = vadd.f32 %v801_v3, %v701_v45  ;;  %v772_v9 = vunpack.c.h.bf16 %v1948_v27  ;;  %v804_v58 = vunpack.c.h.bf16 %v1951_v62  ;;  %v626_v25 = vpop.f32.mrf.mxu0  ;;  %v706_v3 = vpop.f32.mrf.mxu1 }
 0x11c   : > { %v1314_v43 = vpack.c.bf16 %v896_v11, %v895_v29  ;;  %v1330_v30 = vpack.c.bf16 %v928_v1, %v927_v14  ;;  %v834_v46 = vadd.f32 %v770_v53, %v623_v57  ;;  %v866_v5 = vadd.f32 %v802_v38, %v703_v6 }
 0x11d   : > { %v897_v41 = vmax.f32 %v833_v48, 0.0  ;;  %v929_v59 = vmax.f32 %v865_v50, 0.0  ;;  %v625_v18 = vadd.f32 %v624_v24, %v1628_v21  ;;  %v705_v51 = vadd.f32 %v704_v12, %v1628_v21 }
 0x11e   : > { %1138 = vst [vmem:[%s1729_s28 + $0x68] sm:$0xff] %v1314_v43  ;;  %1154 = vst [vmem:[%s1729_s28 + $0xe8] sm:$0xff] %v1330_v30  ;;  %v898_v2 = vmax.f32 %v834_v46, 0.0  ;;  %v930_v42 = vmax.f32 %v866_v5, 0.0  ;;  %v627_v49 = vadd.f32 %v626_v25, %v1638_v26  ;;  %v707_v55 = vadd.f32 %v706_v3, %v1638_v26 }
 0x11f   : > { %v835_v39 = vadd.f32 %v771_v8, %v625_v18  ;;  %v867_v56 = vadd.f32 %v803_v36, %v705_v51 }
 0x120   : > { %v1315_v60 = vpack.c.bf16 %v898_v2, %v897_v41  ;;  %v1331_v10 = vpack.c.bf16 %v930_v42, %v929_v59  ;;  %v836_v53 = vadd.f32 %v772_v9, %v627_v49  ;;  %v868_v38 = vadd.f32 %v804_v58, %v707_v55 }
 0x121   : > { %v899_v21 = vmax.f32 %v835_v39, 0.0  ;;  %v931_v54 = vmax.f32 %v867_v56, 0.0 }
 0x122   : > { %1139 = vst [vmem:[%s1729_s28 + $0x70] sm:$0xff] %v1315_v60  ;;  %1155 = vst [vmem:[%s1729_s28 + $0xf0] sm:$0xff] %v1331_v10  ;;  %v900_v7 = vmax.f32 %v836_v53, 0.0  ;;  %v932_v61 = vmax.f32 %v868_v38, 0.0 }
 0x124   : > { %v1316_v28 = vpack.c.bf16 %v900_v7, %v899_v21  ;;  %v1332_v27 = vpack.c.bf16 %v932_v61, %v931_v54 }
 0x126   : > { %1140 = vst [vmem:[%s1729_s28 + $0x78] sm:$0xff] %v1316_v28  ;;  %1156 = vst [vmem:[%s1729_s28 + $0xf8] sm:$0xff] %v1332_v27 }
 0x127 PF: > { %s15_s18 = sadd.s32 1, %s1447_s18  }
 0x128   : > { %p12_p4 = scmp.ge.s32.totalorder %s15_s18, 4  }
 0x12a   :  { %14 = sbr.rel (!%p12_p4) target bundleno = 1 (0x1), region = 73 }

// kernel: _lambda_.21
= control target key start
LH: loop header
LB: loop body
LE: loop exit
PB: predicated region body
PF: predicated region fallthrough
CT: control target
= control target key end

     0   :  { %s1363_s12 = smov 0   ;;  %s1521_s0 = inlined_call_operand.vmem [shape: bf16[512,256], index: 0, kind: input, shape index: {}]   ;;  %s1522_s1 = inlined_call_operand.vmem [shape: bf16[256,128], index: 1, kind: input, shape index: {}]   ;;  %s1523_s2 = inlined_call_operand.vmem [shape: f32[1,128], index: 2, kind: input, shape index: {}]   ;;  %s1524_s3 = inlined_call_operand.vmem [shape: bf16[512,128], index: 3, kind: output, shape index: {}]  }
   0x1 LB: > { %s914_s13 = sadd.s32 4294967295, %s1341_s12   ;;  %p918_p0 = scmp.ge.s32.totalorder %s1341_s12, 1  ;;  %s1341_s12 = sphi %s1363_s12, %s13_s12  }
   0x2   : > { %p139_p1 = scmp.lt.s32.totalorder %s1341_s12, 3 }
   0x4   : > { %p140_p2 = pnand %p918_p0, %p139_p1 }
   0x5   : > { %s919_s16 = sshll.u32 (!%p140_p2), %s914_s13, 5 }
   0x6   : > { %143 = sbr.rel (%p140_p2) target bundleno = 308 (0x134), region = 32  ;;  %p165_p3 = scmp.lt.s32.totalorder (!%p140_p2), %s919_s16, 63 }
   0xb   : > { %v1271_v0 = vld [vmem:[%s1522_s1 + $0x78] sm:$0xff]   ;;  %v1273_v2 = vld [vmem:[%s1522_s1 + $0x70] sm:$0xff]   ;;  %v1275_v4 = vld [vmem:[%s1522_s1 + $0x68] sm:$0xff]   ;;  %s1526_s16 = smov (!%p165_p3, %s919_s16), 63 }
   0xc   : > { %v1272_v1 = vld [vmem:[%s1522_s1 + $0x38] sm:$0xff]   ;;  %1135 = vmatprep.subr.bf16.mxu0 %v1271_v0  ;;  %1247 = vmatprep.subr.bf16.mxu1 %v1271_v0  ;;  %v1274_v3 = vld [vmem:[%s1522_s1 + $0x30] sm:$0xff]   ;;  %v1276_v5 = vld [vmem:[%s1522_s1 + $0x28] sm:$0xff]   ;;  %s1007_s4 = sshll.u32 %s1526_s16, 3  ;;  %s923_s28 = sshll.u32 %s1526_s16, 2 }
   0xd   : > { %1136 = vmatpush3.bf16.msra.mxu0 %v1272_v1  ;;  %1255 = vmatpush3.bf16.msra.mxu1 %v1272_v1  ;;  %v1277_v6 = vld [vmem:[%s1522_s1 + $0x60] sm:$0xff]   ;;  %v1279_v8 = vld [vmem:[%s1522_s1 + $0x58] sm:$0xff]   ;;  %s1404_s9 = scalar_lea.vmem %s1521_s0, %s1007_s4  ;;  %v1281_v10 = vld [vmem:[%s1522_s1 + $0x50] sm:$0xff]   ;;  %s1472_s4 = scalar_lea.vmem %s1524_s3, %s923_s28 }
   0xe   : > { %1137 = vmatprep.subr.bf16.mxu0 %v1273_v2  ;;  %1248 = vmatprep.subr.bf16.mxu1 %v1273_v2  ;;  %v1278_v7 = vld [vmem:[%s1522_s1 + $0x20] sm:$0xff]   ;;  %v1280_v9 = vld [vmem:[%s1522_s1 + $0x18] sm:$0xff]   ;;  %v1282_v13 = vld [vmem:[%s1522_s1 + $0x10] sm:$0xff]  }
   0xf   : > { %v1289_v11 = vld [vmem:[%s1404_s9 + $0x4] ss:$8 sps:$4 sm:$0xff]   ;;  %v1287_v18 = vld [vmem:[%s1404_s9] ss:$8 sps:$4 sm:$0xff]   ;;  %v1293_v20 = vld [vmem:[%s1404_s9 + $0x14] ss:$8 sps:$4 sm:$0xff]  }
  0x10   : > { %v1292_v12 = vld [vmem:[%s1404_s9 + $0x84] ss:$8 sps:$4 sm:$0xff]   ;;  %537 = vmatprep.mubr.bf16.mxu0 %v1289_v11  ;;  %v1290_v19 = vld [vmem:[%s1404_s9 + $0x80] ss:$8 sps:$4 sm:$0xff]   ;;  %v1295_v21 = vld [vmem:[%s1404_s9 + $0x94] ss:$8 sps:$4 sm:$0xff]  }
  0x11   : > { %1138 = vmatpush3.bf16.msra.mxu0 %v1274_v3  ;;  %1256 = vmatpush3.bf16.msra.mxu1 %v1274_v3  ;;  %v1283_v14 = vld [vmem:[%s1522_s1 + $0x48] sm:$0xff]   ;;  %v1285_v16 = vld [vmem:[%s1522_s1 + $0x40] sm:$0xff]   ;;  %v1297_v22 = vld [vmem:[%s1404_s9 + $0x10] ss:$8 sps:$4 sm:$0xff]  }
  0x12   : > { %1139 = vmatprep.subr.bf16.mxu0 %v1275_v4  ;;  %1249 = vmatprep.subr.bf16.mxu1 %v1275_v4  ;;  %v1284_v15 = vld [vmem:[%s1522_s1 + $0x8] sm:$0xff]   ;;  %v1286_v17 = vld [vmem:[%s1522_s1] sm:$0xff]   ;;  %v1298_v23 = vld [vmem:[%s1404_s9 + $0x90] ss:$8 sps:$4 sm:$0xff]  }
  0x13   : > { %601 = vmatprep.mubr.bf16.mxu1 %v1292_v12  ;;  %v1299_v24 = vld [vmem:[%s1404_s9 + $0x24] ss:$8 sps:$4 sm:$0xff]   ;;  %v1303_v26 = vld [vmem:[%s1404_s9 + $0x20] ss:$8 sps:$4 sm:$0xff]   ;;  %v1305_v28 = vld [vmem:[%s1404_s9 + $0x34] ss:$8 sps:$4 sm:$0xff]  }
  0x14   : > { %v1301_v25 = vld [vmem:[%s1404_s9 + $0xa4] ss:$8 sps:$4 sm:$0xff]   ;;  %v1304_v27 = vld [vmem:[%s1404_s9 + $0xa0] ss:$8 sps:$4 sm:$0xff]   ;;  %v1307_v29 = vld [vmem:[%s1404_s9 + $0xb4] ss:$8 sps:$4 sm:$0xff]  }
  0x15   : > { %1140 = vmatpush3.bf16.msra.mxu0 %v1276_v5  ;;  %1257 = vmatpush3.bf16.msra.mxu1 %v1276_v5  ;;  %v1309_v30 = vld [vmem:[%s1404_s9 + $0x30] ss:$8 sps:$4 sm:$0xff]   ;;  %v1311_v32 = vld [vmem:[%s1404_s9 + $0x44] ss:$8 sps:$4 sm:$0xff]   ;;  %v1315_v34 = vld [vmem:[%s1404_s9 + $0x40] ss:$8 sps:$4 sm:$0xff]  }
  0x16   : > { %1141 = vmatprep.subr.bf16.mxu0 %v1277_v6  ;;  %1250 = vmatprep.subr.bf16.mxu1 %v1277_v6  ;;  %v1310_v31 = vld [vmem:[%s1404_s9 + $0xb0] ss:$8 sps:$4 sm:$0xff]   ;;  %v1313_v33 = vld [vmem:[%s1404_s9 + $0xc4] ss:$8 sps:$4 sm:$0xff]   ;;  %v1316_v35 = vld [vmem:[%s1404_s9 + $0xc0] ss:$8 sps:$4 sm:$0xff]  }
  0x17   : > { %v1317_v36 = vld [vmem:[%s1404_s9 + $0x54] ss:$8 sps:$4 sm:$0xff]   ;;  %v1321_v38 = vld [vmem:[%s1404_s9 + $0x50] ss:$8 sps:$4 sm:$0xff]   ;;  %v1323_v40 = vld [vmem:[%s1404_s9 + $0x64] ss:$8 sps:$4 sm:$0xff]  }
  0x18   : > { %v1319_v37 = vld [vmem:[%s1404_s9 + $0xd4] ss:$8 sps:$4 sm:$0xff]   ;;  %v1322_v39 = vld [vmem:[%s1404_s9 + $0xd0] ss:$8 sps:$4 sm:$0xff]   ;;  %v1325_v41 = vld [vmem:[%s1404_s9 + $0xe4] ss:$8 sps:$4 sm:$0xff]  }
  0x19   : > { %1142 = vmatpush3.bf16.msra.mxu0 %v1278_v7  ;;  %1258 = vmatpush3.bf16.msra.mxu1 %v1278_v7  ;;  %v1327_v42 = vld [vmem:[%s1404_s9 + $0x60] ss:$8 sps:$4 sm:$0xff]   ;;  %v1329_v44 = vld [vmem:[%s1404_s9 + $0x74] ss:$8 sps:$4 sm:$0xff]   ;;  %v1333_v46 = vld [vmem:[%s1404_s9 + $0x70] ss:$8 sps:$4 sm:$0xff]  }
  0x1a   : > { %1143 = vmatprep.subr.bf16.mxu0 %v1279_v8  ;;  %1251 = vmatprep.subr.bf16.mxu1 %v1279_v8  ;;  %v1328_v43 = vld [vmem:[%s1404_s9 + $0xe0] ss:$8 sps:$4 sm:$0xff]   ;;  %v1331_v45 = vld [vmem:[%s1404_s9 + $0xf4] ss:$8 sps:$4 sm:$0xff]   ;;  %v1334_v47 = vld [vmem:[%s1404_s9 + $0xf0] ss:$8 sps:$4 sm:$0xff]  }
  0x1b   : > { %v1462_v52 = vld [vmem:[%s1523_s2] ss:$0 sm:$0xff] }
  0x1d   : > { %1144 = vmatpush3.bf16.msra.mxu0 %v1280_v9  ;;  %1259 = vmatpush3.bf16.msra.mxu1 %v1280_v9 }
  0x1e   : > { %1145 = vmatprep.subr.bf16.mxu0 %v1281_v10  ;;  %1252 = vmatprep.subr.bf16.mxu1 %v1281_v10 }
  0x21   : > { %1146 = vmatpush3.bf16.msra.mxu0 %v1282_v13  ;;  %1260 = vmatpush3.bf16.msra.mxu1 %v1282_v13 }
  0x22   : > { %1147 = vmatprep.subr.bf16.mxu0 %v1283_v14  ;;  %1253 = vmatprep.subr.bf16.mxu1 %v1283_v14 }
  0x25   : > { %1148 = vmatpush3.bf16.msra.mxu0 %v1284_v15  ;;  %1261 = vmatpush3.bf16.msra.mxu1 %v1284_v15 }
  0x26   : > { %1149 = vmatprep.subr.bf16.mxu0 %v1285_v16  ;;  %1254 = vmatprep.subr.bf16.mxu1 %v1285_v16 }
  0x29   : > { %1150 = vmatpush3.bf16.msra.mxu0 %v1286_v17  ;;  %1262 = vmatpush3.bf16.msra.mxu1 %v1286_v17 }
  0x2c   : > { %538 = vmatmul.mubr.bf16.vlgmr.msra.gmra.mxu0 %v1287_v18  ;;  %602 = vmatmul.mubr.bf16.vlgmr.msra.gmra.mxu1 %v1290_v19 }
  0x2d   : > { %545 = vmatprep.mubr.bf16.mxu0 %v1293_v20  ;;  %609 = vmatprep.mubr.bf16.mxu1 %v1295_v21 }
  0x34   : > { %546 = vmatmul.mubr.bf16.gmra.mxu0 %v1297_v22  ;;  %610 = vmatmul.mubr.bf16.gmra.mxu1 %v1298_v23 }
  0x35   : > { %553 = vmatprep.mubr.bf16.mxu0 %v1299_v24  ;;  %617 = vmatprep.mubr.bf16.mxu1 %v1301_v25 }
  0x3c   : > { %554 = vmatmul.mubr.bf16.gmra.mxu0 %v1303_v26  ;;  %618 = vmatmul.mubr.bf16.gmra.mxu1 %v1304_v27 }
  0x3d   : > { %561 = vmatprep.mubr.bf16.mxu0 %v1305_v28  ;;  %625 = vmatprep.mubr.bf16.mxu1 %v1307_v29 }
  0x44   : > { %562 = vmatmul.mubr.bf16.gmra.mxu0 %v1309_v30  ;;  %626 = vmatmul.mubr.bf16.gmra.mxu1 %v1310_v31 }
  0x45   : > { %569 = vmatprep.mubr.bf16.mxu0 %v1311_v32  ;;  %633 = vmatprep.mubr.bf16.mxu1 %v1313_v33 }
  0x4c   : > { %570 = vmatmul.mubr.bf16.gmra.mxu0 %v1315_v34  ;;  %634 = vmatmul.mubr.bf16.gmra.mxu1 %v1316_v35 }
  0x4d   : > { %577 = vmatprep.mubr.bf16.mxu0 %v1317_v36  ;;  %641 = vmatprep.mubr.bf16.mxu1 %v1319_v37 }
  0x54   : > { %578 = vmatmul.mubr.bf16.gmra.mxu0 %v1321_v38  ;;  %642 = vmatmul.mubr.bf16.gmra.mxu1 %v1322_v39 }
  0x55   : > { %585 = vmatprep.mubr.bf16.mxu0 %v1323_v40  ;;  %649 = vmatprep.mubr.bf16.mxu1 %v1325_v41 }
  0x5c   : > { %586 = vmatmul.mubr.bf16.gmra.mxu0 %v1327_v42  ;;  %650 = vmatmul.mubr.bf16.gmra.mxu1 %v1328_v43 }
  0x5d   : > { %593 = vmatprep.mubr.bf16.mxu0 %v1329_v44  ;;  %657 = vmatprep.mubr.bf16.mxu1 %v1331_v45 }
  0x64   : > { %594 = vmatmul.mubr.bf16.gmra.mxu0 %v1333_v46  ;;  %658 = vmatmul.mubr.bf16.gmra.mxu1 %v1334_v47 }
  0xec   : > { %v1151_v48 = vpop.f32.mrf.mxu0  ;;  %v1199_v49 = vpop.f32.mrf.mxu1 }
  0xee   : > { %v1152_v50 = vpop.f32.mrf.mxu0  ;;  %v1200_v51 = vpop.f32.mrf.mxu1 }
  0xef   : > { %v1153_v53 = vadd.f32 %v1152_v50, %v1151_v48  ;;  %v1201_v54 = vadd.f32 %v1200_v51, %v1199_v49 }
  0xf0   : > { %v1154_v55 = vpop.f32.mrf.mxu0  ;;  %v1202_v56 = vpop.f32.mrf.mxu1 }
  0xf1   : > { %v540_v57 = vadd.f32 %v1153_v53, %v1462_v52  ;;  %v604_v58 = vadd.f32 %v1201_v54, %v1462_v52 }
  0xf2   : > { %v1155_v59 = vpop.f32.mrf.mxu0  ;;  %v1203_v60 = vpop.f32.mrf.mxu1 }
  0xf3   : > { %v1156_v61 = vadd.f32 %v1155_v59, %v1154_v55  ;;  %v1204_v62 = vadd.f32 %v1203_v60, %v1202_v56  ;;  %v666_v3 = vmax.f32 %v540_v57, 0.0  ;;  %v682_v4 = vmax.f32 %v604_v58, 0.0 }
  0xf4   : > { %v1157_v63 = vpop.f32.mrf.mxu0  ;;  %v1205_v0 = vpop.f32.mrf.mxu1 }
  0xf5   : > { %v543_v1 = vadd.f32 %v1156_v61, %v1462_v52  ;;  %v607_v2 = vadd.f32 %v1204_v62, %v1462_v52 }
  0xf6   : > { %v1158_v5 = vpop.f32.mrf.mxu0  ;;  %v1206_v6 = vpop.f32.mrf.mxu1 }
  0xf7   : > { %v667_v7 = vmax.f32 %v543_v1, 0.0  ;;  %v683_v8 = vmax.f32 %v607_v2, 0.0  ;;  %v1159_v9 = vadd.f32 %v1158_v5, %v1157_v63  ;;  %v1207_v10 = vadd.f32 %v1206_v6, %v1205_v0 }
  0xf8   : > { %v1160_v11 = vpop.f32.mrf.mxu0  ;;  %v1208_v12 = vpop.f32.mrf.mxu1 }
  0xf9   : > { %v1043_v13 = vpack.c.bf16 %v667_v7, %v666_v3  ;;  %v1083_v14 = vpack.c.bf16 %v683_v8, %v682_v4  ;;  %v548_v15 = vadd.f32 %v1159_v9, %v1462_v52  ;;  %v612_v16 = vadd.f32 %v1207_v10, %v1462_v52 }
  0xfa   : > { %v1161_v17 = vpop.f32.mrf.mxu0  ;;  %v1209_v18 = vpop.f32.mrf.mxu1 }
  0xfb   : > { %1044 = vst [vmem:[%s1472_s4] sm:$0xff] %v1043_v13   ;;  %1127 = vst [vmem:[%s1472_s4 + $0x40] sm:$0xff] %v1083_v14   ;;  %v1162_v19 = vadd.f32 %v1161_v17, %v1160_v11  ;;  %v1210_v20 = vadd.f32 %v1209_v18, %v1208_v12  ;;  %v668_v25 = vmax.f32 %v548_v15, 0.0  ;;  %v684_v26 = vmax.f32 %v612_v16, 0.0 }
  0xfc   : > { %v1163_v21 = vpop.f32.mrf.mxu0  ;;  %v1211_v22 = vpop.f32.mrf.mxu1 }
  0xfd   : > { %v551_v23 = vadd.f32 %v1162_v19, %v1462_v52  ;;  %v615_v24 = vadd.f32 %v1210_v20, %v1462_v52 }
  0xfe   : > { %v1164_v27 = vpop.f32.mrf.mxu0  ;;  %v1212_v28 = vpop.f32.mrf.mxu1 }
  0xff   : > { %v669_v29 = vmax.f32 %v551_v23, 0.0  ;;  %v685_v30 = vmax.f32 %v615_v24, 0.0  ;;  %v1165_v31 = vadd.f32 %v1164_v27, %v1163_v21  ;;  %v1213_v32 = vadd.f32 %v1212_v28, %v1211_v22 }
 0x100   : > { %v1166_v33 = vpop.f32.mrf.mxu0  ;;  %v1214_v34 = vpop.f32.mrf.mxu1 }
 0x101   : > { %v1048_v35 = vpack.c.bf16 %v669_v29, %v668_v25  ;;  %v1088_v36 = vpack.c.bf16 %v685_v30, %v684_v26  ;;  %v556_v37 = vadd.f32 %v1165_v31, %v1462_v52  ;;  %v620_v38 = vadd.f32 %v1213_v32, %v1462_v52 }
 0x102   : > { %v1167_v39 = vpop.f32.mrf.mxu0  ;;  %v1215_v40 = vpop.f32.mrf.mxu1 }
 0x103   : > { %1120 = vst [vmem:[%s1472_s4 + $0x8] sm:$0xff] %v1048_v35   ;;  %1128 = vst [vmem:[%s1472_s4 + $0x48] sm:$0xff] %v1088_v36   ;;  %v1168_v41 = vadd.f32 %v1167_v39, %v1166_v33  ;;  %v1216_v42 = vadd.f32 %v1215_v40, %v1214_v34  ;;  %v670_v47 = vmax.f32 %v556_v37, 0.0  ;;  %v686_v48 = vmax.f32 %v620_v38, 0.0 }
 0x104   : > { %v1169_v43 = vpop.f32.mrf.mxu0  ;;  %v1217_v44 = vpop.f32.mrf.mxu1 }
 0x105   : > { %v559_v45 = vadd.f32 %v1168_v41, %v1462_v52  ;;  %v623_v46 = vadd.f32 %v1216_v42, %v1462_v52 }
 0x106   : > { %v1170_v49 = vpop.f32.mrf.mxu0  ;;  %v1218_v50 = vpop.f32.mrf.mxu1 }
 0x107   : > { %v671_v51 = vmax.f32 %v559_v45, 0.0  ;;  %v687_v53 = vmax.f32 %v623_v46, 0.0  ;;  %v1171_v54 = vadd.f32 %v1170_v49, %v1169_v43  ;;  %v1219_v55 = vadd.f32 %v1218_v50, %v1217_v44 }
 0x108   : > { %v1172_v56 = vpop.f32.mrf.mxu0  ;;  %v1220_v57 = vpop.f32.mrf.mxu1 }
 0x109   : > { %v1053_v58 = vpack.c.bf16 %v671_v51, %v670_v47  ;;  %v1093_v59 = vpack.c.bf16 %v687_v53, %v686_v48  ;;  %v564_v60 = vadd.f32 %v1171_v54, %v1462_v52  ;;  %v628_v61 = vadd.f32 %v1219_v55, %v1462_v52 }
 0x10a   : > { %v1173_v62 = vpop.f32.mrf.mxu0  ;;  %v1221_v63 = vpop.f32.mrf.mxu1 }
 0x10b   : > { %1121 = vst [vmem:[%s1472_s4 + $0x10] sm:$0xff] %v1053_v58   ;;  %1129 = vst [vmem:[%s1472_s4 + $0x50] sm:$0xff] %v1093_v59   ;;  %v1174_v0 = vadd.f32 %v1173_v62, %v1172_v56  ;;  %v1222_v1 = vadd.f32 %v1221_v63, %v1220_v57  ;;  %v672_v6 = vmax.f32 %v564_v60, 0.0  ;;  %v688_v7 = vmax.f32 %v628_v61, 0.0 }
 0x10c   : > { %v1175_v2 = vpop.f32.mrf.mxu0  ;;  %v1223_v3 = vpop.f32.mrf.mxu1 }
 0x10d   : > { %v567_v4 = vadd.f32 %v1174_v0, %v1462_v52  ;;  %v631_v5 = vadd.f32 %v1222_v1, %v1462_v52 }
 0x10e   : > { %v1176_v8 = vpop.f32.mrf.mxu0  ;;  %v1224_v9 = vpop.f32.mrf.mxu1 }
 0x10f   : > { %v673_v10 = vmax.f32 %v567_v4, 0.0  ;;  %v689_v11 = vmax.f32 %v631_v5, 0.0  ;;  %v1177_v12 = vadd.f32 %v1176_v8, %v1175_v2  ;;  %v1225_v13 = vadd.f32 %v1224_v9, %v1223_v3 }
 0x110   : > { %v1178_v14 = vpop.f32.mrf.mxu0  ;;  %v1226_v15 = vpop.f32.mrf.mxu1 }
 0x111   : > { %v1058_v16 = vpack.c.bf16 %v673_v10, %v672_v6  ;;  %v1098_v17 = vpack.c.bf16 %v689_v11, %v688_v7  ;;  %v572_v18 = vadd.f32 %v1177_v12, %v1462_v52  ;;  %v636_v19 = vadd.f32 %v1225_v13, %v1462_v52 }
 0x112   : > { %v1179_v20 = vpop.f32.mrf.mxu0  ;;  %v1227_v21 = vpop.f32.mrf.mxu1 }
 0x113   : > { %1122 = vst [vmem:[%s1472_s4 + $0x18] sm:$0xff] %v1058_v16   ;;  %1130 = vst [vmem:[%s1472_s4 + $0x58] sm:$0xff] %v1098_v17   ;;  %v1180_v22 = vadd.f32 %v1179_v20, %v1178_v14  ;;  %v1228_v23 = vadd.f32 %v1227_v21, %v1226_v15  ;;  %v674_v28 = vmax.f32 %v572_v18, 0.0  ;;  %v690_v29 = vmax.f32 %v636_v19, 0.0 }
 0x114   : > { %v1181_v24 = vpop.f32.mrf.mxu0  ;;  %v1229_v25 = vpop.f32.mrf.mxu1 }
 0x115   : > { %v575_v26 = vadd.f32 %v1180_v22, %v1462_v52  ;;  %v639_v27 = vadd.f32 %v1228_v23, %v1462_v52 }
 0x116   : > { %v1182_v30 = vpop.f32.mrf.mxu0  ;;  %v1230_v31 = vpop.f32.mrf.mxu1 }
 0x117   : > { %v675_v32 = vmax.f32 %v575_v26, 0.0  ;;  %v691_v33 = vmax.f32 %v639_v27, 0.0  ;;  %v1183_v34 = vadd.f32 %v1182_v30, %v1181_v24  ;;  %v1231_v35 = vadd.f32 %v1230_v31, %v1229_v25 }
 0x118   : > { %v1184_v36 = vpop.f32.mrf.mxu0  ;;  %v1232_v37 = vpop.f32.mrf.mxu1 }
 0x119   : > { %v1063_v38 = vpack.c.bf16 %v675_v32, %v674_v28  ;;  %v1103_v39 = vpack.c.bf16 %v691_v33, %v690_v29  ;;  %v580_v40 = vadd.f32 %v1183_v34, %v1462_v52  ;;  %v644_v41 = vadd.f32 %v1231_v35, %v1462_v52 }
 0x11a   : > { %v1185_v42 = vpop.f32.mrf.mxu0  ;;  %v1233_v43 = vpop.f32.mrf.mxu1 }
 0x11b   : > { %1123 = vst [vmem:[%s1472_s4 + $0x20] sm:$0xff] %v1063_v38   ;;  %1131 = vst [vmem:[%s1472_s4 + $0x60] sm:$0xff] %v1103_v39   ;;  %v1186_v44 = vadd.f32 %v1185_v42, %v1184_v36  ;;  %v1234_v45 = vadd.f32 %v1233_v43, %v1232_v37  ;;  %v676_v50 = vmax.f32 %v580_v40, 0.0  ;;  %v692_v51 = vmax.f32 %v644_v41, 0.0 }
 0x11c   : > { %v1187_v46 = vpop.f32.mrf.mxu0  ;;  %v1235_v47 = vpop.f32.mrf.mxu1 }
 0x11d   : > { %v583_v48 = vadd.f32 %v1186_v44, %v1462_v52  ;;  %v647_v49 = vadd.f32 %v1234_v45, %v1462_v52 }
 0x11e   : > { %v1188_v53 = vpop.f32.mrf.mxu0  ;;  %v1236_v54 = vpop.f32.mrf.mxu1 }
 0x11f   : > { %v677_v55 = vmax.f32 %v583_v48, 0.0  ;;  %v693_v56 = vmax.f32 %v647_v49, 0.0  ;;  %v1189_v57 = vadd.f32 %v1188_v53, %v1187_v46  ;;  %v1237_v58 = vadd.f32 %v1236_v54, %v1235_v47 }
 0x120   : > { %v1190_v59 = vpop.f32.mrf.mxu0  ;;  %v1238_v60 = vpop.f32.mrf.mxu1 }
 0x121   : > { %v1068_v61 = vpack.c.bf16 %v677_v55, %v676_v50  ;;  %v1108_v62 = vpack.c.bf16 %v693_v56, %v692_v51  ;;  %v588_v63 = vadd.f32 %v1189_v57, %v1462_v52  ;;  %v652_v0 = vadd.f32 %v1237_v58, %v1462_v52 }
 0x122   : > { %v1191_v1 = vpop.f32.mrf.mxu0  ;;  %v1239_v2 = vpop.f32.mrf.mxu1 }
 0x123   : > { %1124 = vst [vmem:[%s1472_s4 + $0x28] sm:$0xff] %v1068_v61   ;;  %1132 = vst [vmem:[%s1472_s4 + $0x68] sm:$0xff] %v1108_v62   ;;  %v1192_v3 = vadd.f32 %v1191_v1, %v1190_v59  ;;  %v1240_v4 = vadd.f32 %v1239_v2, %v1238_v60  ;;  %v678_v9 = vmax.f32 %v588_v63, 0.0  ;;  %v694_v10 = vmax.f32 %v652_v0, 0.0 }
 0x124   : > { %v1193_v5 = vpop.f32.mrf.mxu0  ;;  %v1241_v6 = vpop.f32.mrf.mxu1 }
 0x125   : > { %v591_v7 = vadd.f32 %v1192_v3, %v1462_v52  ;;  %v655_v8 = vadd.f32 %v1240_v4, %v1462_v52 }
 0x126   : > { %v1194_v11 = vpop.f32.mrf.mxu0  ;;  %v1242_v12 = vpop.f32.mrf.mxu1 }
 0x127   : > { %v679_v13 = vmax.f32 %v591_v7, 0.0  ;;  %v695_v14 = vmax.f32 %v655_v8, 0.0  ;;  %v1195_v15 = vadd.f32 %v1194_v11, %v1193_v5  ;;  %v1243_v16 = vadd.f32 %v1242_v12, %v1241_v6 }
 0x128   : > { %v1196_v17 = vpop.f32.mrf.mxu0  ;;  %v1244_v18 = vpop.f32.mrf.mxu1 }
 0x129   : > { %v1073_v19 = vpack.c.bf16 %v679_v13, %v678_v9  ;;  %v1113_v20 = vpack.c.bf16 %v695_v14, %v694_v10  ;;  %v596_v23 = vadd.f32 %v1195_v15, %v1462_v52  ;;  %v660_v24 = vadd.f32 %v1243_v16, %v1462_v52 }
 0x12a   : > { %v1197_v21 = vpop.f32.mrf.mxu0  ;;  %v1245_v22 = vpop.f32.mrf.mxu1 }
 0x12b   : > { %1125 = vst [vmem:[%s1472_s4 + $0x30] sm:$0xff] %v1073_v19   ;;  %1133 = vst [vmem:[%s1472_s4 + $0x70] sm:$0xff] %v1113_v20   ;;  %v1198_v25 = vadd.f32 %v1197_v21, %v1196_v17  ;;  %v1246_v26 = vadd.f32 %v1245_v22, %v1244_v18  ;;  %v680_v29 = vmax.f32 %v596_v23, 0.0  ;;  %v696_v30 = vmax.f32 %v660_v24, 0.0 }
 0x12d   : > { %v599_v27 = vadd.f32 %v1198_v25, %v1462_v52  ;;  %v663_v28 = vadd.f32 %v1246_v26, %v1462_v52 }
 0x12f   : > { %v681_v31 = vmax.f32 %v599_v27, 0.0  ;;  %v697_v32 = vmax.f32 %v663_v28, 0.0 }
 0x131   : > { %v1078_v33 = vpack.c.bf16 %v681_v31, %v680_v29  ;;  %v1118_v34 = vpack.c.bf16 %v697_v32, %v696_v30 }
 0x133   : > { %1126 = vst [vmem:[%s1472_s4 + $0x38] sm:$0xff] %v1078_v33   ;;  %1134 = vst [vmem:[%s1472_s4 + $0x78] sm:$0xff] %v1118_v34  }
 0x134 PF: > { %s13_s12 = sadd.s32 1, %s1341_s12  }
 0x135   : > { %p10_p4 = scmp.ge.s32.totalorder %s13_s12, 4  }
 0x137   :  { %12 = sbr.rel (!%p10_p4) target bundleno = 1 (0x1), region = 62 }

// kernel: _lambda_.22
= control target key start
LH: loop header
LB: loop body
LE: loop exit
PB: predicated region body
PF: predicated region fallthrough
CT: control target
= control target key end

     0   :  { %s2080_s24 = smov 0   ;;  %s2082_s25 = smov 0   ;;  %s2640_s0 = inlined_call_operand.vmem [shape: bf16[128,128], index: 0, kind: input, shape index: {}]   ;;  %s2641_s1 = inlined_call_operand.vmem [shape: f32[1,128], index: 1, kind: input, shape index: {}]   ;;  %s2642_s2 = inlined_call_operand.vmem [shape: bf16[128,512], index: 2, kind: input, shape index: {}]   ;;  %s2643_s3 = inlined_call_operand.vmem [shape: f32[1,512], index: 3, kind: input, shape index: {}, may-alias: {3,6}]   ;;  %s2644_s4 = inlined_call_operand.vmem [shape: bf16[16,2,8,512], index: 4, kind: input, shape index: {}]   ;;  %s2645_s5 = inlined_call_operand.vmem [shape: bf16[256,512], index: 5, kind: input, shape index: {}]   ;;  %s2646_s6 = inlined_call_operand.vmem [shape: f32[1,512], index: 6, kind: input, shape index: {}, may-alias: {3,6}]   ;;  %s2647_s7 = inlined_call_operand.vmem [shape: bf16[128,512], index: 7, kind: output, shape index: {}]  }
   0x1   :  { %s2084_s26 = smov 0  }
   0x2 LB: > { %s1658_s27 = sadd.s32 4294967295, %s2037_s26   ;;  %s2097_s28 = sadd.s32 1, %s2037_s26   ;;  %s2037_s26 = sphi %s2084_s26, %s2650_s26   ;;  %s2033_s25 = sphi %s2082_s25, %s2649_s25   ;;  %s2029_s24 = sphi %s2080_s24, %s2648_s24  }
   0x3   : > { %s110_s29 = ssub.s32 %s2037_s26, %s2097_s28  ;;  %s113_s30 = sadd.s32 1, %s2033_s25 }
   0x4   : > { %p111_p0 = scmp.eq.s32.totalorder %s110_s29, 0  ;;  %p120_p1 = scmp.ne.s32.totalorder %s2033_s25, %s2029_s24 }
   0x5   : > { %p121_p2 = scmp.eq.s32.totalorder %s2037_s26, 0  ;;  %p1661_p4 = scmp.ge.s32.totalorder %s2037_s26, 2 }
   0x6   : > { %s2106_s8 = scalar_select %p111_p0, %s2033_s25, %s113_s30  }
   0x7   : > { %p122_p3 = por %p121_p2, %p120_p1  ;;  %229 = sbr.rel (%p1661_p4) target bundleno = 24 (0x18), region = 36 }
   0xc   : > { %241 = sbr.rel (!%p122_p3) target bundleno = 24 (0x18), region = 44  ;;  %s243_s9 = sand.u32 (%p122_p3), 1, %s2033_s25  }
   0xd   : > { %s1797_s10 = sshll.u32 (%p122_p3), %s2037_s26, 8  ;;  %s1662_s11 = sshll.u32 (%p122_p3), %s243_s9, 6 }
   0xe   : > { %s249_s14 = scalar_lea.vmem (%p122_p3), %s2644_s4, %s1797_s10  ;;  %s245_s15 = scalar_lea.vmem (%p122_p3), [#allocation2], %s1662_s11 }
   0xf   : > { %v292_v0 = vld [vmem:[%s249_s14] sm:$0xff] (%p122_p3) }
  0x10   : > { %v294_v1 = vld [vmem:[%s249_s14 + $0x20] sm:$0xff] (%p122_p3)  ;;  %293 = vst [vmem:[%s245_s15] sm:$0xff] (%p122_p3), %v292_v0 }
  0x11   : > { %v296_v2 = vld [vmem:[%s249_s14 + $0x40] sm:$0xff]  ;;  %295 = vst [vmem:[%s245_s15 + $0x8] sm:$0xff] %v294_v1 }
  0x12   : > { %297 = vst [vmem:[%s245_s15 + $0x10] sm:$0xff] %v296_v2  ;;  %v298_v3 = vld [vmem:[%s249_s14 + $0x60] sm:$0xff] }
  0x13   : > { %v300_v4 = vld [vmem:[%s249_s14 + $0x80] sm:$0xff]  ;;  %299 = vst [vmem:[%s245_s15 + $0x18] sm:$0xff] %v298_v3 }
  0x14   : > { %v302_v5 = vld [vmem:[%s249_s14 + $0xa0] sm:$0xff]  ;;  %301 = vst [vmem:[%s245_s15 + $0x20] sm:$0xff] %v300_v4 }
  0x15   : > { %303 = vst [vmem:[%s245_s15 + $0x28] sm:$0xff] %v302_v5  ;;  %v304_v6 = vld [vmem:[%s249_s14 + $0xc0] sm:$0xff] }
  0x16   : > { %v306_v7 = vld [vmem:[%s249_s14 + $0xe0] sm:$0xff]  ;;  %305 = vst [vmem:[%s245_s15 + $0x30] sm:$0xff] %v304_v6 }
  0x17   : > { %307 = vst [vmem:[%s245_s15 + $0x38] sm:$0xff] %v306_v7 }
  0x18 PF: > { %p1666_p5 = scmp.ge.s32.totalorder %s2037_s26, 1  ;;  %p312_p6 = scmp.lt.s32.totalorder %s2037_s26, 3 }
  0x1a   : > { %p313_p7 = pnand %p1666_p5, %p312_p6 }
  0x1b   : > { %s1668_s9 = sshll.u32 (!%p313_p7), %s1658_s27, 3  ;;  %s319_s10 = sand.u32 (!%p313_p7), 1, %s2029_s24  }
  0x1c   : > { %316 = sbr.rel (%p313_p7) target bundleno = 363 (0x16b), region = 82  ;;  %p357_p8 = scmp.lt.s32.totalorder (!%p313_p7), %s1668_s9, 15 }
  0x1d   : > { %s1667_s24 = sshll.u32 (!%p313_p7), %s319_s10, 6 }
  0x1e   : > { %s2362_s23 = scalar_lea.vmem (!%p313_p7), [#allocation2], %s1667_s24 }
  0x21   : > { %v1859_v8 = vld [vmem:[%s2642_s2 + $0xe4] ss:$16 sps:$4 sm:$0xff]   ;;  %v1861_v9 = vld [vmem:[%s2642_s2 + $0xec] ss:$16 sps:$4 sm:$0xff]   ;;  %v2039_v10 = vmov 0   ;;  %s2652_s9 = smov (!%p357_p8, %s1668_s9), 15 }
  0x22   : > { %660 = vmatprep.mubr.bf16.mxu0 %v2039_v10  ;;  %733 = vmatprep.mubr.bf16.mxu1 %v2039_v10  ;;  %v1863_v11 = vld [vmem:[%s2642_s2 + $0xe0] ss:$16 sps:$4 sm:$0xff]   ;;  %v1864_v12 = vld [vmem:[%s2642_s2 + $0xe8] ss:$16 sps:$4 sm:$0xff]   ;;  %v1865_v13 = vld [vmem:[%s2642_s2 + $0xc4] ss:$16 sps:$4 sm:$0xff]  }
  0x23   : > { %628 = vmatprep.subr.bf16.mxu0 %v1859_v8  ;;  %701 = vmatprep.subr.bf16.mxu1 %v1861_v9  ;;  %v1867_v14 = vld [vmem:[%s2642_s2 + $0xcc] ss:$16 sps:$4 sm:$0xff]   ;;  %v1869_v15 = vld [vmem:[%s2642_s2 + $0xc0] ss:$16 sps:$4 sm:$0xff]   ;;  %v1870_v16 = vld [vmem:[%s2642_s2 + $0xc8] ss:$16 sps:$4 sm:$0xff]  }
  0x24   : > { %629 = vmatpush1.bf16.msra.mxu0 %v1863_v11  ;;  %702 = vmatpush1.bf16.msra.mxu1 %v1864_v12  ;;  %v1871_v17 = vld [vmem:[%s2642_s2 + $0xa4] ss:$16 sps:$4 sm:$0xff]   ;;  %v1873_v18 = vld [vmem:[%s2642_s2 + $0xac] ss:$16 sps:$4 sm:$0xff]   ;;  %v1875_v19 = vld [vmem:[%s2642_s2 + $0xa0] ss:$16 sps:$4 sm:$0xff]  }
  0x25   : > { %630 = vmatprep.subr.bf16.mxu0 %v1865_v13  ;;  %703 = vmatprep.subr.bf16.mxu1 %v1867_v14  ;;  %v1876_v20 = vld [vmem:[%s2642_s2 + $0xa8] ss:$16 sps:$4 sm:$0xff]   ;;  %v1877_v21 = vld [vmem:[%s2642_s2 + $0x84] ss:$16 sps:$4 sm:$0xff]   ;;  %v1879_v22 = vld [vmem:[%s2642_s2 + $0x8c] ss:$16 sps:$4 sm:$0xff]  }
  0x26   : > { %v1881_v23 = vld [vmem:[%s2642_s2 + $0x80] ss:$16 sps:$4 sm:$0xff]   ;;  %v1882_v24 = vld [vmem:[%s2642_s2 + $0x88] ss:$16 sps:$4 sm:$0xff]   ;;  %v1883_v25 = vld [vmem:[%s2642_s2 + $0x64] ss:$16 sps:$4 sm:$0xff]  }
  0x27   : > { %v1885_v26 = vld [vmem:[%s2642_s2 + $0x6c] ss:$16 sps:$4 sm:$0xff]   ;;  %v1887_v27 = vld [vmem:[%s2642_s2 + $0x60] ss:$16 sps:$4 sm:$0xff]   ;;  %v1888_v28 = vld [vmem:[%s2642_s2 + $0x68] ss:$16 sps:$4 sm:$0xff]  }
  0x28   : > { %631 = vmatpush1.bf16.msra.mxu0 %v1869_v15  ;;  %704 = vmatpush1.bf16.msra.mxu1 %v1870_v16  ;;  %s1669_s20 = sshll.u32 %s2652_s9, 2  ;;  %v1889_v29 = vld [vmem:[%s2642_s2 + $0x44] ss:$16 sps:$4 sm:$0xff]   ;;  %v1891_v30 = vld [vmem:[%s2642_s2 + $0x4c] ss:$16 sps:$4 sm:$0xff]   ;;  %s1798_s30 = sshll.u32 %s2652_s9, 4 }
  0x29   : > { %632 = vmatprep.subr.bf16.mxu0 %v1871_v17  ;;  %705 = vmatprep.subr.bf16.mxu1 %v1873_v18  ;;  %s2192_s11 = scalar_lea.vmem %s2640_s0, %s1669_s20  ;;  %v1893_v31 = vld [vmem:[%s2642_s2 + $0x40] ss:$16 sps:$4 sm:$0xff]   ;;  %v1894_v32 = vld [vmem:[%s2642_s2 + $0x48] ss:$16 sps:$4 sm:$0xff]   ;;  %v1895_v33 = vld [vmem:[%s2642_s2 + $0x24] ss:$16 sps:$4 sm:$0xff]   ;;  %s2540_s12 = scalar_lea.vmem %s2647_s7, %s1798_s30 }
  0x2a   : > { %v1897_v34 = vld [vmem:[%s2642_s2 + $0x2c] ss:$16 sps:$4 sm:$0xff]   ;;  %v1816_v35 = vld [vmem:[%s2192_s11] sm:$0xff]   ;;  %v1900_v40 = vld [vmem:[%s2642_s2 + $0x28] ss:$16 sps:$4 sm:$0xff]  }
  0x2b   : > { %v2210_v36 = vld [vmem:[%s2641_s1] ss:$0 sm:$0xff]  ;;  %v1817_v37 = vunpack.c.l.bf16 %v1816_v35  ;;  %v1818_v38 = vunpack.c.h.bf16 %v1816_v35  ;;  %v1901_v43 = vld [vmem:[%s2642_s2 + $0x4] ss:$16 sps:$4 sm:$0xff]   ;;  %v1903_v44 = vld [vmem:[%s2642_s2 + $0xc] ss:$16 sps:$4 sm:$0xff]  }
  0x2c   : > { %633 = vmatpush1.bf16.msra.mxu0 %v1875_v19  ;;  %706 = vmatpush1.bf16.msra.mxu1 %v1876_v20  ;;  %v1899_v39 = vld [vmem:[%s2642_s2 + $0x20] ss:$16 sps:$4 sm:$0xff]   ;;  %v1906_v48 = vld [vmem:[%s2642_s2 + $0x8] ss:$16 sps:$4 sm:$0xff]   ;;  %v1909_v49 = vld [vmem:[%s2645_s5 + $0xe4] ss:$16 sps:$4 sm:$0xff]  }
  0x2d   : > { %634 = vmatprep.subr.bf16.mxu0 %v1877_v21  ;;  %707 = vmatprep.subr.bf16.mxu1 %v1879_v22  ;;  %v394_v41 = vadd.f32 %v1817_v37, %v2210_v36  ;;  %v395_v42 = vadd.f32 %v1818_v38, %v2210_v36  ;;  %v1905_v47 = vld [vmem:[%s2642_s2] ss:$16 sps:$4 sm:$0xff]   ;;  %v1912_v50 = vld [vmem:[%s2645_s5 + $0xec] ss:$16 sps:$4 sm:$0xff]   ;;  %v1910_v53 = vld [vmem:[%s2645_s5 + $0xe8] ss:$16 sps:$4 sm:$0xff]  }
  0x2e   : > { %v1907_v52 = vld [vmem:[%s2645_s5 + $0xe0] ss:$16 sps:$4 sm:$0xff]   ;;  %v1915_v54 = vld [vmem:[%s2645_s5 + $0xc4] ss:$16 sps:$4 sm:$0xff]   ;;  %v1918_v55 = vld [vmem:[%s2645_s5 + $0xcc] ss:$16 sps:$4 sm:$0xff]  }
  0x2f   : > { %v402_v45 = vmax.f32 %v394_v41, 0.0  ;;  %v403_v46 = vmax.f32 %v395_v42, 0.0  ;;  %v1913_v56 = vld [vmem:[%s2645_s5 + $0xc0] ss:$16 sps:$4 sm:$0xff]   ;;  %v1916_v57 = vld [vmem:[%s2645_s5 + $0xc8] ss:$16 sps:$4 sm:$0xff]  }
  0x30   : > { %635 = vmatpush1.bf16.msra.mxu0 %v1881_v23  ;;  %708 = vmatpush1.bf16.msra.mxu1 %v1882_v24  ;;  %v1921_v58 = vld [vmem:[%s2645_s5 + $0xa4] ss:$16 sps:$4 sm:$0xff]   ;;  %v1924_v59 = vld [vmem:[%s2645_s5 + $0xac] ss:$16 sps:$4 sm:$0xff]   ;;  %v1919_v60 = vld [vmem:[%s2645_s5 + $0xa0] ss:$16 sps:$4 sm:$0xff]  }
  0x31   : > { %636 = vmatprep.subr.bf16.mxu0 %v1883_v25  ;;  %709 = vmatprep.subr.bf16.mxu1 %v1885_v26  ;;  %v410_v51 = vpack.c.bf16 %v403_v46, %v402_v45  ;;  %v1922_v61 = vld [vmem:[%s2645_s5 + $0xa8] ss:$16 sps:$4 sm:$0xff]   ;;  %v1927_v62 = vld [vmem:[%s2645_s5 + $0x84] ss:$16 sps:$4 sm:$0xff]   ;;  %v1930_v63 = vld [vmem:[%s2645_s5 + $0x8c] ss:$16 sps:$4 sm:$0xff]  }
  0x32   : > { %v1925_v0 = vld [vmem:[%s2645_s5 + $0x80] ss:$16 sps:$4 sm:$0xff]   ;;  %v1928_v1 = vld [vmem:[%s2645_s5 + $0x88] ss:$16 sps:$4 sm:$0xff]   ;;  %v1933_v2 = vld [vmem:[%s2645_s5 + $0x64] ss:$16 sps:$4 sm:$0xff]  }
  0x33   : > { %v1936_v3 = vld [vmem:[%s2645_s5 + $0x6c] ss:$16 sps:$4 sm:$0xff]   ;;  %v1931_v5 = vld [vmem:[%s2645_s5 + $0x60] ss:$16 sps:$4 sm:$0xff]   ;;  %v1934_v8 = vld [vmem:[%s2645_s5 + $0x68] ss:$16 sps:$4 sm:$0xff]  }
  0x34   : > { %637 = vmatpush1.bf16.msra.mxu0 %v1887_v27  ;;  %710 = vmatpush1.bf16.msra.mxu1 %v1888_v28  ;;  %v1831_v4 = vld [vmem:[%s2192_s11 + $0x8] sm:$0xff]   ;;  %v1939_v9 = vld [vmem:[%s2645_s5 + $0x44] ss:$16 sps:$4 sm:$0xff]   ;;  %v1937_v14 = vld [vmem:[%s2645_s5 + $0x40] ss:$16 sps:$4 sm:$0xff]  }
  0x35   : > { %638 = vmatprep.subr.bf16.mxu0 %v1889_v29  ;;  %711 = vmatprep.subr.bf16.mxu1 %v1891_v30  ;;  %v1821_v6 = vunpack.c.l.bf16 %v1831_v4  ;;  %v1822_v7 = vunpack.c.h.bf16 %v1831_v4  ;;  %v1942_v11 = vld [vmem:[%s2645_s5 + $0x4c] ss:$16 sps:$4 sm:$0xff]   ;;  %v1940_v15 = vld [vmem:[%s2645_s5 + $0x48] ss:$16 sps:$4 sm:$0xff]   ;;  %v1832_v18 = vld [vmem:[%s2192_s11 + $0x10] sm:$0xff]  }
  0x36   : > { %v1945_v19 = vld [vmem:[%s2645_s5 + $0x24] ss:$16 sps:$4 sm:$0xff]   ;;  %v1948_v20 = vld [vmem:[%s2645_s5 + $0x2c] ss:$16 sps:$4 sm:$0xff]   ;;  %v1825_v22 = vunpack.c.l.bf16 %v1832_v18  ;;  %v1826_v23 = vunpack.c.h.bf16 %v1832_v18  ;;  %v1943_v24 = vld [vmem:[%s2645_s5 + $0x20] ss:$16 sps:$4 sm:$0xff]  }
  0x37   : > { %v396_v12 = vadd.f32 %v1821_v6, %v2210_v36  ;;  %v397_v13 = vadd.f32 %v1822_v7, %v2210_v36  ;;  %v1946_v27 = vld [vmem:[%s2645_s5 + $0x28] ss:$16 sps:$4 sm:$0xff]   ;;  %v1951_v28 = vld [vmem:[%s2645_s5 + $0x4] ss:$16 sps:$4 sm:$0xff]   ;;  %v1954_v29 = vld [vmem:[%s2645_s5 + $0xc] ss:$16 sps:$4 sm:$0xff]  }
  0x38   : > { %639 = vmatpush1.bf16.msra.mxu0 %v1893_v31  ;;  %712 = vmatpush1.bf16.msra.mxu1 %v1894_v32  ;;  %v398_v25 = vadd.f32 %v1825_v22, %v2210_v36  ;;  %v399_v26 = vadd.f32 %v1826_v23, %v2210_v36  ;;  %v1833_v32 = vld [vmem:[%s2192_s11 + $0x18] sm:$0xff]   ;;  %v1999_v7 = vld [vmem:[%s2645_s5 + $0x104] ss:$16 sps:$4 sm:$0xff]  }
  0x39   : > { %640 = vmatprep.subr.bf16.mxu0 %v1895_v33  ;;  %713 = vmatprep.subr.bf16.mxu1 %v1897_v34  ;;  %v404_v16 = vmax.f32 %v396_v12, 0.0  ;;  %v405_v17 = vmax.f32 %v397_v13, 0.0  ;;  %v1949_v33 = vld [vmem:[%s2645_s5] ss:$16 sps:$4 sm:$0xff]   ;;  %v1829_v35 = vunpack.c.l.bf16 %v1833_v32  ;;  %v1830_v37 = vunpack.c.h.bf16 %v1833_v32  ;;  %v1952_v38 = vld [vmem:[%s2645_s5 + $0x8] ss:$16 sps:$4 sm:$0xff]  }
  0x3a   : > { %v406_v30 = vmax.f32 %v398_v25, 0.0  ;;  %v407_v31 = vmax.f32 %v399_v26, 0.0  ;;  %v1996_v4 = vld [vmem:[%s2645_s5 + $0x12c] ss:$16 sps:$4 sm:$0xff]   ;;  %v1994_v6 = vld [vmem:[%s2645_s5 + $0x128] ss:$16 sps:$4 sm:$0xff]  }
  0x3b   : > { %v411_v21 = vpack.c.bf16 %v405_v17, %v404_v16  ;;  %v400_v41 = vadd.f32 %v1829_v35, %v2210_v36  ;;  %v401_v42 = vadd.f32 %v1830_v37, %v2210_v36  ;;  %v1966_v36 = vld [vmem:[%s2645_s5 + $0x1cc] ss:$16 sps:$4 sm:$0xff]   ;;  %v2003_v12 = vld [vmem:[%s2362_s23] ss:$8 sps:$4 sm:$0xff]   ;;  %v2014_v18 = vld [vmem:[%s2362_s23 + $0x30] ss:$8 sps:$4 sm:$0xff]  }
  0x3c   : > { %641 = vmatpush1.bf16.msra.mxu0 %v1899_v39  ;;  %714 = vmatpush1.bf16.msra.mxu1 %v1900_v40  ;;  %v412_v34 = vpack.c.bf16 %v407_v31, %v406_v30  ;;  %v1957_v39 = vld [vmem:[%s2645_s5 + $0x1e4] ss:$16 sps:$4 sm:$0xff]   ;;  %v1960_v40 = vld [vmem:[%s2645_s5 + $0x1ec] ss:$16 sps:$4 sm:$0xff]   ;;  %v2011_v16 = vld [vmem:[%s2362_s23 + $0x20] ss:$8 sps:$4 sm:$0xff]  }
  0x3d   : > { %642 = vmatprep.subr.bf16.mxu0 %v1901_v43  ;;  %715 = vmatprep.subr.bf16.mxu1 %v1903_v44  ;;  %v1955_v43 = vld [vmem:[%s2645_s5 + $0x1e0] ss:$16 sps:$4 sm:$0xff]   ;;  %v1958_v44 = vld [vmem:[%s2645_s5 + $0x1e8] ss:$16 sps:$4 sm:$0xff]   ;;  %v408_v45 = vmax.f32 %v400_v41, 0.0  ;;  %v409_v46 = vmax.f32 %v401_v42, 0.0 }
  0x3e   : > { %v2006_v13 = vld [vmem:[%s2362_s23 + $0x14] ss:$8 sps:$4 sm:$0xff]  }
  0x3f   : > { %v2012_v17 = vld [vmem:[%s2362_s23 + $0x34] ss:$8 sps:$4 sm:$0xff]  }
  0x40   : > { %643 = vmatpush1.bf16.msra.mxu0 %v1905_v47  ;;  %716 = vmatpush1.bf16.msra.mxu1 %v1906_v48  ;;  %v1963_v47 = vld [vmem:[%s2645_s5 + $0x1c4] ss:$16 sps:$4 sm:$0xff]   ;;  %v1961_v48 = vld [vmem:[%s2645_s5 + $0x1c0] ss:$16 sps:$4 sm:$0xff]  }
  0x41   : > { %1206 = vmatprep.subr.bf16.mxu0 %v1909_v49  ;;  %1279 = vmatprep.subr.bf16.mxu1 %v1912_v50  ;;  %v1964_v49 = vld [vmem:[%s2645_s5 + $0x1c8] ss:$16 sps:$4 sm:$0xff]   ;;  %v413_v50 = vpack.c.bf16 %v409_v46, %v408_v45 }
  0x43   : > { %661 = vmatmul.mubr.bf16.vlgmr.msra.gmra.mxu0 %v410_v51  ;;  %734 = vmatmul.mubr.bf16.vlgmr.msra.gmra.mxu1 %v410_v51  ;;  %v1969_v51 = vld [vmem:[%s2645_s5 + $0x1a4] ss:$16 sps:$4 sm:$0xff]  }
  0x44   : > { %1207 = vmatpush1.bf16.msra.mxu0 %v1907_v52  ;;  %1280 = vmatpush1.bf16.msra.mxu1 %v1910_v53  ;;  %v2005_v52 = vld [vmem:[%s2362_s23 + $0x4] ss:$8 sps:$4 sm:$0xff]   ;;  %v1967_v53 = vld [vmem:[%s2645_s5 + $0x1a0] ss:$16 sps:$4 sm:$0xff]  }
  0x45   : > { %1208 = vmatprep.subr.bf16.mxu0 %v1915_v54  ;;  %1281 = vmatprep.subr.bf16.mxu1 %v1918_v55  ;;  %v1970_v54 = vld [vmem:[%s2645_s5 + $0x1a8] ss:$16 sps:$4 sm:$0xff]   ;;  %v1975_v55 = vld [vmem:[%s2645_s5 + $0x184] ss:$16 sps:$4 sm:$0xff]  }
  0x46   : > { %670 = vmatprep.mubr.bf16.mxu0 %v2039_v10  ;;  %743 = vmatprep.mubr.bf16.mxu1 %v2039_v10 }
  0x48   : > { %1209 = vmatpush1.bf16.msra.mxu0 %v1913_v56  ;;  %1282 = vmatpush1.bf16.msra.mxu1 %v1916_v57  ;;  %v1978_v56 = vld [vmem:[%s2645_s5 + $0x18c] ss:$16 sps:$4 sm:$0xff]   ;;  %v1973_v57 = vld [vmem:[%s2645_s5 + $0x180] ss:$16 sps:$4 sm:$0xff]  }
  0x49   : > { %1210 = vmatprep.subr.bf16.mxu0 %v1921_v58  ;;  %1283 = vmatprep.subr.bf16.mxu1 %v1924_v59  ;;  %v1976_v58 = vld [vmem:[%s2645_s5 + $0x188] ss:$16 sps:$4 sm:$0xff]   ;;  %v1981_v59 = vld [vmem:[%s2645_s5 + $0x164] ss:$16 sps:$4 sm:$0xff]  }
  0x4b   : > { %671 = vmatmul.mubr.bf16.gmra.mxu0 %v411_v21  ;;  %744 = vmatmul.mubr.bf16.gmra.mxu1 %v411_v21 }
  0x4c   : > { %1211 = vmatpush1.bf16.msra.mxu0 %v1919_v60  ;;  %1284 = vmatpush1.bf16.msra.mxu1 %v1922_v61  ;;  %v1984_v60 = vld [vmem:[%s2645_s5 + $0x16c] ss:$16 sps:$4 sm:$0xff]   ;;  %v1979_v61 = vld [vmem:[%s2645_s5 + $0x160] ss:$16 sps:$4 sm:$0xff]  }
  0x4d   : > { %1212 = vmatprep.subr.bf16.mxu0 %v1927_v62  ;;  %1285 = vmatprep.subr.bf16.mxu1 %v1930_v63  ;;  %v1982_v62 = vld [vmem:[%s2645_s5 + $0x168] ss:$16 sps:$4 sm:$0xff]   ;;  %v1987_v63 = vld [vmem:[%s2645_s5 + $0x144] ss:$16 sps:$4 sm:$0xff]  }
  0x4e   : > { %680 = vmatprep.mubr.bf16.mxu0 %v2039_v10  ;;  %753 = vmatprep.mubr.bf16.mxu1 %v2039_v10 }
  0x50   : > { %1213 = vmatpush1.bf16.msra.mxu0 %v1925_v0  ;;  %1286 = vmatpush1.bf16.msra.mxu1 %v1928_v1  ;;  %v1990_v0 = vld [vmem:[%s2645_s5 + $0x14c] ss:$16 sps:$4 sm:$0xff]   ;;  %v1985_v1 = vld [vmem:[%s2645_s5 + $0x140] ss:$16 sps:$4 sm:$0xff]  }
  0x51   : > { %1214 = vmatprep.subr.bf16.mxu0 %v1933_v2  ;;  %1287 = vmatprep.subr.bf16.mxu1 %v1936_v3  ;;  %v1988_v2 = vld [vmem:[%s2645_s5 + $0x148] ss:$16 sps:$4 sm:$0xff]   ;;  %v1993_v3 = vld [vmem:[%s2645_s5 + $0x124] ss:$16 sps:$4 sm:$0xff]  }
  0x53   : > { %681 = vmatmul.mubr.bf16.gmra.mxu0 %v412_v34  ;;  %754 = vmatmul.mubr.bf16.gmra.mxu1 %v412_v34 }
  0x54   : > { %1215 = vmatpush1.bf16.msra.mxu0 %v1931_v5  ;;  %1288 = vmatpush1.bf16.msra.mxu1 %v1934_v8  ;;  %v1991_v5 = vld [vmem:[%s2645_s5 + $0x120] ss:$16 sps:$4 sm:$0xff]   ;;  %v2002_v8 = vld [vmem:[%s2645_s5 + $0x10c] ss:$16 sps:$4 sm:$0xff]  }
  0x55   : > { %1216 = vmatprep.subr.bf16.mxu0 %v1939_v9  ;;  %1289 = vmatprep.subr.bf16.mxu1 %v1942_v11  ;;  %v1997_v9 = vld [vmem:[%s2645_s5 + $0x100] ss:$16 sps:$4 sm:$0xff]   ;;  %v2000_v11 = vld [vmem:[%s2645_s5 + $0x108] ss:$16 sps:$4 sm:$0xff]  }
  0x56   : > { %690 = vmatprep.mubr.bf16.mxu0 %v2039_v10  ;;  %763 = vmatprep.mubr.bf16.mxu1 %v2039_v10  ;;  %v1972_v10 = vld [vmem:[%s2645_s5 + $0x1ac] ss:$16 sps:$4 sm:$0xff]  }
  0x58   : > { %1217 = vmatpush1.bf16.msra.mxu0 %v1937_v14  ;;  %1290 = vmatpush1.bf16.msra.mxu1 %v1940_v15  ;;  %v2008_v14 = vld [vmem:[%s2362_s23 + $0x10] ss:$8 sps:$4 sm:$0xff]   ;;  %v2009_v15 = vld [vmem:[%s2362_s23 + $0x24] ss:$8 sps:$4 sm:$0xff]  }
  0x59   : > { %1218 = vmatprep.subr.bf16.mxu0 %v1945_v19  ;;  %1291 = vmatprep.subr.bf16.mxu1 %v1948_v20 }
  0x5b   : > { %691 = vmatmul.mubr.bf16.gmra.mxu0 %v413_v50  ;;  %764 = vmatmul.mubr.bf16.gmra.mxu1 %v413_v50 }
  0x5c   : > { %1219 = vmatpush1.bf16.msra.mxu0 %v1943_v24  ;;  %1292 = vmatpush1.bf16.msra.mxu1 %v1946_v27 }
  0x5d   : > { %1220 = vmatprep.subr.bf16.mxu0 %v1951_v28  ;;  %1293 = vmatprep.subr.bf16.mxu1 %v1954_v29 }
  0x5e   : > { %1238 = vmatprep.mubr.bf16.mxu0 %v2005_v52  ;;  %1311 = vmatprep.mubr.bf16.mxu1 %v2005_v52  ;;  %v446_v52 = vld [vmem:[%s2643_s3] sm:$0xf] }
  0x60   : > { %1221 = vmatpush1.bf16.msra.mxu0 %v1949_v33  ;;  %1294 = vmatpush1.bf16.msra.mxu1 %v1952_v38 }
  0x61   : > { %1222 = vmatprep.subr.bf16.mxu0 %v1957_v39  ;;  %1295 = vmatprep.subr.bf16.mxu1 %v1960_v40 }
  0x64   : > { %1223 = vmatpush2.bf16.msra.mxu0 %v1955_v43  ;;  %1296 = vmatpush2.bf16.msra.mxu1 %v1958_v44  ;;  %v448_v44 = vlaneseq }
  0x65   : > { %1224 = vmatprep.subr.bf16.mxu0 %v1963_v47  ;;  %1297 = vmatprep.subr.bf16.mxu1 %v1966_v36 }
  0x66   : > { %v449_v47 = vshrl.u32 %v448_v44, 7 }
  0x68   : > { %1225 = vmatpush2.bf16.msra.mxu0 %v1961_v48  ;;  %1298 = vmatpush2.bf16.msra.mxu1 %v1964_v49  ;;  %v450_v49 = vsub.s32 0, %v449_v47  ;;  %v458_v50 = vsub.s32 2, %v449_v47 }
  0x69   : > { %1226 = vmatprep.subr.bf16.mxu0 %v1969_v51  ;;  %1299 = vmatprep.subr.bf16.mxu1 %v1972_v10  ;;  %v454_v51 = vsub.s32 1, %v449_v47  ;;  %v462_v10 = vsub.s32 3, %v449_v47 }
  0x6c   : > { %1227 = vmatpush2.bf16.msra.mxu0 %v1967_v53  ;;  %1300 = vmatpush2.bf16.msra.mxu1 %v1970_v54 }
  0x6d   : > { %1228 = vmatprep.subr.bf16.mxu0 %v1975_v55  ;;  %1301 = vmatprep.subr.bf16.mxu1 %v1978_v56  ;;  %v2473_v55 = vrot.slane %v446_v52, %v450_v49  ;;  %v2475_v56 = vrot.slane %v446_v52, %v458_v50 }
  0x70   : > { %1229 = vmatpush2.bf16.msra.mxu0 %v1973_v57  ;;  %1302 = vmatpush2.bf16.msra.mxu1 %v1976_v58  ;;  %v2477_v57 = vrot.slane %v446_v52, %v454_v51  ;;  %v2479_v58 = vrot.slane %v446_v52, %v462_v10 }
  0x71   : > { %1230 = vmatprep.subr.bf16.mxu0 %v1981_v59  ;;  %1303 = vmatprep.subr.bf16.mxu1 %v1984_v60  ;;  %v1384_v59 = vld [vmem:[%s2646_s6] sm:$0xf] }
  0x74   : > { %1231 = vmatpush2.bf16.msra.mxu0 %v1979_v61  ;;  %1304 = vmatpush2.bf16.msra.mxu1 %v1982_v62  ;;  %v2488_v62 = vrot.slane %v1384_v59, %v450_v49 }
  0x75   : > { %1232 = vmatprep.subr.bf16.mxu0 %v1987_v63  ;;  %1305 = vmatprep.subr.bf16.mxu1 %v1990_v0  ;;  %v2490_v63 = vrot.slane %v1384_v59, %v458_v50  ;;  %v2492_v0 = vrot.slane %v1384_v59, %v454_v51 }
  0x78   : > { %1233 = vmatpush2.bf16.msra.mxu0 %v1985_v1  ;;  %1306 = vmatpush2.bf16.msra.mxu1 %v1988_v2  ;;  %v2494_v1 = vrot.slane %v1384_v59, %v462_v10 }
  0x79   : > { %1234 = vmatprep.subr.bf16.mxu0 %v1993_v3  ;;  %1307 = vmatprep.subr.bf16.mxu1 %v1996_v4 }
  0x7c   : > { %1235 = vmatpush2.bf16.msra.mxu0 %v1991_v5  ;;  %1308 = vmatpush2.bf16.msra.mxu1 %v1994_v6 }
  0x7d   : > { %1236 = vmatprep.subr.bf16.mxu0 %v1999_v7  ;;  %1309 = vmatprep.subr.bf16.mxu1 %v2002_v8 }
  0x80   : > { %1237 = vmatpush2.bf16.msra.mxu0 %v1997_v9  ;;  %1310 = vmatpush2.bf16.msra.mxu1 %v2000_v11 }
  0x83   : > { %1239 = vmatmul.mubr.bf16.vlgmr.msra.gmra.mxu0 %v2003_v12  ;;  %1312 = vmatmul.mubr.bf16.vlgmr.msra.gmra.mxu1 %v2003_v12 }
  0x84   : > { %1248 = vmatprep.mubr.bf16.mxu0 %v2006_v13  ;;  %1321 = vmatprep.mubr.bf16.mxu1 %v2006_v13 }
  0x8b   : > { %1249 = vmatmul.mubr.bf16.gmra.mxu0 %v2008_v14  ;;  %1322 = vmatmul.mubr.bf16.gmra.mxu1 %v2008_v14 }
  0x8c   : > { %1258 = vmatprep.mubr.bf16.mxu0 %v2009_v15  ;;  %1331 = vmatprep.mubr.bf16.mxu1 %v2009_v15 }
  0x93   : > { %1259 = vmatmul.mubr.bf16.gmra.mxu0 %v2011_v16  ;;  %1332 = vmatmul.mubr.bf16.gmra.mxu1 %v2011_v16 }
  0x94   : > { %1268 = vmatprep.mubr.bf16.mxu0 %v2012_v17  ;;  %1341 = vmatprep.mubr.bf16.mxu1 %v2012_v17 }
  0x9b   : > { %1269 = vmatmul.mubr.bf16.gmra.mxu0 %v2014_v18  ;;  %1342 = vmatmul.mubr.bf16.gmra.mxu1 %v2014_v18 }
 0x103   : > { %v662_v19 = vpop.f32.mrf.mxu0  ;;  %v735_v20 = vpop.f32.mrf.mxu1 }
 0x104   : > { %v663_v2 = vadd.f32 %v662_v19, %v2473_v55  ;;  %v736_v3 = vadd.f32 %v735_v20, %v2475_v56 }
 0x105   : > { %v664_v21 = vpop.f32.mrf.mxu0  ;;  %v737_v22 = vpop.f32.mrf.mxu1 }
 0x106   : > { %v665_v4 = vadd.f32 %v664_v21, %v2477_v57  ;;  %v738_v5 = vadd.f32 %v737_v22, %v2479_v58 }
 0x107   : > { %v666_v23 = vpop.f32.mrf.mxu0  ;;  %v739_v24 = vpop.f32.mrf.mxu1 }
 0x108   : > { %v667_v6 = vadd.f32 %v666_v23, %v2473_v55  ;;  %v740_v7 = vadd.f32 %v739_v24, %v2475_v56 }
 0x109   : > { %v668_v25 = vpop.f32.mrf.mxu0  ;;  %v741_v26 = vpop.f32.mrf.mxu1 }
 0x10a   : > { %v669_v8 = vadd.f32 %v668_v25, %v2477_v57  ;;  %v742_v9 = vadd.f32 %v741_v26, %v2479_v58 }
 0x10b   : > { %v672_v27 = vpop.f32.mrf.mxu0  ;;  %v745_v28 = vpop.f32.mrf.mxu1 }
 0x10c   : > { %v673_v13 = vadd.f32 %v672_v27, %v2473_v55  ;;  %v746_v14 = vadd.f32 %v745_v28, %v2475_v56 }
 0x10d   : > { %v674_v29 = vpop.f32.mrf.mxu0  ;;  %v747_v30 = vpop.f32.mrf.mxu1 }
 0x10e   : > { %v675_v17 = vadd.f32 %v674_v29, %v2477_v57  ;;  %v748_v18 = vadd.f32 %v747_v30, %v2479_v58 }
 0x10f   : > { %v676_v31 = vpop.f32.mrf.mxu0  ;;  %v749_v32 = vpop.f32.mrf.mxu1 }
 0x110   : > { %v2509_v19 = vadd.f32 %v676_v31, %v2473_v55  ;;  %v2512_v20 = vadd.f32 %v749_v32, %v2475_v56 }
 0x111   : > { %v678_v33 = vpop.f32.mrf.mxu0  ;;  %v751_v34 = vpop.f32.mrf.mxu1 }
 0x112   : > { %v2517_v27 = vadd.f32 %v678_v33, %v2477_v57  ;;  %v2520_v28 = vadd.f32 %v751_v34, %v2479_v58 }
 0x113   : > { %v682_v35 = vpop.f32.mrf.mxu0  ;;  %v755_v37 = vpop.f32.mrf.mxu1 }
 0x114   : > { %v2523_v29 = vadd.f32 %v682_v35, %v2473_v55  ;;  %v2526_v30 = vadd.f32 %v755_v37, %v2475_v56 }
 0x115   : > { %v684_v38 = vpop.f32.mrf.mxu0  ;;  %v757_v39 = vpop.f32.mrf.mxu1 }
 0x116   : > { %v2530_v44 = vadd.f32 %v684_v38, %v2477_v57  ;;  %v2533_v47 = vadd.f32 %v757_v39, %v2479_v58 }
 0x117   : > { %v2450_v40 = vpop.f32.mrf.mxu0  ;;  %v2452_v41 = vpop.f32.mrf.mxu1 }
 0x118   : > { %v2544_v38 = vadd.f32 %v2450_v40, %v2473_v55  ;;  %v2548_v39 = vadd.f32 %v2452_v41, %v2475_v56 }
 0x119   : > { %v2454_v42 = vpop.f32.mrf.mxu0  ;;  %v2456_v43 = vpop.f32.mrf.mxu1 }
 0x11b   : > { %v2458_v45 = vpop.f32.mrf.mxu0  ;;  %v2460_v46 = vpop.f32.mrf.mxu1 }
 0x11d   : > { %v2462_v36 = vpop.f32.mrf.mxu0  ;;  %v2464_v48 = vpop.f32.mrf.mxu1 }
 0x11f   : > { %v2469_v53 = vpop.f32.mrf.mxu0  ;;  %v2471_v54 = vpop.f32.mrf.mxu1 }
 0x121   : > { %v2484_v60 = vpop.f32.mrf.mxu0  ;;  %v2486_v61 = vpop.f32.mrf.mxu1 }
 0x143   : > { %v1240_v11 = vpop.f32.mrf.mxu0  ;;  %v1313_v12 = vpop.f32.mrf.mxu1 }
 0x144   : > { %v1352_v15 = vadd.f32 %v1240_v11, %v663_v2  ;;  %v1354_v16 = vadd.f32 %v1313_v12, %v736_v3 }
 0x145   : > { %v1242_v21 = vpop.f32.mrf.mxu0  ;;  %v1315_v22 = vpop.f32.mrf.mxu1 }
 0x146   : > { %v1406_v23 = vadd.f32 %v2488_v62, %v1352_v15  ;;  %v1408_v24 = vadd.f32 %v2490_v63, %v1354_v16  ;;  %v1353_v25 = vadd.f32 %v1242_v21, %v665_v4  ;;  %v1355_v26 = vadd.f32 %v1315_v22, %v738_v5 }
 0x147   : > { %v1244_v31 = vpop.f32.mrf.mxu0  ;;  %v1317_v32 = vpop.f32.mrf.mxu1 }
 0x148   : > { %v1407_v33 = vadd.f32 %v2492_v0, %v1353_v25  ;;  %v1409_v34 = vadd.f32 %v2494_v1, %v1355_v26  ;;  %v1438_v49 = vmax.f32 %v1406_v23, 0.0  ;;  %v1440_v50 = vmax.f32 %v1408_v24, 0.0 }
 0x149   : > { %v1356_v35 = vadd.f32 %v1244_v31, %v667_v6  ;;  %v1358_v51 = vadd.f32 %v1317_v32, %v740_v7  ;;  %v1246_v10 = vpop.f32.mrf.mxu0  ;;  %v1319_v37 = vpop.f32.mrf.mxu1  ;;  %v2558_v31 = vadd.f32 %v2454_v42, %v2477_v57  ;;  %v2562_v32 = vadd.f32 %v2456_v43, %v2479_v58 }
 0x14a   : > { %v1439_v52 = vmax.f32 %v1407_v33, 0.0  ;;  %v1441_v59 = vmax.f32 %v1409_v34, 0.0  ;;  %v1357_v2 = vadd.f32 %v1246_v10, %v669_v8  ;;  %v1359_v3 = vadd.f32 %v1319_v37, %v742_v9 }
 0x14b   : > { %v1410_v4 = vadd.f32 %v2488_v62, %v1356_v35  ;;  %v1412_v5 = vadd.f32 %v2490_v63, %v1358_v51  ;;  %v1250_v6 = vpop.f32.mrf.mxu0  ;;  %v1323_v7 = vpop.f32.mrf.mxu1 }
 0x14c   : > { %v1799_v8 = vpack.c.bf16 %v1439_v52, %v1438_v49  ;;  %v1800_v9 = vpack.c.bf16 %v1441_v59, %v1440_v50  ;;  %v1411_v11 = vadd.f32 %v2492_v0, %v1357_v2  ;;  %v1413_v12 = vadd.f32 %v2494_v1, %v1359_v3 }
 0x14d   : > { %v1442_v40 = vmax.f32 %v1410_v4, 0.0  ;;  %v1444_v15 = vmax.f32 %v1412_v5, 0.0  ;;  %v1360_v16 = vadd.f32 %v1250_v6, %v673_v13  ;;  %v1362_v21 = vadd.f32 %v1323_v7, %v746_v14  ;;  %v1252_v22 = vpop.f32.mrf.mxu0  ;;  %v1325_v41 = vpop.f32.mrf.mxu1 }
 0x14e   : > { %1566 = vst [vmem:[%s2540_s12] sm:$0xff] %v1799_v8  ;;  %1567 = vst [vmem:[%s2540_s12 + $0x8] sm:$0xff] %v1800_v9  ;;  %v1443_v23 = vmax.f32 %v1411_v11, 0.0  ;;  %v1445_v24 = vmax.f32 %v1413_v12, 0.0  ;;  %v1361_v25 = vadd.f32 %v1252_v22, %v675_v17  ;;  %v1363_v26 = vadd.f32 %v1325_v41, %v748_v18 }
 0x14f   : > { %v1414_v13 = vadd.f32 %v2488_v62, %v1360_v16  ;;  %v1416_v14 = vadd.f32 %v2490_v63, %v1362_v21  ;;  %v1254_v33 = vpop.f32.mrf.mxu0  ;;  %v1327_v34 = vpop.f32.mrf.mxu1  ;;  %v693_v4 = vadd.f32 %v2458_v45, %v2473_v55  ;;  %v766_v5 = vadd.f32 %v2460_v46, %v2475_v56 }
 0x150   : > { %v1801_v49 = vpack.c.bf16 %v1443_v23, %v1442_v40  ;;  %v1802_v50 = vpack.c.bf16 %v1445_v24, %v1444_v15  ;;  %v1415_v17 = vadd.f32 %v2492_v0, %v1361_v25  ;;  %v1417_v18 = vadd.f32 %v2494_v1, %v1363_v26 }
 0x151   : > { %v1446_v42 = vmax.f32 %v1414_v13, 0.0  ;;  %v1448_v35 = vmax.f32 %v1416_v14, 0.0  ;;  %v1364_v51 = vadd.f32 %v1254_v33, %v2509_v19  ;;  %v1366_v43 = vadd.f32 %v1327_v34, %v2512_v20  ;;  %v1256_v10 = vpop.f32.mrf.mxu0  ;;  %v1329_v37 = vpop.f32.mrf.mxu1 }
 0x152   : > { %1568 = vst [vmem:[%s2540_s12 + $0x10] sm:$0xff] %v1801_v49  ;;  %1569 = vst [vmem:[%s2540_s12 + $0x18] sm:$0xff] %v1802_v50  ;;  %v1447_v52 = vmax.f32 %v1415_v17, 0.0  ;;  %v1449_v59 = vmax.f32 %v1417_v18, 0.0  ;;  %v1365_v2 = vadd.f32 %v1256_v10, %v2517_v27  ;;  %v1367_v3 = vadd.f32 %v1329_v37, %v2520_v28 }
 0x153   : > { %v1418_v19 = vadd.f32 %v2488_v62, %v1364_v51  ;;  %v1420_v20 = vadd.f32 %v2490_v63, %v1366_v43  ;;  %v1260_v6 = vpop.f32.mrf.mxu0  ;;  %v1333_v7 = vpop.f32.mrf.mxu1  ;;  %v695_v23 = vadd.f32 %v2462_v36, %v2477_v57  ;;  %v768_v24 = vadd.f32 %v2464_v48, %v2479_v58 }
 0x154   : > { %v1803_v8 = vpack.c.bf16 %v1447_v52, %v1446_v42  ;;  %v1804_v9 = vpack.c.bf16 %v1449_v59, %v1448_v35  ;;  %v1419_v27 = vadd.f32 %v2492_v0, %v1365_v2  ;;  %v1421_v28 = vadd.f32 %v2494_v1, %v1367_v3 }
 0x155   : > { %v1450_v11 = vmax.f32 %v1418_v19, 0.0  ;;  %v1452_v12 = vmax.f32 %v1420_v20, 0.0  ;;  %v1368_v45 = vadd.f32 %v1260_v6, %v2523_v29  ;;  %v1370_v40 = vadd.f32 %v1333_v7, %v2526_v30  ;;  %v1262_v46 = vpop.f32.mrf.mxu0  ;;  %v1335_v15 = vpop.f32.mrf.mxu1 }
 0x156   : > { %1570 = vst [vmem:[%s2540_s12 + $0x20] sm:$0xff] %v1803_v8  ;;  %1571 = vst [vmem:[%s2540_s12 + $0x28] sm:$0xff] %v1804_v9  ;;  %v1451_v16 = vmax.f32 %v1419_v27, 0.0  ;;  %v1453_v21 = vmax.f32 %v1421_v28, 0.0  ;;  %v1369_v22 = vadd.f32 %v1262_v46, %v2530_v44  ;;  %v1371_v41 = vadd.f32 %v1335_v15, %v2533_v47 }
 0x157   : > { %v1422_v29 = vadd.f32 %v2488_v62, %v1368_v45  ;;  %v1424_v30 = vadd.f32 %v2490_v63, %v1370_v40  ;;  %v1264_v25 = vpop.f32.mrf.mxu0  ;;  %v1337_v26 = vpop.f32.mrf.mxu1  ;;  %v697_v51 = vadd.f32 %v2469_v53, %v2473_v55  ;;  %v770_v43 = vadd.f32 %v2471_v54, %v2475_v56 }
 0x158   : > { %v1805_v13 = vpack.c.bf16 %v1451_v16, %v1450_v11  ;;  %v1806_v14 = vpack.c.bf16 %v1453_v21, %v1452_v12  ;;  %v1423_v44 = vadd.f32 %v2492_v0, %v1369_v22  ;;  %v1425_v47 = vadd.f32 %v2494_v1, %v1371_v41 }
 0x159   : > { %v1454_v33 = vmax.f32 %v1422_v29, 0.0  ;;  %v1456_v34 = vmax.f32 %v1424_v30, 0.0  ;;  %v1372_v36 = vadd.f32 %v1264_v25, %v2544_v38  ;;  %v1374_v49 = vadd.f32 %v1337_v26, %v2548_v39  ;;  %v1266_v48 = vpop.f32.mrf.mxu0  ;;  %v1339_v50 = vpop.f32.mrf.mxu1 }
 0x15a   : > { %1572 = vst [vmem:[%s2540_s12 + $0x30] sm:$0xff] %v1805_v13  ;;  %1573 = vst [vmem:[%s2540_s12 + $0x38] sm:$0xff] %v1806_v14  ;;  %v1455_v17 = vmax.f32 %v1423_v44, 0.0  ;;  %v1457_v18 = vmax.f32 %v1425_v47, 0.0  ;;  %v1373_v42 = vadd.f32 %v1266_v48, %v2558_v31  ;;  %v1375_v35 = vadd.f32 %v1339_v50, %v2562_v32 }
 0x15b   : > { %v1426_v38 = vadd.f32 %v2488_v62, %v1372_v36  ;;  %v1428_v39 = vadd.f32 %v2490_v63, %v1374_v49  ;;  %v1270_v10 = vpop.f32.mrf.mxu0  ;;  %v1343_v37 = vpop.f32.mrf.mxu1  ;;  %v699_v8 = vadd.f32 %v2484_v60, %v2477_v57  ;;  %v772_v9 = vadd.f32 %v2486_v61, %v2479_v58 }
 0x15c   : > { %v1807_v52 = vpack.c.bf16 %v1455_v17, %v1454_v33  ;;  %v1808_v59 = vpack.c.bf16 %v1457_v18, %v1456_v34  ;;  %v1427_v31 = vadd.f32 %v2492_v0, %v1373_v42  ;;  %v1429_v32 = vadd.f32 %v2494_v1, %v1375_v35 }
 0x15d   : > { %v1458_v2 = vmax.f32 %v1426_v38, 0.0  ;;  %v1460_v3 = vmax.f32 %v1428_v39, 0.0  ;;  %v1376_v53 = vadd.f32 %v1270_v10, %v693_v4  ;;  %v1378_v55 = vadd.f32 %v1343_v37, %v766_v5  ;;  %v1272_v19 = vpop.f32.mrf.mxu0  ;;  %v1345_v20 = vpop.f32.mrf.mxu1 }
 0x15e   : > { %1574 = vst [vmem:[%s2540_s12 + $0x40] sm:$0xff] %v1807_v52  ;;  %1575 = vst [vmem:[%s2540_s12 + $0x48] sm:$0xff] %v1808_v59  ;;  %v1459_v54 = vmax.f32 %v1427_v31, 0.0  ;;  %v1461_v56 = vmax.f32 %v1429_v32, 0.0  ;;  %v1377_v6 = vadd.f32 %v1272_v19, %v695_v23  ;;  %v1379_v7 = vadd.f32 %v1345_v20, %v768_v24 }
 0x15f   : > { %v1430_v27 = vadd.f32 %v2488_v62, %v1376_v53  ;;  %v1432_v4 = vadd.f32 %v2490_v63, %v1378_v55  ;;  %v1274_v5 = vpop.f32.mrf.mxu0  ;;  %v1347_v28 = vpop.f32.mrf.mxu1 }
 0x160   : > { %v1809_v11 = vpack.c.bf16 %v1459_v54, %v1458_v2  ;;  %v1810_v12 = vpack.c.bf16 %v1461_v56, %v1460_v3  ;;  %v1431_v45 = vadd.f32 %v2492_v0, %v1377_v6  ;;  %v1433_v40 = vadd.f32 %v2494_v1, %v1379_v7 }
 0x161   : > { %v1462_v46 = vmax.f32 %v1430_v27, 0.0  ;;  %v1464_v15 = vmax.f32 %v1432_v4, 0.0  ;;  %v1380_v57 = vadd.f32 %v1274_v5, %v697_v51  ;;  %v1382_v60 = vadd.f32 %v1347_v28, %v770_v43  ;;  %v1276_v58 = vpop.f32.mrf.mxu0  ;;  %v1349_v61 = vpop.f32.mrf.mxu1 }
 0x162   : > { %1576 = vst [vmem:[%s2540_s12 + $0x50] sm:$0xff] %v1809_v11  ;;  %1577 = vst [vmem:[%s2540_s12 + $0x58] sm:$0xff] %v1810_v12  ;;  %v1463_v16 = vmax.f32 %v1431_v45, 0.0  ;;  %v1465_v21 = vmax.f32 %v1433_v40, 0.0  ;;  %v1381_v22 = vadd.f32 %v1276_v58, %v699_v8  ;;  %v1383_v41 = vadd.f32 %v1349_v61, %v772_v9 }
 0x163   : > { %v1434_v23 = vadd.f32 %v2488_v62, %v1380_v57  ;;  %v1436_v24 = vadd.f32 %v2490_v63, %v1382_v60 }
 0x164   : > { %v1811_v29 = vpack.c.bf16 %v1463_v16, %v1462_v46  ;;  %v1812_v30 = vpack.c.bf16 %v1465_v21, %v1464_v15  ;;  %v1435_v25 = vadd.f32 %v2492_v0, %v1381_v22  ;;  %v1437_v26 = vadd.f32 %v2494_v1, %v1383_v41 }
 0x165   : > { %v1466_v13 = vmax.f32 %v1434_v23, 0.0  ;;  %v1468_v14 = vmax.f32 %v1436_v24, 0.0 }
 0x166   : > { %1578 = vst [vmem:[%s2540_s12 + $0x60] sm:$0xff] %v1811_v29  ;;  %1579 = vst [vmem:[%s2540_s12 + $0x68] sm:$0xff] %v1812_v30  ;;  %v1467_v44 = vmax.f32 %v1435_v25, 0.0  ;;  %v1469_v47 = vmax.f32 %v1437_v26, 0.0 }
 0x168   : > { %v1813_v33 = vpack.c.bf16 %v1467_v44, %v1466_v13  ;;  %v1814_v34 = vpack.c.bf16 %v1469_v47, %v1468_v14 }
 0x16a   : > { %1580 = vst [vmem:[%s2540_s12 + $0x70] sm:$0xff] %v1813_v33  ;;  %1581 = vst [vmem:[%s2540_s12 + $0x78] sm:$0xff] %v1814_v34 }
 0x16b PF: > { %p14_p9 = scmp.ge.s32.totalorder %s2097_s28, 4   ;;  %s2648_s24 = smov %s2033_s25 }
 0x16c   : > { %s2649_s25 = smov %s2106_s8  ;;  %s2650_s26 = smov %s2097_s28 }
 0x16d   :  { %16 = sbr.rel (!%p14_p9) target bundleno = 2 (0x2), region = 124 }

// kernel: _lambda_.23
= control target key start
LH: loop header
LB: loop body
LE: loop exit
PB: predicated region body
PF: predicated region fallthrough
CT: control target
= control target key end

     0   :  { %s1373_s1 = inlined_call_operand.vmem [shape: bf16[512,128], index: 1, kind: input, shape index: {}]   ;;  %s1374_s0 = inlined_call_operand.vmem [shape: bf16[128,512], index: 0, kind: input, shape index: {}]   ;;  %s1375_s2 = inlined_call_operand.vmem [shape: f32[1,128], index: 2, kind: input, shape index: {}]   ;;  %s1376_s3 = inlined_call_operand.vmem [shape: bf16[128,128], index: 3, kind: output, shape index: {}]  }
   0x1   :  { %v1036_v0 = vld [vmem:[%s1373_s1 + $0x78] sm:$0xff]   ;;  %v1040_v4 = vld [vmem:[%s1373_s1 + $0x70] sm:$0xff]   ;;  %v1044_v8 = vld [vmem:[%s1373_s1 + $0x68] sm:$0xff]  }
   0x2   :  { %v1037_v1 = vld [vmem:[%s1373_s1 + $0xf8] sm:$0xff]   ;;  %908 = vmatprep.subr.bf16.mxu0 %v1036_v0  ;;  %v1041_v5 = vld [vmem:[%s1373_s1 + $0xf0] sm:$0xff]   ;;  %v1045_v9 = vld [vmem:[%s1373_s1 + $0xe8] sm:$0xff]  }
   0x3   :  { %v1038_v2 = vld [vmem:[%s1373_s1 + $0x38] sm:$0xff]   ;;  %972 = vmatprep.subr.bf16.mxu1 %v1037_v1  ;;  %v1042_v6 = vld [vmem:[%s1373_s1 + $0x30] sm:$0xff]   ;;  %v1046_v10 = vld [vmem:[%s1373_s1 + $0x28] sm:$0xff]  }
   0x4   :  { %v1039_v3 = vld [vmem:[%s1373_s1 + $0xb8] sm:$0xff]   ;;  %909 = vmatpush3.bf16.msra.mxu0 %v1038_v2  ;;  %v1043_v7 = vld [vmem:[%s1373_s1 + $0xb0] sm:$0xff]   ;;  %v1047_v11 = vld [vmem:[%s1373_s1 + $0xa8] sm:$0xff]  }
   0x5   :  { %973 = vmatpush3.bf16.msra.mxu1 %v1039_v3  ;;  %910 = vmatprep.subr.bf16.mxu0 %v1040_v4  ;;  %v1048_v12 = vld [vmem:[%s1373_s1 + $0x60] sm:$0xff]   ;;  %v1052_v16 = vld [vmem:[%s1373_s1 + $0x58] sm:$0xff]   ;;  %v1056_v20 = vld [vmem:[%s1373_s1 + $0x50] sm:$0xff]  }
   0x6   :  { %974 = vmatprep.subr.bf16.mxu1 %v1041_v5  ;;  %v1049_v13 = vld [vmem:[%s1373_s1 + $0xe0] sm:$0xff]   ;;  %v1053_v17 = vld [vmem:[%s1373_s1 + $0xd8] sm:$0xff]   ;;  %v1057_v21 = vld [vmem:[%s1373_s1 + $0xd0] sm:$0xff]  }
   0x7   :  { %v1050_v14 = vld [vmem:[%s1373_s1 + $0x20] sm:$0xff]   ;;  %v1054_v18 = vld [vmem:[%s1373_s1 + $0x18] sm:$0xff]   ;;  %v1058_v22 = vld [vmem:[%s1373_s1 + $0x10] sm:$0xff]  }
   0x8   :  { %911 = vmatpush3.bf16.msra.mxu0 %v1042_v6  ;;  %v1051_v15 = vld [vmem:[%s1373_s1 + $0xa0] sm:$0xff]   ;;  %v1055_v19 = vld [vmem:[%s1373_s1 + $0x98] sm:$0xff]   ;;  %v1059_v23 = vld [vmem:[%s1373_s1 + $0x90] sm:$0xff]  }
   0x9   :  { %975 = vmatpush3.bf16.msra.mxu1 %v1043_v7  ;;  %912 = vmatprep.subr.bf16.mxu0 %v1044_v8  ;;  %v1060_v24 = vld [vmem:[%s1373_s1 + $0x48] sm:$0xff]   ;;  %v1064_v28 = vld [vmem:[%s1373_s1 + $0x40] sm:$0xff]  }
   0xa   :  { %976 = vmatprep.subr.bf16.mxu1 %v1045_v9  ;;  %v1061_v25 = vld [vmem:[%s1373_s1 + $0xc8] sm:$0xff]   ;;  %v1065_v29 = vld [vmem:[%s1373_s1 + $0xc0] sm:$0xff]  }
   0xb   :  { %v1062_v26 = vld [vmem:[%s1373_s1 + $0x8] sm:$0xff]   ;;  %v1066_v30 = vld [vmem:[%s1373_s1] sm:$0xff]  }
   0xc   :  { %913 = vmatpush3.bf16.msra.mxu0 %v1046_v10  ;;  %v1063_v27 = vld [vmem:[%s1373_s1 + $0x88] sm:$0xff]   ;;  %v1067_v31 = vld [vmem:[%s1373_s1 + $0x80] sm:$0xff]  }
   0xd   :  { %977 = vmatpush3.bf16.msra.mxu1 %v1047_v11  ;;  %914 = vmatprep.subr.bf16.mxu0 %v1048_v12  ;;  %v1068_v32 = vld [vmem:[%s1374_s0] ss:$16 sps:$4 sm:$0xff]   ;;  %v1070_v33 = vld [vmem:[%s1374_s0 + $0x4] ss:$16 sps:$4 sm:$0xff]   ;;  %v1071_v34 = vld [vmem:[%s1374_s0 + $0x8] ss:$16 sps:$4 sm:$0xff]  }
   0xe   :  { %978 = vmatprep.subr.bf16.mxu1 %v1049_v13  ;;  %v1073_v35 = vld [vmem:[%s1374_s0 + $0xc] ss:$16 sps:$4 sm:$0xff]   ;;  %502 = vmatprep.mubr.bf16.mxu0 %v1070_v33  ;;  %v1074_v36 = vld [vmem:[%s1374_s0 + $0x24] ss:$16 sps:$4 sm:$0xff]   ;;  %v1078_v38 = vld [vmem:[%s1374_s0 + $0x20] ss:$16 sps:$4 sm:$0xff]  }
   0xf   :  { %599 = vmatprep.mubr.bf16.mxu1 %v1073_v35  ;;  %v1076_v37 = vld [vmem:[%s1374_s0 + $0x2c] ss:$16 sps:$4 sm:$0xff]   ;;  %v1079_v39 = vld [vmem:[%s1374_s0 + $0x28] ss:$16 sps:$4 sm:$0xff]   ;;  %v1080_v40 = vld [vmem:[%s1374_s0 + $0x44] ss:$16 sps:$4 sm:$0xff]  }
  0x10   :  { %915 = vmatpush3.bf16.msra.mxu0 %v1050_v14  ;;  %v1082_v41 = vld [vmem:[%s1374_s0 + $0x4c] ss:$16 sps:$4 sm:$0xff]   ;;  %v1084_v42 = vld [vmem:[%s1374_s0 + $0x40] ss:$16 sps:$4 sm:$0xff]   ;;  %v1085_v43 = vld [vmem:[%s1374_s0 + $0x48] ss:$16 sps:$4 sm:$0xff]  }
  0x11   :  { %979 = vmatpush3.bf16.msra.mxu1 %v1051_v15  ;;  %916 = vmatprep.subr.bf16.mxu0 %v1052_v16  ;;  %v1086_v44 = vld [vmem:[%s1374_s0 + $0x64] ss:$16 sps:$4 sm:$0xff]   ;;  %v1088_v45 = vld [vmem:[%s1374_s0 + $0x6c] ss:$16 sps:$4 sm:$0xff]   ;;  %v1090_v46 = vld [vmem:[%s1374_s0 + $0x60] ss:$16 sps:$4 sm:$0xff]  }
  0x12   :  { %980 = vmatprep.subr.bf16.mxu1 %v1053_v17  ;;  %v1091_v47 = vld [vmem:[%s1374_s0 + $0x68] ss:$16 sps:$4 sm:$0xff]   ;;  %v1092_v48 = vld [vmem:[%s1374_s0 + $0x84] ss:$16 sps:$4 sm:$0xff]   ;;  %v1094_v49 = vld [vmem:[%s1374_s0 + $0x8c] ss:$16 sps:$4 sm:$0xff]  }
  0x13   :  { %v1096_v50 = vld [vmem:[%s1374_s0 + $0x80] ss:$16 sps:$4 sm:$0xff]   ;;  %v1097_v51 = vld [vmem:[%s1374_s0 + $0x88] ss:$16 sps:$4 sm:$0xff]   ;;  %v1098_v52 = vld [vmem:[%s1374_s0 + $0xa4] ss:$16 sps:$4 sm:$0xff]  }
  0x14   :  { %917 = vmatpush3.bf16.msra.mxu0 %v1054_v18  ;;  %v1100_v53 = vld [vmem:[%s1374_s0 + $0xac] ss:$16 sps:$4 sm:$0xff]   ;;  %v1102_v54 = vld [vmem:[%s1374_s0 + $0xa0] ss:$16 sps:$4 sm:$0xff]   ;;  %v1103_v55 = vld [vmem:[%s1374_s0 + $0xa8] ss:$16 sps:$4 sm:$0xff]  }
  0x15   :  { %981 = vmatpush3.bf16.msra.mxu1 %v1055_v19  ;;  %918 = vmatprep.subr.bf16.mxu0 %v1056_v20  ;;  %v1104_v56 = vld [vmem:[%s1374_s0 + $0xc4] ss:$16 sps:$4 sm:$0xff]   ;;  %v1106_v57 = vld [vmem:[%s1374_s0 + $0xcc] ss:$16 sps:$4 sm:$0xff]   ;;  %v1108_v58 = vld [vmem:[%s1374_s0 + $0xc0] ss:$16 sps:$4 sm:$0xff]  }
  0x16   :  { %982 = vmatprep.subr.bf16.mxu1 %v1057_v21  ;;  %v1109_v59 = vld [vmem:[%s1374_s0 + $0xc8] ss:$16 sps:$4 sm:$0xff]   ;;  %v1110_v60 = vld [vmem:[%s1374_s0 + $0xe4] ss:$16 sps:$4 sm:$0xff]   ;;  %v1112_v61 = vld [vmem:[%s1374_s0 + $0xec] ss:$16 sps:$4 sm:$0xff]  }
  0x17   :  { %v1114_v62 = vld [vmem:[%s1374_s0 + $0xe0] ss:$16 sps:$4 sm:$0xff]   ;;  %v1115_v63 = vld [vmem:[%s1374_s0 + $0xe8] ss:$16 sps:$4 sm:$0xff]  }
  0x18   :  { %919 = vmatpush3.bf16.msra.mxu0 %v1058_v22  ;;  %v1331_v2 = vld [vmem:[%s1375_s2] ss:$0 sm:$0xff] }
  0x19   :  { %983 = vmatpush3.bf16.msra.mxu1 %v1059_v23  ;;  %920 = vmatprep.subr.bf16.mxu0 %v1060_v24 }
  0x1a   :  { %984 = vmatprep.subr.bf16.mxu1 %v1061_v25 }
  0x1c   :  { %921 = vmatpush3.bf16.msra.mxu0 %v1062_v26 }
  0x1d   :  { %985 = vmatpush3.bf16.msra.mxu1 %v1063_v27  ;;  %922 = vmatprep.subr.bf16.mxu0 %v1064_v28 }
  0x1e   :  { %986 = vmatprep.subr.bf16.mxu1 %v1065_v29 }
  0x20   :  { %923 = vmatpush3.bf16.msra.mxu0 %v1066_v30 }
  0x21   :  { %987 = vmatpush3.bf16.msra.mxu1 %v1067_v31 }
  0x23   :  { %503 = vmatmul.mubr.bf16.vlgmr.msra.gmra.mxu0 %v1068_v32 }
  0x24   :  { %600 = vmatmul.mubr.bf16.vlgmr.msra.gmra.mxu1 %v1071_v34  ;;  %510 = vmatprep.mubr.bf16.mxu0 %v1074_v36 }
  0x25   :  { %607 = vmatprep.mubr.bf16.mxu1 %v1076_v37 }
  0x2b   :  { %511 = vmatmul.mubr.bf16.gmra.mxu0 %v1078_v38 }
  0x2c   :  { %608 = vmatmul.mubr.bf16.gmra.mxu1 %v1079_v39  ;;  %518 = vmatprep.mubr.bf16.mxu0 %v1080_v40 }
  0x2d   :  { %615 = vmatprep.mubr.bf16.mxu1 %v1082_v41 }
  0x33   :  { %519 = vmatmul.mubr.bf16.gmra.mxu0 %v1084_v42 }
  0x34   :  { %616 = vmatmul.mubr.bf16.gmra.mxu1 %v1085_v43  ;;  %526 = vmatprep.mubr.bf16.mxu0 %v1086_v44 }
  0x35   :  { %623 = vmatprep.mubr.bf16.mxu1 %v1088_v45 }
  0x3b   :  { %527 = vmatmul.mubr.bf16.gmra.mxu0 %v1090_v46 }
  0x3c   :  { %624 = vmatmul.mubr.bf16.gmra.mxu1 %v1091_v47  ;;  %534 = vmatprep.mubr.bf16.mxu0 %v1092_v48 }
  0x3d   :  { %631 = vmatprep.mubr.bf16.mxu1 %v1094_v49 }
  0x43   :  { %535 = vmatmul.mubr.bf16.gmra.mxu0 %v1096_v50 }
  0x44   :  { %632 = vmatmul.mubr.bf16.gmra.mxu1 %v1097_v51  ;;  %542 = vmatprep.mubr.bf16.mxu0 %v1098_v52 }
  0x45   :  { %639 = vmatprep.mubr.bf16.mxu1 %v1100_v53 }
  0x4b   :  { %543 = vmatmul.mubr.bf16.gmra.mxu0 %v1102_v54 }
  0x4c   :  { %640 = vmatmul.mubr.bf16.gmra.mxu1 %v1103_v55  ;;  %550 = vmatprep.mubr.bf16.mxu0 %v1104_v56 }
  0x4d   :  { %647 = vmatprep.mubr.bf16.mxu1 %v1106_v57 }
  0x53   :  { %551 = vmatmul.mubr.bf16.gmra.mxu0 %v1108_v58 }
  0x54   :  { %648 = vmatmul.mubr.bf16.gmra.mxu1 %v1109_v59  ;;  %558 = vmatprep.mubr.bf16.mxu0 %v1110_v60 }
  0x55   :  { %655 = vmatprep.mubr.bf16.mxu1 %v1112_v61 }
  0x5b   :  { %559 = vmatmul.mubr.bf16.gmra.mxu0 %v1114_v62 }
  0x5c   :  { %656 = vmatmul.mubr.bf16.gmra.mxu1 %v1115_v63 }
  0xe3   :  { %v924_v0 = vpop.f32.mrf.mxu0 }
  0xe4   :  { %v988_v1 = vpop.f32.mrf.mxu1 }
  0xe5   :  { %v925_v3 = vpop.f32.mrf.mxu0 }
  0xe6   :  { %v926_v4 = vadd.f32 %v925_v3, %v924_v0  ;;  %v989_v5 = vpop.f32.mrf.mxu1 }
  0xe7   :  { %v927_v6 = vpop.f32.mrf.mxu0  ;;  %v990_v10 = vadd.f32 %v989_v5, %v988_v1 }
  0xe8   :  { %v505_v7 = vadd.f32 %v926_v4, %v1331_v2  ;;  %v991_v8 = vpop.f32.mrf.mxu1 }
  0xe9   :  { %v928_v9 = vpop.f32.mrf.mxu0 }
  0xea   :  { %v929_v11 = vadd.f32 %v928_v9, %v927_v6  ;;  %v992_v12 = vpop.f32.mrf.mxu1  ;;  %v602_v14 = vadd.f32 %v990_v10, %v505_v7 }
  0xeb   :  { %v930_v13 = vpop.f32.mrf.mxu0  ;;  %v993_v16 = vadd.f32 %v992_v12, %v991_v8 }
  0xec   :  { %v508_v15 = vadd.f32 %v929_v11, %v1331_v2  ;;  %v994_v17 = vpop.f32.mrf.mxu1  ;;  %v664_v23 = vmax.f32 %v602_v14, 0.0 }
  0xed   :  { %v931_v18 = vpop.f32.mrf.mxu0 }
  0xee   :  { %v605_v19 = vadd.f32 %v993_v16, %v508_v15  ;;  %v932_v20 = vadd.f32 %v931_v18, %v930_v13  ;;  %v995_v21 = vpop.f32.mrf.mxu1 }
  0xef   :  { %v933_v22 = vpop.f32.mrf.mxu0  ;;  %v996_v29 = vadd.f32 %v995_v21, %v994_v17 }
  0xf0   :  { %v665_v24 = vmax.f32 %v605_v19, 0.0  ;;  %v513_v25 = vadd.f32 %v932_v20, %v1331_v2  ;;  %v997_v26 = vpop.f32.mrf.mxu1 }
  0xf1   :  { %v934_v27 = vpop.f32.mrf.mxu0 }
  0xf2   :  { %v864_v28 = vpack.c.bf16 %v665_v24, %v664_v23  ;;  %v935_v30 = vadd.f32 %v934_v27, %v933_v22  ;;  %v998_v31 = vpop.f32.mrf.mxu1  ;;  %v610_v33 = vadd.f32 %v996_v29, %v513_v25 }
  0xf3   :  { %v936_v32 = vpop.f32.mrf.mxu0  ;;  %v999_v35 = vadd.f32 %v998_v31, %v997_v26 }
  0xf4   :  { %865 = vst [vmem:[%s1376_s3] sm:$0xff] %v864_v28   ;;  %v516_v34 = vadd.f32 %v935_v30, %v1331_v2  ;;  %v1000_v36 = vpop.f32.mrf.mxu1  ;;  %v666_v42 = vmax.f32 %v610_v33, 0.0 }
  0xf5   :  { %v937_v37 = vpop.f32.mrf.mxu0 }
  0xf6   :  { %v613_v38 = vadd.f32 %v999_v35, %v516_v34  ;;  %v938_v39 = vadd.f32 %v937_v37, %v936_v32  ;;  %v1001_v40 = vpop.f32.mrf.mxu1 }
  0xf7   :  { %v939_v41 = vpop.f32.mrf.mxu0  ;;  %v1002_v48 = vadd.f32 %v1001_v40, %v1000_v36 }
  0xf8   :  { %v667_v43 = vmax.f32 %v613_v38, 0.0  ;;  %v521_v44 = vadd.f32 %v938_v39, %v1331_v2  ;;  %v1003_v45 = vpop.f32.mrf.mxu1 }
  0xf9   :  { %v940_v46 = vpop.f32.mrf.mxu0 }
  0xfa   :  { %v869_v47 = vpack.c.bf16 %v667_v43, %v666_v42  ;;  %v941_v49 = vadd.f32 %v940_v46, %v939_v41  ;;  %v1004_v50 = vpop.f32.mrf.mxu1  ;;  %v618_v52 = vadd.f32 %v1002_v48, %v521_v44 }
  0xfb   :  { %v942_v51 = vpop.f32.mrf.mxu0  ;;  %v1005_v54 = vadd.f32 %v1004_v50, %v1003_v45 }
  0xfc   :  { %901 = vst [vmem:[%s1376_s3 + $0x8] sm:$0xff] %v869_v47   ;;  %v524_v53 = vadd.f32 %v941_v49, %v1331_v2  ;;  %v1006_v55 = vpop.f32.mrf.mxu1  ;;  %v668_v61 = vmax.f32 %v618_v52, 0.0 }
  0xfd   :  { %v943_v56 = vpop.f32.mrf.mxu0 }
  0xfe   :  { %v621_v57 = vadd.f32 %v1005_v54, %v524_v53  ;;  %v944_v58 = vadd.f32 %v943_v56, %v942_v51  ;;  %v1007_v59 = vpop.f32.mrf.mxu1 }
  0xff   :  { %v945_v60 = vpop.f32.mrf.mxu0  ;;  %v1008_v4 = vadd.f32 %v1007_v59, %v1006_v55 }
 0x100   :  { %v669_v62 = vmax.f32 %v621_v57, 0.0  ;;  %v529_v63 = vadd.f32 %v944_v58, %v1331_v2  ;;  %v1009_v0 = vpop.f32.mrf.mxu1 }
 0x101   :  { %v946_v1 = vpop.f32.mrf.mxu0 }
 0x102   :  { %v874_v3 = vpack.c.bf16 %v669_v62, %v668_v61  ;;  %v947_v5 = vadd.f32 %v946_v1, %v945_v60  ;;  %v1010_v6 = vpop.f32.mrf.mxu1  ;;  %v626_v8 = vadd.f32 %v1008_v4, %v529_v63 }
 0x103   :  { %v948_v7 = vpop.f32.mrf.mxu0  ;;  %v1011_v10 = vadd.f32 %v1010_v6, %v1009_v0 }
 0x104   :  { %902 = vst [vmem:[%s1376_s3 + $0x10] sm:$0xff] %v874_v3   ;;  %v532_v9 = vadd.f32 %v947_v5, %v1331_v2  ;;  %v1012_v11 = vpop.f32.mrf.mxu1  ;;  %v670_v17 = vmax.f32 %v626_v8, 0.0 }
 0x105   :  { %v949_v12 = vpop.f32.mrf.mxu0 }
 0x106   :  { %v629_v13 = vadd.f32 %v1011_v10, %v532_v9  ;;  %v950_v14 = vadd.f32 %v949_v12, %v948_v7  ;;  %v1013_v15 = vpop.f32.mrf.mxu1 }
 0x107   :  { %v951_v16 = vpop.f32.mrf.mxu0  ;;  %v1014_v23 = vadd.f32 %v1013_v15, %v1012_v11 }
 0x108   :  { %v671_v18 = vmax.f32 %v629_v13, 0.0  ;;  %v537_v19 = vadd.f32 %v950_v14, %v1331_v2  ;;  %v1015_v20 = vpop.f32.mrf.mxu1 }
 0x109   :  { %v952_v21 = vpop.f32.mrf.mxu0 }
 0x10a   :  { %v879_v22 = vpack.c.bf16 %v671_v18, %v670_v17  ;;  %v953_v24 = vadd.f32 %v952_v21, %v951_v16  ;;  %v1016_v25 = vpop.f32.mrf.mxu1  ;;  %v634_v27 = vadd.f32 %v1014_v23, %v537_v19 }
 0x10b   :  { %v954_v26 = vpop.f32.mrf.mxu0  ;;  %v1017_v29 = vadd.f32 %v1016_v25, %v1015_v20 }
 0x10c   :  { %903 = vst [vmem:[%s1376_s3 + $0x18] sm:$0xff] %v879_v22   ;;  %v540_v28 = vadd.f32 %v953_v24, %v1331_v2  ;;  %v1018_v30 = vpop.f32.mrf.mxu1  ;;  %v672_v36 = vmax.f32 %v634_v27, 0.0 }
 0x10d   :  { %v955_v31 = vpop.f32.mrf.mxu0 }
 0x10e   :  { %v637_v32 = vadd.f32 %v1017_v29, %v540_v28  ;;  %v956_v33 = vadd.f32 %v955_v31, %v954_v26  ;;  %v1019_v34 = vpop.f32.mrf.mxu1 }
 0x10f   :  { %v957_v35 = vpop.f32.mrf.mxu0  ;;  %v1020_v42 = vadd.f32 %v1019_v34, %v1018_v30 }
 0x110   :  { %v673_v37 = vmax.f32 %v637_v32, 0.0  ;;  %v545_v38 = vadd.f32 %v956_v33, %v1331_v2  ;;  %v1021_v39 = vpop.f32.mrf.mxu1 }
 0x111   :  { %v958_v40 = vpop.f32.mrf.mxu0 }
 0x112   :  { %v884_v41 = vpack.c.bf16 %v673_v37, %v672_v36  ;;  %v959_v43 = vadd.f32 %v958_v40, %v957_v35  ;;  %v1022_v44 = vpop.f32.mrf.mxu1  ;;  %v642_v46 = vadd.f32 %v1020_v42, %v545_v38 }
 0x113   :  { %v960_v45 = vpop.f32.mrf.mxu0  ;;  %v1023_v48 = vadd.f32 %v1022_v44, %v1021_v39 }
 0x114   :  { %904 = vst [vmem:[%s1376_s3 + $0x20] sm:$0xff] %v884_v41   ;;  %v548_v47 = vadd.f32 %v959_v43, %v1331_v2  ;;  %v1024_v49 = vpop.f32.mrf.mxu1  ;;  %v674_v55 = vmax.f32 %v642_v46, 0.0 }
 0x115   :  { %v961_v50 = vpop.f32.mrf.mxu0 }
 0x116   :  { %v645_v51 = vadd.f32 %v1023_v48, %v548_v47  ;;  %v962_v52 = vadd.f32 %v961_v50, %v960_v45  ;;  %v1025_v53 = vpop.f32.mrf.mxu1 }
 0x117   :  { %v963_v54 = vpop.f32.mrf.mxu0  ;;  %v1026_v61 = vadd.f32 %v1025_v53, %v1024_v49 }
 0x118   :  { %v675_v56 = vmax.f32 %v645_v51, 0.0  ;;  %v553_v57 = vadd.f32 %v962_v52, %v1331_v2  ;;  %v1027_v58 = vpop.f32.mrf.mxu1 }
 0x119   :  { %v964_v59 = vpop.f32.mrf.mxu0 }
 0x11a   :  { %v889_v60 = vpack.c.bf16 %v675_v56, %v674_v55  ;;  %v965_v62 = vadd.f32 %v964_v59, %v963_v54  ;;  %v1028_v63 = vpop.f32.mrf.mxu1  ;;  %v650_v1 = vadd.f32 %v1026_v61, %v553_v57 }
 0x11b   :  { %v966_v0 = vpop.f32.mrf.mxu0  ;;  %v1029_v4 = vadd.f32 %v1028_v63, %v1027_v58 }
 0x11c   :  { %905 = vst [vmem:[%s1376_s3 + $0x28] sm:$0xff] %v889_v60   ;;  %v556_v3 = vadd.f32 %v965_v62, %v1331_v2  ;;  %v1030_v5 = vpop.f32.mrf.mxu1  ;;  %v676_v11 = vmax.f32 %v650_v1, 0.0 }
 0x11d   :  { %v967_v6 = vpop.f32.mrf.mxu0 }
 0x11e   :  { %v653_v7 = vadd.f32 %v1029_v4, %v556_v3  ;;  %v968_v8 = vadd.f32 %v967_v6, %v966_v0  ;;  %v1031_v9 = vpop.f32.mrf.mxu1 }
 0x11f   :  { %v969_v10 = vpop.f32.mrf.mxu0  ;;  %v1032_v17 = vadd.f32 %v1031_v9, %v1030_v5 }
 0x120   :  { %v677_v12 = vmax.f32 %v653_v7, 0.0  ;;  %v561_v13 = vadd.f32 %v968_v8, %v1331_v2  ;;  %v1033_v14 = vpop.f32.mrf.mxu1 }
 0x121   :  { %v970_v15 = vpop.f32.mrf.mxu0 }
 0x122   :  { %v894_v16 = vpack.c.bf16 %v677_v12, %v676_v11  ;;  %v971_v18 = vadd.f32 %v970_v15, %v969_v10  ;;  %v1034_v19 = vpop.f32.mrf.mxu1  ;;  %v658_v20 = vadd.f32 %v1032_v17, %v561_v13 }
 0x123   :  { %v1035_v22 = vadd.f32 %v1034_v19, %v1033_v14 }
 0x124   :  { %906 = vst [vmem:[%s1376_s3 + $0x30] sm:$0xff] %v894_v16   ;;  %v564_v21 = vadd.f32 %v971_v18, %v1331_v2  ;;  %v678_v24 = vmax.f32 %v658_v20, 0.0 }
 0x126   :  { %v661_v23 = vadd.f32 %v1035_v22, %v564_v21 }
 0x128   :  { %v679_v25 = vmax.f32 %v661_v23, 0.0 }
 0x12a   :  { %v899_v26 = vpack.c.bf16 %v679_v25, %v678_v24 }
 0x12c   :  { %907 = vst [vmem:[%s1376_s3 + $0x38] sm:$0xff] %v899_v26  }

// kernel: _lambda_.24
= control target key start
LH: loop header
LB: loop body
LE: loop exit
PB: predicated region body
PF: predicated region fallthrough
CT: control target
= control target key end

     0   :  { %v1177_v1 = vmov 0   ;;  %s1868_s2 = inlined_call_operand.vmem [shape: bf16[128,512], index: 2, kind: input, shape index: {}]   ;;  %s1869_s0 = inlined_call_operand.vmem [shape: bf16[128,128], index: 0, kind: input, shape index: {}]   ;;  %s1870_s1 = inlined_call_operand.vmem [shape: f32[1,128], index: 1, kind: input, shape index: {}]   ;;  %s1871_s3 = inlined_call_operand.vmem [shape: f32[1,512], index: 3, kind: input, shape index: {}]   ;;  %s1872_s4 = inlined_call_operand.vmem [shape: bf16[128,512], index: 4, kind: input, shape index: {}]   ;;  %s1873_s5 = inlined_call_operand.vmem [shape: bf16[128,512], index: 5, kind: output, shape index: {}]  }
   0x1   :  { %v1129_v0 = vld [vmem:[%s1868_s2 + $0xe4] ss:$16 sps:$4 sm:$0xff]   ;;  %346 = vmatprep.mubr.bf16.mxu0 %v1177_v1  ;;  %459 = vmatprep.mubr.bf16.mxu1 %v1177_v1  ;;  %v1131_v2 = vld [vmem:[%s1868_s2 + $0xec] ss:$16 sps:$4 sm:$0xff]   ;;  %v1133_v3 = vld [vmem:[%s1868_s2 + $0xe0] ss:$16 sps:$4 sm:$0xff]  }
   0x2   :  { %314 = vmatprep.subr.bf16.mxu0 %v1129_v0  ;;  %v1134_v4 = vld [vmem:[%s1868_s2 + $0xe8] ss:$16 sps:$4 sm:$0xff]   ;;  %427 = vmatprep.subr.bf16.mxu1 %v1131_v2  ;;  %v1135_v5 = vld [vmem:[%s1868_s2 + $0xc4] ss:$16 sps:$4 sm:$0xff]   ;;  %v1137_v6 = vld [vmem:[%s1868_s2 + $0xcc] ss:$16 sps:$4 sm:$0xff]  }
   0x3   :  { %315 = vmatpush1.bf16.msra.mxu0 %v1133_v3  ;;  %428 = vmatpush1.bf16.msra.mxu1 %v1134_v4  ;;  %v1139_v7 = vld [vmem:[%s1868_s2 + $0xc0] ss:$16 sps:$4 sm:$0xff]   ;;  %v1140_v8 = vld [vmem:[%s1868_s2 + $0xc8] ss:$16 sps:$4 sm:$0xff]   ;;  %v1141_v9 = vld [vmem:[%s1868_s2 + $0xa4] ss:$16 sps:$4 sm:$0xff]  }
   0x4   :  { %316 = vmatprep.subr.bf16.mxu0 %v1135_v5  ;;  %429 = vmatprep.subr.bf16.mxu1 %v1137_v6  ;;  %v1143_v10 = vld [vmem:[%s1868_s2 + $0xac] ss:$16 sps:$4 sm:$0xff]   ;;  %v1145_v11 = vld [vmem:[%s1868_s2 + $0xa0] ss:$16 sps:$4 sm:$0xff]   ;;  %v1146_v12 = vld [vmem:[%s1868_s2 + $0xa8] ss:$16 sps:$4 sm:$0xff]  }
   0x5   :  { %v1147_v13 = vld [vmem:[%s1868_s2 + $0x84] ss:$16 sps:$4 sm:$0xff]   ;;  %v1149_v14 = vld [vmem:[%s1868_s2 + $0x8c] ss:$16 sps:$4 sm:$0xff]   ;;  %v1151_v15 = vld [vmem:[%s1868_s2 + $0x80] ss:$16 sps:$4 sm:$0xff]  }
   0x6   :  { %v1152_v16 = vld [vmem:[%s1868_s2 + $0x88] ss:$16 sps:$4 sm:$0xff]   ;;  %v1153_v17 = vld [vmem:[%s1868_s2 + $0x64] ss:$16 sps:$4 sm:$0xff]   ;;  %v1155_v18 = vld [vmem:[%s1868_s2 + $0x6c] ss:$16 sps:$4 sm:$0xff]  }
   0x7   :  { %317 = vmatpush1.bf16.msra.mxu0 %v1139_v7  ;;  %430 = vmatpush1.bf16.msra.mxu1 %v1140_v8  ;;  %v1157_v19 = vld [vmem:[%s1868_s2 + $0x60] ss:$16 sps:$4 sm:$0xff]   ;;  %v1158_v20 = vld [vmem:[%s1868_s2 + $0x68] ss:$16 sps:$4 sm:$0xff]   ;;  %v1159_v21 = vld [vmem:[%s1868_s2 + $0x44] ss:$16 sps:$4 sm:$0xff]  }
   0x8   :  { %318 = vmatprep.subr.bf16.mxu0 %v1141_v9  ;;  %431 = vmatprep.subr.bf16.mxu1 %v1143_v10  ;;  %v1161_v22 = vld [vmem:[%s1868_s2 + $0x4c] ss:$16 sps:$4 sm:$0xff]   ;;  %v1163_v23 = vld [vmem:[%s1868_s2 + $0x40] ss:$16 sps:$4 sm:$0xff]   ;;  %v1164_v24 = vld [vmem:[%s1868_s2 + $0x48] ss:$16 sps:$4 sm:$0xff]  }
   0x9   :  { %v1165_v25 = vld [vmem:[%s1868_s2 + $0x24] ss:$16 sps:$4 sm:$0xff]   ;;  %v1167_v26 = vld [vmem:[%s1868_s2 + $0x2c] ss:$16 sps:$4 sm:$0xff]   ;;  %v1294_v28 = vld [vmem:[%s1870_s1] ss:$0 sm:$0xff] }
   0xa   :  { %v1090_v27 = vld [vmem:[%s1869_s0] sm:$0xff]   ;;  %v1170_v32 = vld [vmem:[%s1868_s2 + $0x28] ss:$16 sps:$4 sm:$0xff]   ;;  %v1173_v37 = vld [vmem:[%s1868_s2 + $0xc] ss:$16 sps:$4 sm:$0xff]  }
   0xb   :  { %319 = vmatpush1.bf16.msra.mxu0 %v1145_v11  ;;  %432 = vmatpush1.bf16.msra.mxu1 %v1146_v12  ;;  %v1091_v29 = vunpack.c.l.bf16 %v1090_v27  ;;  %v1092_v30 = vunpack.c.h.bf16 %v1090_v27  ;;  %v1169_v31 = vld [vmem:[%s1868_s2 + $0x20] ss:$16 sps:$4 sm:$0xff]   ;;  %v1121_v35 = vld [vmem:[%s1869_s0 + $0x8] sm:$0xff]   ;;  %v1171_v36 = vld [vmem:[%s1868_s2 + $0x4] ss:$16 sps:$4 sm:$0xff]  }
   0xc   :  { %320 = vmatprep.subr.bf16.mxu0 %v1147_v13  ;;  %433 = vmatprep.subr.bf16.mxu1 %v1149_v14  ;;  %v1095_v40 = vunpack.c.l.bf16 %v1121_v35  ;;  %v1096_v41 = vunpack.c.h.bf16 %v1121_v35  ;;  %v1175_v42 = vld [vmem:[%s1868_s2] ss:$16 sps:$4 sm:$0xff]   ;;  %v1176_v43 = vld [vmem:[%s1868_s2 + $0x8] ss:$16 sps:$4 sm:$0xff]  }
   0xd   :  { %v60_v33 = vadd.f32 %v1091_v29, %v1294_v28  ;;  %v61_v34 = vadd.f32 %v1092_v30, %v1294_v28  ;;  %v1122_v47 = vld [vmem:[%s1869_s0 + $0x10] sm:$0xff]   ;;  %v1123_v55 = vld [vmem:[%s1869_s0 + $0x18] sm:$0xff]   ;;  %v1124_v63 = vld [vmem:[%s1869_s0 + $0x20] sm:$0xff]  }
   0xe   :  { %v62_v45 = vadd.f32 %v1095_v40, %v1294_v28  ;;  %v63_v46 = vadd.f32 %v1096_v41, %v1294_v28  ;;  %v1099_v50 = vunpack.c.l.bf16 %v1122_v47  ;;  %v1100_v51 = vunpack.c.h.bf16 %v1122_v47  ;;  %v1125_v8 = vld [vmem:[%s1869_s0 + $0x28] sm:$0xff]   ;;  %v132_v40 = vld [vmem:[%s1871_s3] sm:$0xf] }
   0xf   :  { %321 = vmatpush1.bf16.msra.mxu0 %v1151_v15  ;;  %434 = vmatpush1.bf16.msra.mxu1 %v1152_v16  ;;  %v76_v38 = vmax.f32 %v60_v33, 0.0  ;;  %v77_v39 = vmax.f32 %v61_v34, 0.0  ;;  %v1103_v58 = vunpack.c.l.bf16 %v1123_v55  ;;  %v1104_v59 = vunpack.c.h.bf16 %v1123_v55  ;;  %v1126_v16 = vld [vmem:[%s1869_s0 + $0x30] sm:$0xff]  }
  0x10   :  { %322 = vmatprep.subr.bf16.mxu0 %v1153_v17  ;;  %435 = vmatprep.subr.bf16.mxu1 %v1155_v18  ;;  %v78_v48 = vmax.f32 %v62_v45, 0.0  ;;  %v79_v49 = vmax.f32 %v63_v46, 0.0  ;;  %v64_v53 = vadd.f32 %v1099_v50, %v1294_v28  ;;  %v65_v54 = vadd.f32 %v1100_v51, %v1294_v28  ;;  %v1402_v50 = vld [vmem:[%s1872_s4 + $0x28] sm:$0xff]  ;;  %v1413_v55 = vld [vmem:[%s1872_s4 + $0x30] sm:$0xff] }
  0x11   :  { %v92_v44 = vpack.c.bf16 %v77_v39, %v76_v38  ;;  %v66_v61 = vadd.f32 %v1103_v58, %v1294_v28  ;;  %v67_v62 = vadd.f32 %v1104_v59, %v1294_v28  ;;  %v1107_v3 = vunpack.c.l.bf16 %v1124_v63 }
  0x12   :  { %v93_v52 = vpack.c.bf16 %v79_v49, %v78_v48  ;;  %v80_v56 = vmax.f32 %v64_v53, 0.0  ;;  %v81_v57 = vmax.f32 %v65_v54, 0.0  ;;  %v1108_v4 = vunpack.c.h.bf16 %v1124_v63  ;;  %v1397_v49 = vld [vmem:[%s1872_s4 + $0x20] sm:$0xff] }
  0x13   :  { %323 = vmatpush1.bf16.msra.mxu0 %v1157_v19  ;;  %436 = vmatpush1.bf16.msra.mxu1 %v1158_v20  ;;  %v82_v0 = vmax.f32 %v66_v61, 0.0  ;;  %v83_v2 = vmax.f32 %v67_v62, 0.0  ;;  %v68_v6 = vadd.f32 %v1107_v3, %v1294_v28  ;;  %v1111_v11 = vunpack.c.l.bf16 %v1125_v8  ;;  %v1427_v61 = vld [vmem:[%s1872_s4 + $0x40] sm:$0xff]  ;;  %v1432_v62 = vld [vmem:[%s1872_s4 + $0x48] sm:$0xff] }
  0x14   :  { %324 = vmatprep.subr.bf16.mxu0 %v1159_v21  ;;  %437 = vmatprep.subr.bf16.mxu1 %v1161_v22  ;;  %v94_v60 = vpack.c.bf16 %v81_v57, %v80_v56  ;;  %v69_v7 = vadd.f32 %v1108_v4, %v1294_v28  ;;  %v1112_v12 = vunpack.c.h.bf16 %v1125_v8  ;;  %v1115_v19 = vunpack.c.l.bf16 %v1126_v16  ;;  %v1418_v56 = vld [vmem:[%s1872_s4 + $0x38] sm:$0xff]  ;;  %v1441_v4 = vld [vmem:[%s1872_s4 + $0x50] sm:$0xff] }
  0x15   :  { %v95_v5 = vpack.c.bf16 %v83_v2, %v82_v0  ;;  %v84_v9 = vmax.f32 %v68_v6, 0.0  ;;  %v70_v14 = vadd.f32 %v1111_v11, %v1294_v28  ;;  %v1116_v20 = vunpack.c.h.bf16 %v1126_v16  ;;  %v1460_v11 = vld [vmem:[%s1872_s4 + $0x68] sm:$0xff]  ;;  %v1469_v16 = vld [vmem:[%s1872_s4 + $0x70] sm:$0xff] }
  0x16   :  { %v85_v10 = vmax.f32 %v69_v7, 0.0  ;;  %v71_v15 = vadd.f32 %v1112_v12, %v1294_v28  ;;  %v72_v22 = vadd.f32 %v1115_v19, %v1294_v28  ;;  %v580_v63 = vunpack.c.l.bf16 %v1397_v49 }
  0x17   :  { %325 = vmatpush1.bf16.msra.mxu0 %v1163_v23  ;;  %438 = vmatpush1.bf16.msra.mxu1 %v1164_v24  ;;  %v86_v17 = vmax.f32 %v70_v14, 0.0  ;;  %v73_v23 = vadd.f32 %v1116_v20, %v1294_v28  ;;  %v1127_v24 = vld [vmem:[%s1869_s0 + $0x38] sm:$0xff]   ;;  %v582_v0 = vunpack.c.l.bf16 %v1402_v50  ;;  %v581_v2 = vunpack.c.h.bf16 %v1397_v49 }
  0x18   :  { %326 = vmatprep.subr.bf16.mxu0 %v1165_v25  ;;  %439 = vmatprep.subr.bf16.mxu1 %v1167_v26  ;;  %v96_v13 = vpack.c.bf16 %v85_v10, %v84_v9  ;;  %v87_v18 = vmax.f32 %v71_v15, 0.0  ;;  %v88_v25 = vmax.f32 %v72_v22, 0.0  ;;  %v1119_v27 = vunpack.c.l.bf16 %v1127_v24  ;;  %v1455_v10 = vld [vmem:[%s1872_s4 + $0x60] sm:$0xff] }
  0x19   :  { %v89_v26 = vmax.f32 %v73_v23, 0.0  ;;  %v1120_v29 = vunpack.c.h.bf16 %v1127_v24  ;;  %v583_v3 = vunpack.c.h.bf16 %v1402_v50  ;;  %v584_v6 = vunpack.c.l.bf16 %v1413_v55 }
  0x1a   :  { %v97_v21 = vpack.c.bf16 %v87_v18, %v86_v17  ;;  %v586_v7 = vunpack.c.l.bf16 %v1418_v56  ;;  %v585_v8 = vunpack.c.h.bf16 %v1413_v55  ;;  %v587_v9 = vunpack.c.h.bf16 %v1418_v56  ;;  %v1474_v17 = vld [vmem:[%s1872_s4 + $0x78] sm:$0xff] }
  0x1b   :  { %327 = vmatpush1.bf16.msra.mxu0 %v1169_v31  ;;  %440 = vmatpush1.bf16.msra.mxu1 %v1170_v32  ;;  %v98_v30 = vpack.c.bf16 %v89_v26, %v88_v25  ;;  %v74_v31 = vadd.f32 %v1119_v27, %v1294_v28  ;;  %v75_v32 = vadd.f32 %v1120_v29, %v1294_v28  ;;  %v1371_v28 = vld [vmem:[%s1872_s4] sm:$0xff]  ;;  %v588_v12 = vunpack.c.l.bf16 %v1427_v61 }
  0x1c   :  { %328 = vmatprep.subr.bf16.mxu0 %v1171_v36  ;;  %441 = vmatprep.subr.bf16.mxu1 %v1173_v37  ;;  %v134_v36 = vlaneseq  ;;  %v572_v46 = vunpack.c.l.bf16 %v1371_v28  ;;  %v589_v14 = vunpack.c.h.bf16 %v1427_v61  ;;  %v591_v15 = vunpack.c.h.bf16 %v1432_v62  ;;  %v1487_v29 = vld [vmem:[%s1872_s4 + $0x80] sm:$0xff] }
  0x1d   :  { %v90_v33 = vmax.f32 %v74_v31, 0.0  ;;  %v91_v34 = vmax.f32 %v75_v32, 0.0  ;;  %v592_v20 = vunpack.c.l.bf16 %v1441_v4  ;;  %v593_v22 = vunpack.c.h.bf16 %v1441_v4 }
  0x1e   :  { %v135_v37 = vshrl.u32 %v134_v36, 7  ;;  %v596_v26 = vunpack.c.l.bf16 %v1455_v10  ;;  %v598_v27 = vunpack.c.l.bf16 %v1460_v11 }
  0x1f   :  { %329 = vmatpush1.bf16.msra.mxu0 %v1175_v42  ;;  %442 = vmatpush1.bf16.msra.mxu1 %v1176_v43  ;;  %v99_v35 = vpack.c.bf16 %v91_v34, %v90_v33  ;;  %v1381_v43 = vld [vmem:[%s1872_s4 + $0x10] sm:$0xff] }
  0x20   :  { %v136_v38 = vsub.s32 0, %v135_v37  ;;  %v144_v39 = vsub.s32 2, %v135_v37  ;;  %v140_v41 = vsub.s32 1, %v135_v37  ;;  %v148_v42 = vsub.s32 3, %v135_v37 }
  0x21   :  { %v576_v57 = vunpack.c.l.bf16 %v1381_v43  ;;  %v577_v59 = vunpack.c.h.bf16 %v1381_v43 }
  0x22   :  { %347 = vmatmul.mubr.bf16.vlgmr.msra.gmra.mxu0 %v92_v44  ;;  %460 = vmatmul.mubr.bf16.vlgmr.msra.gmra.mxu1 %v92_v44  ;;  %v1386_v44 = vld [vmem:[%s1872_s4 + $0x18] sm:$0xff]  ;;  %v1388_v45 = vrot.slane %v132_v40, %v136_v38  ;;  %v1391_v47 = vrot.slane %v132_v40, %v144_v39  ;;  %v1404_v51 = vrot.slane %v132_v40, %v140_v41 }
  0x23   :  { %356 = vmatprep.mubr.bf16.mxu0 %v1177_v1  ;;  %469 = vmatprep.mubr.bf16.mxu1 %v1177_v1  ;;  %v1407_v53 = vrot.slane %v132_v40, %v148_v42  ;;  %v578_v58 = vunpack.c.l.bf16 %v1386_v44 }
  0x2a   :  { %357 = vmatmul.mubr.bf16.gmra.mxu0 %v93_v52  ;;  %470 = vmatmul.mubr.bf16.gmra.mxu1 %v93_v52  ;;  %v573_v52 = vunpack.c.h.bf16 %v1371_v28 }
  0x2b   :  { %366 = vmatprep.mubr.bf16.mxu0 %v1177_v1  ;;  %479 = vmatprep.mubr.bf16.mxu1 %v1177_v1 }
  0x32   :  { %367 = vmatmul.mubr.bf16.gmra.mxu0 %v94_v60  ;;  %480 = vmatmul.mubr.bf16.gmra.mxu1 %v94_v60  ;;  %v579_v60 = vunpack.c.h.bf16 %v1386_v44 }
  0x33   :  { %376 = vmatprep.mubr.bf16.mxu0 %v1177_v1  ;;  %489 = vmatprep.mubr.bf16.mxu1 %v1177_v1 }
  0x3a   :  { %377 = vmatmul.mubr.bf16.gmra.mxu0 %v95_v5  ;;  %490 = vmatmul.mubr.bf16.gmra.mxu1 %v95_v5  ;;  %v1446_v5 = vld [vmem:[%s1872_s4 + $0x58] sm:$0xff] }
  0x3b   :  { %386 = vmatprep.mubr.bf16.mxu0 %v1177_v1  ;;  %499 = vmatprep.mubr.bf16.mxu1 %v1177_v1  ;;  %v595_v23 = vunpack.c.h.bf16 %v1446_v5 }
  0x42   :  { %387 = vmatmul.mubr.bf16.gmra.mxu0 %v96_v13  ;;  %500 = vmatmul.mubr.bf16.gmra.mxu1 %v96_v13  ;;  %v590_v13 = vunpack.c.l.bf16 %v1432_v62 }
  0x43   :  { %396 = vmatprep.mubr.bf16.mxu0 %v1177_v1  ;;  %509 = vmatprep.mubr.bf16.mxu1 %v1177_v1 }
  0x4a   :  { %397 = vmatmul.mubr.bf16.gmra.mxu0 %v97_v21  ;;  %510 = vmatmul.mubr.bf16.gmra.mxu1 %v97_v21  ;;  %v594_v21 = vunpack.c.l.bf16 %v1446_v5 }
  0x4b   :  { %406 = vmatprep.mubr.bf16.mxu0 %v1177_v1  ;;  %519 = vmatprep.mubr.bf16.mxu1 %v1177_v1 }
  0x52   :  { %407 = vmatmul.mubr.bf16.gmra.mxu0 %v98_v30  ;;  %520 = vmatmul.mubr.bf16.gmra.mxu1 %v98_v30  ;;  %v1492_v30 = vld [vmem:[%s1872_s4 + $0x88] sm:$0xff] }
  0x53   :  { %416 = vmatprep.mubr.bf16.mxu0 %v1177_v1  ;;  %529 = vmatprep.mubr.bf16.mxu1 %v1177_v1  ;;  %v1376_v1 = vld [vmem:[%s1872_s4 + $0x8] sm:$0xff] }
  0x54   :  { %v574_v48 = vunpack.c.l.bf16 %v1376_v1  ;;  %v575_v54 = vunpack.c.h.bf16 %v1376_v1 }
  0x5a   :  { %417 = vmatmul.mubr.bf16.gmra.mxu0 %v99_v35  ;;  %530 = vmatmul.mubr.bf16.gmra.mxu1 %v99_v35 }
  0xe2   :  { %v348_v18 = vpop.f32.mrf.mxu0  ;;  %v461_v19 = vpop.f32.mrf.mxu1 }
  0xe3   :  { %v349_v24 = vadd.f32 %v348_v18, %v1388_v45  ;;  %v462_v25 = vadd.f32 %v461_v19, %v1391_v47 }
  0xe4   :  { %v350_v31 = vpop.f32.mrf.mxu0  ;;  %v463_v32 = vpop.f32.mrf.mxu1 }
  0xe5   :  { %v636_v37 = vadd.f32 %v572_v46, %v349_v24  ;;  %v638_v38 = vadd.f32 %v574_v48, %v462_v25  ;;  %v351_v39 = vadd.f32 %v350_v31, %v1404_v51  ;;  %v464_v40 = vadd.f32 %v463_v32, %v1407_v53  ;;  %v1509_v48 = vld [vmem:[%s1872_s4 + $0x90] sm:$0xff]  ;;  %v1514_v24 = vld [vmem:[%s1872_s4 + $0x98] sm:$0xff] }
  0xe6   :  { %v352_v28 = vpop.f32.mrf.mxu0  ;;  %v465_v1 = vpop.f32.mrf.mxu1 }
  0xe7   :  { %v637_v34 = vadd.f32 %v573_v52, %v351_v39  ;;  %v639_v35 = vadd.f32 %v575_v54, %v464_v40  ;;  %v700_v25 = vmax.f32 %v636_v37, 0.0  ;;  %v702_v31 = vmax.f32 %v638_v38, 0.0 }
  0xe8   :  { %v353_v32 = vadd.f32 %v352_v28, %v1388_v45  ;;  %v466_v52 = vadd.f32 %v465_v1, %v1391_v47  ;;  %v354_v54 = vpop.f32.mrf.mxu0  ;;  %v467_v39 = vpop.f32.mrf.mxu1  ;;  %v608_v28 = vunpack.c.l.bf16 %v1509_v48  ;;  %v610_v1 = vunpack.c.l.bf16 %v1514_v24 }
  0xe9   :  { %v701_v40 = vmax.f32 %v637_v34, 0.0  ;;  %v703_v46 = vmax.f32 %v639_v35, 0.0  ;;  %v355_v36 = vadd.f32 %v354_v54, %v1404_v51  ;;  %v468_v19 = vadd.f32 %v467_v39, %v1407_v53 }
  0xea   :  { %v640_v18 = vadd.f32 %v576_v57, %v353_v32  ;;  %v642_v42 = vadd.f32 %v578_v58, %v466_v52  ;;  %v358_v37 = vpop.f32.mrf.mxu0  ;;  %v471_v38 = vpop.f32.mrf.mxu1 }
  0xeb   :  { %v1057_v41 = vpack.c.bf16 %v701_v40, %v700_v25  ;;  %v1058_v33 = vpack.c.bf16 %v703_v46, %v702_v31  ;;  %v641_v34 = vadd.f32 %v577_v59, %v355_v36  ;;  %v643_v35 = vadd.f32 %v579_v60, %v468_v19 }
  0xec   :  { %v704_v54 = vmax.f32 %v640_v18, 0.0  ;;  %v706_v39 = vmax.f32 %v642_v42, 0.0  ;;  %v359_v57 = vadd.f32 %v358_v37, %v1388_v45  ;;  %v472_v58 = vadd.f32 %v471_v38, %v1391_v47  ;;  %v360_v32 = vpop.f32.mrf.mxu0  ;;  %v473_v52 = vpop.f32.mrf.mxu1 }
  0xed   :  { %956 = vst [vmem:[%s1873_s5] sm:$0xff] %v1057_v41  ;;  %957 = vst [vmem:[%s1873_s5 + $0x8] sm:$0xff] %v1058_v33  ;;  %v705_v43 = vmax.f32 %v641_v34, 0.0  ;;  %v707_v59 = vmax.f32 %v643_v35, 0.0  ;;  %v361_v44 = vadd.f32 %v360_v32, %v1404_v51  ;;  %v474_v60 = vadd.f32 %v473_v52, %v1407_v53 }
  0xee   :  { %v644_v36 = vadd.f32 %v580_v63, %v359_v57  ;;  %v646_v42 = vadd.f32 %v582_v0, %v472_v58  ;;  %v362_v18 = vpop.f32.mrf.mxu0  ;;  %v475_v19 = vpop.f32.mrf.mxu1  ;;  %v609_v41 = vunpack.c.h.bf16 %v1509_v48  ;;  %v611_v46 = vunpack.c.h.bf16 %v1514_v24  ;;  %v1553_v63 = vld [vmem:[%s1872_s4 + $0xa0] sm:$0xff]  ;;  %v1558_v0 = vld [vmem:[%s1872_s4 + $0xa8] sm:$0xff] }
  0xef   :  { %v1059_v25 = vpack.c.bf16 %v705_v43, %v704_v54  ;;  %v1060_v33 = vpack.c.bf16 %v707_v59, %v706_v39  ;;  %v645_v31 = vadd.f32 %v581_v2, %v361_v44  ;;  %v647_v40 = vadd.f32 %v583_v3, %v474_v60 }
  0xf0   :  { %v708_v37 = vmax.f32 %v644_v36, 0.0  ;;  %v710_v38 = vmax.f32 %v646_v42, 0.0  ;;  %v363_v34 = vadd.f32 %v362_v18, %v1388_v45  ;;  %v476_v49 = vadd.f32 %v475_v19, %v1391_v47  ;;  %v364_v2 = vpop.f32.mrf.mxu0  ;;  %v477_v35 = vpop.f32.mrf.mxu1 }
  0xf1   :  { %958 = vst [vmem:[%s1873_s5 + $0x10] sm:$0xff] %v1059_v25  ;;  %959 = vst [vmem:[%s1873_s5 + $0x18] sm:$0xff] %v1060_v33  ;;  %v709_v50 = vmax.f32 %v645_v31, 0.0  ;;  %v711_v3 = vmax.f32 %v647_v40, 0.0  ;;  %v365_v54 = vadd.f32 %v364_v2, %v1404_v51  ;;  %v478_v39 = vadd.f32 %v477_v35, %v1407_v53 }
  0xf2   :  { %v648_v57 = vadd.f32 %v584_v6, %v363_v34  ;;  %v650_v58 = vadd.f32 %v586_v7, %v476_v49  ;;  %v368_v32 = vpop.f32.mrf.mxu0  ;;  %v481_v52 = vpop.f32.mrf.mxu1  ;;  %v612_v43 = vunpack.c.l.bf16 %v1553_v63  ;;  %v614_v59 = vunpack.c.l.bf16 %v1558_v0 }
  0xf3   :  { %v1061_v44 = vpack.c.bf16 %v709_v50, %v708_v37  ;;  %v1062_v60 = vpack.c.bf16 %v711_v3, %v710_v38  ;;  %v649_v36 = vadd.f32 %v585_v8, %v365_v54  ;;  %v651_v42 = vadd.f32 %v587_v9, %v478_v39 }
  0xf4   :  { %v712_v18 = vmax.f32 %v648_v57, 0.0  ;;  %v714_v19 = vmax.f32 %v650_v58, 0.0  ;;  %v369_v6 = vadd.f32 %v368_v32, %v1388_v45  ;;  %v482_v7 = vadd.f32 %v481_v52, %v1391_v47  ;;  %v370_v25 = vpop.f32.mrf.mxu0  ;;  %v483_v33 = vpop.f32.mrf.mxu1 }
  0xf5   :  { %960 = vst [vmem:[%s1873_s5 + $0x20] sm:$0xff] %v1061_v44  ;;  %961 = vst [vmem:[%s1873_s5 + $0x28] sm:$0xff] %v1062_v60  ;;  %v713_v55 = vmax.f32 %v649_v36, 0.0  ;;  %v715_v8 = vmax.f32 %v651_v42, 0.0  ;;  %v371_v56 = vadd.f32 %v370_v25, %v1404_v51  ;;  %v484_v9 = vadd.f32 %v483_v33, %v1407_v53 }
  0xf6   :  { %v652_v31 = vadd.f32 %v588_v12, %v369_v6  ;;  %v654_v40 = vadd.f32 %v590_v13, %v482_v7  ;;  %v372_v37 = vpop.f32.mrf.mxu0  ;;  %v485_v38 = vpop.f32.mrf.mxu1  ;;  %v613_v34 = vunpack.c.h.bf16 %v1553_v63  ;;  %v615_v49 = vunpack.c.h.bf16 %v1558_v0  ;;  %v1603_v12 = vld [vmem:[%s1872_s4 + $0xb0] sm:$0xff]  ;;  %v1608_v13 = vld [vmem:[%s1872_s4 + $0xb8] sm:$0xff] }
  0xf7   :  { %v1063_v2 = vpack.c.bf16 %v713_v55, %v712_v18  ;;  %v1064_v35 = vpack.c.bf16 %v715_v8, %v714_v19  ;;  %v653_v50 = vadd.f32 %v589_v14, %v371_v56  ;;  %v655_v3 = vadd.f32 %v591_v15, %v484_v9 }
  0xf8   :  { %v716_v54 = vmax.f32 %v652_v31, 0.0  ;;  %v718_v39 = vmax.f32 %v654_v40, 0.0  ;;  %v373_v57 = vadd.f32 %v372_v37, %v1388_v45  ;;  %v486_v61 = vadd.f32 %v485_v38, %v1391_v47  ;;  %v374_v14 = vpop.f32.mrf.mxu0  ;;  %v487_v58 = vpop.f32.mrf.mxu1 }
  0xf9   :  { %962 = vst [vmem:[%s1873_s5 + $0x30] sm:$0xff] %v1063_v2  ;;  %963 = vst [vmem:[%s1873_s5 + $0x38] sm:$0xff] %v1064_v35  ;;  %v717_v62 = vmax.f32 %v653_v50, 0.0  ;;  %v719_v15 = vmax.f32 %v655_v3, 0.0  ;;  %v375_v32 = vadd.f32 %v374_v14, %v1404_v51  ;;  %v488_v52 = vadd.f32 %v487_v58, %v1407_v53 }
  0xfa   :  { %v656_v44 = vadd.f32 %v592_v20, %v373_v57  ;;  %v658_v60 = vadd.f32 %v594_v21, %v486_v61  ;;  %v378_v36 = vpop.f32.mrf.mxu0  ;;  %v491_v42 = vpop.f32.mrf.mxu1  ;;  %v616_v18 = vunpack.c.l.bf16 %v1603_v12  ;;  %v618_v19 = vunpack.c.l.bf16 %v1608_v13 }
  0xfb   :  { %v1065_v6 = vpack.c.bf16 %v717_v62, %v716_v54  ;;  %v1066_v7 = vpack.c.bf16 %v719_v15, %v718_v39  ;;  %v657_v25 = vadd.f32 %v593_v22, %v375_v32  ;;  %v659_v33 = vadd.f32 %v595_v23, %v488_v52 }
  0xfc   :  { %v720_v55 = vmax.f32 %v656_v44, 0.0  ;;  %v722_v8 = vmax.f32 %v658_v60, 0.0  ;;  %v379_v20 = vadd.f32 %v378_v36, %v1388_v45  ;;  %v492_v21 = vadd.f32 %v491_v42, %v1391_v47  ;;  %v380_v56 = vpop.f32.mrf.mxu0  ;;  %v493_v9 = vpop.f32.mrf.mxu1 }
  0xfd   :  { %964 = vst [vmem:[%s1873_s5 + $0x40] sm:$0xff] %v1065_v6  ;;  %965 = vst [vmem:[%s1873_s5 + $0x48] sm:$0xff] %v1066_v7  ;;  %v721_v4 = vmax.f32 %v657_v25, 0.0  ;;  %v723_v22 = vmax.f32 %v659_v33, 0.0  ;;  %v381_v5 = vadd.f32 %v380_v56, %v1404_v51  ;;  %v494_v23 = vadd.f32 %v493_v9, %v1407_v53 }
  0xfe   :  { %v660_v31 = vadd.f32 %v596_v26, %v379_v20  ;;  %v662_v40 = vadd.f32 %v598_v27, %v492_v21  ;;  %v382_v37 = vpop.f32.mrf.mxu0  ;;  %v495_v38 = vpop.f32.mrf.mxu1  ;;  %v617_v2 = vunpack.c.h.bf16 %v1603_v12  ;;  %v619_v35 = vunpack.c.h.bf16 %v1608_v13  ;;  %v1653_v26 = vld [vmem:[%s1872_s4 + $0xc0] sm:$0xff]  ;;  %v1658_v27 = vld [vmem:[%s1872_s4 + $0xc8] sm:$0xff] }
  0xff   :  { %v1067_v50 = vpack.c.bf16 %v721_v4, %v720_v55  ;;  %v1068_v3 = vpack.c.bf16 %v723_v22, %v722_v8  ;;  %v1874_v54 = vunpack.c.h.bf16 %v1455_v10  ;;  %v1875_v57 = vunpack.c.h.bf16 %v1460_v11 }
 0x100   :  { %v724_v14 = vmax.f32 %v660_v31, 0.0  ;;  %v726_v58 = vmax.f32 %v662_v40, 0.0  ;;  %v383_v62 = vadd.f32 %v382_v37, %v1388_v45  ;;  %v496_v10 = vadd.f32 %v495_v38, %v1391_v47  ;;  %v384_v15 = vpop.f32.mrf.mxu0  ;;  %v497_v32 = vpop.f32.mrf.mxu1 }
 0x101   :  { %v661_v39 = vadd.f32 %v1874_v54, %v381_v5  ;;  %v663_v61 = vadd.f32 %v1875_v57, %v494_v23  ;;  %966 = vst [vmem:[%s1873_s5 + $0x50] sm:$0xff] %v1067_v50  ;;  %967 = vst [vmem:[%s1873_s5 + $0x58] sm:$0xff] %v1068_v3  ;;  %v385_v44 = vadd.f32 %v384_v15, %v1404_v51  ;;  %v1876_v36 = vunpack.c.l.bf16 %v1469_v16 }
 0x102   :  { %v498_v60 = vadd.f32 %v497_v32, %v1407_v53  ;;  %v1877_v6 = vunpack.c.l.bf16 %v1474_v17  ;;  %v388_v25 = vpop.f32.mrf.mxu0  ;;  %v501_v33 = vpop.f32.mrf.mxu1  ;;  %v620_v55 = vunpack.c.l.bf16 %v1653_v26  ;;  %v622_v8 = vunpack.c.l.bf16 %v1658_v27 }
 0x103   :  { %v725_v11 = vmax.f32 %v661_v39, 0.0  ;;  %v727_v52 = vmax.f32 %v663_v61, 0.0  ;;  %v664_v42 = vadd.f32 %v1876_v36, %v383_v62  ;;  %v1878_v56 = vunpack.c.h.bf16 %v1469_v16  ;;  %v1703_v36 = vld [vmem:[%s1872_s4 + $0xd0] sm:$0xff] }
 0x104   :  { %v666_v7 = vadd.f32 %v1877_v6, %v496_v10  ;;  %v1879_v4 = vunpack.c.h.bf16 %v1474_v17  ;;  %v389_v31 = vadd.f32 %v388_v25, %v1388_v45  ;;  %v502_v40 = vadd.f32 %v501_v33, %v1391_v47  ;;  %v390_v37 = vpop.f32.mrf.mxu0  ;;  %v503_v38 = vpop.f32.mrf.mxu1 }
 0x105   :  { %v1069_v20 = vpack.c.bf16 %v725_v11, %v724_v14  ;;  %v1070_v21 = vpack.c.bf16 %v727_v52, %v726_v58  ;;  %v665_v9 = vadd.f32 %v1878_v56, %v385_v44  ;;  %v728_v5 = vmax.f32 %v664_v42, 0.0  ;;  %v1708_v42 = vld [vmem:[%s1872_s4 + $0xd8] sm:$0xff] }
 0x106   :  { %v667_v22 = vadd.f32 %v1879_v4, %v498_v60  ;;  %v730_v23 = vmax.f32 %v666_v7, 0.0  ;;  %v391_v17 = vadd.f32 %v390_v37, %v1404_v51  ;;  %v504_v3 = vadd.f32 %v503_v38, %v1407_v53  ;;  %v392_v14 = vpop.f32.mrf.mxu0  ;;  %v505_v58 = vpop.f32.mrf.mxu1 }
 0x107   :  { %968 = vst [vmem:[%s1873_s5 + $0x60] sm:$0xff] %v1069_v20  ;;  %969 = vst [vmem:[%s1873_s5 + $0x68] sm:$0xff] %v1070_v21  ;;  %v729_v16 = vmax.f32 %v665_v9, 0.0  ;;  %v1880_v54 = vunpack.c.l.bf16 %v1487_v29  ;;  %v1881_v57 = vunpack.c.l.bf16 %v1492_v30  ;;  %v621_v62 = vunpack.c.h.bf16 %v1653_v26 }
 0x108   :  { %v731_v50 = vmax.f32 %v667_v22, 0.0  ;;  %v623_v10 = vunpack.c.h.bf16 %v1658_v27  ;;  %v1882_v11 = vunpack.c.h.bf16 %v1487_v29  ;;  %v1883_v44 = vunpack.c.h.bf16 %v1492_v30  ;;  %v394_v33 = vpop.f32.mrf.mxu0  ;;  %v507_v20 = vpop.f32.mrf.mxu1 }
 0x109   :  { %v668_v39 = vadd.f32 %v1880_v54, %v389_v31  ;;  %v670_v61 = vadd.f32 %v1881_v57, %v502_v40  ;;  %v1071_v15 = vpack.c.bf16 %v729_v16, %v728_v5  ;;  %v393_v25 = vadd.f32 %v392_v14, %v1388_v45 }
 0x10a   :  { %v1072_v32 = vpack.c.bf16 %v731_v50, %v730_v23  ;;  %v669_v52 = vadd.f32 %v1882_v11, %v391_v17  ;;  %v671_v60 = vadd.f32 %v1883_v44, %v504_v3  ;;  %v506_v29 = vadd.f32 %v505_v58, %v1391_v47  ;;  %v398_v5 = vpop.f32.mrf.mxu0  ;;  %v511_v23 = vpop.f32.mrf.mxu1 }
 0x10b   :  { %v732_v6 = vmax.f32 %v668_v39, 0.0  ;;  %v734_v7 = vmax.f32 %v670_v61, 0.0  ;;  %970 = vst [vmem:[%s1873_s5 + $0x70] sm:$0xff] %v1071_v15  ;;  %v395_v56 = vadd.f32 %v394_v33, %v1404_v51  ;;  %v508_v9 = vadd.f32 %v507_v20, %v1407_v53 }
 0x10c   :  { %971 = vst [vmem:[%s1873_s5 + $0x78] sm:$0xff] %v1072_v32  ;;  %v733_v30 = vmax.f32 %v669_v52, 0.0  ;;  %v735_v21 = vmax.f32 %v671_v60, 0.0  ;;  %v672_v4 = vadd.f32 %v608_v28, %v393_v25  ;;  %v674_v22 = vadd.f32 %v610_v1, %v506_v29  ;;  %v400_v54 = vpop.f32.mrf.mxu0  ;;  %v513_v39 = vpop.f32.mrf.mxu1 }
 0x10d   :  { %v624_v31 = vunpack.c.l.bf16 %v1703_v36  ;;  %v626_v40 = vunpack.c.l.bf16 %v1708_v42  ;;  %v673_v16 = vadd.f32 %v609_v41, %v395_v56  ;;  %v675_v50 = vadd.f32 %v611_v46, %v508_v9 }
 0x10e   :  { %v1073_v37 = vpack.c.bf16 %v733_v30, %v732_v6  ;;  %v1074_v38 = vpack.c.bf16 %v735_v21, %v734_v7  ;;  %v736_v17 = vmax.f32 %v672_v4, 0.0  ;;  %v738_v3 = vmax.f32 %v674_v22, 0.0  ;;  %v402_v14 = vpop.f32.mrf.mxu0  ;;  %v515_v58 = vpop.f32.mrf.mxu1 }
 0x10f   :  { %v399_v28 = vadd.f32 %v398_v5, %v1388_v45  ;;  %v512_v1 = vadd.f32 %v511_v23, %v1391_v47  ;;  %v737_v48 = vmax.f32 %v673_v16, 0.0  ;;  %v739_v41 = vmax.f32 %v675_v50, 0.0 }
 0x110   :  { %972 = vst [vmem:[%s1873_s5 + $0x80] sm:$0xff] %v1073_v37  ;;  %973 = vst [vmem:[%s1873_s5 + $0x88] sm:$0xff] %v1074_v38  ;;  %v401_v24 = vadd.f32 %v400_v54, %v1404_v51  ;;  %v514_v46 = vadd.f32 %v513_v39, %v1407_v53  ;;  %v625_v15 = vunpack.c.h.bf16 %v1703_v36  ;;  %v627_v32 = vunpack.c.h.bf16 %v1708_v42  ;;  %v517_v29 = vpop.f32.mrf.mxu1 }
 0x111   :  { %v676_v57 = vadd.f32 %v612_v43, %v399_v28  ;;  %v678_v61 = vadd.f32 %v614_v59, %v512_v1  ;;  %v1075_v11 = vpack.c.bf16 %v737_v48, %v736_v17  ;;  %v1076_v52 = vpack.c.bf16 %v739_v41, %v738_v3  ;;  %v1753_v43 = vld [vmem:[%s1872_s4 + $0xe0] sm:$0xff]  ;;  %v1758_v59 = vld [vmem:[%s1872_s4 + $0xe8] sm:$0xff] }
 0x112   :  { %v677_v44 = vadd.f32 %v613_v34, %v401_v24  ;;  %v679_v60 = vadd.f32 %v615_v49, %v514_v46  ;;  %v403_v25 = vadd.f32 %v402_v14, %v1388_v45  ;;  %v516_v63 = vadd.f32 %v515_v58, %v1391_v47  ;;  %v404_v34 = vpop.f32.mrf.mxu0  ;;  %v521_v9 = vpop.f32.mrf.mxu1 }
 0x113   :  { %v740_v6 = vmax.f32 %v676_v57, 0.0  ;;  %v742_v7 = vmax.f32 %v678_v61, 0.0  ;;  %974 = vst [vmem:[%s1873_s5 + $0x90] sm:$0xff] %v1075_v11  ;;  %975 = vst [vmem:[%s1873_s5 + $0x98] sm:$0xff] %v1076_v52  ;;  %v405_v33 = vadd.f32 %v404_v34, %v1404_v51  ;;  %v518_v20 = vadd.f32 %v517_v29, %v1407_v53 }
 0x114   :  { %v741_v0 = vmax.f32 %v677_v44, 0.0  ;;  %v743_v49 = vmax.f32 %v679_v60, 0.0  ;;  %v680_v30 = vadd.f32 %v616_v18, %v403_v25  ;;  %v682_v21 = vadd.f32 %v618_v19, %v516_v63  ;;  %v408_v56 = vpop.f32.mrf.mxu0  ;;  %v523_v3 = vpop.f32.mrf.mxu1 }
 0x115   :  { %v628_v4 = vunpack.c.l.bf16 %v1753_v43  ;;  %v630_v22 = vunpack.c.l.bf16 %v1758_v59  ;;  %v681_v37 = vadd.f32 %v617_v2, %v405_v33  ;;  %v683_v38 = vadd.f32 %v619_v35, %v518_v20 }
 0x116   :  { %v1077_v5 = vpack.c.bf16 %v741_v0, %v740_v6  ;;  %v1078_v23 = vpack.c.bf16 %v743_v49, %v742_v7  ;;  %v744_v16 = vmax.f32 %v680_v30, 0.0  ;;  %v746_v50 = vmax.f32 %v682_v21, 0.0  ;;  %v410_v17 = vpop.f32.mrf.mxu0  ;;  %v525_v39 = vpop.f32.mrf.mxu1 }
 0x117   :  { %v409_v18 = vadd.f32 %v408_v56, %v1388_v45  ;;  %v522_v19 = vadd.f32 %v521_v9, %v1391_v47  ;;  %v745_v12 = vmax.f32 %v681_v37, 0.0  ;;  %v747_v2 = vmax.f32 %v683_v38, 0.0 }
 0x118   :  { %976 = vst [vmem:[%s1873_s5 + $0xa0] sm:$0xff] %v1077_v5  ;;  %977 = vst [vmem:[%s1873_s5 + $0xa8] sm:$0xff] %v1078_v23  ;;  %v411_v13 = vadd.f32 %v410_v17, %v1404_v51  ;;  %v524_v35 = vadd.f32 %v523_v3, %v1407_v53  ;;  %v412_v54 = vpop.f32.mrf.mxu0  ;;  %v629_v48 = vunpack.c.h.bf16 %v1753_v43  ;;  %v631_v41 = vunpack.c.h.bf16 %v1758_v59  ;;  %v527_v52 = vpop.f32.mrf.mxu1 }
 0x119   :  { %v684_v28 = vadd.f32 %v620_v55, %v409_v18  ;;  %v686_v1 = vadd.f32 %v622_v8, %v522_v19  ;;  %v1079_v24 = vpack.c.bf16 %v745_v12, %v744_v16  ;;  %v1080_v46 = vpack.c.bf16 %v747_v2, %v746_v50  ;;  %v1803_v55 = vld [vmem:[%s1872_s4 + $0xf0] sm:$0xff]  ;;  %v1808_v8 = vld [vmem:[%s1872_s4 + $0xf8] sm:$0xff] }
 0x11a   :  { %v685_v57 = vadd.f32 %v621_v62, %v411_v13  ;;  %v687_v61 = vadd.f32 %v623_v10, %v524_v35  ;;  %v413_v11 = vadd.f32 %v412_v54, %v1388_v45  ;;  %v526_v26 = vadd.f32 %v525_v39, %v1391_v47  ;;  %v414_v62 = vpop.f32.mrf.mxu0  ;;  %v531_v63 = vpop.f32.mrf.mxu1 }
 0x11b   :  { %v748_v14 = vmax.f32 %v684_v28, 0.0  ;;  %v750_v58 = vmax.f32 %v686_v1, 0.0  ;;  %978 = vst [vmem:[%s1873_s5 + $0xb0] sm:$0xff] %v1079_v24  ;;  %979 = vst [vmem:[%s1873_s5 + $0xb8] sm:$0xff] %v1080_v46  ;;  %v415_v44 = vadd.f32 %v414_v62, %v1404_v51  ;;  %v528_v60 = vadd.f32 %v527_v52, %v1407_v53 }
 0x11c   :  { %v749_v27 = vmax.f32 %v685_v57, 0.0  ;;  %v751_v10 = vmax.f32 %v687_v61, 0.0  ;;  %v688_v6 = vadd.f32 %v624_v31, %v413_v11  ;;  %v690_v7 = vadd.f32 %v626_v40, %v526_v26  ;;  %v418_v25 = vpop.f32.mrf.mxu0  ;;  %v533_v9 = vpop.f32.mrf.mxu1 }
 0x11d   :  { %v632_v34 = vunpack.c.l.bf16 %v1803_v55  ;;  %v634_v29 = vunpack.c.l.bf16 %v1808_v8  ;;  %v689_v33 = vadd.f32 %v625_v15, %v415_v44  ;;  %v691_v20 = vadd.f32 %v627_v32, %v528_v60 }
 0x11e   :  { %v1081_v0 = vpack.c.bf16 %v749_v27, %v748_v14  ;;  %v1082_v49 = vpack.c.bf16 %v751_v10, %v750_v58  ;;  %v752_v30 = vmax.f32 %v688_v6, 0.0  ;;  %v754_v21 = vmax.f32 %v690_v7, 0.0  ;;  %v420_v56 = vpop.f32.mrf.mxu0  ;;  %v535_v38 = vpop.f32.mrf.mxu1 }
 0x11f   :  { %v419_v31 = vadd.f32 %v418_v25, %v1388_v45  ;;  %v532_v40 = vadd.f32 %v531_v63, %v1391_v47  ;;  %v753_v36 = vmax.f32 %v689_v33, 0.0  ;;  %v755_v15 = vmax.f32 %v691_v20, 0.0 }
 0x120   :  { %980 = vst [vmem:[%s1873_s5 + $0xc0] sm:$0xff] %v1081_v0  ;;  %981 = vst [vmem:[%s1873_s5 + $0xc8] sm:$0xff] %v1082_v49  ;;  %v421_v42 = vadd.f32 %v420_v56, %v1404_v51  ;;  %v534_v32 = vadd.f32 %v533_v9, %v1407_v53  ;;  %v422_v37 = vpop.f32.mrf.mxu0  ;;  %v633_v16 = vunpack.c.h.bf16 %v1803_v55  ;;  %v635_v50 = vunpack.c.h.bf16 %v1808_v8  ;;  %v537_v35 = vpop.f32.mrf.mxu1 }
 0x121   :  { %v692_v5 = vadd.f32 %v628_v4, %v419_v31  ;;  %v694_v23 = vadd.f32 %v630_v22, %v532_v40  ;;  %v1083_v18 = vpack.c.bf16 %v753_v36, %v752_v30  ;;  %v1084_v19 = vpack.c.bf16 %v755_v15, %v754_v21 }
 0x122   :  { %v693_v17 = vadd.f32 %v629_v48, %v421_v42  ;;  %v695_v3 = vadd.f32 %v631_v41, %v534_v32  ;;  %v423_v13 = vadd.f32 %v422_v37, %v1388_v45  ;;  %v536_v43 = vadd.f32 %v535_v38, %v1391_v47  ;;  %v424_v4 = vpop.f32.mrf.mxu0 }
 0x123   :  { %v756_v12 = vmax.f32 %v692_v5, 0.0  ;;  %v758_v2 = vmax.f32 %v694_v23, 0.0  ;;  %982 = vst [vmem:[%s1873_s5 + $0xd0] sm:$0xff] %v1083_v18  ;;  %983 = vst [vmem:[%s1873_s5 + $0xd8] sm:$0xff] %v1084_v19  ;;  %v425_v28 = vadd.f32 %v424_v4, %v1404_v51  ;;  %v538_v1 = vadd.f32 %v537_v35, %v1407_v53 }
 0x124   :  { %v757_v59 = vmax.f32 %v693_v17, 0.0  ;;  %v759_v22 = vmax.f32 %v695_v3, 0.0  ;;  %v696_v54 = vadd.f32 %v632_v34, %v423_v13  ;;  %v698_v45 = vadd.f32 %v634_v29, %v536_v43 }
 0x125   :  { %v697_v48 = vadd.f32 %v633_v16, %v425_v28  ;;  %v699_v41 = vadd.f32 %v635_v50, %v538_v1 }
 0x126   :  { %v1085_v39 = vpack.c.bf16 %v757_v59, %v756_v12  ;;  %v1086_v47 = vpack.c.bf16 %v759_v22, %v758_v2  ;;  %v760_v24 = vmax.f32 %v696_v54, 0.0  ;;  %v762_v46 = vmax.f32 %v698_v45, 0.0 }
 0x127   :  { %v761_v57 = vmax.f32 %v697_v48, 0.0  ;;  %v763_v51 = vmax.f32 %v699_v41, 0.0 }
 0x128   :  { %984 = vst [vmem:[%s1873_s5 + $0xe0] sm:$0xff] %v1085_v39  ;;  %985 = vst [vmem:[%s1873_s5 + $0xe8] sm:$0xff] %v1086_v47 }
 0x129   :  { %v1087_v61 = vpack.c.bf16 %v761_v57, %v760_v24  ;;  %v1088_v53 = vpack.c.bf16 %v763_v51, %v762_v46 }
 0x12b   :  { %986 = vst [vmem:[%s1873_s5 + $0xf0] sm:$0xff] %v1087_v61  ;;  %987 = vst [vmem:[%s1873_s5 + $0xf8] sm:$0xff] %v1088_v53 }

// kernel: _lambda_.29
= control target key start
LH: loop header
LB: loop body
LE: loop exit
PB: predicated region body
PF: predicated region fallthrough
CT: control target
= control target key end

     0   :  { %s5355_s0 = inlined_call_operand.vmem [shape: bf16[2,4,2048], index: 0, kind: input, shape index: {}]   ;;  %s5356_s1 = inlined_call_operand.vmem [shape: bf16[2048,1024], index: 1, kind: input, shape index: {}]   ;;  %s5357_s2 = inlined_call_operand.vmem [shape: f32[1,1024], index: 2, kind: input, shape index: {}]   ;;  %s5358_s3 = inlined_call_operand.vmem [shape: bf16[1024,256], index: 3, kind: input, shape index: {}]   ;;  %s5359_s4 = inlined_call_operand.vmem [shape: f32[1,256], index: 4, kind: input, shape index: {}]   ;;  %s5360_s5 = inlined_call_operand.vmem [shape: bf16[256,1], index: 5, kind: input, shape index: {}]   ;;  %s5361_s6 = inlined_call_operand.<no memory space> [shape: f32[1,1], index: 6, kind: input, shape index: {}]   ;;  %s5362_s7 = inlined_call_operand.vmem [shape: f32[2,1], index: 7, kind: output, shape index: {}]  }
   0x1   :  { %v12_v0 = vstv %s5361_s6 }
   0x2   :  { %13 = vst [vmem:[#allocation3] sm:$0x1] %v12_v0 }
   0x3   :  { %s4429_s26 = smov 0   ;;  %s4431_s27 = smov 0  }
   0x4   :  { %s4433_s28 = smov 0  }
   0x5 LB: > { %s4442_s6 = sadd.s32 4294967295, %s4382_s28   ;;  %s4444_s29 = sadd.s32 1, %s4382_s28   ;;  %s4382_s28 = sphi %s4433_s28, %s5365_s28   ;;  %s4378_s27 = sphi %s4431_s27, %s5364_s27   ;;  %s4374_s26 = sphi %s4429_s26, %s5363_s26  }
   0x6   : > { %s23_s30 = ssub.s32 %s4382_s28, %s4444_s29  ;;  %s26_s8 = sadd.s32 1, %s4378_s27 }
   0x7   : > { %p24_p0 = scmp.eq.s32.totalorder %s23_s30, 0  ;;  %p33_p1 = scmp.ne.s32.totalorder %s4378_s27, %s4374_s26 }
   0x8   : > { %p34_p2 = scmp.eq.s32.totalorder %s4382_s28, 0  ;;  %p3683_p4 = scmp.ge.s32.totalorder %s4382_s28, 4 }
   0x9   : > { %s4451_s9 = scalar_select %p24_p0, %s4378_s27, %s26_s8  }
   0xa   : > { %p35_p3 = por %p34_p2, %p33_p1  ;;  %226 = sbr.rel (%p3683_p4) target bundleno = 21 (0x15), region = 36 }
   0xf   : > { %229 = sbr.rel (!%p35_p3) target bundleno = 21 (0x15), region = 40  ;;  %s231_s10 = sand.u32 (%p35_p3), 1, %s4378_s27  }
  0x10   : > { %s4098_s11 = sshll.u32 (%p35_p3), %s4382_s28, 3  ;;  %s3684_s12 = sshll.u32 (%p35_p3), %s231_s10, 4 }
  0x11   : > { %s236_s15 = scalar_lea.vmem (%p35_p3), %s5355_s0, %s4098_s11  ;;  %s233_s16 = scalar_lea.vmem (%p35_p3), [#allocation4], %s3684_s12 }
  0x12   : > { %v267_v1 = vld [vmem:[%s236_s15] sm:$0xff] (%p35_p3) }
  0x13   : > { %v269_v2 = vld [vmem:[%s236_s15 + $0x20] sm:$0xff] (%p35_p3)  ;;  %268 = vst [vmem:[%s233_s16] sm:$0xff] (%p35_p3), %v267_v1 }
  0x14   : > { %270 = vst [vmem:[%s233_s16 + $0x8] sm:$0xff] %v269_v2 }
  0x15 PF: > { %p3687_p5 = scmp.ge.s32.totalorder %s4382_s28, 1  ;;  %p285_p6 = scmp.lt.s32.totalorder %s4382_s28, 5 }
  0x17   : > { %p286_p7 = pnand %p3687_p5, %p285_p6 }
  0x18   : > { %s292_s17 = sand.u32 (!%p286_p7), 1, %s4374_s26   ;;  %s3689_s18 = sshll.u32 (!%p286_p7), %s4442_s6, 6 }
  0x19   : > { %289 = sbr.rel (%p286_p7) target bundleno = 1079 (0x437), region = 82  ;;  %s4459_s19 = sshll.u32 (!%p286_p7), %s292_s17, 4 }
  0x1a   : > { %p326_p8 = scmp.lt.s32.totalorder (!%p286_p7), %s3689_s18, 255  ;;  %s294_s24 = scalar_lea.vmem (!%p286_p7), [#allocation4], %s4459_s19 }
  0x1b   : > { %p3692_p9 = scmp.ne.s32.totalorder (!%p286_p7), %s4442_s6, 0 }
  0x1e   : > { %s5367_s18 = smov (!%p326_p8, %s3689_s18), 255  ;;  %336 = sbr.rel (%p3692_p9) target bundleno = 37 (0x25), region = 90 }
  0x1f   : > { %s4099_s20 = sshll.u32 %s5367_s18, 5 }
  0x20   : > { %s4464_s23 = scalar_lea.vmem %s5356_s1, %s4099_s20 }
  0x23   : > { %v4384_v3 = vmov 0.0  }
  0x24   : > { %337 = vst [vmem:[#allocation2] sm:$0xff] %v4384_v3  ;;  %338 = vst [vmem:[#allocation2 + $0x8] sm:$0xff] %v4384_v3 }
  0x25 PF: > { %v489_v4 = vld [vmem:[%s4464_s23 + $0x1c0] sm:$0xff]  ;;  %vm357_vm0 = vcmask 1043456   ;;  %vm705_vm1 = vcmask 1041409   ;;  %p3949_p10 = scmp.ne.s32.totalorder %s4442_s6, 3 }
  0x26   : > { %v493_v5 = vld [vmem:[%s4464_s23 + $0x1e0] sm:$0xff] }
  0x27   : > { %v617_v6 = vld [vmem:[%s4464_s23 + $0x5c0] sm:$0xff]  ;;  %v3750_v7 = vcombine.high %v489_v4, %v493_v5  ;;  %v3749_v9 = vcombine.low %v489_v4, %v493_v5 }
  0x28   : > { %v621_v8 = vld [vmem:[%s4464_s23 + $0x5e0] sm:$0xff] }
  0x29   : > { %v481_v10 = vld [vmem:[%s4464_s23 + $0x180] sm:$0xff]  ;;  %v3878_v12 = vcombine.high %v617_v6, %v621_v8  ;;  %v3877_v13 = vcombine.low %v617_v6, %v621_v8  ;;  %1998 = vmatprep.subr.bf16.mxu0 %v3750_v7 }
  0x2a   : > { %v485_v11 = vld [vmem:[%s4464_s23 + $0x1a0] sm:$0xff]  ;;  %1999 = vmatpush1.bf16.msra.mxu0 %v3749_v9 }
  0x2b   : > { %v3742_v14 = vcombine.high %v481_v10, %v485_v11  ;;  %v609_v15 = vld [vmem:[%s4464_s23 + $0x580] sm:$0xff]  ;;  %2039 = vmatprep.subr.bf16.mxu1 %v3878_v12  ;;  %v3741_v22 = vcombine.low %v481_v10, %v485_v11 }
  0x2c   : > { %v613_v16 = vld [vmem:[%s4464_s23 + $0x5a0] sm:$0xff]  ;;  %2040 = vmatpush1.bf16.msra.mxu1 %v3877_v13 }
  0x2d   : > { %v473_v17 = vld [vmem:[%s4464_s23 + $0x140] sm:$0xff]  ;;  %v3870_v18 = vcombine.high %v609_v15, %v613_v16  ;;  %2000 = vmatprep.subr.bf16.mxu0 %v3742_v14  ;;  %v3869_v23 = vcombine.low %v609_v15, %v613_v16 }
  0x2e   : > { %v477_v19 = vld [vmem:[%s4464_s23 + $0x160] sm:$0xff]  ;;  %2001 = vmatpush1.bf16.msra.mxu0 %v3741_v22 }
  0x2f   : > { %v601_v20 = vld [vmem:[%s4464_s23 + $0x540] sm:$0xff]  ;;  %v3734_v24 = vcombine.high %v473_v17, %v477_v19  ;;  %2041 = vmatprep.subr.bf16.mxu1 %v3870_v18  ;;  %v3733_v30 = vcombine.low %v473_v17, %v477_v19 }
  0x30   : > { %v605_v21 = vld [vmem:[%s4464_s23 + $0x560] sm:$0xff]  ;;  %2042 = vmatpush1.bf16.msra.mxu1 %v3869_v23 }
  0x31   : > { %v3862_v25 = vcombine.high %v601_v20, %v605_v21  ;;  %v465_v26 = vld [vmem:[%s4464_s23 + $0x100] sm:$0xff]  ;;  %2002 = vmatprep.subr.bf16.mxu0 %v3734_v24  ;;  %v3861_v31 = vcombine.low %v601_v20, %v605_v21 }
  0x32   : > { %v469_v27 = vld [vmem:[%s4464_s23 + $0x120] sm:$0xff]  ;;  %2003 = vmatpush1.bf16.msra.mxu0 %v3733_v30 }
  0x33   : > { %v593_v28 = vld [vmem:[%s4464_s23 + $0x500] sm:$0xff]  ;;  %v3726_v32 = vcombine.high %v465_v26, %v469_v27  ;;  %2043 = vmatprep.subr.bf16.mxu1 %v3862_v25  ;;  %v3725_v38 = vcombine.low %v465_v26, %v469_v27 }
  0x34   : > { %v597_v29 = vld [vmem:[%s4464_s23 + $0x520] sm:$0xff]  ;;  %2044 = vmatpush1.bf16.msra.mxu1 %v3861_v31 }
  0x35   : > { %v3854_v33 = vcombine.high %v593_v28, %v597_v29  ;;  %v457_v34 = vld [vmem:[%s4464_s23 + $0xc0] sm:$0xff]  ;;  %2004 = vmatprep.subr.bf16.mxu0 %v3726_v32  ;;  %v3853_v39 = vcombine.low %v593_v28, %v597_v29 }
  0x36   : > { %v461_v35 = vld [vmem:[%s4464_s23 + $0xe0] sm:$0xff]  ;;  %2005 = vmatpush1.bf16.msra.mxu0 %v3725_v38 }
  0x37   : > { %v585_v36 = vld [vmem:[%s4464_s23 + $0x4c0] sm:$0xff]  ;;  %v3718_v40 = vcombine.high %v457_v34, %v461_v35  ;;  %2045 = vmatprep.subr.bf16.mxu1 %v3854_v33  ;;  %v3717_v46 = vcombine.low %v457_v34, %v461_v35 }
  0x38   : > { %v589_v37 = vld [vmem:[%s4464_s23 + $0x4e0] sm:$0xff]  ;;  %2046 = vmatpush1.bf16.msra.mxu1 %v3853_v39 }
  0x39   : > { %v3846_v41 = vcombine.high %v585_v36, %v589_v37  ;;  %v449_v42 = vld [vmem:[%s4464_s23 + $0x80] sm:$0xff]  ;;  %2006 = vmatprep.subr.bf16.mxu0 %v3718_v40  ;;  %v3845_v50 = vcombine.low %v585_v36, %v589_v37 }
  0x3a   : > { %v453_v43 = vld [vmem:[%s4464_s23 + $0xa0] sm:$0xff]  ;;  %2007 = vmatpush1.bf16.msra.mxu0 %v3717_v46 }
  0x3b   : > { %v577_v44 = vld [vmem:[%s4464_s23 + $0x480] sm:$0xff]  ;;  %v3710_v51 = vcombine.high %v449_v42, %v453_v43  ;;  %2047 = vmatprep.subr.bf16.mxu1 %v3846_v41  ;;  %v3709_v59 = vcombine.low %v449_v42, %v453_v43 }
  0x3c   : > { %v581_v45 = vld [vmem:[%s4464_s23 + $0x4a0] sm:$0xff]  ;;  %2048 = vmatpush1.bf16.msra.mxu1 %v3845_v50 }
  0x3d   : > { %v4493_v47 = vld [vmem:[%s4464_s23 + $0x40] sm:$0xff]  ;;  %v3838_v55 = vcombine.high %v577_v44, %v581_v45  ;;  %v3837_v60 = vcombine.low %v577_v44, %v581_v45  ;;  %2008 = vmatprep.subr.bf16.mxu0 %v3710_v51 }
  0x3e   : > { %v4496_v48 = vld [vmem:[%s4464_s23 + $0x60] sm:$0xff]  ;;  %2009 = vmatpush1.bf16.msra.mxu0 %v3709_v59 }
  0x3f   : > { %v4499_v49 = vld [vmem:[%s4464_s23 + $0x440] sm:$0xff]  ;;  %v3702_v61 = vcombine.high %v4493_v47, %v4496_v48  ;;  %v3701_v2 = vcombine.low %v4493_v47, %v4496_v48  ;;  %2049 = vmatprep.subr.bf16.mxu1 %v3838_v55 }
  0x40   : > { %v4502_v52 = vld [vmem:[%s4464_s23 + $0x460] sm:$0xff]  ;;  %2050 = vmatpush1.bf16.msra.mxu1 %v3837_v60 }
  0x41   : > { %v4505_v53 = vld [vmem:[%s4464_s23] sm:$0xff]  ;;  %v3830_v1 = vcombine.high %v4499_v49, %v4502_v52  ;;  %v3829_v3 = vcombine.low %v4499_v49, %v4502_v52  ;;  %2010 = vmatprep.subr.bf16.mxu0 %v3702_v61 }
  0x42   : > { %v4508_v54 = vld [vmem:[%s4464_s23 + $0x20] sm:$0xff]  ;;  %2011 = vmatpush1.bf16.msra.mxu0 %v3701_v2 }
  0x43   : > { %v4511_v56 = vld [vmem:[%s4464_s23 + $0x400] sm:$0xff]  ;;  %v3694_v4 = vcombine.high %v4505_v53, %v4508_v54  ;;  %v3693_v6 = vcombine.low %v4505_v53, %v4508_v54  ;;  %2051 = vmatprep.subr.bf16.mxu1 %v3830_v1 }
  0x44   : > { %v4514_v57 = vld [vmem:[%s4464_s23 + $0x420] sm:$0xff]  ;;  %2052 = vmatpush1.bf16.msra.mxu1 %v3829_v3 }
  0x45   : > { %v4517_v58 = vld [vmem:[%s4464_s23 + $0x3c0] sm:$0xff]  ;;  %v3822_v5 = vcombine.high %v4511_v56, %v4514_v57  ;;  %v3821_v7 = vcombine.low %v4511_v56, %v4514_v57  ;;  %2012 = vmatprep.subr.bf16.mxu0 %v3694_v4 }
  0x46   : > { %v4522_v62 = vld [vmem:[%s4464_s23 + $0x3e0] sm:$0xff]  ;;  %2013 = vmatpush1.bf16.msra.mxu0 %v3693_v6 }
  0x47   : > { %v4525_v63 = vld [vmem:[%s4464_s23 + $0x7c0] sm:$0xff]  ;;  %v3814_v10 = vcombine.high %v4517_v58, %v4522_v62  ;;  %v3813_v14 = vcombine.low %v4517_v58, %v4522_v62  ;;  %2053 = vmatprep.subr.bf16.mxu1 %v3822_v5 }
  0x48   : > { %v4528_v0 = vld [vmem:[%s4464_s23 + $0x7e0] sm:$0xff]  ;;  %2054 = vmatpush1.bf16.msra.mxu1 %v3821_v7 }
  0x49   : > { %v339_v8 = vld [vmem:[%s294_s24] sm:$0xff]  ;;  %v340_v9 = vld [vmem:[%s294_s24 + $0x8] sm:$0xff]  ;;  %v3942_v11 = vcombine.high %v4525_v63, %v4528_v0  ;;  %v3941_v15 = vcombine.low %v4525_v63, %v4528_v0  ;;  %2014 = vmatprep.subr.bf16.mxu0 %v3814_v10 }
  0x4a   : > { %v341_v12 = vunpack.c.l.bf16 %v339_v8  ;;  %v343_v13 = vunpack.c.l.bf16 %v340_v9  ;;  %v342_v16 = vunpack.c.h.bf16 %v339_v8  ;;  %v344_v17 = vunpack.c.h.bf16 %v340_v9  ;;  %v4563_v30 = vld [vmem:[%s4464_s23 + $0x380] sm:$0xff]  ;;  %2015 = vmatpush2.bf16.msra.mxu0 %v3813_v14 }
  0x4b   : > { %v4566_v31 = vld [vmem:[%s4464_s23 + $0x3a0] sm:$0xff]  ;;  %2055 = vmatprep.subr.bf16.mxu1 %v3942_v11 }
  0x4c   : > { %v349_v18 = vcombine.high %v341_v12, %v341_v12  ;;  %v351_v19 = vcombine.high %v343_v13, %v343_v13  ;;  %v358_v20 = vsel %vm357_vm0, %v341_v12, 0.0  ;;  %v386_v21 = vsel %vm357_vm0, %v343_v13, 0.0  ;;  %v673_v48 = vld [vmem:[%s4464_s23 + $0x780] sm:$0xff]  ;;  %2056 = vmatpush2.bf16.msra.mxu1 %v3941_v15 }
  0x4d   : > { %v350_v22 = vcombine.high %v342_v16, %v342_v16  ;;  %v352_v23 = vcombine.high %v344_v17, %v344_v17  ;;  %v359_v24 = vrot.slane %v358_v20, 4  ;;  %v387_v25 = vrot.slane %v386_v21, 4  ;;  %v677_v49 = vld [vmem:[%s4464_s23 + $0x7a0] sm:$0xff] }
  0x4e   : > { %v365_v26 = vsel %vm357_vm0, %v349_v18, 0.0  ;;  %v393_v27 = vsel %vm357_vm0, %v351_v19, 0.0  ;;  %v372_v28 = vsel %vm357_vm0, %v342_v16, 0.0  ;;  %v400_v29 = vsel %vm357_vm0, %v344_v17, 0.0  ;;  %v4577_v55 = vld [vmem:[%s4464_s23 + $0x340] sm:$0xff] }
  0x4f   : > { %v366_v32 = vrot.slane %v365_v26, 4  ;;  %v394_v33 = vrot.slane %v393_v27, 4  ;;  %v379_v34 = vsel %vm357_vm0, %v350_v22, 0.0  ;;  %v407_v35 = vsel %vm357_vm0, %v352_v23, 0.0  ;;  %v4580_v59 = vld [vmem:[%s4464_s23 + $0x360] sm:$0xff] }
  0x50   : > { %v380_v36 = vrot.slane %v379_v34, 4  ;;  %v408_v37 = vrot.slane %v407_v35, 4  ;;  %v360_v38 = vadd.f32 %v359_v24, %v358_v20  ;;  %v388_v39 = vadd.f32 %v387_v25, %v386_v21  ;;  %v665_v56 = vld [vmem:[%s4464_s23 + $0x740] sm:$0xff] }
  0x51   : > { %v367_v40 = vadd.f32 %v366_v32, %v365_v26  ;;  %v395_v41 = vadd.f32 %v394_v33, %v393_v27  ;;  %v373_v42 = vrot.slane %v372_v28, 4  ;;  %v401_v43 = vrot.slane %v400_v29, 4  ;;  %v669_v57 = vld [vmem:[%s4464_s23 + $0x760] sm:$0xff] }
  0x52   : > { %v3806_v44 = vcombine.high %v4563_v30, %v4566_v31  ;;  %v381_v45 = vadd.f32 %v380_v36, %v379_v34  ;;  %v409_v46 = vadd.f32 %v408_v37, %v407_v35  ;;  %v361_v47 = vrot.slane %v360_v38, 2  ;;  %v4596_v17 = vld [vmem:[%s4464_s23 + $0x300] sm:$0xff] }
  0x53   : > { %v368_v50 = vrot.slane %v367_v40, 2  ;;  %v396_v51 = vrot.slane %v395_v41, 2  ;;  %v374_v52 = vadd.f32 %v373_v42, %v372_v28  ;;  %v402_v53 = vadd.f32 %v401_v43, %v400_v29  ;;  %v4599_v18 = vld [vmem:[%s4464_s23 + $0x320] sm:$0xff] }
  0x54   : > { %v3805_v54 = vcombine.low %v4563_v30, %v4566_v31  ;;  %v382_v60 = vrot.slane %v381_v45, 2  ;;  %v410_v61 = vrot.slane %v409_v46, 2  ;;  %v389_v1 = vrot.slane %v388_v39, 2  ;;  %2016 = vmatprep.subr.bf16.mxu0 %v3806_v44  ;;  %v657_v63 = vld [vmem:[%s4464_s23 + $0x700] sm:$0xff] }
  0x55   : > { %v369_v2 = vadd.f32 %v368_v50, %v367_v40  ;;  %v397_v3 = vadd.f32 %v396_v51, %v395_v41  ;;  %v375_v4 = vrot.slane %v374_v52, 2  ;;  %v403_v5 = vrot.slane %v402_v53, 2  ;;  %v661_v0 = vld [vmem:[%s4464_s23 + $0x720] sm:$0xff] }
  0x56   : > { %v3934_v6 = vcombine.high %v673_v48, %v677_v49  ;;  %v3933_v8 = vcombine.low %v673_v48, %v677_v49  ;;  %v383_v9 = vadd.f32 %v382_v60, %v381_v45  ;;  %v411_v12 = vadd.f32 %v410_v61, %v409_v46  ;;  %2017 = vmatpush2.bf16.msra.mxu0 %v3805_v54  ;;  %v521_v29 = vld [vmem:[%s4464_s23 + $0x2c0] sm:$0xff] }
  0x57   : > { %v3798_v13 = vcombine.high %v4577_v55, %v4580_v59  ;;  %v370_v7 = vrot.slane %v369_v2, 1  ;;  %v398_v10 = vrot.slane %v397_v3, 1  ;;  %v362_v16 = vadd.f32 %v361_v47, %v360_v38  ;;  %v525_v30 = vld [vmem:[%s4464_s23 + $0x2e0] sm:$0xff] }
  0x58   : > { %v384_v11 = vrot.slane %v383_v9, 1  ;;  %v412_v19 = vrot.slane %v411_v12, 1  ;;  %v390_v20 = vadd.f32 %v389_v1, %v388_v39  ;;  %v376_v21 = vadd.f32 %v375_v4, %v374_v52  ;;  %2057 = vmatprep.subr.bf16.mxu1 %v3934_v6  ;;  %v649_v45 = vld [vmem:[%s4464_s23 + $0x6c0] sm:$0xff] }
  0x59   : > { %v371_v22 = vadd.f32 %v370_v7, %v369_v2  ;;  %v399_v23 = vadd.f32 %v398_v10, %v397_v3  ;;  %v404_v58 = vadd.f32 %v403_v5, %v402_v53  ;;  %v3926_v62 = vcombine.high %v665_v56, %v669_v57  ;;  %2058 = vmatpush2.bf16.msra.mxu1 %v3933_v8  ;;  %v653_v46 = vld [vmem:[%s4464_s23 + $0x6e0] sm:$0xff] }
  0x5a   : > { %v3797_v14 = vcombine.low %v4577_v55, %v4580_v59  ;;  %v385_v24 = vadd.f32 %v384_v11, %v383_v9  ;;  %v413_v25 = vadd.f32 %v412_v19, %v411_v12  ;;  %v3925_v26 = vcombine.low %v665_v56, %v669_v57  ;;  %2018 = vmatprep.subr.bf16.mxu0 %v3798_v13  ;;  %v513_v60 = vld [vmem:[%s4464_s23 + $0x280] sm:$0xff] }
  0x5b   : > { %v3790_v27 = vcombine.high %v4596_v17, %v4599_v18  ;;  %v416_v15 = vmul.f32 0.25, %v371_v22  ;;  %v420_v28 = vmul.f32 0.25, %v399_v23  ;;  %v363_v33 = vrot.slane %v362_v16, 1  ;;  %2059 = vmatprep.subr.bf16.mxu1 %v3926_v62  ;;  %v517_v61 = vld [vmem:[%s4464_s23 + $0x2a0] sm:$0xff] }
  0x5c   : > { %v418_v31 = vmul.f32 0.25, %v385_v24  ;;  %v422_v32 = vmul.f32 0.25, %v413_v25  ;;  %v391_v34 = vrot.slane %v390_v20, 1  ;;  %v377_v37 = vrot.slane %v376_v21, 1  ;;  %2019 = vmatpush2.bf16.msra.mxu0 %v3797_v14  ;;  %v641_v3 = vld [vmem:[%s4464_s23 + $0x680] sm:$0xff] }
  0x5d   : > { %v426_v35 = vpack.c.bf16 %v416_v15, %v416_v15  ;;  %v430_v36 = vpack.c.bf16 %v420_v28, %v420_v28  ;;  %v405_v38 = vrot.slane %v404_v58, 1  ;;  %v3918_v39 = vcombine.high %v657_v63, %v661_v0  ;;  %2060 = vmatpush2.bf16.msra.mxu1 %v3925_v26  ;;  %2020 = vmatprep.subr.bf16.mxu0 %v3790_v27  ;;  %v645_v4 = vld [vmem:[%s4464_s23 + $0x6a0] sm:$0xff] }
  0x5e   : > { %v3789_v40 = vcombine.low %v4596_v17, %v4599_v18  ;;  %v428_v41 = vpack.c.bf16 %v418_v31, %v418_v31  ;;  %v432_v42 = vpack.c.bf16 %v422_v32, %v422_v32  ;;  %v3917_v43 = vcombine.low %v657_v63, %v661_v0  ;;  %v505_v10 = vld [vmem:[%s4464_s23 + $0x240] sm:$0xff]  ;;  %v490_v32 = vld [vmem:[%s4464_s23 + $0x1c8] sm:$0xff] }
  0x5f   : > { %v3782_v44 = vcombine.high %v521_v29, %v525_v30  ;;  %v698_v47 = vunpack.c.l.b16 %v426_v35  ;;  %v702_v48 = vunpack.c.l.b16 %v430_v36  ;;  %v364_v51 = vadd.f32 %v363_v33, %v362_v16  ;;  %2061 = vmatprep.subr.bf16.mxu1 %v3918_v39  ;;  %v509_v16 = vld [vmem:[%s4464_s23 + $0x260] sm:$0xff]  ;;  %v494_v33 = vld [vmem:[%s4464_s23 + $0x1e8] sm:$0xff] }
  0x60   : > { %v700_v49 = vunpack.c.l.b16 %v428_v41  ;;  %v704_v50 = vunpack.c.l.b16 %v432_v42  ;;  %v392_v52 = vadd.f32 %v391_v34, %v390_v20  ;;  %v378_v54 = vadd.f32 %v377_v37, %v376_v21  ;;  %2021 = vmatpush2.bf16.msra.mxu0 %v3789_v40  ;;  %v633_v17 = vld [vmem:[%s4464_s23 + $0x640] sm:$0xff]  ;;  %v618_v34 = vld [vmem:[%s4464_s23 + $0x5c8] sm:$0xff] }
  0x61   : > { %v707_v53 = vsel %vm705_vm1, %v702_v48, %v698_v47  ;;  %v406_v55 = vadd.f32 %v405_v38, %v404_v58  ;;  %v3910_v59 = vcombine.high %v649_v45, %v653_v46  ;;  %v3781_v6 = vcombine.low %v521_v29, %v525_v30  ;;  %2062 = vmatpush2.bf16.msra.mxu1 %v3917_v43  ;;  %v637_v18 = vld [vmem:[%s4464_s23 + $0x660] sm:$0xff]  ;;  %v622_v35 = vld [vmem:[%s4464_s23 + $0x5e8] sm:$0xff] }
  0x62   : > { %v4619_v1 = vpack.c.b16 %v707_v53, %v707_v53  ;;  %v709_v2 = vsel %vm705_vm1, %v704_v50, %v700_v49  ;;  %v415_v8 = vmul.f32 0.25, %v364_v51  ;;  %v419_v9 = vmul.f32 0.25, %v392_v52  ;;  %2022 = vmatprep.subr.bf16.mxu0 %v3782_v44  ;;  %v497_v14 = vld [vmem:[%s4464_s23 + $0x200] sm:$0xff]  ;;  %v482_v42 = vld [vmem:[%s4464_s23 + $0x188] sm:$0xff] }
  0x63   : > { %v4624_v5 = vpack.c.b16 %v709_v2, %v709_v2  ;;  %v3909_v12 = vcombine.low %v649_v45, %v653_v46  ;;  %v3774_v13 = vcombine.high %v513_v60, %v517_v61  ;;  %v417_v56 = vmul.f32 0.25, %v378_v54  ;;  %2063 = vmatprep.subr.bf16.mxu1 %v3910_v59  ;;  %v501_v24 = vld [vmem:[%s4464_s23 + $0x220] sm:$0xff]  ;;  %v486_v43 = vld [vmem:[%s4464_s23 + $0x1a8] sm:$0xff] }
  0x64   : > { %2030 = vmatprep.mubr.bf16.mxu0 %v4619_v1  ;;  %v421_v57 = vmul.f32 0.25, %v406_v55  ;;  %v3902_v7 = vcombine.high %v641_v3, %v645_v4  ;;  %2023 = vmatpush2.bf16.msra.mxu0 %v3781_v6  ;;  %v3773_v11 = vcombine.low %v513_v60, %v517_v61  ;;  %v3901_v19 = vcombine.low %v641_v3, %v645_v4  ;;  %v625_v25 = vld [vmem:[%s4464_s23 + $0x600] sm:$0xff]  ;;  %v610_v45 = vld [vmem:[%s4464_s23 + $0x588] sm:$0xff] }
  0x65   : > { %2071 = vmatprep.mubr.bf16.mxu1 %v4624_v5  ;;  %v425_v20 = vpack.c.bf16 %v415_v8, %v415_v8  ;;  %v429_v21 = vpack.c.bf16 %v419_v9, %v419_v9  ;;  %2064 = vmatpush2.bf16.msra.mxu1 %v3909_v12  ;;  %v3766_v22 = vcombine.high %v505_v10, %v509_v16  ;;  %v629_v26 = vld [vmem:[%s4464_s23 + $0x620] sm:$0xff]  ;;  %v614_v46 = vld [vmem:[%s4464_s23 + $0x5a8] sm:$0xff] }
  0x66   : > { %2024 = vmatprep.subr.bf16.mxu0 %v3774_v13  ;;  %v427_v23 = vpack.c.bf16 %v417_v56, %v417_v56  ;;  %v431_v58 = vpack.c.bf16 %v421_v57, %v421_v57  ;;  %2065 = vmatprep.subr.bf16.mxu1 %v3902_v7  ;;  %v3894_v62 = vcombine.high %v633_v17, %v637_v18  ;;  %v474_v52 = vld [vmem:[%s4464_s23 + $0x148] sm:$0xff] }
  0x67   : > { %v3765_v27 = vcombine.low %v505_v10, %v509_v16  ;;  %v697_v63 = vunpack.c.l.b16 %v425_v20  ;;  %v701_v0 = vunpack.c.l.b16 %v429_v21  ;;  %v3893_v15 = vcombine.low %v633_v17, %v637_v18  ;;  %v478_v53 = vld [vmem:[%s4464_s23 + $0x168] sm:$0xff] }
  0x68   : > { %2025 = vmatpush2.bf16.msra.mxu0 %v3773_v11  ;;  %v3758_v28 = vcombine.high %v497_v14, %v501_v24  ;;  %v699_v29 = vunpack.c.l.b16 %v427_v23  ;;  %v703_v30 = vunpack.c.l.b16 %v431_v58  ;;  %v3886_v31 = vcombine.high %v625_v25, %v629_v26  ;;  %v602_v54 = vld [vmem:[%s4464_s23 + $0x548] sm:$0xff] }
  0x69   : > { %2066 = vmatpush2.bf16.msra.mxu1 %v3901_v19  ;;  %2026 = vmatprep.subr.bf16.mxu0 %v3766_v22  ;;  %v3757_v36 = vcombine.low %v497_v14, %v501_v24  ;;  %v706_v37 = vsel %vm705_vm1, %v701_v0, %v697_v63  ;;  %v3885_v38 = vcombine.low %v625_v25, %v629_v26  ;;  %v606_v55 = vld [vmem:[%s4464_s23 + $0x568] sm:$0xff] }
  0x6a   : > { %2067 = vmatprep.subr.bf16.mxu1 %v3894_v62  ;;  %v708_v39 = vsel %vm705_vm1, %v703_v30, %v699_v29  ;;  %v3752_v40 = vcombine.high %v490_v32, %v494_v33  ;;  %v3880_v41 = vcombine.high %v618_v34, %v622_v35  ;;  %v4644_v44 = vpack.c.b16 %v706_v37, %v706_v37  ;;  %v466_v3 = vld [vmem:[%s4464_s23 + $0x108] sm:$0xff] }
  0x6b   : > { %v4648_v47 = vpack.c.b16 %v708_v39, %v708_v39  ;;  %v3751_v48 = vcombine.low %v490_v32, %v494_v33  ;;  %v3879_v49 = vcombine.low %v618_v34, %v622_v35  ;;  %v3744_v50 = vcombine.high %v482_v42, %v486_v43  ;;  %v470_v4 = vld [vmem:[%s4464_s23 + $0x128] sm:$0xff] }
  0x6c   : > { %2027 = vmatpush2.bf16.msra.mxu0 %v3765_v27  ;;  %v3872_v51 = vcombine.high %v610_v45, %v614_v46  ;;  %v3743_v59 = vcombine.low %v482_v42, %v486_v43  ;;  %v3871_v60 = vcombine.low %v610_v45, %v614_v46  ;;  %v3736_v61 = vcombine.high %v474_v52, %v478_v53  ;;  %v594_v6 = vld [vmem:[%s4464_s23 + $0x508] sm:$0xff] }
  0x6d   : > { %2068 = vmatpush2.bf16.msra.mxu1 %v3893_v15  ;;  %2028 = vmatprep.subr.bf16.mxu0 %v3758_v28  ;;  %v3864_v2 = vcombine.high %v602_v54, %v606_v55  ;;  %v598_v8 = vld [vmem:[%s4464_s23 + $0x528] sm:$0xff]  ;;  %v3735_v9 = vcombine.low %v474_v52, %v478_v53  ;;  %v3863_v12 = vcombine.low %v602_v54, %v606_v55 }
  0x6e   : > { %2069 = vmatprep.subr.bf16.mxu1 %v3886_v31  ;;  %v3728_v13 = vcombine.high %v466_v3, %v470_v4  ;;  %v3856_v56 = vcombine.high %v594_v6, %v598_v8  ;;  %v458_v57 = vld [vmem:[%s4464_s23 + $0xc8] sm:$0xff]  ;;  %v3727_v17 = vcombine.low %v466_v3, %v470_v4  ;;  %v3855_v18 = vcombine.low %v594_v6, %v598_v8 }
  0x6f   : > { %v462_v7 = vld [vmem:[%s4464_s23 + $0xe8] sm:$0xff] }
  0x70   : > { %2029 = vmatpush2.bf16.msra.mxu0 %v3757_v36  ;;  %v586_v10 = vld [vmem:[%s4464_s23 + $0x4c8] sm:$0xff]  ;;  %v3720_v11 = vcombine.high %v458_v57, %v462_v7  ;;  %v3719_v58 = vcombine.low %v458_v57, %v462_v7 }
  0x71   : > { %2070 = vmatpush2.bf16.msra.mxu1 %v3885_v38  ;;  %2080 = vmatprep.subr.bf16.mxu0 %v3752_v40  ;;  %v590_v16 = vld [vmem:[%s4464_s23 + $0x4e8] sm:$0xff] }
  0x72   : > { %2121 = vmatprep.subr.bf16.mxu1 %v3880_v41  ;;  %v3848_v19 = vcombine.high %v586_v10, %v590_v16  ;;  %v450_v20 = vld [vmem:[%s4464_s23 + $0x88] sm:$0xff]  ;;  %v3847_v62 = vcombine.low %v586_v10, %v590_v16 }
  0x73   : > { %2031 = vmatmul.mubr.bf16.vlgmr.msra.gmra.mxu0 %v4644_v44  ;;  %v454_v21 = vld [vmem:[%s4464_s23 + $0xa8] sm:$0xff] }
  0x74   : > { %2072 = vmatmul.mubr.bf16.vlgmr.msra.gmra.mxu1 %v4648_v47  ;;  %2081 = vmatpush1.bf16.msra.mxu0 %v3751_v48  ;;  %v578_v22 = vld [vmem:[%s4464_s23 + $0x488] sm:$0xff]  ;;  %v3712_v14 = vcombine.high %v450_v20, %v454_v21  ;;  %v3711_v0 = vcombine.low %v450_v20, %v454_v21 }
  0x75   : > { %2122 = vmatpush1.bf16.msra.mxu1 %v3879_v49  ;;  %2082 = vmatprep.subr.bf16.mxu0 %v3744_v50  ;;  %v582_v23 = vld [vmem:[%s4464_s23 + $0x4a8] sm:$0xff] }
  0x76   : > { %2123 = vmatprep.subr.bf16.mxu1 %v3872_v51  ;;  %2112 = vmatprep.mubr.bf16.mxu0 %v4619_v1  ;;  %v3840_v24 = vcombine.high %v578_v22, %v582_v23  ;;  %v442_v25 = vld [vmem:[%s4464_s23 + $0x48] sm:$0xff]  ;;  %v3839_v15 = vcombine.low %v578_v22, %v582_v23 }
  0x77   : > { %2153 = vmatprep.mubr.bf16.mxu1 %v4624_v5  ;;  %v446_v26 = vld [vmem:[%s4464_s23 + $0x68] sm:$0xff] }
  0x78   : > { %2083 = vmatpush1.bf16.msra.mxu0 %v3743_v59  ;;  %v570_v27 = vld [vmem:[%s4464_s23 + $0x448] sm:$0xff]  ;;  %v3704_v28 = vcombine.high %v442_v25, %v446_v26  ;;  %v3703_v34 = vcombine.low %v442_v25, %v446_v26 }
  0x79   : > { %2124 = vmatpush1.bf16.msra.mxu1 %v3871_v60  ;;  %2084 = vmatprep.subr.bf16.mxu0 %v3736_v61  ;;  %v574_v63 = vld [vmem:[%s4464_s23 + $0x468] sm:$0xff] }
  0x7a   : > { %2125 = vmatprep.subr.bf16.mxu1 %v3864_v2  ;;  %v3832_v29 = vcombine.high %v570_v27, %v574_v63  ;;  %v434_v30 = vld [vmem:[%s4464_s23 + $0x8] sm:$0xff]  ;;  %v3831_v35 = vcombine.low %v570_v27, %v574_v63 }
  0x7b   : > { %v438_v31 = vld [vmem:[%s4464_s23 + $0x28] sm:$0xff] }
  0x7c   : > { %2085 = vmatpush1.bf16.msra.mxu0 %v3735_v9  ;;  %v562_v32 = vld [vmem:[%s4464_s23 + $0x408] sm:$0xff]  ;;  %v3696_v36 = vcombine.high %v434_v30, %v438_v31  ;;  %v3695_v42 = vcombine.low %v434_v30, %v438_v31 }
  0x7d   : > { %2126 = vmatpush1.bf16.msra.mxu1 %v3863_v12  ;;  %2086 = vmatprep.subr.bf16.mxu0 %v3728_v13  ;;  %v566_v33 = vld [vmem:[%s4464_s23 + $0x428] sm:$0xff] }
  0x7e   : > { %2127 = vmatprep.subr.bf16.mxu1 %v3856_v56  ;;  %v3824_v37 = vcombine.high %v562_v32, %v566_v33  ;;  %v554_v38 = vld [vmem:[%s4464_s23 + $0x3c8] sm:$0xff]  ;;  %v3823_v43 = vcombine.low %v562_v32, %v566_v33 }
  0x7f   : > { %v558_v39 = vld [vmem:[%s4464_s23 + $0x3e8] sm:$0xff] }
  0x80   : > { %2087 = vmatpush1.bf16.msra.mxu0 %v3727_v17  ;;  %v682_v40 = vld [vmem:[%s4464_s23 + $0x7c8] sm:$0xff]  ;;  %v3816_v45 = vcombine.high %v554_v38, %v558_v39  ;;  %v3815_v52 = vcombine.low %v554_v38, %v558_v39 }
  0x81   : > { %2128 = vmatpush1.bf16.msra.mxu1 %v3855_v18  ;;  %2088 = vmatprep.subr.bf16.mxu0 %v3720_v11  ;;  %v686_v41 = vld [vmem:[%s4464_s23 + $0x7e8] sm:$0xff] }
  0x82   : > { %2129 = vmatprep.subr.bf16.mxu1 %v3848_v19  ;;  %v3944_v46 = vcombine.high %v682_v40, %v686_v41  ;;  %v546_v48 = vld [vmem:[%s4464_s23 + $0x388] sm:$0xff]  ;;  %v3943_v53 = vcombine.low %v682_v40, %v686_v41 }
  0x83   : > { %v550_v49 = vld [vmem:[%s4464_s23 + $0x3a8] sm:$0xff] }
  0x84   : > { %2089 = vmatpush1.bf16.msra.mxu0 %v3719_v58  ;;  %v674_v50 = vld [vmem:[%s4464_s23 + $0x788] sm:$0xff]  ;;  %v3808_v54 = vcombine.high %v546_v48, %v550_v49  ;;  %v3807_v3 = vcombine.low %v546_v48, %v550_v49 }
  0x85   : > { %2130 = vmatpush1.bf16.msra.mxu1 %v3847_v62  ;;  %2090 = vmatprep.subr.bf16.mxu0 %v3712_v14  ;;  %v678_v51 = vld [vmem:[%s4464_s23 + $0x7a8] sm:$0xff] }
  0x86   : > { %2131 = vmatprep.subr.bf16.mxu1 %v3840_v24  ;;  %v3936_v55 = vcombine.high %v674_v50, %v678_v51  ;;  %v538_v59 = vld [vmem:[%s4464_s23 + $0x348] sm:$0xff]  ;;  %v3935_v4 = vcombine.low %v674_v50, %v678_v51 }
  0x87   : > { %v542_v60 = vld [vmem:[%s4464_s23 + $0x368] sm:$0xff] }
  0x88   : > { %2091 = vmatpush1.bf16.msra.mxu0 %v3711_v0  ;;  %v666_v61 = vld [vmem:[%s4464_s23 + $0x748] sm:$0xff]  ;;  %v3800_v6 = vcombine.high %v538_v59, %v542_v60  ;;  %v3799_v57 = vcombine.low %v538_v59, %v542_v60 }
  0x89   : > { %2132 = vmatpush1.bf16.msra.mxu1 %v3839_v15  ;;  %2092 = vmatprep.subr.bf16.mxu0 %v3704_v28  ;;  %v670_v2 = vld [vmem:[%s4464_s23 + $0x768] sm:$0xff] }
  0x8a   : > { %2133 = vmatprep.subr.bf16.mxu1 %v3832_v29  ;;  %v3928_v8 = vcombine.high %v666_v61, %v670_v2  ;;  %v530_v9 = vld [vmem:[%s4464_s23 + $0x308] sm:$0xff]  ;;  %v3927_v7 = vcombine.low %v666_v61, %v670_v2 }
  0x8b   : > { %v534_v12 = vld [vmem:[%s4464_s23 + $0x328] sm:$0xff] }
  0x8c   : > { %2093 = vmatpush1.bf16.msra.mxu0 %v3703_v34  ;;  %v658_v13 = vld [vmem:[%s4464_s23 + $0x708] sm:$0xff]  ;;  %v3792_v10 = vcombine.high %v530_v9, %v534_v12  ;;  %v3791_v20 = vcombine.low %v530_v9, %v534_v12 }
  0x8d   : > { %2134 = vmatpush1.bf16.msra.mxu1 %v3831_v35  ;;  %2094 = vmatprep.subr.bf16.mxu0 %v3696_v36  ;;  %v662_v56 = vld [vmem:[%s4464_s23 + $0x728] sm:$0xff] }
  0x8e   : > { %2135 = vmatprep.subr.bf16.mxu1 %v3824_v37  ;;  %v3920_v16 = vcombine.high %v658_v13, %v662_v56  ;;  %v522_v17 = vld [vmem:[%s4464_s23 + $0x2c8] sm:$0xff]  ;;  %v3919_v21 = vcombine.low %v658_v13, %v662_v56 }
  0x8f   : > { %v526_v18 = vld [vmem:[%s4464_s23 + $0x2e8] sm:$0xff] }
  0x90   : > { %2095 = vmatpush1.bf16.msra.mxu0 %v3695_v42  ;;  %v650_v11 = vld [vmem:[%s4464_s23 + $0x6c8] sm:$0xff]  ;;  %v3784_v22 = vcombine.high %v522_v17, %v526_v18  ;;  %v3783_v25 = vcombine.low %v522_v17, %v526_v18  ;;  %v491_v42 = vld [vmem:[%s4464_s23 + $0x1d0] sm:$0xff] }
  0x91   : > { %2136 = vmatpush1.bf16.msra.mxu1 %v3823_v43  ;;  %2096 = vmatprep.subr.bf16.mxu0 %v3816_v45  ;;  %v654_v19 = vld [vmem:[%s4464_s23 + $0x6e8] sm:$0xff]  ;;  %v495_v43 = vld [vmem:[%s4464_s23 + $0x1f0] sm:$0xff] }
  0x92   : > { %2137 = vmatprep.subr.bf16.mxu1 %v3944_v46  ;;  %v3912_v23 = vcombine.high %v650_v11, %v654_v19  ;;  %v514_v58 = vld [vmem:[%s4464_s23 + $0x288] sm:$0xff]  ;;  %v3911_v26 = vcombine.low %v650_v11, %v654_v19  ;;  %v619_v45 = vld [vmem:[%s4464_s23 + $0x5d0] sm:$0xff]  ;;  %v3754_v50 = vcombine.high %v491_v42, %v495_v43  ;;  %v3753_v59 = vcombine.low %v491_v42, %v495_v43 }
  0x93   : > { %v518_v62 = vld [vmem:[%s4464_s23 + $0x2a8] sm:$0xff]  ;;  %v623_v46 = vld [vmem:[%s4464_s23 + $0x5f0] sm:$0xff] }
  0x94   : > { %2097 = vmatpush2.bf16.msra.mxu0 %v3815_v52  ;;  %v642_v14 = vld [vmem:[%s4464_s23 + $0x688] sm:$0xff]  ;;  %v3776_v27 = vcombine.high %v514_v58, %v518_v62  ;;  %v3775_v30 = vcombine.low %v514_v58, %v518_v62  ;;  %v3882_v51 = vcombine.high %v619_v45, %v623_v46  ;;  %v483_v52 = vld [vmem:[%s4464_s23 + $0x190] sm:$0xff]  ;;  %v3881_v60 = vcombine.low %v619_v45, %v623_v46 }
  0x95   : > { %2138 = vmatpush2.bf16.msra.mxu1 %v3943_v53  ;;  %2098 = vmatprep.subr.bf16.mxu0 %v3808_v54  ;;  %v646_v24 = vld [vmem:[%s4464_s23 + $0x6a8] sm:$0xff]  ;;  %v487_v53 = vld [vmem:[%s4464_s23 + $0x1b0] sm:$0xff] }
  0x96   : > { %2139 = vmatprep.subr.bf16.mxu1 %v3936_v55  ;;  %v3904_v63 = vcombine.high %v642_v14, %v646_v24  ;;  %v506_v0 = vld [vmem:[%s4464_s23 + $0x248] sm:$0xff]  ;;  %v3903_v31 = vcombine.low %v642_v14, %v646_v24  ;;  %v611_v54 = vld [vmem:[%s4464_s23 + $0x590] sm:$0xff]  ;;  %v3746_v61 = vcombine.high %v483_v52, %v487_v53  ;;  %v3745_v9 = vcombine.low %v483_v52, %v487_v53 }
  0x97   : > { %v510_v15 = vld [vmem:[%s4464_s23 + $0x268] sm:$0xff]  ;;  %v615_v55 = vld [vmem:[%s4464_s23 + $0x5b0] sm:$0xff] }
  0x98   : > { %2099 = vmatpush2.bf16.msra.mxu0 %v3807_v3  ;;  %v634_v28 = vld [vmem:[%s4464_s23 + $0x648] sm:$0xff]  ;;  %v3768_v32 = vcombine.high %v506_v0, %v510_v15  ;;  %v3767_v38 = vcombine.low %v506_v0, %v510_v15  ;;  %v3874_v2 = vcombine.high %v611_v54, %v615_v55  ;;  %v475_v3 = vld [vmem:[%s4464_s23 + $0x150] sm:$0xff]  ;;  %v3873_v12 = vcombine.low %v611_v54, %v615_v55 }
  0x99   : > { %2140 = vmatpush2.bf16.msra.mxu1 %v3935_v4  ;;  %2100 = vmatprep.subr.bf16.mxu0 %v3800_v6  ;;  %v638_v29 = vld [vmem:[%s4464_s23 + $0x668] sm:$0xff]  ;;  %v479_v4 = vld [vmem:[%s4464_s23 + $0x170] sm:$0xff] }
  0x9a   : > { %2141 = vmatprep.subr.bf16.mxu1 %v3928_v8  ;;  %v3896_v33 = vcombine.high %v634_v28, %v638_v29  ;;  %v498_v34 = vld [vmem:[%s4464_s23 + $0x208] sm:$0xff]  ;;  %v3895_v39 = vcombine.low %v634_v28, %v638_v29  ;;  %v603_v6 = vld [vmem:[%s4464_s23 + $0x550] sm:$0xff]  ;;  %v3738_v13 = vcombine.high %v475_v3, %v479_v4  ;;  %v3737_v17 = vcombine.low %v475_v3, %v479_v4 }
  0x9b   : > { %v502_v35 = vld [vmem:[%s4464_s23 + $0x228] sm:$0xff]  ;;  %v607_v8 = vld [vmem:[%s4464_s23 + $0x570] sm:$0xff] }
  0x9c   : > { %2101 = vmatpush2.bf16.msra.mxu0 %v3799_v57  ;;  %v626_v36 = vld [vmem:[%s4464_s23 + $0x608] sm:$0xff]  ;;  %v3760_v40 = vcombine.high %v498_v34, %v502_v35  ;;  %v3759_v48 = vcombine.low %v498_v34, %v502_v35  ;;  %v3866_v56 = vcombine.high %v603_v6, %v607_v8  ;;  %v467_v57 = vld [vmem:[%s4464_s23 + $0x110] sm:$0xff]  ;;  %v3865_v18 = vcombine.low %v603_v6, %v607_v8 }
  0x9d   : > { %2142 = vmatpush2.bf16.msra.mxu1 %v3927_v7  ;;  %2102 = vmatprep.subr.bf16.mxu0 %v3792_v10  ;;  %v630_v37 = vld [vmem:[%s4464_s23 + $0x628] sm:$0xff]  ;;  %v471_v7 = vld [vmem:[%s4464_s23 + $0x130] sm:$0xff] }
  0x9e   : > { %2143 = vmatprep.subr.bf16.mxu1 %v3920_v16  ;;  %v3888_v41 = vcombine.high %v626_v36, %v630_v37  ;;  %v3887_v49 = vcombine.low %v626_v36, %v630_v37  ;;  %v595_v10 = vld [vmem:[%s4464_s23 + $0x510] sm:$0xff]  ;;  %v3730_v11 = vcombine.high %v467_v57, %v471_v7  ;;  %v3729_v58 = vcombine.low %v467_v57, %v471_v7 }
  0x9f   : > { %v599_v16 = vld [vmem:[%s4464_s23 + $0x530] sm:$0xff] }
  0xa0   : > { %2103 = vmatpush2.bf16.msra.mxu0 %v3791_v20  ;;  %v3858_v19 = vcombine.high %v595_v10, %v599_v16  ;;  %v459_v20 = vld [vmem:[%s4464_s23 + $0xd0] sm:$0xff]  ;;  %v3857_v62 = vcombine.low %v595_v10, %v599_v16 }
  0xa1   : > { %2144 = vmatpush2.bf16.msra.mxu1 %v3919_v21  ;;  %2104 = vmatprep.subr.bf16.mxu0 %v3784_v22  ;;  %v463_v21 = vld [vmem:[%s4464_s23 + $0xf0] sm:$0xff] }
  0xa2   : > { %2145 = vmatprep.subr.bf16.mxu1 %v3912_v23  ;;  %v587_v22 = vld [vmem:[%s4464_s23 + $0x4d0] sm:$0xff]  ;;  %v3722_v14 = vcombine.high %v459_v20, %v463_v21  ;;  %v3721_v0 = vcombine.low %v459_v20, %v463_v21 }
  0xa3   : > { %v591_v23 = vld [vmem:[%s4464_s23 + $0x4f0] sm:$0xff] }
  0xa4   : > { %2105 = vmatpush2.bf16.msra.mxu0 %v3783_v25  ;;  %v3850_v24 = vcombine.high %v587_v22, %v591_v23  ;;  %v451_v25 = vld [vmem:[%s4464_s23 + $0x90] sm:$0xff]  ;;  %v3849_v15 = vcombine.low %v587_v22, %v591_v23 }
  0xa5   : > { %2146 = vmatpush2.bf16.msra.mxu1 %v3911_v26  ;;  %2106 = vmatprep.subr.bf16.mxu0 %v3776_v27  ;;  %v455_v26 = vld [vmem:[%s4464_s23 + $0xb0] sm:$0xff] }
  0xa6   : > { %2147 = vmatprep.subr.bf16.mxu1 %v3904_v63  ;;  %v579_v27 = vld [vmem:[%s4464_s23 + $0x490] sm:$0xff]  ;;  %v3714_v28 = vcombine.high %v451_v25, %v455_v26  ;;  %v3713_v34 = vcombine.low %v451_v25, %v455_v26 }
  0xa7   : > { %v583_v63 = vld [vmem:[%s4464_s23 + $0x4b0] sm:$0xff] }
  0xa8   : > { %2107 = vmatpush2.bf16.msra.mxu0 %v3775_v30  ;;  %v3842_v29 = vcombine.high %v579_v27, %v583_v63  ;;  %v443_v30 = vld [vmem:[%s4464_s23 + $0x50] sm:$0xff]  ;;  %v3841_v35 = vcombine.low %v579_v27, %v583_v63 }
  0xa9   : > { %2148 = vmatpush2.bf16.msra.mxu1 %v3903_v31  ;;  %2108 = vmatprep.subr.bf16.mxu0 %v3768_v32  ;;  %v447_v31 = vld [vmem:[%s4464_s23 + $0x70] sm:$0xff] }
  0xaa   : > { %2149 = vmatprep.subr.bf16.mxu1 %v3896_v33  ;;  %v571_v32 = vld [vmem:[%s4464_s23 + $0x450] sm:$0xff]  ;;  %v3706_v36 = vcombine.high %v443_v30, %v447_v31  ;;  %v3705_v42 = vcombine.low %v443_v30, %v447_v31 }
  0xab   : > { %v575_v33 = vld [vmem:[%s4464_s23 + $0x470] sm:$0xff] }
  0xac   : > { %2109 = vmatpush2.bf16.msra.mxu0 %v3767_v38  ;;  %v3834_v37 = vcombine.high %v571_v32, %v575_v33  ;;  %v435_v38 = vld [vmem:[%s4464_s23 + $0x10] sm:$0xff]  ;;  %v3833_v43 = vcombine.low %v571_v32, %v575_v33 }
  0xad   : > { %2150 = vmatpush2.bf16.msra.mxu1 %v3895_v39  ;;  %2110 = vmatprep.subr.bf16.mxu0 %v3760_v40  ;;  %v439_v39 = vld [vmem:[%s4464_s23 + $0x30] sm:$0xff] }
  0xae   : > { %2151 = vmatprep.subr.bf16.mxu1 %v3888_v41  ;;  %v563_v40 = vld [vmem:[%s4464_s23 + $0x410] sm:$0xff]  ;;  %v3698_v45 = vcombine.high %v435_v38, %v439_v39  ;;  %v3697_v52 = vcombine.low %v435_v38, %v439_v39 }
  0xaf   : > { %v567_v41 = vld [vmem:[%s4464_s23 + $0x430] sm:$0xff] }
  0xb0   : > { %2111 = vmatpush2.bf16.msra.mxu0 %v3759_v48  ;;  %v3826_v46 = vcombine.high %v563_v40, %v567_v41  ;;  %v555_v48 = vld [vmem:[%s4464_s23 + $0x3d0] sm:$0xff]  ;;  %v3825_v53 = vcombine.low %v563_v40, %v567_v41 }
  0xb1   : > { %2152 = vmatpush2.bf16.msra.mxu1 %v3887_v49  ;;  %2162 = vmatprep.subr.bf16.mxu0 %v3754_v50  ;;  %v559_v49 = vld [vmem:[%s4464_s23 + $0x3f0] sm:$0xff] }
  0xb2   : > { %2203 = vmatprep.subr.bf16.mxu1 %v3882_v51  ;;  %v683_v50 = vld [vmem:[%s4464_s23 + $0x7d0] sm:$0xff]  ;;  %v3818_v54 = vcombine.high %v555_v48, %v559_v49  ;;  %v3817_v3 = vcombine.low %v555_v48, %v559_v49 }
  0xb3   : > { %2113 = vmatmul.mubr.bf16.vlgmr.msra.gmra.mxu0 %v4644_v44  ;;  %v687_v51 = vld [vmem:[%s4464_s23 + $0x7f0] sm:$0xff] }
  0xb4   : > { %2154 = vmatmul.mubr.bf16.vlgmr.msra.gmra.mxu1 %v4648_v47  ;;  %2163 = vmatpush1.bf16.msra.mxu0 %v3753_v59  ;;  %v3946_v55 = vcombine.high %v683_v50, %v687_v51  ;;  %v547_v59 = vld [vmem:[%s4464_s23 + $0x390] sm:$0xff]  ;;  %v3945_v4 = vcombine.low %v683_v50, %v687_v51 }
  0xb5   : > { %2204 = vmatpush1.bf16.msra.mxu1 %v3881_v60  ;;  %2164 = vmatprep.subr.bf16.mxu0 %v3746_v61  ;;  %v551_v60 = vld [vmem:[%s4464_s23 + $0x3b0] sm:$0xff] }
  0xb6   : > { %2205 = vmatprep.subr.bf16.mxu1 %v3874_v2  ;;  %2194 = vmatprep.mubr.bf16.mxu0 %v4619_v1  ;;  %v675_v61 = vld [vmem:[%s4464_s23 + $0x790] sm:$0xff]  ;;  %v3810_v6 = vcombine.high %v547_v59, %v551_v60  ;;  %v3809_v57 = vcombine.low %v547_v59, %v551_v60 }
  0xb7   : > { %2235 = vmatprep.mubr.bf16.mxu1 %v4624_v5  ;;  %v679_v2 = vld [vmem:[%s4464_s23 + $0x7b0] sm:$0xff] }
  0xb8   : > { %2165 = vmatpush1.bf16.msra.mxu0 %v3745_v9  ;;  %v3938_v8 = vcombine.high %v675_v61, %v679_v2  ;;  %v539_v9 = vld [vmem:[%s4464_s23 + $0x350] sm:$0xff]  ;;  %v3937_v7 = vcombine.low %v675_v61, %v679_v2 }
  0xb9   : > { %2206 = vmatpush1.bf16.msra.mxu1 %v3873_v12  ;;  %2166 = vmatprep.subr.bf16.mxu0 %v3738_v13  ;;  %v543_v12 = vld [vmem:[%s4464_s23 + $0x370] sm:$0xff] }
  0xba   : > { %2207 = vmatprep.subr.bf16.mxu1 %v3866_v56  ;;  %v667_v13 = vld [vmem:[%s4464_s23 + $0x750] sm:$0xff]  ;;  %v3802_v10 = vcombine.high %v539_v9, %v543_v12  ;;  %v3801_v20 = vcombine.low %v539_v9, %v543_v12 }
  0xbb   : > { %v671_v56 = vld [vmem:[%s4464_s23 + $0x770] sm:$0xff] }
  0xbc   : > { %2167 = vmatpush1.bf16.msra.mxu0 %v3737_v17  ;;  %v3930_v16 = vcombine.high %v667_v13, %v671_v56  ;;  %v531_v17 = vld [vmem:[%s4464_s23 + $0x310] sm:$0xff]  ;;  %v3929_v21 = vcombine.low %v667_v13, %v671_v56 }
  0xbd   : > { %2208 = vmatpush1.bf16.msra.mxu1 %v3865_v18  ;;  %2168 = vmatprep.subr.bf16.mxu0 %v3730_v11  ;;  %v535_v18 = vld [vmem:[%s4464_s23 + $0x330] sm:$0xff] }
  0xbe   : > { %2209 = vmatprep.subr.bf16.mxu1 %v3858_v19  ;;  %v659_v11 = vld [vmem:[%s4464_s23 + $0x710] sm:$0xff]  ;;  %v3794_v22 = vcombine.high %v531_v17, %v535_v18  ;;  %v3793_v25 = vcombine.low %v531_v17, %v535_v18 }
  0xbf   : > { %v663_v19 = vld [vmem:[%s4464_s23 + $0x730] sm:$0xff] }
  0xc0   : > { %2169 = vmatpush1.bf16.msra.mxu0 %v3729_v58  ;;  %v3922_v23 = vcombine.high %v659_v11, %v663_v19  ;;  %v523_v58 = vld [vmem:[%s4464_s23 + $0x2d0] sm:$0xff]  ;;  %v3921_v26 = vcombine.low %v659_v11, %v663_v19 }
  0xc1   : > { %2210 = vmatpush1.bf16.msra.mxu1 %v3857_v62  ;;  %2170 = vmatprep.subr.bf16.mxu0 %v3722_v14  ;;  %v527_v62 = vld [vmem:[%s4464_s23 + $0x2f0] sm:$0xff] }
  0xc2   : > { %2211 = vmatprep.subr.bf16.mxu1 %v3850_v24  ;;  %v651_v14 = vld [vmem:[%s4464_s23 + $0x6d0] sm:$0xff]  ;;  %v3786_v27 = vcombine.high %v523_v58, %v527_v62  ;;  %v3785_v30 = vcombine.low %v523_v58, %v527_v62 }
  0xc3   : > { %v655_v24 = vld [vmem:[%s4464_s23 + $0x6f0] sm:$0xff] }
  0xc4   : > { %2171 = vmatpush1.bf16.msra.mxu0 %v3721_v0  ;;  %v3914_v63 = vcombine.high %v651_v14, %v655_v24  ;;  %v515_v0 = vld [vmem:[%s4464_s23 + $0x290] sm:$0xff]  ;;  %v3913_v31 = vcombine.low %v651_v14, %v655_v24 }
  0xc5   : > { %2212 = vmatpush1.bf16.msra.mxu1 %v3849_v15  ;;  %2172 = vmatprep.subr.bf16.mxu0 %v3714_v28  ;;  %v519_v15 = vld [vmem:[%s4464_s23 + $0x2b0] sm:$0xff] }
  0xc6   : > { %2213 = vmatprep.subr.bf16.mxu1 %v3842_v29  ;;  %v643_v28 = vld [vmem:[%s4464_s23 + $0x690] sm:$0xff]  ;;  %v3778_v32 = vcombine.high %v515_v0, %v519_v15  ;;  %v3777_v38 = vcombine.low %v515_v0, %v519_v15 }
  0xc7   : > { %v647_v29 = vld [vmem:[%s4464_s23 + $0x6b0] sm:$0xff] }
  0xc8   : > { %2173 = vmatpush1.bf16.msra.mxu0 %v3713_v34  ;;  %v3906_v33 = vcombine.high %v643_v28, %v647_v29  ;;  %v507_v34 = vld [vmem:[%s4464_s23 + $0x250] sm:$0xff]  ;;  %v3905_v39 = vcombine.low %v643_v28, %v647_v29  ;;  %v452_v28 = vld [vmem:[%s4464_s23 + $0x98] sm:$0xff] }
  0xc9   : > { %2214 = vmatpush1.bf16.msra.mxu1 %v3841_v35  ;;  %2174 = vmatprep.subr.bf16.mxu0 %v3706_v36  ;;  %v511_v35 = vld [vmem:[%s4464_s23 + $0x270] sm:$0xff]  ;;  %v456_v29 = vld [vmem:[%s4464_s23 + $0xb8] sm:$0xff] }
  0xca   : > { %2215 = vmatprep.subr.bf16.mxu1 %v3834_v37  ;;  %v635_v36 = vld [vmem:[%s4464_s23 + $0x650] sm:$0xff]  ;;  %v3770_v40 = vcombine.high %v507_v34, %v511_v35  ;;  %v3769_v48 = vcombine.low %v507_v34, %v511_v35  ;;  %v3716_v34 = vcombine.high %v452_v28, %v456_v29 }
  0xcb   : > { %v639_v37 = vld [vmem:[%s4464_s23 + $0x670] sm:$0xff] }
  0xcc   : > { %2175 = vmatpush1.bf16.msra.mxu0 %v3705_v42  ;;  %v3898_v41 = vcombine.high %v635_v36, %v639_v37  ;;  %v499_v42 = vld [vmem:[%s4464_s23 + $0x210] sm:$0xff]  ;;  %v3897_v49 = vcombine.low %v635_v36, %v639_v37  ;;  %v444_v36 = vld [vmem:[%s4464_s23 + $0x58] sm:$0xff] }
  0xcd   : > { %2216 = vmatpush1.bf16.msra.mxu1 %v3833_v43  ;;  %2176 = vmatprep.subr.bf16.mxu0 %v3698_v45  ;;  %v503_v43 = vld [vmem:[%s4464_s23 + $0x230] sm:$0xff]  ;;  %v448_v37 = vld [vmem:[%s4464_s23 + $0x78] sm:$0xff] }
  0xce   : > { %2217 = vmatprep.subr.bf16.mxu1 %v3826_v46  ;;  %v627_v45 = vld [vmem:[%s4464_s23 + $0x610] sm:$0xff]  ;;  %v3762_v50 = vcombine.high %v499_v42, %v503_v43  ;;  %v3761_v59 = vcombine.low %v499_v42, %v503_v43  ;;  %v3708_v42 = vcombine.high %v444_v36, %v448_v37 }
  0xcf   : > { %v631_v46 = vld [vmem:[%s4464_s23 + $0x630] sm:$0xff] }
  0xd0   : > { %2177 = vmatpush1.bf16.msra.mxu0 %v3697_v52  ;;  %v3890_v51 = vcombine.high %v627_v45, %v631_v46  ;;  %v492_v52 = vld [vmem:[%s4464_s23 + $0x1d8] sm:$0xff]  ;;  %v3889_v60 = vcombine.low %v627_v45, %v631_v46 }
  0xd1   : > { %2218 = vmatpush1.bf16.msra.mxu1 %v3825_v53  ;;  %2178 = vmatprep.subr.bf16.mxu0 %v3818_v54  ;;  %v496_v53 = vld [vmem:[%s4464_s23 + $0x1f8] sm:$0xff] }
  0xd2   : > { %2219 = vmatprep.subr.bf16.mxu1 %v3946_v55  ;;  %v620_v54 = vld [vmem:[%s4464_s23 + $0x5d8] sm:$0xff]  ;;  %v3756_v61 = vcombine.high %v492_v52, %v496_v53  ;;  %v3755_v9 = vcombine.low %v492_v52, %v496_v53 }
  0xd3   : > { %v624_v55 = vld [vmem:[%s4464_s23 + $0x5f8] sm:$0xff] }
  0xd4   : > { %2179 = vmatpush2.bf16.msra.mxu0 %v3817_v3  ;;  %v3884_v2 = vcombine.high %v620_v54, %v624_v55  ;;  %v484_v3 = vld [vmem:[%s4464_s23 + $0x198] sm:$0xff]  ;;  %v3883_v12 = vcombine.low %v620_v54, %v624_v55 }
  0xd5   : > { %2220 = vmatpush2.bf16.msra.mxu1 %v3945_v4  ;;  %2180 = vmatprep.subr.bf16.mxu0 %v3810_v6  ;;  %v488_v4 = vld [vmem:[%s4464_s23 + $0x1b8] sm:$0xff] }
  0xd6   : > { %2221 = vmatprep.subr.bf16.mxu1 %v3938_v8  ;;  %v612_v6 = vld [vmem:[%s4464_s23 + $0x598] sm:$0xff]  ;;  %v3748_v13 = vcombine.high %v484_v3, %v488_v4  ;;  %v3747_v17 = vcombine.low %v484_v3, %v488_v4 }
  0xd7   : > { %v616_v8 = vld [vmem:[%s4464_s23 + $0x5b8] sm:$0xff] }
  0xd8   : > { %2181 = vmatpush2.bf16.msra.mxu0 %v3809_v57  ;;  %v3876_v56 = vcombine.high %v612_v6, %v616_v8  ;;  %v476_v57 = vld [vmem:[%s4464_s23 + $0x158] sm:$0xff]  ;;  %v3875_v18 = vcombine.low %v612_v6, %v616_v8 }
  0xd9   : > { %2222 = vmatpush2.bf16.msra.mxu1 %v3937_v7  ;;  %2182 = vmatprep.subr.bf16.mxu0 %v3802_v10  ;;  %v480_v7 = vld [vmem:[%s4464_s23 + $0x178] sm:$0xff] }
  0xda   : > { %2223 = vmatprep.subr.bf16.mxu1 %v3930_v16  ;;  %v604_v10 = vld [vmem:[%s4464_s23 + $0x558] sm:$0xff]  ;;  %v3740_v11 = vcombine.high %v476_v57, %v480_v7  ;;  %v3739_v58 = vcombine.low %v476_v57, %v480_v7 }
  0xdb   : > { %v608_v16 = vld [vmem:[%s4464_s23 + $0x578] sm:$0xff] }
  0xdc   : > { %2183 = vmatpush2.bf16.msra.mxu0 %v3801_v20  ;;  %v3868_v19 = vcombine.high %v604_v10, %v608_v16  ;;  %v468_v20 = vld [vmem:[%s4464_s23 + $0x118] sm:$0xff]  ;;  %v3867_v62 = vcombine.low %v604_v10, %v608_v16 }
  0xdd   : > { %2224 = vmatpush2.bf16.msra.mxu1 %v3929_v21  ;;  %2184 = vmatprep.subr.bf16.mxu0 %v3794_v22  ;;  %v472_v21 = vld [vmem:[%s4464_s23 + $0x138] sm:$0xff] }
  0xde   : > { %2225 = vmatprep.subr.bf16.mxu1 %v3922_v23  ;;  %v596_v22 = vld [vmem:[%s4464_s23 + $0x518] sm:$0xff]  ;;  %v3732_v14 = vcombine.high %v468_v20, %v472_v21 }
  0xdf   : > { %v600_v23 = vld [vmem:[%s4464_s23 + $0x538] sm:$0xff] }
  0xe0   : > { %2185 = vmatpush2.bf16.msra.mxu0 %v3793_v25  ;;  %v3860_v24 = vcombine.high %v596_v22, %v600_v23  ;;  %v460_v25 = vld [vmem:[%s4464_s23 + $0xd8] sm:$0xff] }
  0xe1   : > { %2226 = vmatpush2.bf16.msra.mxu1 %v3921_v26  ;;  %2186 = vmatprep.subr.bf16.mxu0 %v3786_v27  ;;  %v464_v26 = vld [vmem:[%s4464_s23 + $0xf8] sm:$0xff] }
  0xe2   : > { %2227 = vmatprep.subr.bf16.mxu1 %v3914_v63  ;;  %v588_v27 = vld [vmem:[%s4464_s23 + $0x4d8] sm:$0xff]  ;;  %v3731_v63 = vcombine.low %v468_v20, %v472_v21  ;;  %v3724_v0 = vcombine.high %v460_v25, %v464_v26 }
  0xe3   : > { %v436_v45 = vld [vmem:[%s4464_s23 + $0x18] sm:$0xff] }
  0xe4   : > { %2187 = vmatpush2.bf16.msra.mxu0 %v3785_v30  ;;  %v580_v30 = vld [vmem:[%s4464_s23 + $0x498] sm:$0xff] }
  0xe5   : > { %2228 = vmatpush2.bf16.msra.mxu1 %v3913_v31  ;;  %2188 = vmatprep.subr.bf16.mxu0 %v3778_v32  ;;  %v584_v31 = vld [vmem:[%s4464_s23 + $0x4b8] sm:$0xff]  ;;  %v3723_v32 = vcombine.low %v460_v25, %v464_v26 }
  0xe6   : > { %2229 = vmatprep.subr.bf16.mxu1 %v3906_v33  ;;  %v3844_v35 = vcombine.high %v580_v30, %v584_v31  ;;  %v440_v46 = vld [vmem:[%s4464_s23 + $0x38] sm:$0xff] }
  0xe7   : > { %v3700_v52 = vcombine.high %v436_v45, %v440_v46  ;;  %v556_v54 = vld [vmem:[%s4464_s23 + $0x3d8] sm:$0xff] }
  0xe8   : > { %2189 = vmatpush2.bf16.msra.mxu0 %v3777_v38  ;;  %v572_v38 = vld [vmem:[%s4464_s23 + $0x458] sm:$0xff] }
  0xe9   : > { %2230 = vmatpush2.bf16.msra.mxu1 %v3905_v39  ;;  %2190 = vmatprep.subr.bf16.mxu0 %v3770_v40  ;;  %v576_v39 = vld [vmem:[%s4464_s23 + $0x478] sm:$0xff]  ;;  %v3715_v40 = vcombine.low %v452_v28, %v456_v29 }
  0xea   : > { %2231 = vmatprep.subr.bf16.mxu1 %v3898_v41  ;;  %v3843_v41 = vcombine.low %v580_v30, %v584_v31  ;;  %v3836_v43 = vcombine.high %v572_v38, %v576_v39  ;;  %v560_v55 = vld [vmem:[%s4464_s23 + $0x3f8] sm:$0xff] }
  0xeb   : > { %v3820_v3 = vcombine.high %v556_v54, %v560_v55  ;;  %v548_v6 = vld [vmem:[%s4464_s23 + $0x398] sm:$0xff] }
  0xec   : > { %2191 = vmatpush2.bf16.msra.mxu0 %v3769_v48  ;;  %v564_v48 = vld [vmem:[%s4464_s23 + $0x418] sm:$0xff] }
  0xed   : > { %2232 = vmatpush2.bf16.msra.mxu1 %v3897_v49  ;;  %2192 = vmatprep.subr.bf16.mxu0 %v3762_v50  ;;  %v568_v49 = vld [vmem:[%s4464_s23 + $0x438] sm:$0xff]  ;;  %v3707_v50 = vcombine.low %v444_v36, %v448_v37 }
  0xee   : > { %2233 = vmatprep.subr.bf16.mxu1 %v3890_v51  ;;  %v3835_v51 = vcombine.low %v572_v38, %v576_v39  ;;  %v3828_v53 = vcombine.high %v564_v48, %v568_v49  ;;  %v552_v8 = vld [vmem:[%s4464_s23 + $0x3b8] sm:$0xff] }
  0xef   : > { %v3812_v57 = vcombine.high %v548_v6, %v552_v8  ;;  %v540_v10 = vld [vmem:[%s4464_s23 + $0x358] sm:$0xff] }
  0xf0   : > { %2193 = vmatpush2.bf16.msra.mxu0 %v3761_v59  ;;  %v684_v59 = vld [vmem:[%s4464_s23 + $0x7d8] sm:$0xff] }
  0xf1   : > { %2234 = vmatpush2.bf16.msra.mxu1 %v3889_v60  ;;  %2244 = vmatprep.subr.bf16.mxu0 %v3756_v61  ;;  %v688_v60 = vld [vmem:[%s4464_s23 + $0x7f8] sm:$0xff]  ;;  %v3699_v61 = vcombine.low %v436_v45, %v440_v46 }
  0xf2   : > { %2285 = vmatprep.subr.bf16.mxu1 %v3884_v2  ;;  %v3827_v2 = vcombine.low %v564_v48, %v568_v49  ;;  %v3948_v4 = vcombine.high %v684_v59, %v688_v60  ;;  %v544_v16 = vld [vmem:[%s4464_s23 + $0x378] sm:$0xff] }
  0xf3   : > { %2195 = vmatmul.mubr.bf16.vlgmr.msra.gmra.mxu0 %v4644_v44  ;;  %v3804_v20 = vcombine.high %v540_v10, %v544_v16  ;;  %v516_v30 = vld [vmem:[%s4464_s23 + $0x298] sm:$0xff] }
  0xf4   : > { %2236 = vmatmul.mubr.bf16.vlgmr.msra.gmra.mxu1 %v4648_v47  ;;  %2245 = vmatpush1.bf16.msra.mxu0 %v3755_v9  ;;  %v676_v9 = vld [vmem:[%s4464_s23 + $0x798] sm:$0xff] }
  0xf5   : > { %2286 = vmatpush1.bf16.msra.mxu1 %v3883_v12  ;;  %2246 = vmatprep.subr.bf16.mxu0 %v3748_v13  ;;  %v680_v12 = vld [vmem:[%s4464_s23 + $0x7b8] sm:$0xff]  ;;  %v3819_v13 = vcombine.low %v556_v54, %v560_v55 }
  0xf6   : > { %2287 = vmatprep.subr.bf16.mxu1 %v3876_v56  ;;  %2276 = vmatprep.mubr.bf16.mxu0 %v4619_v1  ;;  %v592_v1 = vld [vmem:[%s4464_s23 + $0x4f8] sm:$0xff]  ;;  %v3947_v56 = vcombine.low %v684_v59, %v688_v60  ;;  %v3940_v7 = vcombine.high %v676_v9, %v680_v12 }
  0xf7   : > { %2317 = vmatprep.mubr.bf16.mxu1 %v4624_v5  ;;  %v3859_v5 = vcombine.low %v596_v22, %v600_v23  ;;  %v3852_v15 = vcombine.high %v588_v27, %v592_v1  ;;  %v3851_v33 = vcombine.low %v588_v27, %v592_v1  ;;  %v532_v22 = vld [vmem:[%s4464_s23 + $0x318] sm:$0xff] }
  0xf8   : > { %2247 = vmatpush1.bf16.msra.mxu0 %v3747_v17  ;;  %v668_v17 = vld [vmem:[%s4464_s23 + $0x758] sm:$0xff] }
  0xf9   : > { %2288 = vmatpush1.bf16.msra.mxu1 %v3875_v18  ;;  %2248 = vmatprep.subr.bf16.mxu0 %v3740_v11  ;;  %v672_v18 = vld [vmem:[%s4464_s23 + $0x778] sm:$0xff]  ;;  %v3811_v11 = vcombine.low %v548_v6, %v552_v8 }
  0xfa   : > { %2289 = vmatprep.subr.bf16.mxu1 %v3868_v19  ;;  %v3939_v19 = vcombine.low %v676_v9, %v680_v12  ;;  %v3932_v21 = vcombine.high %v668_v17, %v672_v18  ;;  %v536_v23 = vld [vmem:[%s4464_s23 + $0x338] sm:$0xff] }
  0xfb   : > { %v3796_v25 = vcombine.high %v532_v22, %v536_v23  ;;  %v524_v27 = vld [vmem:[%s4464_s23 + $0x2d8] sm:$0xff] }
  0xfc   : > { %2249 = vmatpush1.bf16.msra.mxu0 %v3739_v58  ;;  %v660_v58 = vld [vmem:[%s4464_s23 + $0x718] sm:$0xff] }
  0xfd   : > { %2290 = vmatpush1.bf16.msra.mxu1 %v3867_v62  ;;  %2250 = vmatprep.subr.bf16.mxu0 %v3732_v14  ;;  %v664_v62 = vld [vmem:[%s4464_s23 + $0x738] sm:$0xff]  ;;  %v3803_v14 = vcombine.low %v540_v10, %v544_v16  ;;  %v2339_v16 = vlaneseq }
  0xfe   : > { %2291 = vmatprep.subr.bf16.mxu1 %v3860_v24  ;;  %v3931_v24 = vcombine.low %v668_v17, %v672_v18  ;;  %v3924_v26 = vcombine.high %v660_v58, %v664_v62  ;;  %v528_v1 = vld [vmem:[%s4464_s23 + $0x2f8] sm:$0xff] }
  0xff   : > { %v3788_v28 = vcombine.high %v524_v27, %v528_v1  ;;  %v520_v31 = vld [vmem:[%s4464_s23 + $0x2b8] sm:$0xff]  ;;  %v4848_v18 = vshrl.u32 %v2339_v16, 7 }
 0x100   : > { %2251 = vmatpush1.bf16.msra.mxu0 %v3731_v63  ;;  %v652_v63 = vld [vmem:[%s4464_s23 + $0x6d8] sm:$0xff]  ;;  %v3780_v36 = vcombine.high %v516_v30, %v520_v31 }
 0x101   : > { %2292 = vmatpush1.bf16.msra.mxu1 %v3859_v5  ;;  %2252 = vmatprep.subr.bf16.mxu0 %v3724_v0  ;;  %v656_v5 = vld [vmem:[%s4464_s23 + $0x6f8] sm:$0xff]  ;;  %v3795_v0 = vcombine.low %v532_v22, %v536_v23 }
 0x102   : > { %2293 = vmatprep.subr.bf16.mxu1 %v3852_v15  ;;  %v3923_v15 = vcombine.low %v660_v58, %v664_v62  ;;  %v3916_v29 = vcombine.high %v652_v63, %v656_v5  ;;  %v508_v38 = vld [vmem:[%s4464_s23 + $0x258] sm:$0xff] }
 0x103   : > { %v512_v39 = vld [vmem:[%s4464_s23 + $0x278] sm:$0xff] }
 0x104   : > { %2253 = vmatpush1.bf16.msra.mxu0 %v3723_v32  ;;  %v644_v32 = vld [vmem:[%s4464_s23 + $0x698] sm:$0xff]  ;;  %v3772_v45 = vcombine.high %v508_v38, %v512_v39 }
 0x105   : > { %2294 = vmatpush1.bf16.msra.mxu1 %v3851_v33  ;;  %2254 = vmatprep.subr.bf16.mxu0 %v3716_v34  ;;  %v648_v33 = vld [vmem:[%s4464_s23 + $0x6b8] sm:$0xff]  ;;  %v3787_v34 = vcombine.low %v524_v27, %v528_v1  ;;  %v423_v27 = vld [vmem:[#allocation2] sm:$0xff] }
 0x106   : > { %2295 = vmatprep.subr.bf16.mxu1 %v3844_v35  ;;  %v3915_v35 = vcombine.low %v652_v63, %v656_v5  ;;  %v3908_v37 = vcombine.high %v644_v32, %v648_v33  ;;  %v500_v48 = vld [vmem:[%s4464_s23 + $0x218] sm:$0xff] }
 0x107   : > { %v504_v49 = vld [vmem:[%s4464_s23 + $0x238] sm:$0xff] }
 0x108   : > { %2255 = vmatpush1.bf16.msra.mxu0 %v3715_v40  ;;  %v636_v40 = vld [vmem:[%s4464_s23 + $0x658] sm:$0xff]  ;;  %v3764_v54 = vcombine.high %v500_v48, %v504_v49  ;;  %v3763_v59 = vcombine.low %v500_v48, %v504_v49 }
 0x109   : > { %2296 = vmatpush1.bf16.msra.mxu1 %v3843_v41  ;;  %2256 = vmatprep.subr.bf16.mxu0 %v3708_v42  ;;  %v640_v41 = vld [vmem:[%s4464_s23 + $0x678] sm:$0xff]  ;;  %v3779_v42 = vcombine.low %v516_v30, %v520_v31 }
 0x10a   : > { %2297 = vmatprep.subr.bf16.mxu1 %v3836_v43  ;;  %v3907_v43 = vcombine.low %v644_v32, %v648_v33  ;;  %v3900_v46 = vcombine.high %v636_v40, %v640_v41 }
 0x10c   : > { %2257 = vmatpush1.bf16.msra.mxu0 %v3707_v50  ;;  %v628_v50 = vld [vmem:[%s4464_s23 + $0x618] sm:$0xff] }
 0x10d   : > { %2298 = vmatpush1.bf16.msra.mxu1 %v3835_v51  ;;  %2258 = vmatprep.subr.bf16.mxu0 %v3700_v52  ;;  %v632_v51 = vld [vmem:[%s4464_s23 + $0x638] sm:$0xff]  ;;  %v3771_v52 = vcombine.low %v508_v38, %v512_v39 }
 0x10e   : > { %2299 = vmatprep.subr.bf16.mxu1 %v3828_v53  ;;  %v3899_v53 = vcombine.low %v636_v40, %v640_v41  ;;  %v3892_v55 = vcombine.high %v628_v50, %v632_v51  ;;  %v3891_v60 = vcombine.low %v628_v50, %v632_v51  ;;  %v424_v51 = vld [vmem:[#allocation2 + $0x8] sm:$0xff] }
 0x110   : > { %2259 = vmatpush1.bf16.msra.mxu0 %v3699_v61 }
 0x111   : > { %2300 = vmatpush1.bf16.msra.mxu1 %v3827_v2  ;;  %2260 = vmatprep.subr.bf16.mxu0 %v3820_v3 }
 0x112   : > { %2301 = vmatprep.subr.bf16.mxu1 %v3948_v4 }
 0x114   : > { %2261 = vmatpush2.bf16.msra.mxu0 %v3819_v13 }
 0x115   : > { %2302 = vmatpush2.bf16.msra.mxu1 %v3947_v56  ;;  %2262 = vmatprep.subr.bf16.mxu0 %v3812_v57 }
 0x116   : > { %2303 = vmatprep.subr.bf16.mxu1 %v3940_v7  ;;  %v4385_v7 = vmov 1983009808  }
 0x117   : > { %v2337_v10 = vunpack.c.l.s4 %v4385_v7 }
 0x118   : > { %2263 = vmatpush2.bf16.msra.mxu0 %v3811_v11 }
 0x119   : > { %2304 = vmatpush2.bf16.msra.mxu1 %v3939_v19  ;;  %2264 = vmatprep.subr.bf16.mxu0 %v3804_v20  ;;  %v2338_v17 = vunpack.c.0.s8 %v2337_v10 }
 0x11a   : > { %2305 = vmatprep.subr.bf16.mxu1 %v3932_v21 }
 0x11b   : > { %v4851_v21 = vsub.s32 %v2338_v17, %v4848_v18 }
 0x11c   : > { %2265 = vmatpush2.bf16.msra.mxu0 %v3803_v14 }
 0x11d   : > { %2306 = vmatpush2.bf16.msra.mxu1 %v3931_v24  ;;  %2266 = vmatprep.subr.bf16.mxu0 %v3796_v25 }
 0x11e   : > { %2307 = vmatprep.subr.bf16.mxu1 %v3924_v26 }
 0x120   : > { %2267 = vmatpush2.bf16.msra.mxu0 %v3795_v0 }
 0x121   : > { %2308 = vmatpush2.bf16.msra.mxu1 %v3923_v15  ;;  %2268 = vmatprep.subr.bf16.mxu0 %v3788_v28 }
 0x122   : > { %2309 = vmatprep.subr.bf16.mxu1 %v3916_v29 }
 0x124   : > { %2269 = vmatpush2.bf16.msra.mxu0 %v3787_v34 }
 0x125   : > { %2310 = vmatpush2.bf16.msra.mxu1 %v3915_v35  ;;  %2270 = vmatprep.subr.bf16.mxu0 %v3780_v36 }
 0x126   : > { %2311 = vmatprep.subr.bf16.mxu1 %v3908_v37 }
 0x128   : > { %2271 = vmatpush2.bf16.msra.mxu0 %v3779_v42 }
 0x129   : > { %2312 = vmatpush2.bf16.msra.mxu1 %v3907_v43  ;;  %2272 = vmatprep.subr.bf16.mxu0 %v3772_v45 }
 0x12a   : > { %2313 = vmatprep.subr.bf16.mxu1 %v3900_v46 }
 0x12c   : > { %2273 = vmatpush2.bf16.msra.mxu0 %v3771_v52 }
 0x12d   : > { %2314 = vmatpush2.bf16.msra.mxu1 %v3899_v53  ;;  %2274 = vmatprep.subr.bf16.mxu0 %v3764_v54 }
 0x12e   : > { %2315 = vmatprep.subr.bf16.mxu1 %v3892_v55 }
 0x130   : > { %2275 = vmatpush2.bf16.msra.mxu0 %v3763_v59 }
 0x131   : > { %2316 = vmatpush2.bf16.msra.mxu1 %v3891_v60 }
 0x133   : > { %v2032_v61 = vpop.f32.mrf.mxu0  ;;  %2277 = vmatmul.mubr.bf16.vlgmr.msra.gmra.mxu0 %v4644_v44 }
 0x134   : > { %v2073_v2 = vpop.f32.mrf.mxu1  ;;  %2318 = vmatmul.mubr.bf16.vlgmr.msra.gmra.mxu1 %v4648_v47 }
 0x135   : > { %v2074_v3 = vadd.f32 %v2073_v2, %v2032_v61  ;;  %v2034_v4 = vpop.f32.mrf.mxu0 }
 0x136   : > { %v2075_v6 = vpop.f32.mrf.mxu1 }
 0x137   : > { %v2076_v8 = vadd.f32 %v2075_v6, %v2034_v4  ;;  %v2036_v9 = vpop.f32.mrf.mxu0 }
 0x138   : > { %v2077_v12 = vpop.f32.mrf.mxu1 }
 0x139   : > { %v2334_v13 = vcombine.low %v2074_v3, %v2076_v8  ;;  %v2037_v56 = vpop.f32.mrf.mxu0 }
 0x13a   : > { %v2078_v57 = vpop.f32.mrf.mxu1 }
 0x13b   : > { %v2342_v25 = vrot.slane %v2334_v13, %v4851_v21 }
 0x173   : > { %v2114_v11 = vpop.f32.mrf.mxu0 }
 0x174   : > { %v2155_v44 = vpop.f32.mrf.mxu1 }
 0x175   : > { %v2156_v19 = vadd.f32 %v2155_v44, %v2114_v11  ;;  %v2116_v20 = vpop.f32.mrf.mxu0 }
 0x176   : > { %v2157_v47 = vpop.f32.mrf.mxu1 }
 0x177   : > { %v2158_v22 = vadd.f32 %v2157_v47, %v2116_v20  ;;  %v2118_v23 = vpop.f32.mrf.mxu0 }
 0x178   : > { %v2159_v58 = vpop.f32.mrf.mxu1 }
 0x179   : > { %v2335_v62 = vcombine.low %v2156_v19, %v2158_v22  ;;  %v2119_v14 = vpop.f32.mrf.mxu0 }
 0x17a   : > { %v2160_v24 = vpop.f32.mrf.mxu1 }
 0x17b   : > { %v2349_v26 = vrot.slane %v2335_v62, %v4851_v21 }
 0x17d   : > { %v2350_v1 = vcombine.low %v2342_v25, %v2349_v26 }
 0x17f   : > { %v2370_v63 = vadd.f32 %v2350_v1, %v423_v27 }
 0x181   : > { %2372 = vst [vmem:[#allocation2] sm:$0xff] %v2370_v63 }
 0x1b3   : > { %v2196_v5 = vpop.f32.mrf.mxu0 }
 0x1b4   : > { %v2237_v0 = vpop.f32.mrf.mxu1 }
 0x1b5   : > { %v2238_v15 = vadd.f32 %v2237_v0, %v2196_v5  ;;  %v2198_v28 = vpop.f32.mrf.mxu0 }
 0x1b6   : > { %v2239_v29 = vpop.f32.mrf.mxu1 }
 0x1b7   : > { %v2240_v30 = vadd.f32 %v2239_v29, %v2198_v28  ;;  %v2200_v31 = vpop.f32.mrf.mxu0 }
 0x1b8   : > { %v2241_v32 = vpop.f32.mrf.mxu1 }
 0x1b9   : > { %v2351_v33 = vcombine.low %v2238_v15, %v2240_v30  ;;  %v2201_v34 = vpop.f32.mrf.mxu0 }
 0x1ba   : > { %v2242_v35 = vpop.f32.mrf.mxu1 }
 0x1bb   : > { %v2359_v49 = vrot.slane %v2351_v33, %v4851_v21 }
 0x1f3   : > { %v2278_v36 = vpop.f32.mrf.mxu0 }
 0x1f4   : > { %v2319_v37 = vpop.f32.mrf.mxu1 }
 0x1f5   : > { %v2280_v38 = vpop.f32.mrf.mxu0  ;;  %v2320_v40 = vadd.f32 %v2319_v37, %v2278_v36 }
 0x1f6   : > { %v2321_v39 = vpop.f32.mrf.mxu1 }
 0x1f7   : > { %v2322_v41 = vadd.f32 %v2321_v39, %v2280_v38  ;;  %v2282_v42 = vpop.f32.mrf.mxu0 }
 0x1f8   : > { %v2323_v43 = vpop.f32.mrf.mxu1 }
 0x1f9   : > { %v2352_v45 = vcombine.low %v2320_v40, %v2322_v41  ;;  %v2283_v46 = vpop.f32.mrf.mxu0 }
 0x1fa   : > { %v2324_v48 = vpop.f32.mrf.mxu1 }
 0x1fb   : > { %v2366_v50 = vrot.slane %v2352_v45, %v4851_v21 }
 0x1fd   : > { %v2367_v52 = vcombine.low %v2359_v49, %v2366_v50  ;;  %2377 = sbr.rel (%p3949_p10) target bundleno = 1079 (0x437), region = 94 }
 0x1ff   : > { %v2371_v53 = vadd.f32 %v2367_v52, %v424_v51 }
 0x201   : > { %2373 = vst [vmem:[#allocation2 + $0x8] sm:$0xff] %v2371_v53 }
 0x202   : > { %v4148_v54 = vld [vmem:[%s5358_s3 + $0x74] ss:$8 sps:$4 sm:$0xff]   ;;  %v4152_v59 = vld [vmem:[%s5358_s3 + $0x70] ss:$8 sps:$4 sm:$0xff]   ;;  %v4154_v61 = vld [vmem:[%s5358_s3 + $0x64] ss:$8 sps:$4 sm:$0xff]  }
 0x203   : > { %v4150_v55 = vld [vmem:[%s5358_s3 + $0x174] ss:$8 sps:$4 sm:$0xff]   ;;  %3284 = vmatprep.subr.bf16.mxu0 %v4148_v54  ;;  %v4153_v60 = vld [vmem:[%s5358_s3 + $0x170] ss:$8 sps:$4 sm:$0xff]   ;;  %v4156_v2 = vld [vmem:[%s5358_s3 + $0x164] ss:$8 sps:$4 sm:$0xff]  }
 0x204   : > { %3325 = vmatprep.subr.bf16.mxu1 %v4150_v55  ;;  %3285 = vmatpush1.bf16.msra.mxu0 %v4152_v59  ;;  %v4158_v3 = vld [vmem:[%s5358_s3 + $0x60] ss:$8 sps:$4 sm:$0xff]   ;;  %v4160_v6 = vld [vmem:[%s5358_s3 + $0x54] ss:$8 sps:$4 sm:$0xff]   ;;  %v4164_v9 = vld [vmem:[%s5358_s3 + $0x50] ss:$8 sps:$4 sm:$0xff]  }
 0x205   : > { %3326 = vmatpush1.bf16.msra.mxu1 %v4153_v60  ;;  %3286 = vmatprep.subr.bf16.mxu0 %v4154_v61  ;;  %v4159_v4 = vld [vmem:[%s5358_s3 + $0x160] ss:$8 sps:$4 sm:$0xff]   ;;  %v4162_v8 = vld [vmem:[%s5358_s3 + $0x154] ss:$8 sps:$4 sm:$0xff]   ;;  %v4165_v12 = vld [vmem:[%s5358_s3 + $0x150] ss:$8 sps:$4 sm:$0xff]  }
 0x206   : > { %3327 = vmatprep.subr.bf16.mxu1 %v4156_v2  ;;  %v4166_v13 = vld [vmem:[%s5358_s3 + $0x44] ss:$8 sps:$4 sm:$0xff]   ;;  %v4170_v57 = vld [vmem:[%s5358_s3 + $0x40] ss:$8 sps:$4 sm:$0xff]   ;;  %v4172_v10 = vld [vmem:[%s5358_s3 + $0x34] ss:$8 sps:$4 sm:$0xff]  }
 0x207   : > { %v4168_v56 = vld [vmem:[%s5358_s3 + $0x144] ss:$8 sps:$4 sm:$0xff]   ;;  %v4171_v7 = vld [vmem:[%s5358_s3 + $0x140] ss:$8 sps:$4 sm:$0xff]   ;;  %v4174_v16 = vld [vmem:[%s5358_s3 + $0x134] ss:$8 sps:$4 sm:$0xff]  }
 0x208   : > { %3287 = vmatpush1.bf16.msra.mxu0 %v4158_v3  ;;  %v4176_v17 = vld [vmem:[%s5358_s3 + $0x30] ss:$8 sps:$4 sm:$0xff]   ;;  %v4178_v44 = vld [vmem:[%s5358_s3 + $0x24] ss:$8 sps:$4 sm:$0xff]   ;;  %v4182_v20 = vld [vmem:[%s5358_s3 + $0x20] ss:$8 sps:$4 sm:$0xff]  }
 0x209   : > { %3328 = vmatpush1.bf16.msra.mxu1 %v4159_v4  ;;  %3288 = vmatprep.subr.bf16.mxu0 %v4160_v6  ;;  %v4177_v11 = vld [vmem:[%s5358_s3 + $0x130] ss:$8 sps:$4 sm:$0xff]   ;;  %v4180_v19 = vld [vmem:[%s5358_s3 + $0x124] ss:$8 sps:$4 sm:$0xff]   ;;  %v4183_v47 = vld [vmem:[%s5358_s3 + $0x120] ss:$8 sps:$4 sm:$0xff]  }
 0x20a   : > { %3329 = vmatprep.subr.bf16.mxu1 %v4162_v8  ;;  %v4184_v22 = vld [vmem:[%s5358_s3 + $0x14] ss:$8 sps:$4 sm:$0xff]   ;;  %v4188_v58 = vld [vmem:[%s5358_s3 + $0x10] ss:$8 sps:$4 sm:$0xff]   ;;  %v4190_v14 = vld [vmem:[%s5358_s3 + $0x4] ss:$8 sps:$4 sm:$0xff]  }
 0x20b   : > { %v4186_v23 = vld [vmem:[%s5358_s3 + $0x114] ss:$8 sps:$4 sm:$0xff]   ;;  %v4189_v62 = vld [vmem:[%s5358_s3 + $0x110] ss:$8 sps:$4 sm:$0xff]   ;;  %v4192_v24 = vld [vmem:[%s5358_s3 + $0x104] ss:$8 sps:$4 sm:$0xff]  }
 0x20c   : > { %3289 = vmatpush1.bf16.msra.mxu0 %v4164_v9  ;;  %v4194_v25 = vld [vmem:[%s5358_s3] ss:$8 sps:$4 sm:$0xff]   ;;  %v4196_v27 = vld [vmem:[%s5358_s3 + $0xf4] ss:$8 sps:$4 sm:$0xff]   ;;  %v4200_v63 = vld [vmem:[%s5358_s3 + $0xf0] ss:$8 sps:$4 sm:$0xff]  }
 0x20d   : > { %3330 = vmatpush1.bf16.msra.mxu1 %v4165_v12  ;;  %3290 = vmatprep.subr.bf16.mxu0 %v4166_v13  ;;  %v4195_v26 = vld [vmem:[%s5358_s3 + $0x100] ss:$8 sps:$4 sm:$0xff]   ;;  %v4198_v1 = vld [vmem:[%s5358_s3 + $0x1f4] ss:$8 sps:$4 sm:$0xff]   ;;  %v4201_v5 = vld [vmem:[%s5358_s3 + $0x1f0] ss:$8 sps:$4 sm:$0xff]  }
 0x20e   : > { %3331 = vmatprep.subr.bf16.mxu1 %v4168_v56  ;;  %v4202_v0 = vld [vmem:[%s5358_s3 + $0xe4] ss:$8 sps:$4 sm:$0xff]   ;;  %v4206_v28 = vld [vmem:[%s5358_s3 + $0xe0] ss:$8 sps:$4 sm:$0xff]   ;;  %v4208_v30 = vld [vmem:[%s5358_s3 + $0xd4] ss:$8 sps:$4 sm:$0xff]  }
 0x20f   : > { %v4204_v15 = vld [vmem:[%s5358_s3 + $0x1e4] ss:$8 sps:$4 sm:$0xff]   ;;  %v4207_v29 = vld [vmem:[%s5358_s3 + $0x1e0] ss:$8 sps:$4 sm:$0xff]   ;;  %v4210_v31 = vld [vmem:[%s5358_s3 + $0x1d4] ss:$8 sps:$4 sm:$0xff]  }
 0x210   : > { %3291 = vmatpush1.bf16.msra.mxu0 %v4170_v57  ;;  %v4212_v32 = vld [vmem:[%s5358_s3 + $0xd0] ss:$8 sps:$4 sm:$0xff]   ;;  %v2384_v34 = vsub.s32 0, %v4848_v18  ;;  %v4214_v35 = vld [vmem:[%s5358_s3 + $0xc4] ss:$8 sps:$4 sm:$0xff]   ;;  %v2388_v36 = vsub.s32 1, %v4848_v18 }
 0x211   : > { %3332 = vmatpush1.bf16.msra.mxu1 %v4171_v7  ;;  %3292 = vmatprep.subr.bf16.mxu0 %v4172_v10  ;;  %v4213_v33 = vld [vmem:[%s5358_s3 + $0x1d0] ss:$8 sps:$4 sm:$0xff]   ;;  %v2392_v37 = vsub.s32 2, %v4848_v18  ;;  %v4216_v38 = vld [vmem:[%s5358_s3 + $0x1c4] ss:$8 sps:$4 sm:$0xff]   ;;  %v2396_v39 = vsub.s32 3, %v4848_v18 }
 0x212   : > { %3333 = vmatprep.subr.bf16.mxu1 %v4174_v16  ;;  %v5003_v40 = vld [vmem:[%s5357_s2] sm:$0xff]  ;;  %v4220_v48 = vld [vmem:[%s5358_s3 + $0xb4] ss:$8 sps:$4 sm:$0xff]   ;;  %v4224_v53 = vld [vmem:[%s5358_s3 + $0xb0] ss:$8 sps:$4 sm:$0xff]   ;;  %vm3633_vm2 = vcmask 1024  }
 0x213   : > { %v4218_v41 = vld [vmem:[%s5358_s3 + $0xc0] ss:$8 sps:$4 sm:$0xff]   ;;  %v2385_v43 = vrot.slane %v5003_v40, %v2384_v34  ;;  %v2389_v45 = vrot.slane %v5003_v40, %v2388_v36  ;;  %v2393_v46 = vrot.slane %v5003_v40, %v2392_v37  ;;  %v4222_v49 = vld [vmem:[%s5358_s3 + $0x1b4] ss:$8 sps:$4 sm:$0xff]   ;;  %v2397_v50 = vrot.slane %v5003_v40, %v2396_v39  ;;  %v4225_v54 = vld [vmem:[%s5358_s3 + $0x1b0] ss:$8 sps:$4 sm:$0xff]  }
 0x214   : > { %3293 = vmatpush1.bf16.msra.mxu0 %v4176_v17  ;;  %v4219_v42 = vld [vmem:[%s5358_s3 + $0x1c0] ss:$8 sps:$4 sm:$0xff]   ;;  %v4226_v59 = vld [vmem:[%s5358_s3 + $0xa4] ss:$8 sps:$4 sm:$0xff]   ;;  %v4232_v8 = vld [vmem:[%s5358_s3 + $0x94] ss:$8 sps:$4 sm:$0xff]  }
 0x215   : > { %3334 = vmatpush1.bf16.msra.mxu1 %v4177_v11  ;;  %3294 = vmatprep.subr.bf16.mxu0 %v4178_v44  ;;  %v2414_v51 = vcombine.low %v2385_v43, %v2389_v45  ;;  %v2415_v52 = vcombine.low %v2393_v46, %v2397_v50  ;;  %v4228_v60 = vld [vmem:[%s5358_s3 + $0x1a4] ss:$8 sps:$4 sm:$0xff]   ;;  %v4230_v4 = vld [vmem:[%s5358_s3 + $0xa0] ss:$8 sps:$4 sm:$0xff]   ;;  %v4234_v9 = vld [vmem:[%s5358_s3 + $0x194] ss:$8 sps:$4 sm:$0xff]  }
 0x216   : > { %3335 = vmatprep.subr.bf16.mxu1 %v4180_v19  ;;  %v2378_v2 = vld [vmem:[#allocation2] sm:$0xff]  ;;  %v4236_v57 = vld [vmem:[%s5358_s3 + $0x90] ss:$8 sps:$4 sm:$0xff]   ;;  %v4270_v46 = vld [vmem:[%s5358_s3 + $0x234] ss:$8 sps:$4 sm:$0xff]  }
 0x217   : > { %v2422_v55 = vrot.slane %v2414_v51, %v4851_v21  ;;  %v2429_v61 = vrot.slane %v2415_v52, %v4851_v21  ;;  %v4231_v6 = vld [vmem:[%s5358_s3 + $0x1a0] ss:$8 sps:$4 sm:$0xff]   ;;  %v4237_v7 = vld [vmem:[%s5358_s3 + $0x190] ss:$8 sps:$4 sm:$0xff]   ;;  %v4238_v10 = vld [vmem:[%s5358_s3 + $0x84] ss:$8 sps:$4 sm:$0xff]  }
 0x218   : > { %3295 = vmatpush1.bf16.msra.mxu0 %v4182_v20  ;;  %v4240_v16 = vld [vmem:[%s5358_s3 + $0x184] ss:$8 sps:$4 sm:$0xff]   ;;  %v4242_v20 = vld [vmem:[%s5358_s3 + $0x80] ss:$8 sps:$4 sm:$0xff]   ;;  %v4256_v37 = vld [vmem:[%s5358_s3 + $0x250] ss:$8 sps:$4 sm:$0xff]  }
 0x219   : > { %3336 = vmatpush1.bf16.msra.mxu1 %v4183_v47  ;;  %3296 = vmatprep.subr.bf16.mxu0 %v4184_v22  ;;  %v2430_v3 = vcombine.low %v2422_v55, %v2429_v61  ;;  %v4243_v47 = vld [vmem:[%s5358_s3 + $0x180] ss:$8 sps:$4 sm:$0xff]   ;;  %v4264_v39 = vld [vmem:[%s5358_s3 + $0x244] ss:$8 sps:$4 sm:$0xff]   ;;  %v4268_v51 = vld [vmem:[%s5358_s3 + $0x230] ss:$8 sps:$4 sm:$0xff]  }
 0x21a   : > { %3337 = vmatprep.subr.bf16.mxu1 %v4186_v23  ;;  %v4246_v23 = vld [vmem:[%s5358_s3 + $0x274] ss:$8 sps:$4 sm:$0xff]   ;;  %v4262_v43 = vld [vmem:[%s5358_s3 + $0x240] ss:$8 sps:$4 sm:$0xff]   ;;  %v4271_v52 = vld [vmem:[%s5358_s3 + $0x330] ss:$8 sps:$4 sm:$0xff]  }
 0x21b   : > { %v2450_v12 = vadd.f32 %v2430_v3, %v2378_v2  ;;  %v4265_v45 = vld [vmem:[%s5358_s3 + $0x340] ss:$8 sps:$4 sm:$0xff]   ;;  %v4282_v61 = vld [vmem:[%s5358_s3 + $0x214] ss:$8 sps:$4 sm:$0xff]   ;;  %v4280_v3 = vld [vmem:[%s5358_s3 + $0x210] ss:$8 sps:$4 sm:$0xff]  }
 0x21c   : > { %3297 = vmatpush1.bf16.msra.mxu0 %v4188_v58  ;;  %v4249_v58 = vld [vmem:[%s5358_s3 + $0x374] ss:$8 sps:$4 sm:$0xff]  }
 0x21d   : > { %3338 = vmatpush1.bf16.msra.mxu1 %v4189_v62  ;;  %3298 = vmatprep.subr.bf16.mxu0 %v4190_v14  ;;  %v2461_v13 = vrot.slane %v2450_v12, %v4851_v21  ;;  %v2454_v56 = vcombine.high %v2450_v12, %v2450_v12  ;;  %v4285_v2 = vld [vmem:[%s5358_s3 + $0x314] ss:$8 sps:$4 sm:$0xff]  }
 0x21e   : > { %3339 = vmatprep.subr.bf16.mxu1 %v4192_v24  ;;  %v4244_v24 = vld [vmem:[%s5358_s3 + $0x270] ss:$8 sps:$4 sm:$0xff]  }
 0x21f   : > { %v2469_v17 = vcombine.high %v2461_v13, %v2461_v13  ;;  %v2468_v11 = vrot.slane %v2454_v56, %v4851_v21  ;;  %v2496_v62 = vpack.c.bf16 %v2461_v13, %v2461_v13 }
 0x220   : > { %3299 = vmatpush1.bf16.msra.mxu0 %v4194_v25  ;;  %v4247_v25 = vld [vmem:[%s5358_s3 + $0x370] ss:$8 sps:$4 sm:$0xff]  }
 0x221   : > { %3340 = vmatpush1.bf16.msra.mxu1 %v4195_v26  ;;  %3300 = vmatprep.subr.bf16.mxu0 %v4196_v27  ;;  %v2497_v44 = vpack.c.bf16 %v2469_v17, %v2469_v17  ;;  %v2470_v19 = vcombine.high %v2468_v11, %v2468_v11  ;;  %v2498_v14 = vpack.c.bf16 %v2468_v11, %v2468_v11  ;;  %v4252_v26 = vld [vmem:[%s5358_s3 + $0x264] ss:$8 sps:$4 sm:$0xff]  }
 0x222   : > { %3341 = vmatprep.subr.bf16.mxu1 %v4198_v1  ;;  %v4255_v27 = vld [vmem:[%s5358_s3 + $0x364] ss:$8 sps:$4 sm:$0xff]   ;;  %v2400_v1 = vsub.s32 4, %v4848_v18 }
 0x223   : > { %v2499_v22 = vpack.c.bf16 %v2470_v19, %v2470_v19  ;;  %3316 = vmatprep.mubr.bf16.mxu0 %v2497_v44 }
 0x224   : > { %3301 = vmatpush2.bf16.msra.mxu0 %v4200_v63  ;;  %v2404_v63 = vsub.s32 5, %v4848_v18 }
 0x225   : > { %3342 = vmatpush2.bf16.msra.mxu1 %v4201_v5  ;;  %3302 = vmatprep.subr.bf16.mxu0 %v4202_v0  ;;  %v2408_v5 = vsub.s32 6, %v4848_v18  ;;  %v2412_v0 = vsub.s32 7, %v4848_v18 }
 0x226   : > { %3343 = vmatprep.subr.bf16.mxu1 %v4204_v15  ;;  %3357 = vmatprep.mubr.bf16.mxu1 %v2499_v22  ;;  %v4250_v15 = vld [vmem:[%s5358_s3 + $0x260] ss:$8 sps:$4 sm:$0xff]  }
 0x228   : > { %3303 = vmatpush2.bf16.msra.mxu0 %v4206_v28  ;;  %v4253_v28 = vld [vmem:[%s5358_s3 + $0x360] ss:$8 sps:$4 sm:$0xff]  }
 0x229   : > { %3344 = vmatpush2.bf16.msra.mxu1 %v4207_v29  ;;  %3304 = vmatprep.subr.bf16.mxu0 %v4208_v30  ;;  %v4258_v29 = vld [vmem:[%s5358_s3 + $0x254] ss:$8 sps:$4 sm:$0xff]  }
 0x22a   : > { %3345 = vmatprep.subr.bf16.mxu1 %v4210_v31  ;;  %v4261_v30 = vld [vmem:[%s5358_s3 + $0x354] ss:$8 sps:$4 sm:$0xff]   ;;  %v2401_v31 = vrot.slane %v5003_v40, %v2400_v1  ;;  %v4315_v1 = vld [vmem:[%s5358_s3 + $0x3c4] ss:$8 sps:$4 sm:$0xff]  }
 0x22c   : > { %3305 = vmatpush2.bf16.msra.mxu0 %v4212_v32  ;;  %v2405_v32 = vrot.slane %v5003_v40, %v2404_v63  ;;  %v4310_v63 = vld [vmem:[%s5358_s3 + $0x2c0] ss:$8 sps:$4 sm:$0xff]  }
 0x22d   : > { %3346 = vmatpush2.bf16.msra.mxu1 %v4213_v33  ;;  %3306 = vmatprep.subr.bf16.mxu0 %v4214_v35  ;;  %v2409_v33 = vrot.slane %v5003_v40, %v2408_v5  ;;  %v2413_v35 = vrot.slane %v5003_v40, %v2412_v0  ;;  %v4267_v40 = vld [vmem:[%s5358_s3 + $0x344] ss:$8 sps:$4 sm:$0xff]   ;;  %v4313_v5 = vld [vmem:[%s5358_s3 + $0x3c0] ss:$8 sps:$4 sm:$0xff]   ;;  %v4318_v0 = vld [vmem:[%s5358_s3 + $0x2b4] ss:$8 sps:$4 sm:$0xff]  }
 0x22e   : > { %3347 = vmatprep.subr.bf16.mxu1 %v4216_v38  ;;  %v4259_v38 = vld [vmem:[%s5358_s3 + $0x350] ss:$8 sps:$4 sm:$0xff]  }
 0x230   : > { %3307 = vmatpush2.bf16.msra.mxu0 %v4218_v41  ;;  %v2431_v41 = vcombine.low %v2401_v31, %v2405_v32  ;;  %v4327_v31 = vld [vmem:[%s5358_s3 + $0x3a4] ss:$8 sps:$4 sm:$0xff]   ;;  %v4322_v32 = vld [vmem:[%s5358_s3 + $0x2a0] ss:$8 sps:$4 sm:$0xff]  }
 0x231   : > { %3348 = vmatpush2.bf16.msra.mxu1 %v4219_v42  ;;  %3308 = vmatprep.subr.bf16.mxu0 %v4220_v48  ;;  %v2432_v42 = vcombine.low %v2409_v33, %v2413_v35  ;;  %v4273_v48 = vld [vmem:[%s5358_s3 + $0x334] ss:$8 sps:$4 sm:$0xff]   ;;  %v4325_v33 = vld [vmem:[%s5358_s3 + $0x3a0] ss:$8 sps:$4 sm:$0xff]  }
 0x232   : > { %3349 = vmatprep.subr.bf16.mxu1 %v4222_v49  ;;  %v2439_v49 = vrot.slane %v2431_v41, %v4851_v21  ;;  %v4330_v35 = vld [vmem:[%s5358_s3 + $0x294] ss:$8 sps:$4 sm:$0xff]   ;;  %v4339_v41 = vld [vmem:[%s5358_s3 + $0x384] ss:$8 sps:$4 sm:$0xff]  }
 0x233   : > { %v2446_v50 = vrot.slane %v2432_v42, %v4851_v21  ;;  %v4334_v42 = vld [vmem:[%s5358_s3 + $0x280] ss:$8 sps:$4 sm:$0xff]  }
 0x234   : > { %3309 = vmatpush2.bf16.msra.mxu0 %v4224_v53  ;;  %v4276_v53 = vld [vmem:[%s5358_s3 + $0x224] ss:$8 sps:$4 sm:$0xff]  }
 0x235   : > { %3350 = vmatpush2.bf16.msra.mxu1 %v4225_v54  ;;  %3310 = vmatprep.subr.bf16.mxu0 %v4226_v59  ;;  %v4279_v54 = vld [vmem:[%s5358_s3 + $0x324] ss:$8 sps:$4 sm:$0xff]   ;;  %v2447_v55 = vcombine.low %v2439_v49, %v2446_v50  ;;  %v4274_v59 = vld [vmem:[%s5358_s3 + $0x220] ss:$8 sps:$4 sm:$0xff]   ;;  %v4341_v49 = vld [vmem:[%s5360_s5 + $0x38] sm:$0xff]  }
 0x236   : > { %3351 = vmatprep.subr.bf16.mxu1 %v4228_v60  ;;  %v4277_v60 = vld [vmem:[%s5358_s3 + $0x320] ss:$8 sps:$4 sm:$0xff]   ;;  %v4342_v50 = vld [vmem:[%s5360_s5 + $0x70] sm:$0xff]  }
 0x238   : > { %3311 = vmatpush2.bf16.msra.mxu0 %v4230_v4  ;;  %v4283_v4 = vld [vmem:[%s5358_s3 + $0x310] ss:$8 sps:$4 sm:$0xff]  }
 0x239   : > { %3352 = vmatpush2.bf16.msra.mxu1 %v4231_v6  ;;  %3312 = vmatprep.subr.bf16.mxu0 %v4232_v8  ;;  %v2379_v6 = vld [vmem:[#allocation2 + $0x8] sm:$0xff] }
 0x23a   : > { %3353 = vmatprep.subr.bf16.mxu1 %v4234_v9  ;;  %v4288_v8 = vld [vmem:[%s5358_s3 + $0x204] ss:$8 sps:$4 sm:$0xff]   ;;  %v2451_v12 = vadd.f32 %v2447_v55, %v2379_v6 }
 0x23b   : > { %v4291_v9 = vld [vmem:[%s5358_s3 + $0x304] ss:$8 sps:$4 sm:$0xff]  }
 0x23c   : > { %3313 = vmatpush2.bf16.msra.mxu0 %v4236_v57  ;;  %v5172_v13 = vrot.slane %v2451_v12, %v4851_v21  ;;  %v2471_v56 = vcombine.high %v2451_v12, %v2451_v12  ;;  %v4286_v57 = vld [vmem:[%s5358_s3 + $0x200] ss:$8 sps:$4 sm:$0xff]  }
 0x23d   : > { %3354 = vmatpush2.bf16.msra.mxu1 %v4237_v7  ;;  %3314 = vmatprep.subr.bf16.mxu0 %v4238_v10  ;;  %v4289_v7 = vld [vmem:[%s5358_s3 + $0x300] ss:$8 sps:$4 sm:$0xff]   ;;  %v4294_v10 = vld [vmem:[%s5358_s3 + $0x2f4] ss:$8 sps:$4 sm:$0xff]  }
 0x23e   : > { %3355 = vmatprep.subr.bf16.mxu1 %v4240_v16  ;;  %v4297_v16 = vld [vmem:[%s5358_s3 + $0x3f4] ss:$8 sps:$4 sm:$0xff]   ;;  %v2486_v17 = vcombine.high %v5172_v13, %v5172_v13  ;;  %v5189_v11 = vrot.slane %v2471_v56, %v4851_v21  ;;  %v4300_v21 = vld [vmem:[%s5358_s3 + $0x2e4] ss:$8 sps:$4 sm:$0xff]  }
 0x23f   : > { %v4347_v55 = vld [vmem:[%s5360_s5 + $0x20] sm:$0xff]  }
 0x240   : > { %3315 = vmatpush2.bf16.msra.mxu0 %v4242_v20  ;;  %v2501_v44 = vpack.c.bf16 %v2486_v17, %v2486_v17  ;;  %v2487_v19 = vcombine.high %v5189_v11, %v5189_v11  ;;  %v4292_v20 = vld [vmem:[%s5358_s3 + $0x2f0] ss:$8 sps:$4 sm:$0xff]   ;;  %v4354_v6 = vld [vmem:[%s5360_s5 + $0x40] sm:$0xff]  }
 0x241   : > { %3356 = vmatpush2.bf16.msra.mxu1 %v4243_v47  ;;  %3366 = vmatprep.subr.bf16.mxu0 %v4246_v23  ;;  %v4295_v47 = vld [vmem:[%s5358_s3 + $0x3f0] ss:$8 sps:$4 sm:$0xff]   ;;  %v4303_v23 = vld [vmem:[%s5358_s3 + $0x3e4] ss:$8 sps:$4 sm:$0xff]  }
 0x242   : > { %3407 = vmatprep.subr.bf16.mxu1 %v4249_v58  ;;  %v2503_v22 = vpack.c.bf16 %v2487_v19, %v2487_v19  ;;  %v4298_v58 = vld [vmem:[%s5358_s3 + $0x2e0] ss:$8 sps:$4 sm:$0xff]  }
 0x243   : > { %3317 = vmatmul.mubr.bf16.vlgmr.msra.gmra.mxu0 %v2496_v62  ;;  %v4301_v62 = vld [vmem:[%s5358_s3 + $0x3e0] ss:$8 sps:$4 sm:$0xff]  }
 0x244   : > { %3358 = vmatmul.mubr.bf16.vlgmr.msra.gmra.mxu1 %v2498_v14  ;;  %3367 = vmatpush1.bf16.msra.mxu0 %v4244_v24  ;;  %v4306_v14 = vld [vmem:[%s5358_s3 + $0x2d4] ss:$8 sps:$4 sm:$0xff]  }
 0x245   : > { %3408 = vmatpush1.bf16.msra.mxu1 %v4247_v25  ;;  %3368 = vmatprep.subr.bf16.mxu0 %v4252_v26  ;;  %v4309_v24 = vld [vmem:[%s5358_s3 + $0x3d4] ss:$8 sps:$4 sm:$0xff]   ;;  %v4304_v25 = vld [vmem:[%s5358_s3 + $0x2d0] ss:$8 sps:$4 sm:$0xff]  }
 0x246   : > { %3409 = vmatprep.subr.bf16.mxu1 %v4255_v27  ;;  %3398 = vmatprep.mubr.bf16.mxu0 %v2501_v44  ;;  %v4307_v26 = vld [vmem:[%s5358_s3 + $0x3d0] ss:$8 sps:$4 sm:$0xff]   ;;  %v4312_v27 = vld [vmem:[%s5358_s3 + $0x2c4] ss:$8 sps:$4 sm:$0xff]  }
 0x247   : > { %3439 = vmatprep.mubr.bf16.mxu1 %v2503_v22 }
 0x248   : > { %3369 = vmatpush1.bf16.msra.mxu0 %v4250_v15  ;;  %v4321_v15 = vld [vmem:[%s5358_s3 + $0x3b4] ss:$8 sps:$4 sm:$0xff]  }
 0x249   : > { %3410 = vmatpush1.bf16.msra.mxu1 %v4253_v28  ;;  %3370 = vmatprep.subr.bf16.mxu0 %v4258_v29  ;;  %v4316_v28 = vld [vmem:[%s5358_s3 + $0x2b0] ss:$8 sps:$4 sm:$0xff]  }
 0x24a   : > { %3411 = vmatprep.subr.bf16.mxu1 %v4261_v30  ;;  %v4319_v29 = vld [vmem:[%s5358_s3 + $0x3b0] ss:$8 sps:$4 sm:$0xff]   ;;  %v4324_v30 = vld [vmem:[%s5358_s3 + $0x2a4] ss:$8 sps:$4 sm:$0xff]  }
 0x24c   : > { %3371 = vmatpush1.bf16.msra.mxu0 %v4256_v37  ;;  %v4333_v37 = vld [vmem:[%s5358_s3 + $0x394] ss:$8 sps:$4 sm:$0xff]  }
 0x24d   : > { %3412 = vmatpush1.bf16.msra.mxu1 %v4259_v38  ;;  %3372 = vmatprep.subr.bf16.mxu0 %v4264_v39  ;;  %v4328_v38 = vld [vmem:[%s5358_s3 + $0x290] ss:$8 sps:$4 sm:$0xff]  }
 0x24e   : > { %3413 = vmatprep.subr.bf16.mxu1 %v4267_v40  ;;  %v4331_v39 = vld [vmem:[%s5358_s3 + $0x390] ss:$8 sps:$4 sm:$0xff]   ;;  %v4336_v40 = vld [vmem:[%s5358_s3 + $0x284] ss:$8 sps:$4 sm:$0xff]  }
 0x250   : > { %3373 = vmatpush1.bf16.msra.mxu0 %v4262_v43  ;;  %v4337_v43 = vld [vmem:[%s5358_s3 + $0x380] ss:$8 sps:$4 sm:$0xff]  }
 0x251   : > { %3414 = vmatpush1.bf16.msra.mxu1 %v4265_v45  ;;  %3374 = vmatprep.subr.bf16.mxu0 %v4270_v46  ;;  %v2500_v45 = vpack.c.bf16 %v5172_v13, %v5172_v13  ;;  %v2502_v46 = vpack.c.bf16 %v5189_v11, %v5189_v11 }
 0x252   : > { %3415 = vmatprep.subr.bf16.mxu1 %v4273_v48  ;;  %v4340_v48 = vld [vmem:[%s5360_s5 + $0x78] sm:$0xff]  }
 0x254   : > { %3375 = vmatpush1.bf16.msra.mxu0 %v4268_v51  ;;  %v4343_v51 = vld [vmem:[%s5360_s5 + $0x30] sm:$0xff]  }
 0x255   : > { %3416 = vmatpush1.bf16.msra.mxu1 %v4271_v52  ;;  %3376 = vmatprep.subr.bf16.mxu0 %v4276_v53  ;;  %v4344_v52 = vld [vmem:[%s5360_s5 + $0x68] sm:$0xff]  }
 0x256   : > { %3417 = vmatprep.subr.bf16.mxu1 %v4279_v54  ;;  %v4345_v53 = vld [vmem:[%s5360_s5 + $0x28] sm:$0xff]   ;;  %v4346_v54 = vld [vmem:[%s5360_s5 + $0x60] sm:$0xff]  }
 0x258   : > { %3377 = vmatpush1.bf16.msra.mxu0 %v4274_v59  ;;  %v4348_v59 = vld [vmem:[%s5360_s5 + $0x58] sm:$0xff]  }
 0x259   : > { %3418 = vmatpush1.bf16.msra.mxu1 %v4277_v60  ;;  %3378 = vmatprep.subr.bf16.mxu0 %v4282_v61  ;;  %v4349_v60 = vld [vmem:[%s5360_s5 + $0x18] sm:$0xff]   ;;  %v4350_v61 = vld [vmem:[%s5360_s5 + $0x50] sm:$0xff]  }
 0x25a   : > { %3419 = vmatprep.subr.bf16.mxu1 %v4285_v2  ;;  %v4351_v2 = vld [vmem:[%s5360_s5 + $0x10] sm:$0xff]  }
 0x25c   : > { %3379 = vmatpush1.bf16.msra.mxu0 %v4280_v3  ;;  %v4352_v3 = vld [vmem:[%s5360_s5 + $0x48] sm:$0xff]  }
 0x25d   : > { %3420 = vmatpush1.bf16.msra.mxu1 %v4283_v4  ;;  %3380 = vmatprep.subr.bf16.mxu0 %v4288_v8  ;;  %v4353_v4 = vld [vmem:[%s5360_s5 + $0x8] sm:$0xff]   ;;  %v4355_v8 = vld [vmem:[%s5360_s5] sm:$0xff]  }
 0x25e   : > { %3421 = vmatprep.subr.bf16.mxu1 %v4291_v9  ;;  %v2632_v9 = vld [vmem:[%s5359_s4] sm:$0x3] }
 0x25f   : > { %v2637_v12 = vrot.slane %v2632_v9, %v2384_v34 }
 0x260   : > { %3381 = vmatpush1.bf16.msra.mxu0 %v4286_v57 }
 0x261   : > { %3422 = vmatpush1.bf16.msra.mxu1 %v4289_v7  ;;  %3382 = vmatprep.subr.bf16.mxu0 %v4294_v10 }
 0x262   : > { %3423 = vmatprep.subr.bf16.mxu1 %v4297_v16 }
 0x264   : > { %3383 = vmatpush2.bf16.msra.mxu0 %v4292_v20  ;;  %v2641_v20 = vrot.slane %v2632_v9, %v2388_v36  ;;  %v4078_v36 = vld [vmem:[#allocation3] ss:$0 sm:$0xff] }
 0x265   : > { %3424 = vmatpush2.bf16.msra.mxu1 %v4295_v47  ;;  %3384 = vmatprep.subr.bf16.mxu0 %v4300_v21 }
 0x266   : > { %3425 = vmatprep.subr.bf16.mxu1 %v4303_v23 }
 0x268   : > { %3385 = vmatpush2.bf16.msra.mxu0 %v4298_v58 }
 0x269   : > { %3426 = vmatpush2.bf16.msra.mxu1 %v4301_v62  ;;  %3386 = vmatprep.subr.bf16.mxu0 %v4306_v14 }
 0x26a   : > { %3427 = vmatprep.subr.bf16.mxu1 %v4309_v24 }
 0x26c   : > { %3387 = vmatpush2.bf16.msra.mxu0 %v4304_v25 }
 0x26d   : > { %3428 = vmatpush2.bf16.msra.mxu1 %v4307_v26  ;;  %3388 = vmatprep.subr.bf16.mxu0 %v4312_v27 }
 0x26e   : > { %3429 = vmatprep.subr.bf16.mxu1 %v4315_v1 }
 0x270   : > { %3389 = vmatpush2.bf16.msra.mxu0 %v4310_v63 }
 0x271   : > { %3430 = vmatpush2.bf16.msra.mxu1 %v4313_v5  ;;  %3390 = vmatprep.subr.bf16.mxu0 %v4318_v0 }
 0x272   : > { %3431 = vmatprep.subr.bf16.mxu1 %v4321_v15 }
 0x274   : > { %3391 = vmatpush2.bf16.msra.mxu0 %v4316_v28 }
 0x275   : > { %3432 = vmatpush2.bf16.msra.mxu1 %v4319_v29  ;;  %3392 = vmatprep.subr.bf16.mxu0 %v4324_v30 }
 0x276   : > { %3433 = vmatprep.subr.bf16.mxu1 %v4327_v31 }
 0x278   : > { %3393 = vmatpush2.bf16.msra.mxu0 %v4322_v32 }
 0x279   : > { %3434 = vmatpush2.bf16.msra.mxu1 %v4325_v33  ;;  %3394 = vmatprep.subr.bf16.mxu0 %v4330_v35 }
 0x27a   : > { %3435 = vmatprep.subr.bf16.mxu1 %v4333_v37 }
 0x27c   : > { %3395 = vmatpush2.bf16.msra.mxu0 %v4328_v38 }
 0x27d   : > { %3436 = vmatpush2.bf16.msra.mxu1 %v4331_v39  ;;  %3396 = vmatprep.subr.bf16.mxu0 %v4336_v40 }
 0x27e   : > { %3437 = vmatprep.subr.bf16.mxu1 %v4339_v41 }
 0x280   : > { %3397 = vmatpush2.bf16.msra.mxu0 %v4334_v42 }
 0x281   : > { %3438 = vmatpush2.bf16.msra.mxu1 %v4337_v43  ;;  %4100 = vmatprep.subr.bf16.mxu0 %v4340_v48 }
 0x283   : > { %3399 = vmatmul.mubr.bf16.vlgmr.msra.gmra.mxu0 %v2500_v45 }
 0x284   : > { %3440 = vmatmul.mubr.bf16.vlgmr.msra.gmra.mxu1 %v2502_v46  ;;  %4101 = vmatpush3.bf16.msra.mxu0 %v4341_v49 }
 0x285   : > { %4102 = vmatprep.subr.bf16.mxu0 %v4342_v50 }
 0x288   : > { %4103 = vmatpush3.bf16.msra.mxu0 %v4343_v51 }
 0x289   : > { %4104 = vmatprep.subr.bf16.mxu0 %v4344_v52 }
 0x28c   : > { %4105 = vmatpush3.bf16.msra.mxu0 %v4345_v53 }
 0x28d   : > { %4106 = vmatprep.subr.bf16.mxu0 %v4346_v54 }
 0x290   : > { %4107 = vmatpush3.bf16.msra.mxu0 %v4347_v55 }
 0x291   : > { %4108 = vmatprep.subr.bf16.mxu0 %v4348_v59 }
 0x294   : > { %4109 = vmatpush3.bf16.msra.mxu0 %v4349_v60 }
 0x295   : > { %4110 = vmatprep.subr.bf16.mxu0 %v4350_v61 }
 0x298   : > { %4111 = vmatpush3.bf16.msra.mxu0 %v4351_v2 }
 0x299   : > { %4112 = vmatprep.subr.bf16.mxu0 %v4352_v3 }
 0x29c   : > { %4113 = vmatpush3.bf16.msra.mxu0 %v4353_v4 }
 0x29d   : > { %4114 = vmatprep.subr.bf16.mxu0 %v4354_v6 }
 0x2a0   : > { %4115 = vmatpush3.bf16.msra.mxu0 %v4355_v8 }
 0x303   : > { %v3318_v13 = vpop.f32.mrf.mxu0 }
 0x304   : > { %v3359_v56 = vpop.f32.mrf.mxu1  ;;  %v3319_v57 = vadd.f32 %v3318_v13, %v2637_v12 }
 0x305   : > { %v3320_v7 = vpop.f32.mrf.mxu0 }
 0x306   : > { %v3361_v10 = vpop.f32.mrf.mxu1  ;;  %v3360_v16 = vadd.f32 %v3359_v56, %v3319_v57  ;;  %v3321_v47 = vadd.f32 %v3320_v7, %v2641_v20 }
 0x307   : > { %v3322_v17 = vpop.f32.mrf.mxu0 }
 0x308   : > { %v3363_v11 = vpop.f32.mrf.mxu1  ;;  %v3362_v23 = vadd.f32 %v3361_v10, %v3321_v47 }
 0x309   : > { %v3323_v44 = vpop.f32.mrf.mxu0 }
 0x30a   : > { %v3364_v19 = vpop.f32.mrf.mxu1 }
 0x343   : > { %v3400_v22 = vpop.f32.mrf.mxu0 }
 0x344   : > { %v3441_v21 = vpop.f32.mrf.mxu1  ;;  %v3401_v58 = vadd.f32 %v3400_v22, %v3360_v16 }
 0x345   : > { %v3402_v62 = vpop.f32.mrf.mxu0 }
 0x346   : > { %v3443_v34 = vpop.f32.mrf.mxu1  ;;  %v3442_v14 = vadd.f32 %v3441_v21, %v3401_v58  ;;  %v3403_v24 = vadd.f32 %v3402_v62, %v3362_v23 }
 0x347   : > { %v3404_v25 = vpop.f32.mrf.mxu0 }
 0x348   : > { %v3445_v26 = vpop.f32.mrf.mxu1  ;;  %v3444_v27 = vadd.f32 %v3443_v34, %v3403_v24  ;;  %v3448_v1 = vmax.f32 %v3442_v14, 0.0 }
 0x349   : > { %v3405_v63 = vpop.f32.mrf.mxu0 }
 0x34a   : > { %v3446_v5 = vpop.f32.mrf.mxu1  ;;  %v3449_v0 = vmax.f32 %v3444_v27, 0.0  ;;  %v3450_v28 = vpack.c.bf16 %v3448_v1, %v3448_v1 }
 0x34c   : > { %v3451_v15 = vpack.c.bf16 %v3449_v0, %v3449_v0 }
 0x34e   : > { %3619 = vmatprep.mubr.bf16.mxu0 %v3451_v15 }
 0x34f   : > { %3620 = vmatmul.mubr.bf16.vlgmr.msra.gmra.mxu0 %v3450_v28 }
 0x40f   : > { %v4116_v18 = vpop.f32.mrf.mxu0 }
 0x411   : > { %v4117_v29 = vpop.f32.mrf.mxu0 }
 0x412   : > { %v4118_v30 = vadd.f32 %v4117_v29, %v4116_v18 }
 0x413   : > { %v4119_v31 = vpop.f32.mrf.mxu0 }
 0x414   : > { %v3622_v32 = vadd.f32 %v4118_v30, %v4078_v36 }
 0x415   : > { %v4120_v33 = vpop.f32.mrf.mxu0 }
 0x416   : > { %v4095_v35 = vmul.f32 -1.442695, %v3622_v32 }
 0x418   : > { %4356 = vpow2.f32 %v4095_v35 }
 0x425   : > { %v4357_v37 = vpop.eup %4356 }
 0x426   : > { %v3630_v38 = vadd.f32 1.0, %v4357_v37 }
 0x428   : > { %4358 = vrcp.f32 %v3630_v38 }
 0x435   : > { %v4359_v39 = vpop.eup %4358 }
 0x436   : > { %3634 = vst.msk [vmem:[%s5362_s7] sm:$0x3] %vm3633_vm2, %v4359_v39 }
 0x437 PF: > { %p16_p11 = scmp.ge.s32.totalorder %s4444_s29, 6   ;;  %s5363_s26 = smov %s4378_s27 }
 0x438   : > { %s5364_s27 = smov %s4451_s9  ;;  %s5365_s28 = smov %s4444_s29 }
 0x439   :  { %18 = sbr.rel (!%p16_p11) target bundleno = 5 (0x5), region = 128 }

</bundles_post_ra>
